<compile_context>
chip_gen: v6e
topology: v6e:2x2x1
jax: 0.10.0
libtpu: 0.0.40
codegen_flags: <defaults>
</compile_context>

<pallas_src>
import functools

import numpy as np
import jax
import jax.numpy as jnp
from jax import lax
from jax.experimental import pallas as pl
from jax.experimental.pallas import tpu as pltpu


# ----------------------------------------------------------------------------
# Pallas kernel: one batch block (Bblk images, all windows) per grid step.
# ----------------------------------------------------------------------------
def _wmsa_kernel(x_rows_ref, x_t_ref, wq_ref, bq_ref, wkv_ref, bkv_ref,
                 bias_ref, wout_ref, bout_ref, o_ref, kv_scr, oh_scr,
                 *, n_heads, head_dim, group_tokens, groups_per_image):
    # x_rows_ref : [Mblk, C]            bf16 tokens (row layout, for Q)
    # x_t_ref    : [C, Mblk]            bf16 tokens (transposed, for K/V)
    # wq_ref     : [n_heads, C, hd]     bf16 per-head Q weights (scale folded)
    # bq_ref     : [n_heads, 1, hd]     f32  per-head Q bias (scale folded)
    # wkv_ref    : [2C, C]              bf16 transposed K/V weights
    # bkv_ref    : [2C, 1]              f32
    # bias_ref   : [n_heads, nGpI, Ng, Ng] f32 rel-pos + shift mask, block-diag
    # wout_ref   : [Cout, C]            bf16 transposed output projection
    # bout_ref   : [Cout, 1]            f32
    # o_ref      : [Cout, Mblk]         output, tokens lane-dense
    # kv_scr     : [2C, Mblk] f32 VMEM  transposed K/V activations
    # oh_scr     : [C, Mblk]  f32 VMEM  per-head attention outputs (head concat
    #                                    lives on sublanes -> free)
    C = n_heads * head_dim
    Mblk = x_t_ref.shape[1]
    Ng = group_tokens
    n_groups = Mblk // Ng

    # ---- K/V projection, transposed layout: one [2C,C] x [C,Mblk] MXU call ----
    kv = jnp.dot(wkv_ref[...], x_t_ref[...], preferred_element_type=jnp.float32)
    kv_scr[...] = kv + bkv_ref[...]                       # lane-broadcast bias

    # Static loops (n_groups * n_heads = 16 here); every iteration drains into
    # VMEM scratch, so there is no cross-iteration value chain.
    for g in range(n_groups):
        gi = g % groups_per_image
        g0 = g * Ng
        xg = x_rows_ref[g0:g0 + Ng, :]                    # [Ng, C] bf16
        for h in range(n_heads):
            lo = h * head_dim

            # Q for this (head, group) in row layout; scale already folded.
            q = jnp.dot(xg, wq_ref[h], preferred_element_type=jnp.float32)
            q = (q + bq_ref[h]).astype(jnp.bfloat16)      # [Ng, hd]

            k = kv_scr[lo:lo + head_dim, g0:g0 + Ng].astype(jnp.bfloat16)
            v = kv_scr[C + lo:C + lo + head_dim, g0:g0 + Ng].astype(jnp.bfloat16)

            # Grouped block-diagonal scores; cross-window entries carry a finite
            # -1e9 additive bias (never -inf -> no NaN path).
            sim = jnp.dot(q, k, preferred_element_type=jnp.float32)   # [Ng, Ng]
            sim = sim + bias_ref[h, gi]

            # Softmax along the (lane-dense) key axis, all in f32.
            m = jnp.max(sim, axis=-1, keepdims=True)
            p = jnp.exp(sim - m)
            denom = jnp.sum(p, axis=-1, keepdims=True)
            inv = pl.reciprocal(denom, approx=True)       # EUP slot
            inv = inv * (2.0 - denom * inv)               # Newton -> f32 exact
            p = (p * inv).astype(jnp.bfloat16)

            # out_head^T [hd, Nq] = V [hd, Nk] @ P^T   (NT matmul)
            oh = lax.dot_general(v, p, (((1,), (1,)), ((), ())),
                                 preferred_element_type=jnp.float32)
            oh_scr[lo:lo + head_dim, g0:g0 + Ng] = oh     # sublane-aligned store

    # Single lane-dense output projection: [Cout,C] x [C,Mblk].
    out = jnp.dot(wout_ref[...], oh_scr[...].astype(jnp.bfloat16),
                  preferred_element_type=jnp.float32)
    o_ref[...] = (out + bout_ref[...]).astype(o_ref.dtype)


# ----------------------------------------------------------------------------
# Host-side helpers (window partition, masks, relative embedding, bias fold).
# These mirror the PyTorch module's generate_mask / relative_embedding exactly.
# ----------------------------------------------------------------------------
def _relative_embedding(rel_params, window_size):
    # rel_params: [n_heads, 2*ws-1, 2*ws-1]  ->  [n_heads, ws*ws, ws*ws]
    cord = np.array([[i, j] for i in range(window_size)
                     for j in range(window_size)], dtype=np.int64)
    relation = cord[:, None, :] - cord[None, :, :] + window_size - 1
    return rel_params[:, relation[:, :, 0], relation[:, :, 1]]


def _generate_mask(w_windows, p, shift, attn_type):
    # Matches WMSA.generate_mask, collapsed to [nW, NP, NP] float (1.0 = mask).
    attn_mask = np.zeros((w_windows, w_windows, p, p, p, p), dtype=bool)
    if attn_type != 'W':
        s = p - shift
        attn_mask[-1, :, :s, :, s:, :] = True
        attn_mask[-1, :, s:, :, :s, :] = True
        attn_mask[:, -1, :, :s, :, s:] = True
        attn_mask[:, -1, :, s:, :, :s] = True
    attn_mask = attn_mask.reshape(w_windows * w_windows, p * p, p * p)
    return attn_mask.astype(np.float32)


def wmsa_forward(x, params, *, head_dim, window_size, attn_type):
    """x: [B, H, W, C] -> [B, H, W, Cout]"""
    B, H, W, C = x.shape
    ws = window_size
    n_heads = C // head_dim
    scale = head_dim ** (-0.5)
    Cout = params['w_out'].shape[1]
    NP = ws * ws
    w1, w2 = H // ws, W // ws
    assert w1 == w2
    nW = w1 * w2
    T = nW * NP
    shift = ws // 2

    # ---- group G windows onto the key/lane axis (target N = 128 keys) -------
    # 128 keeps the grouped layout lane-dense on every generation (v5e's MXU is
    # 128-wide) while capping the extra exp volume; on v6e/v7x N=256 would also
    # be reasonable.
    if NP % 128 == 0:
        G = 1
    elif 128 % NP == 0:
        G = min(nW, 128 // NP)
    else:
        G = 1
    while nW % G:
        G -= 1
    Ng = G * NP
    nGpI = nW // G                       # groups per image

    # ---- batch blocking: fold as much of B per grid step as is reasonable ---
    # (With B >= 4 this naturally leaves >= 2 grid steps for v7x's two TCs.)
    Bblk = 1
    for cand in range(B, 0, -1):
        if B % cand == 0 and cand * T <= 2048:
            Bblk = cand
            break
    Mblk = Bblk * T
    nB = B // Bblk

    if attn_type != 'W':
        x = jnp.roll(x, shift=(-shift, -shift), axis=(1, 2))

    # b (w1 p1) (w2 p2) c -> (b w1 w2 p1 p2) c   (layout plumbing stays in XLA)
    xw = x.reshape(B, w1, ws, w2, ws, C).transpose(0, 1, 3, 2, 4, 5)
    xw = xw.reshape(B * T, C)
    x_rows = xw.astype(jnp.bfloat16)               # [B*T, C]   (for Q)
    x_t = xw.T.astype(jnp.bfloat16)                # [C, B*T]   (for K/V)

    # ---- lane-dense block-diagonal additive bias: rel-pos + (-1e9)*mask -----
    rel = np.asarray(_relative_embedding(np.asarray(params['rel_params']), ws),
                     dtype=np.float32)                           # [h, NP, NP]
    mask = _generate_mask(w1, ws, shift, attn_type)              # [nW, NP, NP]
    NEG = np.float32(-1e9)
    per_win = rel[:, None] + NEG * mask[None]                    # [h,nW,NP,NP]
    bias = np.full((n_heads, nGpI, Ng, Ng), NEG, dtype=np.float32)
    for gi in range(nGpI):
        for wl in range(G):
            w = gi * G + wl
            bias[:, gi, wl * NP:(wl + 1) * NP,
                 wl * NP:(wl + 1) * NP] = per_win[:, w]
    bias = jnp.asarray(bias)                       # [h, nGpI, Ng, Ng] f32

    # ---- weights: scale folded into Q, transposed / per-head layouts --------
    # (fold scale BEFORE the bf16 cast)
    wq = params['w_qkv'][:, :C] * scale                              # [C, C]
    wq_heads = wq.reshape(C, n_heads, head_dim).transpose(1, 0, 2)   # [h, C, hd]
    wq_heads = wq_heads.astype(jnp.bfloat16)
    bq_heads = (params['b_qkv'][:C] * scale).reshape(n_heads, 1, head_dim)
    bq_heads = bq_heads.astype(jnp.float32)
    wkv_t = params['w_qkv'][:, C:].T.astype(jnp.bfloat16)            # [2C, C]
    bkv_t = params['b_qkv'][C:].reshape(2 * C, 1).astype(jnp.float32)
    wout_t = params['w_out'].T.astype(jnp.bfloat16)                  # [Cout, C]
    bout_t = params['b_out'].reshape(Cout, 1).astype(jnp.float32)

    kernel = functools.partial(_wmsa_kernel, n_heads=n_heads, head_dim=head_dim,
                               group_tokens=Ng, groups_per_image=nGpI)

    out_t = pl.pallas_call(
        kernel,
        out_shape=jax.ShapeDtypeStruct((Cout, B * T), x.dtype),
        grid_spec=pltpu.PrefetchScalarGridSpec(
            num_scalar_prefetch=0,
            grid=(nB,),
            in_specs=[
                pl.BlockSpec((Mblk, C), lambda b: (b, 0)),                  # x_rows
                pl.BlockSpec((C, Mblk), lambda b: (0, b)),                  # x_t
                pl.BlockSpec((n_heads, C, head_dim), lambda b: (0, 0, 0)),  # wq
                pl.BlockSpec((n_heads, 1, head_dim), lambda b: (0, 0, 0)),  # bq
                pl.BlockSpec((2 * C, C), lambda b: (0, 0)),                 # wkv_t
                pl.BlockSpec((2 * C, 1), lambda b: (0, 0)),                 # bkv_t
                pl.BlockSpec((n_heads, nGpI, Ng, Ng),
                             lambda b: (0, 0, 0, 0)),                       # bias
                pl.BlockSpec((Cout, C), lambda b: (0, 0)),                  # wout_t
                pl.BlockSpec((Cout, 1), lambda b: (0, 0)),                  # bout_t
            ],
            out_specs=pl.BlockSpec((Cout, Mblk), lambda b: (0, b)),
            scratch_shapes=[pltpu.VMEM((2 * C, Mblk), jnp.float32),   # K/V
                            pltpu.VMEM((C, Mblk), jnp.float32)],      # head outs
        ),
        compiler_params=pltpu.CompilerParams(
            dimension_semantics=("parallel",)),
    )(x_rows, x_t, wq_heads, bq_heads, wkv_t, bkv_t, bias, wout_t, bout_t)

    # [Cout, B*T] -> b (w1 p1) (w2 p2) c   (transpose folded into the wrapper)
    out = out_t.T.reshape(B, w1, w2, ws, ws, Cout)
    out = out.transpose(0, 1, 3, 2, 4, 5).reshape(B, H, W, Cout)
    if attn_type != 'W':
        out = jnp.roll(out, shift=(shift, shift), axis=(1, 2))
    return out


# ----------------------------------------------------------------------------
# Pure-JAX reference (mirrors the PyTorch forward) for a correctness check.
# ----------------------------------------------------------------------------
def wmsa_reference(x, params, *, head_dim, window_size, attn_type):
    B, H, W, C = x.shape
    ws = window_size
    n_heads = C // head_dim
    scale = head_dim ** (-0.5)
    NP = ws * ws
    w1, w2 = H // ws, W // ws
    nW = w1 * w2
    shift = ws // 2

    if attn_type != 'W':
        x = jnp.roll(x, shift=(-shift, -shift), axis=(1, 2))
    xw = x.reshape(B, w1, ws, w2, ws, C).transpose(0, 1, 3, 2, 4, 5)
    xw = xw.reshape(B, nW, NP, C)

    qkv = xw @ params['w_qkv'] + params['b_qkv']                   # [B,nW,NP,3C]
    qkv = qkv.reshape(B, nW, NP, 3 * n_heads, head_dim)
    qkv = jnp.moveaxis(qkv, 3, 0)                                   # [3h,B,nW,NP,hd]
    q, k, v = qkv[:n_heads], qkv[n_heads:2 * n_heads], qkv[2 * n_heads:]

    sim = jnp.einsum('hbwpc,hbwqc->hbwpq', q, k) * scale
    rel = jnp.asarray(_relative_embedding(
        np.asarray(params['rel_params']), ws), dtype=jnp.float32)
    sim = sim + rel[:, None, None]
    if attn_type != 'W':
        mask = _generate_mask(w1, ws, shift, attn_type) > 0.5       # [nW,NP,NP]
        sim = jnp.where(mask[None, None], -jnp.inf, sim)
    probs = jax.nn.softmax(sim, axis=-1)
    out = jnp.einsum('hbwij,hbwjc->hbwic', probs, v)                # [h,B,nW,NP,hd]
    out = jnp.moveaxis(out, 0, 3).reshape(B, nW, NP, C)             # (h c) concat
    out = out @ params['w_out'] + params['b_out']

    Cout = out.shape[-1]
    out = out.reshape(B, w1, w2, ws, ws, Cout)
    out = out.transpose(0, 1, 3, 2, 4, 5).reshape(B, H, W, Cout)
    if attn_type != 'W':
        out = jnp.roll(out, shift=(shift, shift), axis=(1, 2))
    return out


# ----------------------------------------------------------------------------
if __name__ == "__main__":
    # Small shapes consistent with the module.
    B, H, W = 2, 16, 16
    input_dim = 32
    output_dim = 32
    head_dim = 8
    window_size = 4
    n_heads = input_dim // head_dim

    key = jax.random.PRNGKey(0)
    k_x, k_wq, k_bq, k_rel, k_wo, k_bo = jax.random.split(key, 6)

    x = jax.random.normal(k_x, (B, H, W, input_dim), dtype=jnp.float32)

    # Deterministic synthetic parameters (shapes from WMSA.__init__).
    params = {
        'w_qkv': jax.random.normal(k_wq, (input_dim, 3 * input_dim),
                                   dtype=jnp.float32) * 0.05,
        'b_qkv': jax.random.normal(k_bq, (3 * input_dim,),
                                   dtype=jnp.float32) * 0.02,
        # relative_position_params after the __init__ reshape/transposes:
        # [n_heads, 2*ws-1, 2*ws-1]
        'rel_params': jax.random.normal(
            k_rel, (n_heads, 2 * window_size - 1, 2 * window_size - 1),
            dtype=jnp.float32) * 0.02,
        'w_out': jax.random.normal(k_wo, (input_dim, output_dim),
                                   dtype=jnp.float32) * 0.05,
        'b_out': jax.random.normal(k_bo, (output_dim,),
                                   dtype=jnp.float32) * 0.02,
    }

    ok = True
    for attn_type in ('W', 'SW'):
        out = wmsa_forward(x, params, head_dim=head_dim,
                           window_size=window_size, attn_type=attn_type)
        out = jax.block_until_ready(out)
        ref = wmsa_reference(x, params, head_dim=head_dim,
                             window_size=window_size, attn_type=attn_type)
        # bf16 MXU operands (f32 accumulation) -> allow a few e-3 of error.
        if not np.allclose(np.asarray(out), np.asarray(ref),
                           rtol=2e-2, atol=2e-2):
            ok = False
            print(f"MISMATCH for type={attn_type}, "
                  f"max err={np.max(np.abs(np.asarray(out) - np.asarray(ref)))}")

    if ok:
        print("KERNEL_OK")
</pallas_src>

<mosaic_0001>
module attributes {stable_mosaic.version = 11 : i64} {
  func.func @_wmsa_kernel(%arg0: i32, %arg1: memref<512x32xbf16, #tpu.memory_space<vmem>>, %arg2: memref<32x512xbf16, #tpu.memory_space<vmem>>, %arg3: memref<4x32x8xbf16, #tpu.memory_space<vmem>>, %arg4: memref<4x1x8xf32, #tpu.memory_space<vmem>>, %arg5: memref<64x32xbf16, #tpu.memory_space<vmem>>, %arg6: memref<64x1xf32, #tpu.memory_space<vmem>>, %arg7: memref<4x2x128x128xf32, #tpu.memory_space<vmem>>, %arg8: memref<32x32xbf16, #tpu.memory_space<vmem>>, %arg9: memref<32x1xf32, #tpu.memory_space<vmem>>, %arg10: memref<32x512xf32, #tpu.memory_space<vmem>>, %arg11: memref<64x512xf32, #tpu.memory_space<vmem>>, %arg12: memref<32x512xf32, #tpu.memory_space<vmem>>) attributes {dimension_semantics = [#tpu.dimension_semantics<parallel>], iteration_bounds = array<i64: 1>, scalar_prefetch = 0 : i64, scratch_operands = 2 : i64, tpu.core_type = #tpu.core_type<tc>, window_params = [{transform_indices = @transform_0, window_bounds = array<i64: 512, 32>}, {transform_indices = @transform_1, window_bounds = array<i64: 32, 512>}, {pipeline_mode = #tpu.pipeline_mode<synchronous>, transform_indices = @transform_2, window_bounds = array<i64: 4, 32, 8>}, {pipeline_mode = #tpu.pipeline_mode<synchronous>, transform_indices = @transform_3, window_bounds = array<i64: 4, 1, 8>}, {pipeline_mode = #tpu.pipeline_mode<synchronous>, transform_indices = @transform_4, window_bounds = array<i64: 64, 32>}, {pipeline_mode = #tpu.pipeline_mode<synchronous>, transform_indices = @transform_5, window_bounds = array<i64: 64, 1>}, {pipeline_mode = #tpu.pipeline_mode<synchronous>, transform_indices = @transform_6, window_bounds = array<i64: 4, 2, 128, 128>}, {pipeline_mode = #tpu.pipeline_mode<synchronous>, transform_indices = @transform_7, window_bounds = array<i64: 32, 32>}, {pipeline_mode = #tpu.pipeline_mode<synchronous>, transform_indices = @transform_8, window_bounds = array<i64: 32, 1>}, {transform_indices = @transform_9, window_bounds = array<i64: 32, 512>}]} {
    %c0 = arith.constant 0 : index
    %c0_0 = arith.constant 0 : index
    %0 = vector.load %arg5[%c0, %c0_0] : memref<64x32xbf16, #tpu.memory_space<vmem>>, vector<64x32xbf16>
    %c0_1 = arith.constant 0 : index
    %c0_2 = arith.constant 0 : index
    %1 = vector.load %arg2[%c0_1, %c0_2] : memref<32x512xbf16, #tpu.memory_space<vmem>>, vector<32x512xbf16>
    %cst = arith.constant dense<0.000000e+00> : vector<64x512xf32>
    %2 = tpu.matmul %0, %1, %cst {dimension_numbers = #tpu.dot_dimension_numbers<[1], [0], [0], [1], [0, 0, 1, 1], [], []>} : vector<64x32xbf16>, vector<32x512xbf16>, vector<64x512xf32> -> vector<64x512xf32>
    %c0_3 = arith.constant 0 : index
    %c0_4 = arith.constant 0 : index
    %3 = vector.load %arg6[%c0_3, %c0_4] : memref<64x1xf32, #tpu.memory_space<vmem>>, vector<64x1xf32>
    %4 = vector.broadcast %3 : vector<64x1xf32> to vector<64x512xf32>
    %5 = arith.addf %2, %4 : vector<64x512xf32>
    %c0_5 = arith.constant 0 : index
    %c0_6 = arith.constant 0 : index
    %6 = vector.load %arg11[%c0_5, %c0_6] : memref<64x512xf32, #tpu.memory_space<vmem>>, vector<64x512xf32>
    tpu.vector_store %arg11[%c0_5, %c0_6], %5 {strides = array<i32>} : memref<64x512xf32, #tpu.memory_space<vmem>>, vector<64x512xf32>,
    %c0_7 = arith.constant 0 : index
    %c0_8 = arith.constant 0 : index
    %7 = vector.load %arg1[%c0_7, %c0_8] : memref<512x32xbf16, #tpu.memory_space<vmem>>, vector<128x32xbf16>
    %c0_9 = arith.constant 0 : index
    %c0_10 = arith.constant 0 : index
    %c0_11 = arith.constant 0 : index
    %8 = vector.load %arg3[%c0_9, %c0_10, %c0_11] : memref<4x32x8xbf16, #tpu.memory_space<vmem>>, vector<1x32x8xbf16>
    %9 = vector.shape_cast %8 : vector<1x32x8xbf16> to vector<32x8xbf16>
    %cst_12 = arith.constant dense<0.000000e+00> : vector<128x8xf32>
    %10 = tpu.matmul %7, %9, %cst_12 {dimension_numbers = #tpu.dot_dimension_numbers<[1], [0], [0], [1], [0, 0, 1, 1], [], []>} : vector<128x32xbf16>, vector<32x8xbf16>, vector<128x8xf32> -> vector<128x8xf32>
    %c0_13 = arith.constant 0 : index
    %c0_14 = arith.constant 0 : index
    %c0_15 = arith.constant 0 : index
    %11 = vector.load %arg4[%c0_13, %c0_14, %c0_15] : memref<4x1x8xf32, #tpu.memory_space<vmem>>, vector<1x1x8xf32>
    %12 = vector.shape_cast %11 : vector<1x1x8xf32> to vector<1x8xf32>
    %13 = vector.broadcast %12 : vector<1x8xf32> to vector<128x8xf32>
    %14 = arith.addf %10, %13 : vector<128x8xf32>
    %15 = arith.truncf %14 : vector<128x8xf32> to vector<128x8xbf16>
    %c0_16 = arith.constant 0 : index
    %c0_17 = arith.constant 0 : index
    %16 = vector.load %arg11[%c0_16, %c0_17] : memref<64x512xf32, #tpu.memory_space<vmem>>, vector<8x128xf32>
    %17 = arith.truncf %16 : vector<8x128xf32> to vector<8x128xbf16>
    %c32 = arith.constant 32 : index
    %c0_18 = arith.constant 0 : index
    %18 = vector.load %arg11[%c32, %c0_18] : memref<64x512xf32, #tpu.memory_space<vmem>>, vector<8x128xf32>
    %19 = arith.truncf %18 : vector<8x128xf32> to vector<8x128xbf16>
    %cst_19 = arith.constant dense<0.000000e+00> : vector<128x128xf32>
    %20 = tpu.matmul %15, %17, %cst_19 {dimension_numbers = #tpu.dot_dimension_numbers<[1], [0], [0], [1], [0, 0, 1, 1], [], []>} : vector<128x8xbf16>, vector<8x128xbf16>, vector<128x128xf32> -> vector<128x128xf32>
    %c0_20 = arith.constant 0 : index
    %c0_21 = arith.constant 0 : index
    %c0_22 = arith.constant 0 : index
    %c0_23 = arith.constant 0 : index
    %21 = vector.load %arg7[%c0_20, %c0_21, %c0_22, %c0_23] : memref<4x2x128x128xf32, #tpu.memory_space<vmem>>, vector<1x1x128x128xf32>
    %22 = vector.shape_cast %21 : vector<1x1x128x128xf32> to vector<128x128xf32>
    %23 = arith.addf %20, %22 : vector<128x128xf32>
    %cst_24 = arith.constant dense<0xFF800000> : vector<128xf32>
    %24 = vector.multi_reduction <maximumf>, %23, %cst_24 [1] : vector<128x128xf32> to vector<128xf32>
    %25 = vector.shape_cast %24 : vector<128xf32> to vector<128x1xf32>
    %26 = vector.broadcast %25 : vector<128x1xf32> to vector<128x128xf32>
    %27 = arith.subf %23, %26 : vector<128x128xf32>
    %28 = math.exp %27 : vector<128x128xf32>
    %cst_25 = arith.constant dense<0.000000e+00> : vector<128xf32>
    %29 = vector.multi_reduction <add>, %28, %cst_25 [1] : vector<128x128xf32> to vector<128xf32>
    %30 = vector.shape_cast %29 : vector<128xf32> to vector<128x1xf32>
    %31 = tpu.reciprocal %30 {approx = true} : vector<128x1xf32> -> vector<128x1xf32>
    %32 = arith.mulf %30, %31 : vector<128x1xf32>
    %cst_26 = arith.constant 2.000000e+00 : f32
    %33 = vector.broadcast %cst_26 : f32 to vector<128x1xf32>
    %34 = arith.subf %33, %32 : vector<128x1xf32>
    %35 = arith.mulf %31, %34 : vector<128x1xf32>
    %36 = vector.broadcast %35 : vector<128x1xf32> to vector<128x128xf32>
    %37 = arith.mulf %28, %36 : vector<128x128xf32>
    %38 = arith.truncf %37 : vector<128x128xf32> to vector<128x128xbf16>
    %cst_27 = arith.constant dense<0.000000e+00> : vector<8x128xf32>
    %39 = tpu.matmul %19, %38, %cst_27 {dimension_numbers = #tpu.dot_dimension_numbers<[1], [1], [0], [0], [0, 0, 1, 0], [], []>} : vector<8x128xbf16>, vector<128x128xbf16>, vector<8x128xf32> -> vector<8x128xf32>
    %c0_28 = arith.constant 0 : index
    %c0_29 = arith.constant 0 : index
    %40 = vector.load %arg12[%c0_28, %c0_29] : memref<32x512xf32, #tpu.memory_space<vmem>>, vector<8x128xf32>
    tpu.vector_store %arg12[%c0_28, %c0_29], %39 {strides = array<i32>} : memref<32x512xf32, #tpu.memory_space<vmem>>, vector<8x128xf32>,
    %c1 = arith.constant 1 : index
    %c0_30 = arith.constant 0 : index
    %c0_31 = arith.constant 0 : index
    %41 = vector.load %arg3[%c1, %c0_30, %c0_31] : memref<4x32x8xbf16, #tpu.memory_space<vmem>>, vector<1x32x8xbf16>
    %42 = vector.shape_cast %41 : vector<1x32x8xbf16> to vector<32x8xbf16>
    %cst_32 = arith.constant dense<0.000000e+00> : vector<128x8xf32>
    %43 = tpu.matmul %7, %42, %cst_32 {dimension_numbers = #tpu.dot_dimension_numbers<[1], [0], [0], [1], [0, 0, 1, 1], [], []>} : vector<128x32xbf16>, vector<32x8xbf16>, vector<128x8xf32> -> vector<128x8xf32>
    %c1_33 = arith.constant 1 : index
    %c0_34 = arith.constant 0 : index
    %c0_35 = arith.constant 0 : index
    %44 = vector.load %arg4[%c1_33, %c0_34, %c0_35] : memref<4x1x8xf32, #tpu.memory_space<vmem>>, vector<1x1x8xf32>
    %45 = vector.shape_cast %44 : vector<1x1x8xf32> to vector<1x8xf32>
    %46 = vector.broadcast %45 : vector<1x8xf32> to vector<128x8xf32>
    %47 = arith.addf %43, %46 : vector<128x8xf32>
    %48 = arith.truncf %47 : vector<128x8xf32> to vector<128x8xbf16>
    %c8 = arith.constant 8 : index
    %c0_36 = arith.constant 0 : index
    %49 = vector.load %arg11[%c8, %c0_36] : memref<64x512xf32, #tpu.memory_space<vmem>>, vector<8x128xf32>
    %50 = arith.truncf %49 : vector<8x128xf32> to vector<8x128xbf16>
    %c40 = arith.constant 40 : index
    %c0_37 = arith.constant 0 : index
    %51 = vector.load %arg11[%c40, %c0_37] : memref<64x512xf32, #tpu.memory_space<vmem>>, vector<8x128xf32>
    %52 = arith.truncf %51 : vector<8x128xf32> to vector<8x128xbf16>
    %cst_38 = arith.constant dense<0.000000e+00> : vector<128x128xf32>
    %53 = tpu.matmul %48, %50, %cst_38 {dimension_numbers = #tpu.dot_dimension_numbers<[1], [0], [0], [1], [0, 0, 1, 1], [], []>} : vector<128x8xbf16>, vector<8x128xbf16>, vector<128x128xf32> -> vector<128x128xf32>
    %c1_39 = arith.constant 1 : index
    %c0_40 = arith.constant 0 : index
    %c0_41 = arith.constant 0 : index
    %c0_42 = arith.constant 0 : index
    %54 = vector.load %arg7[%c1_39, %c0_40, %c0_41, %c0_42] : memref<4x2x128x128xf32, #tpu.memory_space<vmem>>, vector<1x1x128x128xf32>
    %55 = vector.shape_cast %54 : vector<1x1x128x128xf32> to vector<128x128xf32>
    %56 = arith.addf %53, %55 : vector<128x128xf32>
    %cst_43 = arith.constant dense<0xFF800000> : vector<128xf32>
    %57 = vector.multi_reduction <maximumf>, %56, %cst_43 [1] : vector<128x128xf32> to vector<128xf32>
    %58 = vector.shape_cast %57 : vector<128xf32> to vector<128x1xf32>
    %59 = vector.broadcast %58 : vector<128x1xf32> to vector<128x128xf32>
    %60 = arith.subf %56, %59 : vector<128x128xf32>
    %61 = math.exp %60 : vector<128x128xf32>
    %cst_44 = arith.constant dense<0.000000e+00> : vector<128xf32>
    %62 = vector.multi_reduction <add>, %61, %cst_44 [1] : vector<128x128xf32> to vector<128xf32>
    %63 = vector.shape_cast %62 : vector<128xf32> to vector<128x1xf32>
    %64 = tpu.reciprocal %63 {approx = true} : vector<128x1xf32> -> vector<128x1xf32>
    %65 = arith.mulf %63, %64 : vector<128x1xf32>
    %cst_45 = arith.constant 2.000000e+00 : f32
    %66 = vector.broadcast %cst_45 : f32 to vector<128x1xf32>
    %67 = arith.subf %66, %65 : vector<128x1xf32>
    %68 = arith.mulf %64, %67 : vector<128x1xf32>
    %69 = vector.broadcast %68 : vector<128x1xf32> to vector<128x128xf32>
    %70 = arith.mulf %61, %69 : vector<128x128xf32>
    %71 = arith.truncf %70 : vector<128x128xf32> to vector<128x128xbf16>
    %cst_46 = arith.constant dense<0.000000e+00> : vector<8x128xf32>
    %72 = tpu.matmul %52, %71, %cst_46 {dimension_numbers = #tpu.dot_dimension_numbers<[1], [1], [0], [0], [0, 0, 1, 0], [], []>} : vector<8x128xbf16>, vector<128x128xbf16>, vector<8x128xf32> -> vector<8x128xf32>
    %c8_47 = arith.constant 8 : index
    %c0_48 = arith.constant 0 : index
    %73 = vector.load %arg12[%c8_47, %c0_48] : memref<32x512xf32, #tpu.memory_space<vmem>>, vector<8x128xf32>
    tpu.vector_store %arg12[%c8_47, %c0_48], %72 {strides = array<i32>} : memref<32x512xf32, #tpu.memory_space<vmem>>, vector<8x128xf32>,
    %c2 = arith.constant 2 : index
    %c0_49 = arith.constant 0 : index
    %c0_50 = arith.constant 0 : index
    %74 = vector.load %arg3[%c2, %c0_49, %c0_50] : memref<4x32x8xbf16, #tpu.memory_space<vmem>>, vector<1x32x8xbf16>
    %75 = vector.shape_cast %74 : vector<1x32x8xbf16> to vector<32x8xbf16>
    %cst_51 = arith.constant dense<0.000000e+00> : vector<128x8xf32>
    %76 = tpu.matmul %7, %75, %cst_51 {dimension_numbers = #tpu.dot_dimension_numbers<[1], [0], [0], [1], [0, 0, 1, 1], [], []>} : vector<128x32xbf16>, vector<32x8xbf16>, vector<128x8xf32> -> vector<128x8xf32>
    %c2_52 = arith.constant 2 : index
    %c0_53 = arith.constant 0 : index
    %c0_54 = arith.constant 0 : index
    %77 = vector.load %arg4[%c2_52, %c0_53, %c0_54] : memref<4x1x8xf32, #tpu.memory_space<vmem>>, vector<1x1x8xf32>
    %78 = vector.shape_cast %77 : vector<1x1x8xf32> to vector<1x8xf32>
    %79 = vector.broadcast %78 : vector<1x8xf32> to vector<128x8xf32>
    %80 = arith.addf %76, %79 : vector<128x8xf32>
    %81 = arith.truncf %80 : vector<128x8xf32> to vector<128x8xbf16>
    %c16 = arith.constant 16 : index
    %c0_55 = arith.constant 0 : index
    %82 = vector.load %arg11[%c16, %c0_55] : memref<64x512xf32, #tpu.memory_space<vmem>>, vector<8x128xf32>
    %83 = arith.truncf %82 : vector<8x128xf32> to vector<8x128xbf16>
    %c48 = arith.constant 48 : index
    %c0_56 = arith.constant 0 : index
    %84 = vector.load %arg11[%c48, %c0_56] : memref<64x512xf32, #tpu.memory_space<vmem>>, vector<8x128xf32>
    %85 = arith.truncf %84 : vector<8x128xf32> to vector<8x128xbf16>
    %cst_57 = arith.constant dense<0.000000e+00> : vector<128x128xf32>
    %86 = tpu.matmul %81, %83, %cst_57 {dimension_numbers = #tpu.dot_dimension_numbers<[1], [0], [0], [1], [0, 0, 1, 1], [], []>} : vector<128x8xbf16>, vector<8x128xbf16>, vector<128x128xf32> -> vector<128x128xf32>
    %c2_58 = arith.constant 2 : index
    %c0_59 = arith.constant 0 : index
    %c0_60 = arith.constant 0 : index
    %c0_61 = arith.constant 0 : index
    %87 = vector.load %arg7[%c2_58, %c0_59, %c0_60, %c0_61] : memref<4x2x128x128xf32, #tpu.memory_space<vmem>>, vector<1x1x128x128xf32>
    %88 = vector.shape_cast %87 : vector<1x1x128x128xf32> to vector<128x128xf32>
    %89 = arith.addf %86, %88 : vector<128x128xf32>
    %cst_62 = arith.constant dense<0xFF800000> : vector<128xf32>
    %90 = vector.multi_reduction <maximumf>, %89, %cst_62 [1] : vector<128x128xf32> to vector<128xf32>
    %91 = vector.shape_cast %90 : vector<128xf32> to vector<128x1xf32>
    %92 = vector.broadcast %91 : vector<128x1xf32> to vector<128x128xf32>
    %93 = arith.subf %89, %92 : vector<128x128xf32>
    %94 = math.exp %93 : vector<128x128xf32>
    %cst_63 = arith.constant dense<0.000000e+00> : vector<128xf32>
    %95 = vector.multi_reduction <add>, %94, %cst_63 [1] : vector<128x128xf32> to vector<128xf32>
    %96 = vector.shape_cast %95 : vector<128xf32> to vector<128x1xf32>
    %97 = tpu.reciprocal %96 {approx = true} : vector<128x1xf32> -> vector<128x1xf32>
    %98 = arith.mulf %96, %97 : vector<128x1xf32>
    %cst_64 = arith.constant 2.000000e+00 : f32
    %99 = vector.broadcast %cst_64 : f32 to vector<128x1xf32>
    %100 = arith.subf %99, %98 : vector<128x1xf32>
    %101 = arith.mulf %97, %100 : vector<128x1xf32>
    %102 = vector.broadcast %101 : vector<128x1xf32> to vector<128x128xf32>
    %103 = arith.mulf %94, %102 : vector<128x128xf32>
    %104 = arith.truncf %103 : vector<128x128xf32> to vector<128x128xbf16>
    %cst_65 = arith.constant dense<0.000000e+00> : vector<8x128xf32>
    %105 = tpu.matmul %85, %104, %cst_65 {dimension_numbers = #tpu.dot_dimension_numbers<[1], [1], [0], [0], [0, 0, 1, 0], [], []>} : vector<8x128xbf16>, vector<128x128xbf16>, vector<8x128xf32> -> vector<8x128xf32>
    %c16_66 = arith.constant 16 : index
    %c0_67 = arith.constant 0 : index
    %106 = vector.load %arg12[%c16_66, %c0_67] : memref<32x512xf32, #tpu.memory_space<vmem>>, vector<8x128xf32>
    tpu.vector_store %arg12[%c16_66, %c0_67], %105 {strides = array<i32>} : memref<32x512xf32, #tpu.memory_space<vmem>>, vector<8x128xf32>,
    %c3 = arith.constant 3 : index
    %c0_68 = arith.constant 0 : index
    %c0_69 = arith.constant 0 : index
    %107 = vector.load %arg3[%c3, %c0_68, %c0_69] : memref<4x32x8xbf16, #tpu.memory_space<vmem>>, vector<1x32x8xbf16>
    %108 = vector.shape_cast %107 : vector<1x32x8xbf16> to vector<32x8xbf16>
    %cst_70 = arith.constant dense<0.000000e+00> : vector<128x8xf32>
    %109 = tpu.matmul %7, %108, %cst_70 {dimension_numbers = #tpu.dot_dimension_numbers<[1], [0], [0], [1], [0, 0, 1, 1], [], []>} : vector<128x32xbf16>, vector<32x8xbf16>, vector<128x8xf32> -> vector<128x8xf32>
    %c3_71 = arith.constant 3 : index
    %c0_72 = arith.constant 0 : index
    %c0_73 = arith.constant 0 : index
    %110 = vector.load %arg4[%c3_71, %c0_72, %c0_73] : memref<4x1x8xf32, #tpu.memory_space<vmem>>, vector<1x1x8xf32>
    %111 = vector.shape_cast %110 : vector<1x1x8xf32> to vector<1x8xf32>
    %112 = vector.broadcast %111 : vector<1x8xf32> to vector<128x8xf32>
    %113 = arith.addf %109, %112 : vector<128x8xf32>
    %114 = arith.truncf %113 : vector<128x8xf32> to vector<128x8xbf16>
    %c24 = arith.constant 24 : index
    %c0_74 = arith.constant 0 : index
    %115 = vector.load %arg11[%c24, %c0_74] : memref<64x512xf32, #tpu.memory_space<vmem>>, vector<8x128xf32>
    %116 = arith.truncf %115 : vector<8x128xf32> to vector<8x128xbf16>
    %c56 = arith.constant 56 : index
    %c0_75 = arith.constant 0 : index
    %117 = vector.load %arg11[%c56, %c0_75] : memref<64x512xf32, #tpu.memory_space<vmem>>, vector<8x128xf32>
    %118 = arith.truncf %117 : vector<8x128xf32> to vector<8x128xbf16>
    %cst_76 = arith.constant dense<0.000000e+00> : vector<128x128xf32>
    %119 = tpu.matmul %114, %116, %cst_76 {dimension_numbers = #tpu.dot_dimension_numbers<[1], [0], [0], [1], [0, 0, 1, 1], [], []>} : vector<128x8xbf16>, vector<8x128xbf16>, vector<128x128xf32> -> vector<128x128xf32>
    %c3_77 = arith.constant 3 : index
    %c0_78 = arith.constant 0 : index
    %c0_79 = arith.constant 0 : index
    %c0_80 = arith.constant 0 : index
    %120 = vector.load %arg7[%c3_77, %c0_78, %c0_79, %c0_80] : memref<4x2x128x128xf32, #tpu.memory_space<vmem>>, vector<1x1x128x128xf32>
    %121 = vector.shape_cast %120 : vector<1x1x128x128xf32> to vector<128x128xf32>
    %122 = arith.addf %119, %121 : vector<128x128xf32>
    %cst_81 = arith.constant dense<0xFF800000> : vector<128xf32>
    %123 = vector.multi_reduction <maximumf>, %122, %cst_81 [1] : vector<128x128xf32> to vector<128xf32>
    %124 = vector.shape_cast %123 : vector<128xf32> to vector<128x1xf32>
    %125 = vector.broadcast %124 : vector<128x1xf32> to vector<128x128xf32>
    %126 = arith.subf %122, %125 : vector<128x128xf32>
    %127 = math.exp %126 : vector<128x128xf32>
    %cst_82 = arith.constant dense<0.000000e+00> : vector<128xf32>
    %128 = vector.multi_reduction <add>, %127, %cst_82 [1] : vector<128x128xf32> to vector<128xf32>
    %129 = vector.shape_cast %128 : vector<128xf32> to vector<128x1xf32>
    %130 = tpu.reciprocal %129 {approx = true} : vector<128x1xf32> -> vector<128x1xf32>
    %131 = arith.mulf %129, %130 : vector<128x1xf32>
    %cst_83 = arith.constant 2.000000e+00 : f32
    %132 = vector.broadcast %cst_83 : f32 to vector<128x1xf32>
    %133 = arith.subf %132, %131 : vector<128x1xf32>
    %134 = arith.mulf %130, %133 : vector<128x1xf32>
    %135 = vector.broadcast %134 : vector<128x1xf32> to vector<128x128xf32>
    %136 = arith.mulf %127, %135 : vector<128x128xf32>
    %137 = arith.truncf %136 : vector<128x128xf32> to vector<128x128xbf16>
    %cst_84 = arith.constant dense<0.000000e+00> : vector<8x128xf32>
    %138 = tpu.matmul %118, %137, %cst_84 {dimension_numbers = #tpu.dot_dimension_numbers<[1], [1], [0], [0], [0, 0, 1, 0], [], []>} : vector<8x128xbf16>, vector<128x128xbf16>, vector<8x128xf32> -> vector<8x128xf32>
    %c24_85 = arith.constant 24 : index
    %c0_86 = arith.constant 0 : index
    %139 = vector.load %arg12[%c24_85, %c0_86] : memref<32x512xf32, #tpu.memory_space<vmem>>, vector<8x128xf32>
    tpu.vector_store %arg12[%c24_85, %c0_86], %138 {strides = array<i32>} : memref<32x512xf32, #tpu.memory_space<vmem>>, vector<8x128xf32>,
    %c128 = arith.constant 128 : index
    %c0_87 = arith.constant 0 : index
    %140 = vector.load %arg1[%c128, %c0_87] : memref<512x32xbf16, #tpu.memory_space<vmem>>, vector<128x32xbf16>
    %c0_88 = arith.constant 0 : index
    %c0_89 = arith.constant 0 : index
    %c0_90 = arith.constant 0 : index
    %141 = vector.load %arg3[%c0_88, %c0_89, %c0_90] : memref<4x32x8xbf16, #tpu.memory_space<vmem>>, vector<1x32x8xbf16>
    %142 = vector.shape_cast %141 : vector<1x32x8xbf16> to vector<32x8xbf16>
    %cst_91 = arith.constant dense<0.000000e+00> : vector<128x8xf32>
    %143 = tpu.matmul %140, %142, %cst_91 {dimension_numbers = #tpu.dot_dimension_numbers<[1], [0], [0], [1], [0, 0, 1, 1], [], []>} : vector<128x32xbf16>, vector<32x8xbf16>, vector<128x8xf32> -> vector<128x8xf32>
    %c0_92 = arith.constant 0 : index
    %c0_93 = arith.constant 0 : index
    %c0_94 = arith.constant 0 : index
    %144 = vector.load %arg4[%c0_92, %c0_93, %c0_94] : memref<4x1x8xf32, #tpu.memory_space<vmem>>, vector<1x1x8xf32>
    %145 = vector.shape_cast %144 : vector<1x1x8xf32> to vector<1x8xf32>
    %146 = vector.broadcast %145 : vector<1x8xf32> to vector<128x8xf32>
    %147 = arith.addf %143, %146 : vector<128x8xf32>
    %148 = arith.truncf %147 : vector<128x8xf32> to vector<128x8xbf16>
    %c0_95 = arith.constant 0 : index
    %c128_96 = arith.constant 128 : index
    %149 = vector.load %arg11[%c0_95, %c128_96] : memref<64x512xf32, #tpu.memory_space<vmem>>, vector<8x128xf32>
    %150 = arith.truncf %149 : vector<8x128xf32> to vector<8x128xbf16>
    %c32_97 = arith.constant 32 : index
    %c128_98 = arith.constant 128 : index
    %151 = vector.load %arg11[%c32_97, %c128_98] : memref<64x512xf32, #tpu.memory_space<vmem>>, vector<8x128xf32>
    %152 = arith.truncf %151 : vector<8x128xf32> to vector<8x128xbf16>
    %cst_99 = arith.constant dense<0.000000e+00> : vector<128x128xf32>
    %153 = tpu.matmul %148, %150, %cst_99 {dimension_numbers = #tpu.dot_dimension_numbers<[1], [0], [0], [1], [0, 0, 1, 1], [], []>} : vector<128x8xbf16>, vector<8x128xbf16>, vector<128x128xf32> -> vector<128x128xf32>
    %c0_100 = arith.constant 0 : index
    %c1_101 = arith.constant 1 : index
    %c0_102 = arith.constant 0 : index
    %c0_103 = arith.constant 0 : index
    %154 = vector.load %arg7[%c0_100, %c1_101, %c0_102, %c0_103] : memref<4x2x128x128xf32, #tpu.memory_space<vmem>>, vector<1x1x128x128xf32>
    %155 = vector.shape_cast %154 : vector<1x1x128x128xf32> to vector<128x128xf32>
    %156 = arith.addf %153, %155 : vector<128x128xf32>
    %cst_104 = arith.constant dense<0xFF800000> : vector<128xf32>
    %157 = vector.multi_reduction <maximumf>, %156, %cst_104 [1] : vector<128x128xf32> to vector<128xf32>
    %158 = vector.shape_cast %157 : vector<128xf32> to vector<128x1xf32>
    %159 = vector.broadcast %158 : vector<128x1xf32> to vector<128x128xf32>
    %160 = arith.subf %156, %159 : vector<128x128xf32>
    %161 = math.exp %160 : vector<128x128xf32>
    %cst_105 = arith.constant dense<0.000000e+00> : vector<128xf32>
    %162 = vector.multi_reduction <add>, %161, %cst_105 [1] : vector<128x128xf32> to vector<128xf32>
    %163 = vector.shape_cast %162 : vector<128xf32> to vector<128x1xf32>
    %164 = tpu.reciprocal %163 {approx = true} : vector<128x1xf32> -> vector<128x1xf32>
    %165 = arith.mulf %163, %164 : vector<128x1xf32>
    %cst_106 = arith.constant 2.000000e+00 : f32
    %166 = vector.broadcast %cst_106 : f32 to vector<128x1xf32>
    %167 = arith.subf %166, %165 : vector<128x1xf32>
    %168 = arith.mulf %164, %167 : vector<128x1xf32>
    %169 = vector.broadcast %168 : vector<128x1xf32> to vector<128x128xf32>
    %170 = arith.mulf %161, %169 : vector<128x128xf32>
    %171 = arith.truncf %170 : vector<128x128xf32> to vector<128x128xbf16>
    %cst_107 = arith.constant dense<0.000000e+00> : vector<8x128xf32>
    %172 = tpu.matmul %152, %171, %cst_107 {dimension_numbers = #tpu.dot_dimension_numbers<[1], [1], [0], [0], [0, 0, 1, 0], [], []>} : vector<8x128xbf16>, vector<128x128xbf16>, vector<8x128xf32> -> vector<8x128xf32>
    %c0_108 = arith.constant 0 : index
    %c128_109 = arith.constant 128 : index
    %173 = vector.load %arg12[%c0_108, %c128_109] : memref<32x512xf32, #tpu.memory_space<vmem>>, vector<8x128xf32>
    tpu.vector_store %arg12[%c0_108, %c128_109], %172 {strides = array<i32>} : memref<32x512xf32, #tpu.memory_space<vmem>>, vector<8x128xf32>,
    %c1_110 = arith.constant 1 : index
    %c0_111 = arith.constant 0 : index
    %c0_112 = arith.constant 0 : index
    %174 = vector.load %arg3[%c1_110, %c0_111, %c0_112] : memref<4x32x8xbf16, #tpu.memory_space<vmem>>, vector<1x32x8xbf16>
    %175 = vector.shape_cast %174 : vector<1x32x8xbf16> to vector<32x8xbf16>
    %cst_113 = arith.constant dense<0.000000e+00> : vector<128x8xf32>
    %176 = tpu.matmul %140, %175, %cst_113 {dimension_numbers = #tpu.dot_dimension_numbers<[1], [0], [0], [1], [0, 0, 1, 1], [], []>} : vector<128x32xbf16>, vector<32x8xbf16>, vector<128x8xf32> -> vector<128x8xf32>
    %c1_114 = arith.constant 1 : index
    %c0_115 = arith.constant 0 : index
    %c0_116 = arith.constant 0 : index
    %177 = vector.load %arg4[%c1_114, %c0_115, %c0_116] : memref<4x1x8xf32, #tpu.memory_space<vmem>>, vector<1x1x8xf32>
    %178 = vector.shape_cast %177 : vector<1x1x8xf32> to vector<1x8xf32>
    %179 = vector.broadcast %178 : vector<1x8xf32> to vector<128x8xf32>
    %180 = arith.addf %176, %179 : vector<128x8xf32>
    %181 = arith.truncf %180 : vector<128x8xf32> to vector<128x8xbf16>
    %c8_117 = arith.constant 8 : index
    %c128_118 = arith.constant 128 : index
    %182 = vector.load %arg11[%c8_117, %c128_118] : memref<64x512xf32, #tpu.memory_space<vmem>>, vector<8x128xf32>
    %183 = arith.truncf %182 : vector<8x128xf32> to vector<8x128xbf16>
    %c40_119 = arith.constant 40 : index
    %c128_120 = arith.constant 128 : index
    %184 = vector.load %arg11[%c40_119, %c128_120] : memref<64x512xf32, #tpu.memory_space<vmem>>, vector<8x128xf32>
    %185 = arith.truncf %184 : vector<8x128xf32> to vector<8x128xbf16>
    %cst_121 = arith.constant dense<0.000000e+00> : vector<128x128xf32>
    %186 = tpu.matmul %181, %183, %cst_121 {dimension_numbers = #tpu.dot_dimension_numbers<[1], [0], [0], [1], [0, 0, 1, 1], [], []>} : vector<128x8xbf16>, vector<8x128xbf16>, vector<128x128xf32> -> vector<128x128xf32>
    %c1_122 = arith.constant 1 : index
    %c1_123 = arith.constant 1 : index
    %c0_124 = arith.constant 0 : index
    %c0_125 = arith.constant 0 : index
    %187 = vector.load %arg7[%c1_122, %c1_123, %c0_124, %c0_125] : memref<4x2x128x128xf32, #tpu.memory_space<vmem>>, vector<1x1x128x128xf32>
    %188 = vector.shape_cast %187 : vector<1x1x128x128xf32> to vector<128x128xf32>
    %189 = arith.addf %186, %188 : vector<128x128xf32>
    %cst_126 = arith.constant dense<0xFF800000> : vector<128xf32>
    %190 = vector.multi_reduction <maximumf>, %189, %cst_126 [1] : vector<128x128xf32> to vector<128xf32>
    %191 = vector.shape_cast %190 : vector<128xf32> to vector<128x1xf32>
    %192 = vector.broadcast %191 : vector<128x1xf32> to vector<128x128xf32>
    %193 = arith.subf %189, %192 : vector<128x128xf32>
    %194 = math.exp %193 : vector<128x128xf32>
    %cst_127 = arith.constant dense<0.000000e+00> : vector<128xf32>
    %195 = vector.multi_reduction <add>, %194, %cst_127 [1] : vector<128x128xf32> to vector<128xf32>
    %196 = vector.shape_cast %195 : vector<128xf32> to vector<128x1xf32>
    %197 = tpu.reciprocal %196 {approx = true} : vector<128x1xf32> -> vector<128x1xf32>
    %198 = arith.mulf %196, %197 : vector<128x1xf32>
    %cst_128 = arith.constant 2.000000e+00 : f32
    %199 = vector.broadcast %cst_128 : f32 to vector<128x1xf32>
    %200 = arith.subf %199, %198 : vector<128x1xf32>
    %201 = arith.mulf %197, %200 : vector<128x1xf32>
    %202 = vector.broadcast %201 : vector<128x1xf32> to vector<128x128xf32>
    %203 = arith.mulf %194, %202 : vector<128x128xf32>
    %204 = arith.truncf %203 : vector<128x128xf32> to vector<128x128xbf16>
    %cst_129 = arith.constant dense<0.000000e+00> : vector<8x128xf32>
    %205 = tpu.matmul %185, %204, %cst_129 {dimension_numbers = #tpu.dot_dimension_numbers<[1], [1], [0], [0], [0, 0, 1, 0], [], []>} : vector<8x128xbf16>, vector<128x128xbf16>, vector<8x128xf32> -> vector<8x128xf32>
    %c8_130 = arith.constant 8 : index
    %c128_131 = arith.constant 128 : index
    %206 = vector.load %arg12[%c8_130, %c128_131] : memref<32x512xf32, #tpu.memory_space<vmem>>, vector<8x128xf32>
    tpu.vector_store %arg12[%c8_130, %c128_131], %205 {strides = array<i32>} : memref<32x512xf32, #tpu.memory_space<vmem>>, vector<8x128xf32>,
    %c2_132 = arith.constant 2 : index
    %c0_133 = arith.constant 0 : index
    %c0_134 = arith.constant 0 : index
    %207 = vector.load %arg3[%c2_132, %c0_133, %c0_134] : memref<4x32x8xbf16, #tpu.memory_space<vmem>>, vector<1x32x8xbf16>
    %208 = vector.shape_cast %207 : vector<1x32x8xbf16> to vector<32x8xbf16>
    %cst_135 = arith.constant dense<0.000000e+00> : vector<128x8xf32>
    %209 = tpu.matmul %140, %208, %cst_135 {dimension_numbers = #tpu.dot_dimension_numbers<[1], [0], [0], [1], [0, 0, 1, 1], [], []>} : vector<128x32xbf16>, vector<32x8xbf16>, vector<128x8xf32> -> vector<128x8xf32>
    %c2_136 = arith.constant 2 : index
    %c0_137 = arith.constant 0 : index
    %c0_138 = arith.constant 0 : index
    %210 = vector.load %arg4[%c2_136, %c0_137, %c0_138] : memref<4x1x8xf32, #tpu.memory_space<vmem>>, vector<1x1x8xf32>
    %211 = vector.shape_cast %210 : vector<1x1x8xf32> to vector<1x8xf32>
    %212 = vector.broadcast %211 : vector<1x8xf32> to vector<128x8xf32>
    %213 = arith.addf %209, %212 : vector<128x8xf32>
    %214 = arith.truncf %213 : vector<128x8xf32> to vector<128x8xbf16>
    %c16_139 = arith.constant 16 : index
    %c128_140 = arith.constant 128 : index
    %215 = vector.load %arg11[%c16_139, %c128_140] : memref<64x512xf32, #tpu.memory_space<vmem>>, vector<8x128xf32>
    %216 = arith.truncf %215 : vector<8x128xf32> to vector<8x128xbf16>
    %c48_141 = arith.constant 48 : index
    %c128_142 = arith.constant 128 : index
    %217 = vector.load %arg11[%c48_141, %c128_142] : memref<64x512xf32, #tpu.memory_space<vmem>>, vector<8x128xf32>
    %218 = arith.truncf %217 : vector<8x128xf32> to vector<8x128xbf16>
    %cst_143 = arith.constant dense<0.000000e+00> : vector<128x128xf32>
    %219 = tpu.matmul %214, %216, %cst_143 {dimension_numbers = #tpu.dot_dimension_numbers<[1], [0], [0], [1], [0, 0, 1, 1], [], []>} : vector<128x8xbf16>, vector<8x128xbf16>, vector<128x128xf32> -> vector<128x128xf32>
    %c2_144 = arith.constant 2 : index
    %c1_145 = arith.constant 1 : index
    %c0_146 = arith.constant 0 : index
    %c0_147 = arith.constant 0 : index
    %220 = vector.load %arg7[%c2_144, %c1_145, %c0_146, %c0_147] : memref<4x2x128x128xf32, #tpu.memory_space<vmem>>, vector<1x1x128x128xf32>
    %221 = vector.shape_cast %220 : vector<1x1x128x128xf32> to vector<128x128xf32>
    %222 = arith.addf %219, %221 : vector<128x128xf32>
    %cst_148 = arith.constant dense<0xFF800000> : vector<128xf32>
    %223 = vector.multi_reduction <maximumf>, %222, %cst_148 [1] : vector<128x128xf32> to vector<128xf32>
    %224 = vector.shape_cast %223 : vector<128xf32> to vector<128x1xf32>
    %225 = vector.broadcast %224 : vector<128x1xf32> to vector<128x128xf32>
    %226 = arith.subf %222, %225 : vector<128x128xf32>
    %227 = math.exp %226 : vector<128x128xf32>
    %cst_149 = arith.constant dense<0.000000e+00> : vector<128xf32>
    %228 = vector.multi_reduction <add>, %227, %cst_149 [1] : vector<128x128xf32> to vector<128xf32>
    %229 = vector.shape_cast %228 : vector<128xf32> to vector<128x1xf32>
    %230 = tpu.reciprocal %229 {approx = true} : vector<128x1xf32> -> vector<128x1xf32>
    %231 = arith.mulf %229, %230 : vector<128x1xf32>
    %cst_150 = arith.constant 2.000000e+00 : f32
    %232 = vector.broadcast %cst_150 : f32 to vector<128x1xf32>
    %233 = arith.subf %232, %231 : vector<128x1xf32>
    %234 = arith.mulf %230, %233 : vector<128x1xf32>
    %235 = vector.broadcast %234 : vector<128x1xf32> to vector<128x128xf32>
    %236 = arith.mulf %227, %235 : vector<128x128xf32>
    %237 = arith.truncf %236 : vector<128x128xf32> to vector<128x128xbf16>
    %cst_151 = arith.constant dense<0.000000e+00> : vector<8x128xf32>
    %238 = tpu.matmul %218, %237, %cst_151 {dimension_numbers = #tpu.dot_dimension_numbers<[1], [1], [0], [0], [0, 0, 1, 0], [], []>} : vector<8x128xbf16>, vector<128x128xbf16>, vector<8x128xf32> -> vector<8x128xf32>
    %c16_152 = arith.constant 16 : index
    %c128_153 = arith.constant 128 : index
    %239 = vector.load %arg12[%c16_152, %c128_153] : memref<32x512xf32, #tpu.memory_space<vmem>>, vector<8x128xf32>
    tpu.vector_store %arg12[%c16_152, %c128_153], %238 {strides = array<i32>} : memref<32x512xf32, #tpu.memory_space<vmem>>, vector<8x128xf32>,
    %c3_154 = arith.constant 3 : index
    %c0_155 = arith.constant 0 : index
    %c0_156 = arith.constant 0 : index
    %240 = vector.load %arg3[%c3_154, %c0_155, %c0_156] : memref<4x32x8xbf16, #tpu.memory_space<vmem>>, vector<1x32x8xbf16>
    %241 = vector.shape_cast %240 : vector<1x32x8xbf16> to vector<32x8xbf16>
    %cst_157 = arith.constant dense<0.000000e+00> : vector<128x8xf32>
    %242 = tpu.matmul %140, %241, %cst_157 {dimension_numbers = #tpu.dot_dimension_numbers<[1], [0], [0], [1], [0, 0, 1, 1], [], []>} : vector<128x32xbf16>, vector<32x8xbf16>, vector<128x8xf32> -> vector<128x8xf32>
    %c3_158 = arith.constant 3 : index
    %c0_159 = arith.constant 0 : index
    %c0_160 = arith.constant 0 : index
    %243 = vector.load %arg4[%c3_158, %c0_159, %c0_160] : memref<4x1x8xf32, #tpu.memory_space<vmem>>, vector<1x1x8xf32>
    %244 = vector.shape_cast %243 : vector<1x1x8xf32> to vector<1x8xf32>
    %245 = vector.broadcast %244 : vector<1x8xf32> to vector<128x8xf32>
    %246 = arith.addf %242, %245 : vector<128x8xf32>
    %247 = arith.truncf %246 : vector<128x8xf32> to vector<128x8xbf16>
    %c24_161 = arith.constant 24 : index
    %c128_162 = arith.constant 128 : index
    %248 = vector.load %arg11[%c24_161, %c128_162] : memref<64x512xf32, #tpu.memory_space<vmem>>, vector<8x128xf32>
    %249 = arith.truncf %248 : vector<8x128xf32> to vector<8x128xbf16>
    %c56_163 = arith.constant 56 : index
    %c128_164 = arith.constant 128 : index
    %250 = vector.load %arg11[%c56_163, %c128_164] : memref<64x512xf32, #tpu.memory_space<vmem>>, vector<8x128xf32>
    %251 = arith.truncf %250 : vector<8x128xf32> to vector<8x128xbf16>
    %cst_165 = arith.constant dense<0.000000e+00> : vector<128x128xf32>
    %252 = tpu.matmul %247, %249, %cst_165 {dimension_numbers = #tpu.dot_dimension_numbers<[1], [0], [0], [1], [0, 0, 1, 1], [], []>} : vector<128x8xbf16>, vector<8x128xbf16>, vector<128x128xf32> -> vector<128x128xf32>
    %c3_166 = arith.constant 3 : index
    %c1_167 = arith.constant 1 : index
    %c0_168 = arith.constant 0 : index
    %c0_169 = arith.constant 0 : index
    %253 = vector.load %arg7[%c3_166, %c1_167, %c0_168, %c0_169] : memref<4x2x128x128xf32, #tpu.memory_space<vmem>>, vector<1x1x128x128xf32>
    %254 = vector.shape_cast %253 : vector<1x1x128x128xf32> to vector<128x128xf32>
    %255 = arith.addf %252, %254 : vector<128x128xf32>
    %cst_170 = arith.constant dense<0xFF800000> : vector<128xf32>
    %256 = vector.multi_reduction <maximumf>, %255, %cst_170 [1] : vector<128x128xf32> to vector<128xf32>
    %257 = vector.shape_cast %256 : vector<128xf32> to vector<128x1xf32>
    %258 = vector.broadcast %257 : vector<128x1xf32> to vector<128x128xf32>
    %259 = arith.subf %255, %258 : vector<128x128xf32>
    %260 = math.exp %259 : vector<128x128xf32>
    %cst_171 = arith.constant dense<0.000000e+00> : vector<128xf32>
    %261 = vector.multi_reduction <add>, %260, %cst_171 [1] : vector<128x128xf32> to vector<128xf32>
    %262 = vector.shape_cast %261 : vector<128xf32> to vector<128x1xf32>
    %263 = tpu.reciprocal %262 {approx = true} : vector<128x1xf32> -> vector<128x1xf32>
    %264 = arith.mulf %262, %263 : vector<128x1xf32>
    %cst_172 = arith.constant 2.000000e+00 : f32
    %265 = vector.broadcast %cst_172 : f32 to vector<128x1xf32>
    %266 = arith.subf %265, %264 : vector<128x1xf32>
    %267 = arith.mulf %263, %266 : vector<128x1xf32>
    %268 = vector.broadcast %267 : vector<128x1xf32> to vector<128x128xf32>
    %269 = arith.mulf %260, %268 : vector<128x128xf32>
    %270 = arith.truncf %269 : vector<128x128xf32> to vector<128x128xbf16>
    %cst_173 = arith.constant dense<0.000000e+00> : vector<8x128xf32>
    %271 = tpu.matmul %251, %270, %cst_173 {dimension_numbers = #tpu.dot_dimension_numbers<[1], [1], [0], [0], [0, 0, 1, 0], [], []>} : vector<8x128xbf16>, vector<128x128xbf16>, vector<8x128xf32> -> vector<8x128xf32>
    %c24_174 = arith.constant 24 : index
    %c128_175 = arith.constant 128 : index
    %272 = vector.load %arg12[%c24_174, %c128_175] : memref<32x512xf32, #tpu.memory_space<vmem>>, vector<8x128xf32>
    tpu.vector_store %arg12[%c24_174, %c128_175], %271 {strides = array<i32>} : memref<32x512xf32, #tpu.memory_space<vmem>>, vector<8x128xf32>,
    %c256 = arith.constant 256 : index
    %c0_176 = arith.constant 0 : index
    %273 = vector.load %arg1[%c256, %c0_176] : memref<512x32xbf16, #tpu.memory_space<vmem>>, vector<128x32xbf16>
    %c0_177 = arith.constant 0 : index
    %c0_178 = arith.constant 0 : index
    %c0_179 = arith.constant 0 : index
    %274 = vector.load %arg3[%c0_177, %c0_178, %c0_179] : memref<4x32x8xbf16, #tpu.memory_space<vmem>>, vector<1x32x8xbf16>
    %275 = vector.shape_cast %274 : vector<1x32x8xbf16> to vector<32x8xbf16>
    %cst_180 = arith.constant dense<0.000000e+00> : vector<128x8xf32>
    %276 = tpu.matmul %273, %275, %cst_180 {dimension_numbers = #tpu.dot_dimension_numbers<[1], [0], [0], [1], [0, 0, 1, 1], [], []>} : vector<128x32xbf16>, vector<32x8xbf16>, vector<128x8xf32> -> vector<128x8xf32>
    %c0_181 = arith.constant 0 : index
    %c0_182 = arith.constant 0 : index
    %c0_183 = arith.constant 0 : index
    %277 = vector.load %arg4[%c0_181, %c0_182, %c0_183] : memref<4x1x8xf32, #tpu.memory_space<vmem>>, vector<1x1x8xf32>
    %278 = vector.shape_cast %277 : vector<1x1x8xf32> to vector<1x8xf32>
    %279 = vector.broadcast %278 : vector<1x8xf32> to vector<128x8xf32>
    %280 = arith.addf %276, %279 : vector<128x8xf32>
    %281 = arith.truncf %280 : vector<128x8xf32> to vector<128x8xbf16>
    %c0_184 = arith.constant 0 : index
    %c256_185 = arith.constant 256 : index
    %282 = vector.load %arg11[%c0_184, %c256_185] : memref<64x512xf32, #tpu.memory_space<vmem>>, vector<8x128xf32>
    %283 = arith.truncf %282 : vector<8x128xf32> to vector<8x128xbf16>
    %c32_186 = arith.constant 32 : index
    %c256_187 = arith.constant 256 : index
    %284 = vector.load %arg11[%c32_186, %c256_187] : memref<64x512xf32, #tpu.memory_space<vmem>>, vector<8x128xf32>
    %285 = arith.truncf %284 : vector<8x128xf32> to vector<8x128xbf16>
    %cst_188 = arith.constant dense<0.000000e+00> : vector<128x128xf32>
    %286 = tpu.matmul %281, %283, %cst_188 {dimension_numbers = #tpu.dot_dimension_numbers<[1], [0], [0], [1], [0, 0, 1, 1], [], []>} : vector<128x8xbf16>, vector<8x128xbf16>, vector<128x128xf32> -> vector<128x128xf32>
    %c0_189 = arith.constant 0 : index
    %c0_190 = arith.constant 0 : index
    %c0_191 = arith.constant 0 : index
    %c0_192 = arith.constant 0 : index
    %287 = vector.load %arg7[%c0_189, %c0_190, %c0_191, %c0_192] : memref<4x2x128x128xf32, #tpu.memory_space<vmem>>, vector<1x1x128x128xf32>
    %288 = vector.shape_cast %287 : vector<1x1x128x128xf32> to vector<128x128xf32>
    %289 = arith.addf %286, %288 : vector<128x128xf32>
    %cst_193 = arith.constant dense<0xFF800000> : vector<128xf32>
    %290 = vector.multi_reduction <maximumf>, %289, %cst_193 [1] : vector<128x128xf32> to vector<128xf32>
    %291 = vector.shape_cast %290 : vector<128xf32> to vector<128x1xf32>
    %292 = vector.broadcast %291 : vector<128x1xf32> to vector<128x128xf32>
    %293 = arith.subf %289, %292 : vector<128x128xf32>
    %294 = math.exp %293 : vector<128x128xf32>
    %cst_194 = arith.constant dense<0.000000e+00> : vector<128xf32>
    %295 = vector.multi_reduction <add>, %294, %cst_194 [1] : vector<128x128xf32> to vector<128xf32>
    %296 = vector.shape_cast %295 : vector<128xf32> to vector<128x1xf32>
    %297 = tpu.reciprocal %296 {approx = true} : vector<128x1xf32> -> vector<128x1xf32>
    %298 = arith.mulf %296, %297 : vector<128x1xf32>
    %cst_195 = arith.constant 2.000000e+00 : f32
    %299 = vector.broadcast %cst_195 : f32 to vector<128x1xf32>
    %300 = arith.subf %299, %298 : vector<128x1xf32>
    %301 = arith.mulf %297, %300 : vector<128x1xf32>
    %302 = vector.broadcast %301 : vector<128x1xf32> to vector<128x128xf32>
    %303 = arith.mulf %294, %302 : vector<128x128xf32>
    %304 = arith.truncf %303 : vector<128x128xf32> to vector<128x128xbf16>
    %cst_196 = arith.constant dense<0.000000e+00> : vector<8x128xf32>
    %305 = tpu.matmul %285, %304, %cst_196 {dimension_numbers = #tpu.dot_dimension_numbers<[1], [1], [0], [0], [0, 0, 1, 0], [], []>} : vector<8x128xbf16>, vector<128x128xbf16>, vector<8x128xf32> -> vector<8x128xf32>
    %c0_197 = arith.constant 0 : index
    %c256_198 = arith.constant 256 : index
    %306 = vector.load %arg12[%c0_197, %c256_198] : memref<32x512xf32, #tpu.memory_space<vmem>>, vector<8x128xf32>
    tpu.vector_store %arg12[%c0_197, %c256_198], %305 {strides = array<i32>} : memref<32x512xf32, #tpu.memory_space<vmem>>, vector<8x128xf32>,
    %c1_199 = arith.constant 1 : index
    %c0_200 = arith.constant 0 : index
    %c0_201 = arith.constant 0 : index
    %307 = vector.load %arg3[%c1_199, %c0_200, %c0_201] : memref<4x32x8xbf16, #tpu.memory_space<vmem>>, vector<1x32x8xbf16>
    %308 = vector.shape_cast %307 : vector<1x32x8xbf16> to vector<32x8xbf16>
    %cst_202 = arith.constant dense<0.000000e+00> : vector<128x8xf32>
    %309 = tpu.matmul %273, %308, %cst_202 {dimension_numbers = #tpu.dot_dimension_numbers<[1], [0], [0], [1], [0, 0, 1, 1], [], []>} : vector<128x32xbf16>, vector<32x8xbf16>, vector<128x8xf32> -> vector<128x8xf32>
    %c1_203 = arith.constant 1 : index
    %c0_204 = arith.constant 0 : index
    %c0_205 = arith.constant 0 : index
    %310 = vector.load %arg4[%c1_203, %c0_204, %c0_205] : memref<4x1x8xf32, #tpu.memory_space<vmem>>, vector<1x1x8xf32>
    %311 = vector.shape_cast %310 : vector<1x1x8xf32> to vector<1x8xf32>
    %312 = vector.broadcast %311 : vector<1x8xf32> to vector<128x8xf32>
    %313 = arith.addf %309, %312 : vector<128x8xf32>
    %314 = arith.truncf %313 : vector<128x8xf32> to vector<128x8xbf16>
    %c8_206 = arith.constant 8 : index
    %c256_207 = arith.constant 256 : index
    %315 = vector.load %arg11[%c8_206, %c256_207] : memref<64x512xf32, #tpu.memory_space<vmem>>, vector<8x128xf32>
    %316 = arith.truncf %315 : vector<8x128xf32> to vector<8x128xbf16>
    %c40_208 = arith.constant 40 : index
    %c256_209 = arith.constant 256 : index
    %317 = vector.load %arg11[%c40_208, %c256_209] : memref<64x512xf32, #tpu.memory_space<vmem>>, vector<8x128xf32>
    %318 = arith.truncf %317 : vector<8x128xf32> to vector<8x128xbf16>
    %cst_210 = arith.constant dense<0.000000e+00> : vector<128x128xf32>
    %319 = tpu.matmul %314, %316, %cst_210 {dimension_numbers = #tpu.dot_dimension_numbers<[1], [0], [0], [1], [0, 0, 1, 1], [], []>} : vector<128x8xbf16>, vector<8x128xbf16>, vector<128x128xf32> -> vector<128x128xf32>
    %c1_211 = arith.constant 1 : index
    %c0_212 = arith.constant 0 : index
    %c0_213 = arith.constant 0 : index
    %c0_214 = arith.constant 0 : index
    %320 = vector.load %arg7[%c1_211, %c0_212, %c0_213, %c0_214] : memref<4x2x128x128xf32, #tpu.memory_space<vmem>>, vector<1x1x128x128xf32>
    %321 = vector.shape_cast %320 : vector<1x1x128x128xf32> to vector<128x128xf32>
    %322 = arith.addf %319, %321 : vector<128x128xf32>
    %cst_215 = arith.constant dense<0xFF800000> : vector<128xf32>
    %323 = vector.multi_reduction <maximumf>, %322, %cst_215 [1] : vector<128x128xf32> to vector<128xf32>
    %324 = vector.shape_cast %323 : vector<128xf32> to vector<128x1xf32>
    %325 = vector.broadcast %324 : vector<128x1xf32> to vector<128x128xf32>
    %326 = arith.subf %322, %325 : vector<128x128xf32>
    %327 = math.exp %326 : vector<128x128xf32>
    %cst_216 = arith.constant dense<0.000000e+00> : vector<128xf32>
    %328 = vector.multi_reduction <add>, %327, %cst_216 [1] : vector<128x128xf32> to vector<128xf32>
    %329 = vector.shape_cast %328 : vector<128xf32> to vector<128x1xf32>
    %330 = tpu.reciprocal %329 {approx = true} : vector<128x1xf32> -> vector<128x1xf32>
    %331 = arith.mulf %329, %330 : vector<128x1xf32>
    %cst_217 = arith.constant 2.000000e+00 : f32
    %332 = vector.broadcast %cst_217 : f32 to vector<128x1xf32>
    %333 = arith.subf %332, %331 : vector<128x1xf32>
    %334 = arith.mulf %330, %333 : vector<128x1xf32>
    %335 = vector.broadcast %334 : vector<128x1xf32> to vector<128x128xf32>
    %336 = arith.mulf %327, %335 : vector<128x128xf32>
    %337 = arith.truncf %336 : vector<128x128xf32> to vector<128x128xbf16>
    %cst_218 = arith.constant dense<0.000000e+00> : vector<8x128xf32>
    %338 = tpu.matmul %318, %337, %cst_218 {dimension_numbers = #tpu.dot_dimension_numbers<[1], [1], [0], [0], [0, 0, 1, 0], [], []>} : vector<8x128xbf16>, vector<128x128xbf16>, vector<8x128xf32> -> vector<8x128xf32>
    %c8_219 = arith.constant 8 : index
    %c256_220 = arith.constant 256 : index
    %339 = vector.load %arg12[%c8_219, %c256_220] : memref<32x512xf32, #tpu.memory_space<vmem>>, vector<8x128xf32>
    tpu.vector_store %arg12[%c8_219, %c256_220], %338 {strides = array<i32>} : memref<32x512xf32, #tpu.memory_space<vmem>>, vector<8x128xf32>,
    %c2_221 = arith.constant 2 : index
    %c0_222 = arith.constant 0 : index
    %c0_223 = arith.constant 0 : index
    %340 = vector.load %arg3[%c2_221, %c0_222, %c0_223] : memref<4x32x8xbf16, #tpu.memory_space<vmem>>, vector<1x32x8xbf16>
    %341 = vector.shape_cast %340 : vector<1x32x8xbf16> to vector<32x8xbf16>
    %cst_224 = arith.constant dense<0.000000e+00> : vector<128x8xf32>
    %342 = tpu.matmul %273, %341, %cst_224 {dimension_numbers = #tpu.dot_dimension_numbers<[1], [0], [0], [1], [0, 0, 1, 1], [], []>} : vector<128x32xbf16>, vector<32x8xbf16>, vector<128x8xf32> -> vector<128x8xf32>
    %c2_225 = arith.constant 2 : index
    %c0_226 = arith.constant 0 : index
    %c0_227 = arith.constant 0 : index
    %343 = vector.load %arg4[%c2_225, %c0_226, %c0_227] : memref<4x1x8xf32, #tpu.memory_space<vmem>>, vector<1x1x8xf32>
    %344 = vector.shape_cast %343 : vector<1x1x8xf32> to vector<1x8xf32>
    %345 = vector.broadcast %344 : vector<1x8xf32> to vector<128x8xf32>
    %346 = arith.addf %342, %345 : vector<128x8xf32>
    %347 = arith.truncf %346 : vector<128x8xf32> to vector<128x8xbf16>
    %c16_228 = arith.constant 16 : index
    %c256_229 = arith.constant 256 : index
    %348 = vector.load %arg11[%c16_228, %c256_229] : memref<64x512xf32, #tpu.memory_space<vmem>>, vector<8x128xf32>
    %349 = arith.truncf %348 : vector<8x128xf32> to vector<8x128xbf16>
    %c48_230 = arith.constant 48 : index
    %c256_231 = arith.constant 256 : index
    %350 = vector.load %arg11[%c48_230, %c256_231] : memref<64x512xf32, #tpu.memory_space<vmem>>, vector<8x128xf32>
    %351 = arith.truncf %350 : vector<8x128xf32> to vector<8x128xbf16>
    %cst_232 = arith.constant dense<0.000000e+00> : vector<128x128xf32>
    %352 = tpu.matmul %347, %349, %cst_232 {dimension_numbers = #tpu.dot_dimension_numbers<[1], [0], [0], [1], [0, 0, 1, 1], [], []>} : vector<128x8xbf16>, vector<8x128xbf16>, vector<128x128xf32> -> vector<128x128xf32>
    %c2_233 = arith.constant 2 : index
    %c0_234 = arith.constant 0 : index
    %c0_235 = arith.constant 0 : index
    %c0_236 = arith.constant 0 : index
    %353 = vector.load %arg7[%c2_233, %c0_234, %c0_235, %c0_236] : memref<4x2x128x128xf32, #tpu.memory_space<vmem>>, vector<1x1x128x128xf32>
    %354 = vector.shape_cast %353 : vector<1x1x128x128xf32> to vector<128x128xf32>
    %355 = arith.addf %352, %354 : vector<128x128xf32>
    %cst_237 = arith.constant dense<0xFF800000> : vector<128xf32>
    %356 = vector.multi_reduction <maximumf>, %355, %cst_237 [1] : vector<128x128xf32> to vector<128xf32>
    %357 = vector.shape_cast %356 : vector<128xf32> to vector<128x1xf32>
    %358 = vector.broadcast %357 : vector<128x1xf32> to vector<128x128xf32>
    %359 = arith.subf %355, %358 : vector<128x128xf32>
    %360 = math.exp %359 : vector<128x128xf32>
    %cst_238 = arith.constant dense<0.000000e+00> : vector<128xf32>
    %361 = vector.multi_reduction <add>, %360, %cst_238 [1] : vector<128x128xf32> to vector<128xf32>
    %362 = vector.shape_cast %361 : vector<128xf32> to vector<128x1xf32>
    %363 = tpu.reciprocal %362 {approx = true} : vector<128x1xf32> -> vector<128x1xf32>
    %364 = arith.mulf %362, %363 : vector<128x1xf32>
    %cst_239 = arith.constant 2.000000e+00 : f32
    %365 = vector.broadcast %cst_239 : f32 to vector<128x1xf32>
    %366 = arith.subf %365, %364 : vector<128x1xf32>
    %367 = arith.mulf %363, %366 : vector<128x1xf32>
    %368 = vector.broadcast %367 : vector<128x1xf32> to vector<128x128xf32>
    %369 = arith.mulf %360, %368 : vector<128x128xf32>
    %370 = arith.truncf %369 : vector<128x128xf32> to vector<128x128xbf16>
    %cst_240 = arith.constant dense<0.000000e+00> : vector<8x128xf32>
    %371 = tpu.matmul %351, %370, %cst_240 {dimension_numbers = #tpu.dot_dimension_numbers<[1], [1], [0], [0], [0, 0, 1, 0], [], []>} : vector<8x128xbf16>, vector<128x128xbf16>, vector<8x128xf32> -> vector<8x128xf32>
    %c16_241 = arith.constant 16 : index
    %c256_242 = arith.constant 256 : index
    %372 = vector.load %arg12[%c16_241, %c256_242] : memref<32x512xf32, #tpu.memory_space<vmem>>, vector<8x128xf32>
    tpu.vector_store %arg12[%c16_241, %c256_242], %371 {strides = array<i32>} : memref<32x512xf32, #tpu.memory_space<vmem>>, vector<8x128xf32>,
    %c3_243 = arith.constant 3 : index
    %c0_244 = arith.constant 0 : index
    %c0_245 = arith.constant 0 : index
    %373 = vector.load %arg3[%c3_243, %c0_244, %c0_245] : memref<4x32x8xbf16, #tpu.memory_space<vmem>>, vector<1x32x8xbf16>
    %374 = vector.shape_cast %373 : vector<1x32x8xbf16> to vector<32x8xbf16>
    %cst_246 = arith.constant dense<0.000000e+00> : vector<128x8xf32>
    %375 = tpu.matmul %273, %374, %cst_246 {dimension_numbers = #tpu.dot_dimension_numbers<[1], [0], [0], [1], [0, 0, 1, 1], [], []>} : vector<128x32xbf16>, vector<32x8xbf16>, vector<128x8xf32> -> vector<128x8xf32>
    %c3_247 = arith.constant 3 : index
    %c0_248 = arith.constant 0 : index
    %c0_249 = arith.constant 0 : index
    %376 = vector.load %arg4[%c3_247, %c0_248, %c0_249] : memref<4x1x8xf32, #tpu.memory_space<vmem>>, vector<1x1x8xf32>
    %377 = vector.shape_cast %376 : vector<1x1x8xf32> to vector<1x8xf32>
    %378 = vector.broadcast %377 : vector<1x8xf32> to vector<128x8xf32>
    %379 = arith.addf %375, %378 : vector<128x8xf32>
    %380 = arith.truncf %379 : vector<128x8xf32> to vector<128x8xbf16>
    %c24_250 = arith.constant 24 : index
    %c256_251 = arith.constant 256 : index
    %381 = vector.load %arg11[%c24_250, %c256_251] : memref<64x512xf32, #tpu.memory_space<vmem>>, vector<8x128xf32>
    %382 = arith.truncf %381 : vector<8x128xf32> to vector<8x128xbf16>
    %c56_252 = arith.constant 56 : index
    %c256_253 = arith.constant 256 : index
    %383 = vector.load %arg11[%c56_252, %c256_253] : memref<64x512xf32, #tpu.memory_space<vmem>>, vector<8x128xf32>
    %384 = arith.truncf %383 : vector<8x128xf32> to vector<8x128xbf16>
    %cst_254 = arith.constant dense<0.000000e+00> : vector<128x128xf32>
    %385 = tpu.matmul %380, %382, %cst_254 {dimension_numbers = #tpu.dot_dimension_numbers<[1], [0], [0], [1], [0, 0, 1, 1], [], []>} : vector<128x8xbf16>, vector<8x128xbf16>, vector<128x128xf32> -> vector<128x128xf32>
    %c3_255 = arith.constant 3 : index
    %c0_256 = arith.constant 0 : index
    %c0_257 = arith.constant 0 : index
    %c0_258 = arith.constant 0 : index
    %386 = vector.load %arg7[%c3_255, %c0_256, %c0_257, %c0_258] : memref<4x2x128x128xf32, #tpu.memory_space<vmem>>, vector<1x1x128x128xf32>
    %387 = vector.shape_cast %386 : vector<1x1x128x128xf32> to vector<128x128xf32>
    %388 = arith.addf %385, %387 : vector<128x128xf32>
    %cst_259 = arith.constant dense<0xFF800000> : vector<128xf32>
    %389 = vector.multi_reduction <maximumf>, %388, %cst_259 [1] : vector<128x128xf32> to vector<128xf32>
    %390 = vector.shape_cast %389 : vector<128xf32> to vector<128x1xf32>
    %391 = vector.broadcast %390 : vector<128x1xf32> to vector<128x128xf32>
    %392 = arith.subf %388, %391 : vector<128x128xf32>
    %393 = math.exp %392 : vector<128x128xf32>
    %cst_260 = arith.constant dense<0.000000e+00> : vector<128xf32>
    %394 = vector.multi_reduction <add>, %393, %cst_260 [1] : vector<128x128xf32> to vector<128xf32>
    %395 = vector.shape_cast %394 : vector<128xf32> to vector<128x1xf32>
    %396 = tpu.reciprocal %395 {approx = true} : vector<128x1xf32> -> vector<128x1xf32>
    %397 = arith.mulf %395, %396 : vector<128x1xf32>
    %cst_261 = arith.constant 2.000000e+00 : f32
    %398 = vector.broadcast %cst_261 : f32 to vector<128x1xf32>
    %399 = arith.subf %398, %397 : vector<128x1xf32>
    %400 = arith.mulf %396, %399 : vector<128x1xf32>
    %401 = vector.broadcast %400 : vector<128x1xf32> to vector<128x128xf32>
    %402 = arith.mulf %393, %401 : vector<128x128xf32>
    %403 = arith.truncf %402 : vector<128x128xf32> to vector<128x128xbf16>
    %cst_262 = arith.constant dense<0.000000e+00> : vector<8x128xf32>
    %404 = tpu.matmul %384, %403, %cst_262 {dimension_numbers = #tpu.dot_dimension_numbers<[1], [1], [0], [0], [0, 0, 1, 0], [], []>} : vector<8x128xbf16>, vector<128x128xbf16>, vector<8x128xf32> -> vector<8x128xf32>
    %c24_263 = arith.constant 24 : index
    %c256_264 = arith.constant 256 : index
    %405 = vector.load %arg12[%c24_263, %c256_264] : memref<32x512xf32, #tpu.memory_space<vmem>>, vector<8x128xf32>
    tpu.vector_store %arg12[%c24_263, %c256_264], %404 {strides = array<i32>} : memref<32x512xf32, #tpu.memory_space<vmem>>, vector<8x128xf32>,
    %c384 = arith.constant 384 : index
    %c0_265 = arith.constant 0 : index
    %406 = vector.load %arg1[%c384, %c0_265] : memref<512x32xbf16, #tpu.memory_space<vmem>>, vector<128x32xbf16>
    %c0_266 = arith.constant 0 : index
    %c0_267 = arith.constant 0 : index
    %c0_268 = arith.constant 0 : index
    %407 = vector.load %arg3[%c0_266, %c0_267, %c0_268] : memref<4x32x8xbf16, #tpu.memory_space<vmem>>, vector<1x32x8xbf16>
    %408 = vector.shape_cast %407 : vector<1x32x8xbf16> to vector<32x8xbf16>
    %cst_269 = arith.constant dense<0.000000e+00> : vector<128x8xf32>
    %409 = tpu.matmul %406, %408, %cst_269 {dimension_numbers = #tpu.dot_dimension_numbers<[1], [0], [0], [1], [0, 0, 1, 1], [], []>} : vector<128x32xbf16>, vector<32x8xbf16>, vector<128x8xf32> -> vector<128x8xf32>
    %c0_270 = arith.constant 0 : index
    %c0_271 = arith.constant 0 : index
    %c0_272 = arith.constant 0 : index
    %410 = vector.load %arg4[%c0_270, %c0_271, %c0_272] : memref<4x1x8xf32, #tpu.memory_space<vmem>>, vector<1x1x8xf32>
    %411 = vector.shape_cast %410 : vector<1x1x8xf32> to vector<1x8xf32>
    %412 = vector.broadcast %411 : vector<1x8xf32> to vector<128x8xf32>
    %413 = arith.addf %409, %412 : vector<128x8xf32>
    %414 = arith.truncf %413 : vector<128x8xf32> to vector<128x8xbf16>
    %c0_273 = arith.constant 0 : index
    %c384_274 = arith.constant 384 : index
    %415 = vector.load %arg11[%c0_273, %c384_274] : memref<64x512xf32, #tpu.memory_space<vmem>>, vector<8x128xf32>
    %416 = arith.truncf %415 : vector<8x128xf32> to vector<8x128xbf16>
    %c32_275 = arith.constant 32 : index
    %c384_276 = arith.constant 384 : index
    %417 = vector.load %arg11[%c32_275, %c384_276] : memref<64x512xf32, #tpu.memory_space<vmem>>, vector<8x128xf32>
    %418 = arith.truncf %417 : vector<8x128xf32> to vector<8x128xbf16>
    %cst_277 = arith.constant dense<0.000000e+00> : vector<128x128xf32>
    %419 = tpu.matmul %414, %416, %cst_277 {dimension_numbers = #tpu.dot_dimension_numbers<[1], [0], [0], [1], [0, 0, 1, 1], [], []>} : vector<128x8xbf16>, vector<8x128xbf16>, vector<128x128xf32> -> vector<128x128xf32>
    %c0_278 = arith.constant 0 : index
    %c1_279 = arith.constant 1 : index
    %c0_280 = arith.constant 0 : index
    %c0_281 = arith.constant 0 : index
    %420 = vector.load %arg7[%c0_278, %c1_279, %c0_280, %c0_281] : memref<4x2x128x128xf32, #tpu.memory_space<vmem>>, vector<1x1x128x128xf32>
    %421 = vector.shape_cast %420 : vector<1x1x128x128xf32> to vector<128x128xf32>
    %422 = arith.addf %419, %421 : vector<128x128xf32>
    %cst_282 = arith.constant dense<0xFF800000> : vector<128xf32>
    %423 = vector.multi_reduction <maximumf>, %422, %cst_282 [1] : vector<128x128xf32> to vector<128xf32>
    %424 = vector.shape_cast %423 : vector<128xf32> to vector<128x1xf32>
    %425 = vector.broadcast %424 : vector<128x1xf32> to vector<128x128xf32>
    %426 = arith.subf %422, %425 : vector<128x128xf32>
    %427 = math.exp %426 : vector<128x128xf32>
    %cst_283 = arith.constant dense<0.000000e+00> : vector<128xf32>
    %428 = vector.multi_reduction <add>, %427, %cst_283 [1] : vector<128x128xf32> to vector<128xf32>
    %429 = vector.shape_cast %428 : vector<128xf32> to vector<128x1xf32>
    %430 = tpu.reciprocal %429 {approx = true} : vector<128x1xf32> -> vector<128x1xf32>
    %431 = arith.mulf %429, %430 : vector<128x1xf32>
    %cst_284 = arith.constant 2.000000e+00 : f32
    %432 = vector.broadcast %cst_284 : f32 to vector<128x1xf32>
    %433 = arith.subf %432, %431 : vector<128x1xf32>
    %434 = arith.mulf %430, %433 : vector<128x1xf32>
    %435 = vector.broadcast %434 : vector<128x1xf32> to vector<128x128xf32>
    %436 = arith.mulf %427, %435 : vector<128x128xf32>
    %437 = arith.truncf %436 : vector<128x128xf32> to vector<128x128xbf16>
    %cst_285 = arith.constant dense<0.000000e+00> : vector<8x128xf32>
    %438 = tpu.matmul %418, %437, %cst_285 {dimension_numbers = #tpu.dot_dimension_numbers<[1], [1], [0], [0], [0, 0, 1, 0], [], []>} : vector<8x128xbf16>, vector<128x128xbf16>, vector<8x128xf32> -> vector<8x128xf32>
    %c0_286 = arith.constant 0 : index
    %c384_287 = arith.constant 384 : index
    %439 = vector.load %arg12[%c0_286, %c384_287] : memref<32x512xf32, #tpu.memory_space<vmem>>, vector<8x128xf32>
    tpu.vector_store %arg12[%c0_286, %c384_287], %438 {strides = array<i32>} : memref<32x512xf32, #tpu.memory_space<vmem>>, vector<8x128xf32>,
    %c1_288 = arith.constant 1 : index
    %c0_289 = arith.constant 0 : index
    %c0_290 = arith.constant 0 : index
    %440 = vector.load %arg3[%c1_288, %c0_289, %c0_290] : memref<4x32x8xbf16, #tpu.memory_space<vmem>>, vector<1x32x8xbf16>
    %441 = vector.shape_cast %440 : vector<1x32x8xbf16> to vector<32x8xbf16>
    %cst_291 = arith.constant dense<0.000000e+00> : vector<128x8xf32>
    %442 = tpu.matmul %406, %441, %cst_291 {dimension_numbers = #tpu.dot_dimension_numbers<[1], [0], [0], [1], [0, 0, 1, 1], [], []>} : vector<128x32xbf16>, vector<32x8xbf16>, vector<128x8xf32> -> vector<128x8xf32>
    %c1_292 = arith.constant 1 : index
    %c0_293 = arith.constant 0 : index
    %c0_294 = arith.constant 0 : index
    %443 = vector.load %arg4[%c1_292, %c0_293, %c0_294] : memref<4x1x8xf32, #tpu.memory_space<vmem>>, vector<1x1x8xf32>
    %444 = vector.shape_cast %443 : vector<1x1x8xf32> to vector<1x8xf32>
    %445 = vector.broadcast %444 : vector<1x8xf32> to vector<128x8xf32>
    %446 = arith.addf %442, %445 : vector<128x8xf32>
    %447 = arith.truncf %446 : vector<128x8xf32> to vector<128x8xbf16>
    %c8_295 = arith.constant 8 : index
    %c384_296 = arith.constant 384 : index
    %448 = vector.load %arg11[%c8_295, %c384_296] : memref<64x512xf32, #tpu.memory_space<vmem>>, vector<8x128xf32>
    %449 = arith.truncf %448 : vector<8x128xf32> to vector<8x128xbf16>
    %c40_297 = arith.constant 40 : index
    %c384_298 = arith.constant 384 : index
    %450 = vector.load %arg11[%c40_297, %c384_298] : memref<64x512xf32, #tpu.memory_space<vmem>>, vector<8x128xf32>
    %451 = arith.truncf %450 : vector<8x128xf32> to vector<8x128xbf16>
    %cst_299 = arith.constant dense<0.000000e+00> : vector<128x128xf32>
    %452 = tpu.matmul %447, %449, %cst_299 {dimension_numbers = #tpu.dot_dimension_numbers<[1], [0], [0], [1], [0, 0, 1, 1], [], []>} : vector<128x8xbf16>, vector<8x128xbf16>, vector<128x128xf32> -> vector<128x128xf32>
    %c1_300 = arith.constant 1 : index
    %c1_301 = arith.constant 1 : index
    %c0_302 = arith.constant 0 : index
    %c0_303 = arith.constant 0 : index
    %453 = vector.load %arg7[%c1_300, %c1_301, %c0_302, %c0_303] : memref<4x2x128x128xf32, #tpu.memory_space<vmem>>, vector<1x1x128x128xf32>
    %454 = vector.shape_cast %453 : vector<1x1x128x128xf32> to vector<128x128xf32>
    %455 = arith.addf %452, %454 : vector<128x128xf32>
    %cst_304 = arith.constant dense<0xFF800000> : vector<128xf32>
    %456 = vector.multi_reduction <maximumf>, %455, %cst_304 [1] : vector<128x128xf32> to vector<128xf32>
    %457 = vector.shape_cast %456 : vector<128xf32> to vector<128x1xf32>
    %458 = vector.broadcast %457 : vector<128x1xf32> to vector<128x128xf32>
    %459 = arith.subf %455, %458 : vector<128x128xf32>
    %460 = math.exp %459 : vector<128x128xf32>
    %cst_305 = arith.constant dense<0.000000e+00> : vector<128xf32>
    %461 = vector.multi_reduction <add>, %460, %cst_305 [1] : vector<128x128xf32> to vector<128xf32>
    %462 = vector.shape_cast %461 : vector<128xf32> to vector<128x1xf32>
    %463 = tpu.reciprocal %462 {approx = true} : vector<128x1xf32> -> vector<128x1xf32>
    %464 = arith.mulf %462, %463 : vector<128x1xf32>
    %cst_306 = arith.constant 2.000000e+00 : f32
    %465 = vector.broadcast %cst_306 : f32 to vector<128x1xf32>
    %466 = arith.subf %465, %464 : vector<128x1xf32>
    %467 = arith.mulf %463, %466 : vector<128x1xf32>
    %468 = vector.broadcast %467 : vector<128x1xf32> to vector<128x128xf32>
    %469 = arith.mulf %460, %468 : vector<128x128xf32>
    %470 = arith.truncf %469 : vector<128x128xf32> to vector<128x128xbf16>
    %cst_307 = arith.constant dense<0.000000e+00> : vector<8x128xf32>
    %471 = tpu.matmul %451, %470, %cst_307 {dimension_numbers = #tpu.dot_dimension_numbers<[1], [1], [0], [0], [0, 0, 1, 0], [], []>} : vector<8x128xbf16>, vector<128x128xbf16>, vector<8x128xf32> -> vector<8x128xf32>
    %c8_308 = arith.constant 8 : index
    %c384_309 = arith.constant 384 : index
    %472 = vector.load %arg12[%c8_308, %c384_309] : memref<32x512xf32, #tpu.memory_space<vmem>>, vector<8x128xf32>
    tpu.vector_store %arg12[%c8_308, %c384_309], %471 {strides = array<i32>} : memref<32x512xf32, #tpu.memory_space<vmem>>, vector<8x128xf32>,
    %c2_310 = arith.constant 2 : index
    %c0_311 = arith.constant 0 : index
    %c0_312 = arith.constant 0 : index
    %473 = vector.load %arg3[%c2_310, %c0_311, %c0_312] : memref<4x32x8xbf16, #tpu.memory_space<vmem>>, vector<1x32x8xbf16>
    %474 = vector.shape_cast %473 : vector<1x32x8xbf16> to vector<32x8xbf16>
    %cst_313 = arith.constant dense<0.000000e+00> : vector<128x8xf32>
    %475 = tpu.matmul %406, %474, %cst_313 {dimension_numbers = #tpu.dot_dimension_numbers<[1], [0], [0], [1], [0, 0, 1, 1], [], []>} : vector<128x32xbf16>, vector<32x8xbf16>, vector<128x8xf32> -> vector<128x8xf32>
    %c2_314 = arith.constant 2 : index
    %c0_315 = arith.constant 0 : index
    %c0_316 = arith.constant 0 : index
    %476 = vector.load %arg4[%c2_314, %c0_315, %c0_316] : memref<4x1x8xf32, #tpu.memory_space<vmem>>, vector<1x1x8xf32>
    %477 = vector.shape_cast %476 : vector<1x1x8xf32> to vector<1x8xf32>
    %478 = vector.broadcast %477 : vector<1x8xf32> to vector<128x8xf32>
    %479 = arith.addf %475, %478 : vector<128x8xf32>
    %480 = arith.truncf %479 : vector<128x8xf32> to vector<128x8xbf16>
    %c16_317 = arith.constant 16 : index
    %c384_318 = arith.constant 384 : index
    %481 = vector.load %arg11[%c16_317, %c384_318] : memref<64x512xf32, #tpu.memory_space<vmem>>, vector<8x128xf32>
    %482 = arith.truncf %481 : vector<8x128xf32> to vector<8x128xbf16>
    %c48_319 = arith.constant 48 : index
    %c384_320 = arith.constant 384 : index
    %483 = vector.load %arg11[%c48_319, %c384_320] : memref<64x512xf32, #tpu.memory_space<vmem>>, vector<8x128xf32>
    %484 = arith.truncf %483 : vector<8x128xf32> to vector<8x128xbf16>
    %cst_321 = arith.constant dense<0.000000e+00> : vector<128x128xf32>
    %485 = tpu.matmul %480, %482, %cst_321 {dimension_numbers = #tpu.dot_dimension_numbers<[1], [0], [0], [1], [0, 0, 1, 1], [], []>} : vector<128x8xbf16>, vector<8x128xbf16>, vector<128x128xf32> -> vector<128x128xf32>
    %c2_322 = arith.constant 2 : index
    %c1_323 = arith.constant 1 : index
    %c0_324 = arith.constant 0 : index
    %c0_325 = arith.constant 0 : index
    %486 = vector.load %arg7[%c2_322, %c1_323, %c0_324, %c0_325] : memref<4x2x128x128xf32, #tpu.memory_space<vmem>>, vector<1x1x128x128xf32>
    %487 = vector.shape_cast %486 : vector<1x1x128x128xf32> to vector<128x128xf32>
    %488 = arith.addf %485, %487 : vector<128x128xf32>
    %cst_326 = arith.constant dense<0xFF800000> : vector<128xf32>
    %489 = vector.multi_reduction <maximumf>, %488, %cst_326 [1] : vector<128x128xf32> to vector<128xf32>
    %490 = vector.shape_cast %489 : vector<128xf32> to vector<128x1xf32>
    %491 = vector.broadcast %490 : vector<128x1xf32> to vector<128x128xf32>
    %492 = arith.subf %488, %491 : vector<128x128xf32>
    %493 = math.exp %492 : vector<128x128xf32>
    %cst_327 = arith.constant dense<0.000000e+00> : vector<128xf32>
    %494 = vector.multi_reduction <add>, %493, %cst_327 [1] : vector<128x128xf32> to vector<128xf32>
    %495 = vector.shape_cast %494 : vector<128xf32> to vector<128x1xf32>
    %496 = tpu.reciprocal %495 {approx = true} : vector<128x1xf32> -> vector<128x1xf32>
    %497 = arith.mulf %495, %496 : vector<128x1xf32>
    %cst_328 = arith.constant 2.000000e+00 : f32
    %498 = vector.broadcast %cst_328 : f32 to vector<128x1xf32>
    %499 = arith.subf %498, %497 : vector<128x1xf32>
    %500 = arith.mulf %496, %499 : vector<128x1xf32>
    %501 = vector.broadcast %500 : vector<128x1xf32> to vector<128x128xf32>
    %502 = arith.mulf %493, %501 : vector<128x128xf32>
    %503 = arith.truncf %502 : vector<128x128xf32> to vector<128x128xbf16>
    %cst_329 = arith.constant dense<0.000000e+00> : vector<8x128xf32>
    %504 = tpu.matmul %484, %503, %cst_329 {dimension_numbers = #tpu.dot_dimension_numbers<[1], [1], [0], [0], [0, 0, 1, 0], [], []>} : vector<8x128xbf16>, vector<128x128xbf16>, vector<8x128xf32> -> vector<8x128xf32>
    %c16_330 = arith.constant 16 : index
    %c384_331 = arith.constant 384 : index
    %505 = vector.load %arg12[%c16_330, %c384_331] : memref<32x512xf32, #tpu.memory_space<vmem>>, vector<8x128xf32>
    tpu.vector_store %arg12[%c16_330, %c384_331], %504 {strides = array<i32>} : memref<32x512xf32, #tpu.memory_space<vmem>>, vector<8x128xf32>,
    %c3_332 = arith.constant 3 : index
    %c0_333 = arith.constant 0 : index
    %c0_334 = arith.constant 0 : index
    %506 = vector.load %arg3[%c3_332, %c0_333, %c0_334] : memref<4x32x8xbf16, #tpu.memory_space<vmem>>, vector<1x32x8xbf16>
    %507 = vector.shape_cast %506 : vector<1x32x8xbf16> to vector<32x8xbf16>
    %cst_335 = arith.constant dense<0.000000e+00> : vector<128x8xf32>
    %508 = tpu.matmul %406, %507, %cst_335 {dimension_numbers = #tpu.dot_dimension_numbers<[1], [0], [0], [1], [0, 0, 1, 1], [], []>} : vector<128x32xbf16>, vector<32x8xbf16>, vector<128x8xf32> -> vector<128x8xf32>
    %c3_336 = arith.constant 3 : index
    %c0_337 = arith.constant 0 : index
    %c0_338 = arith.constant 0 : index
    %509 = vector.load %arg4[%c3_336, %c0_337, %c0_338] : memref<4x1x8xf32, #tpu.memory_space<vmem>>, vector<1x1x8xf32>
    %510 = vector.shape_cast %509 : vector<1x1x8xf32> to vector<1x8xf32>
    %511 = vector.broadcast %510 : vector<1x8xf32> to vector<128x8xf32>
    %512 = arith.addf %508, %511 : vector<128x8xf32>
    %513 = arith.truncf %512 : vector<128x8xf32> to vector<128x8xbf16>
    %c24_339 = arith.constant 24 : index
    %c384_340 = arith.constant 384 : index
    %514 = vector.load %arg11[%c24_339, %c384_340] : memref<64x512xf32, #tpu.memory_space<vmem>>, vector<8x128xf32>
    %515 = arith.truncf %514 : vector<8x128xf32> to vector<8x128xbf16>
    %c56_341 = arith.constant 56 : index
    %c384_342 = arith.constant 384 : index
    %516 = vector.load %arg11[%c56_341, %c384_342] : memref<64x512xf32, #tpu.memory_space<vmem>>, vector<8x128xf32>
    %517 = arith.truncf %516 : vector<8x128xf32> to vector<8x128xbf16>
    %cst_343 = arith.constant dense<0.000000e+00> : vector<128x128xf32>
    %518 = tpu.matmul %513, %515, %cst_343 {dimension_numbers = #tpu.dot_dimension_numbers<[1], [0], [0], [1], [0, 0, 1, 1], [], []>} : vector<128x8xbf16>, vector<8x128xbf16>, vector<128x128xf32> -> vector<128x128xf32>
    %c3_344 = arith.constant 3 : index
    %c1_345 = arith.constant 1 : index
    %c0_346 = arith.constant 0 : index
    %c0_347 = arith.constant 0 : index
    %519 = vector.load %arg7[%c3_344, %c1_345, %c0_346, %c0_347] : memref<4x2x128x128xf32, #tpu.memory_space<vmem>>, vector<1x1x128x128xf32>
    %520 = vector.shape_cast %519 : vector<1x1x128x128xf32> to vector<128x128xf32>
    %521 = arith.addf %518, %520 : vector<128x128xf32>
    %cst_348 = arith.constant dense<0xFF800000> : vector<128xf32>
    %522 = vector.multi_reduction <maximumf>, %521, %cst_348 [1] : vector<128x128xf32> to vector<128xf32>
    %523 = vector.shape_cast %522 : vector<128xf32> to vector<128x1xf32>
    %524 = vector.broadcast %523 : vector<128x1xf32> to vector<128x128xf32>
    %525 = arith.subf %521, %524 : vector<128x128xf32>
    %526 = math.exp %525 : vector<128x128xf32>
    %cst_349 = arith.constant dense<0.000000e+00> : vector<128xf32>
    %527 = vector.multi_reduction <add>, %526, %cst_349 [1] : vector<128x128xf32> to vector<128xf32>
    %528 = vector.shape_cast %527 : vector<128xf32> to vector<128x1xf32>
    %529 = tpu.reciprocal %528 {approx = true} : vector<128x1xf32> -> vector<128x1xf32>
    %530 = arith.mulf %528, %529 : vector<128x1xf32>
    %cst_350 = arith.constant 2.000000e+00 : f32
    %531 = vector.broadcast %cst_350 : f32 to vector<128x1xf32>
    %532 = arith.subf %531, %530 : vector<128x1xf32>
    %533 = arith.mulf %529, %532 : vector<128x1xf32>
    %534 = vector.broadcast %533 : vector<128x1xf32> to vector<128x128xf32>
    %535 = arith.mulf %526, %534 : vector<128x128xf32>
    %536 = arith.truncf %535 : vector<128x128xf32> to vector<128x128xbf16>
    %cst_351 = arith.constant dense<0.000000e+00> : vector<8x128xf32>
    %537 = tpu.matmul %517, %536, %cst_351 {dimension_numbers = #tpu.dot_dimension_numbers<[1], [1], [0], [0], [0, 0, 1, 0], [], []>} : vector<8x128xbf16>, vector<128x128xbf16>, vector<8x128xf32> -> vector<8x128xf32>
    %c24_352 = arith.constant 24 : index
    %c384_353 = arith.constant 384 : index
    %538 = vector.load %arg12[%c24_352, %c384_353] : memref<32x512xf32, #tpu.memory_space<vmem>>, vector<8x128xf32>
    tpu.vector_store %arg12[%c24_352, %c384_353], %537 {strides = array<i32>} : memref<32x512xf32, #tpu.memory_space<vmem>>, vector<8x128xf32>,
    %c0_354 = arith.constant 0 : index
    %c0_355 = arith.constant 0 : index
    %539 = vector.load %arg8[%c0_354, %c0_355] : memref<32x32xbf16, #tpu.memory_space<vmem>>, vector<32x32xbf16>
    %c0_356 = arith.constant 0 : index
    %c0_357 = arith.constant 0 : index
    %540 = vector.load %arg12[%c0_356, %c0_357] : memref<32x512xf32, #tpu.memory_space<vmem>>, vector<32x512xf32>
    %541 = arith.truncf %540 : vector<32x512xf32> to vector<32x512xbf16>
    %cst_358 = arith.constant dense<0.000000e+00> : vector<32x512xf32>
    %542 = tpu.matmul %539, %541, %cst_358 {dimension_numbers = #tpu.dot_dimension_numbers<[1], [0], [0], [1], [0, 0, 1, 1], [], []>} : vector<32x32xbf16>, vector<32x512xbf16>, vector<32x512xf32> -> vector<32x512xf32>
    %c0_359 = arith.constant 0 : index
    %c0_360 = arith.constant 0 : index
    %543 = vector.load %arg9[%c0_359, %c0_360] : memref<32x1xf32, #tpu.memory_space<vmem>>, vector<32x1xf32>
    %544 = vector.broadcast %543 : vector<32x1xf32> to vector<32x512xf32>
    %545 = arith.addf %542, %544 : vector<32x512xf32>
    %c0_361 = arith.constant 0 : index
    %c0_362 = arith.constant 0 : index
    %546 = vector.load %arg10[%c0_361, %c0_362] : memref<32x512xf32, #tpu.memory_space<vmem>>, vector<32x512xf32>
    tpu.vector_store %arg10[%c0_361, %c0_362], %545 {strides = array<i32>} : memref<32x512xf32, #tpu.memory_space<vmem>>, vector<32x512xf32>,
    return
  }
  func.func @transform_0(%arg0: i32) -> (i32, i32) {
    %c0_i32 = arith.constant 0 : i32
    %c0_i32_0 = arith.constant 0 : i32
    return %arg0, %c0_i32 : i32, i32
  }
  func.func @transform_1(%arg0: i32) -> (i32, i32) {
    %c0_i32 = arith.constant 0 : i32
    %c0_i32_0 = arith.constant 0 : i32
    return %c0_i32, %arg0 : i32, i32
  }
  func.func @transform_2(%arg0: i32) -> (i32, i32, i32) {
    %c0_i32 = arith.constant 0 : i32
    %c0_i32_0 = arith.constant 0 : i32
    %c0_i32_1 = arith.constant 0 : i32
    %c0_i32_2 = arith.constant 0 : i32
    return %c0_i32, %c0_i32_0, %c0_i32_1 : i32, i32, i32
  }
  func.func @transform_3(%arg0: i32) -> (i32, i32, i32) {
    %c0_i32 = arith.constant 0 : i32
    %c0_i32_0 = arith.constant 0 : i32
    %c0_i32_1 = arith.constant 0 : i32
    %c0_i32_2 = arith.constant 0 : i32
    return %c0_i32, %c0_i32_0, %c0_i32_1 : i32, i32, i32
  }
  func.func @transform_4(%arg0: i32) -> (i32, i32) {
    %c0_i32 = arith.constant 0 : i32
    %c0_i32_0 = arith.constant 0 : i32
    %c0_i32_1 = arith.constant 0 : i32
    return %c0_i32, %c0_i32_0 : i32, i32
  }
  func.func @transform_5(%arg0: i32) -> (i32, i32) {
    %c0_i32 = arith.constant 0 : i32
    %c0_i32_0 = arith.constant 0 : i32
    %c0_i32_1 = arith.constant 0 : i32
    return %c0_i32, %c0_i32_0 : i32, i32
  }
  func.func @transform_6(%arg0: i32) -> (i32, i32, i32, i32) {
    %c0_i32 = arith.constant 0 : i32
    %c0_i32_0 = arith.constant 0 : i32
    %c0_i32_1 = arith.constant 0 : i32
    %c0_i32_2 = arith.constant 0 : i32
    %c0_i32_3 = arith.constant 0 : i32
    return %c0_i32, %c0_i32_0, %c0_i32_1, %c0_i32_2 : i32, i32, i32, i32
  }
  func.func @transform_7(%arg0: i32) -> (i32, i32) {
    %c0_i32 = arith.constant 0 : i32
    %c0_i32_0 = arith.constant 0 : i32
    %c0_i32_1 = arith.constant 0 : i32
    return %c0_i32, %c0_i32_0 : i32, i32
  }
  func.func @transform_8(%arg0: i32) -> (i32, i32) {
    %c0_i32 = arith.constant 0 : i32
    %c0_i32_0 = arith.constant 0 : i32
    %c0_i32_1 = arith.constant 0 : i32
    return %c0_i32, %c0_i32_0 : i32, i32
  }
  func.func @transform_9(%arg0: i32) -> (i32, i32) {
    %c0_i32 = arith.constant 0 : i32
    %c0_i32_0 = arith.constant 0 : i32
    return %c0_i32, %arg0 : i32, i32
  }
}

</mosaic_0001>

<bundles_post_ra>
// kernel: tpu_custom_call.1
= control target key start
LH: loop header
LB: loop body
LE: loop exit
PB: predicated region body
PF: predicated region fallthrough
CT: control target
= control target key end

     0   :  { %14 = vsyncpa [#allocation5], 0  ;;  %s16937_s0 = inlined_call_operand.vmem [shape: bf16[512,32], index: 0, kind: input, shape index: {}]   ;;  %s16938_s1 = inlined_call_operand.vmem [shape: bf16[32,512], index: 1, kind: input, shape index: {}]   ;;  %s16939_s2 = inlined_call_operand.vmem [shape: bf16[4,32,8], index: 2, kind: input, shape index: {}]   ;;  %s16940_s3 = inlined_call_operand.vmem [shape: f32[4,1,8], index: 3, kind: input, shape index: {}]   ;;  %s16941_s4 = inlined_call_operand.vmem [shape: bf16[64,32], index: 4, kind: input, shape index: {}]   ;;  %s16942_s5 = inlined_call_operand.vmem [shape: f32[64,1], index: 5, kind: input, shape index: {}]   ;;  %s16943_s6 = inlined_call_operand.hbm [shape: f32[4,2,128,128], index: 6, kind: input, shape index: {}]   ;;  %s16944_s7 = inlined_call_operand.vmem [shape: bf16[32,32], index: 7, kind: input, shape index: {}]   ;;  %s16945_s8 = inlined_call_operand.vmem [shape: f32[32,1], index: 8, kind: input, shape index: {}]   ;;  %s16946_s9 = inlined_call_operand.hbm [shape: f32[32,512], index: 9, kind: output, shape index: {}]  }
   0x1   :  { %15 = vsyncpa [#allocation6], 0  ;;  %s12121_s30 = smov [#allocation4]  }
   0x2   :  { %s33_s10 = sshll.u32 %s12121_s30, 4  ;;  %s34_s10 = int_to_ptr.vmem [resolvable:$true] %s33_s10 }
   0x3   :  { %s12085_s11 = scalar_lea.vmem %s34_s10, 16384  ;;  %p12090_p1 = scmp.lt.s32.totalorder %s34_s10, %s34_s10 }
   0x4   :  { %p12086_p0 = scmp.ne.s32.totalorder %s34_s10, %s12085_s11  ;;  %p12091_p2 = scmp.lt.s32.totalorder %s12085_s11, %s12085_s11 }
   0x6   :  { %p12092_p3 = por %p12091_p2, %p12090_p1 }
   0x8   :  { %p12093_p4 = pnand %p12092_p3, %p12086_p0 }
   0xa   :  { %12096 = shalt.err (!%p12093_p4)
}
   0xb   :  { %s12122_s12 = smov 128   ;;  %s12123_s13 = smov 8  }
   0xc   :  { %39 = dma.hbm_to_vmem [thread:$0]  %s16943_s6, 16384, %s34_s10, [#allocation5], %s12122_s12, %s12122_s12, %s12123_s13  }
   0xd   :  { %12117 = dma.done.wait [#allocation5], 16384  }
   0xe   :  { %12118 = vsyncadd [#allocation5], 4294950912  ;;  %v16947_v0 = vmov 0   ;;  %v10938_v1 = vld [vmem:[%s16938_s1 + $0x24] ss:$16 sps:$4 sm:$0xff]   ;;  %vm172_vm0 = vcmask 261120  }
   0xf   :  { %217 = vmatprep.mubr.bf16.mxu0 %v16947_v0  ;;  %290 = vmatprep.mubr.bf16.mxu1 %v16947_v0  ;;  %v10940_v2 = vld [vmem:[%s16938_s1 + $0x20] ss:$16 sps:$4 sm:$0xff]   ;;  %v10941_v3 = vld [vmem:[%s16938_s1 + $0x4] ss:$16 sps:$4 sm:$0xff]   ;;  %v10945_v5 = vld [vmem:[%s16938_s1 + $0x2c] ss:$16 sps:$4 sm:$0xff]  }
  0x10   :  { %10936 = vset.pattern.permute.xlu0 %v16947_v0  ;;  %10937 = vset.pattern.permute.xlu1 %v16947_v0  ;;  %v10943_v4 = vld [vmem:[%s16938_s1] ss:$16 sps:$4 sm:$0xff]   ;;  %v10947_v6 = vld [vmem:[%s16938_s1 + $0x28] ss:$16 sps:$4 sm:$0xff]   ;;  %v10948_v7 = vld [vmem:[%s16938_s1 + $0xc] ss:$16 sps:$4 sm:$0xff]  }
  0x11   :  { %197 = vmatprep.subr.bf16.mxu0 %v10938_v1  ;;  %v10944_v8 = vld [vmem:[%s16941_s4] sm:$0xff]   ;;  %270 = vmatprep.subr.bf16.mxu1 %v10945_v5  ;;  %v10950_v9 = vld [vmem:[%s16938_s1 + $0x8] ss:$16 sps:$4 sm:$0xff]   ;;  %v10953_v15 = vld [vmem:[%s16941_s4 + $0x10] sm:$0xff]   ;;  %vm616_vm1 = vcmask 1043456   ;;  %vm591_vm2 = vcmask 64512  }
  0x12   :  { %198 = vmatpush1.bf16.msra.mxu0 %v10940_v2  ;;  %271 = vmatpush1.bf16.msra.mxu1 %v10947_v6  ;;  %v10952_v10 = vld [vmem:[%s16939_s2 + $0x8] sm:$0xff]   ;;  %v10955_v11 = vld [vmem:[%s16939_s2] sm:$0xff]   ;;  %v66_v16 = vld [vmem:[%s16942_s5 + $0x10] sm:$0xff]  ;;  %vm12126_vm3 = vmmov 0  }
  0x13   :  { %199 = vmatprep.subr.bf16.mxu0 %v10941_v3  ;;  %272 = vmatprep.subr.bf16.mxu1 %v10948_v7  ;;  %v10951_v12 = vld [vmem:[%s16941_s4 + $0x8] sm:$0xff]   ;;  %v64_v13 = vld [vmem:[%s16942_s5] sm:$0xff]  ;;  %v67_v17 = vld [vmem:[%s16942_s5 + $0x18] sm:$0xff] }
  0x14   :  { %v65_v14 = vld [vmem:[%s16942_s5 + $0x8] sm:$0xff]  ;;  %74 = vperm.xlu0 %10936, %v64_v13   ;;  %84 = vperm.xlu1 %10937, %v66_v16   ;;  %v10954_v18 = vld [vmem:[%s16941_s4 + $0x18] sm:$0xff]   ;;  %v12254_v19 = vld [vmem:[%s16937_s0] sm:$0xff]  }
  0x15   :  { %v12264_v20 = vld [vmem:[%s16937_s0 + $0x8] sm:$0xff]   ;;  %v12269_v21 = vld [vmem:[%s16937_s0 + $0x10] sm:$0xff]   ;;  %v12279_v22 = vld [vmem:[%s16937_s0 + $0x18] sm:$0xff]  }
  0x16   :  { %200 = vmatpush1.bf16.msra.mxu0 %v10943_v4  ;;  %273 = vmatpush1.bf16.msra.mxu1 %v10950_v9  ;;  %v12284_v23 = vld [vmem:[%s16937_s0 + $0x20] sm:$0xff]   ;;  %v12293_v24 = vld [vmem:[%s16937_s0 + $0x28] sm:$0xff]   ;;  %v12298_v25 = vld [vmem:[%s16937_s0 + $0x30] sm:$0xff]  }
  0x17   :  { %9983 = vmatprep.subr.bf16.mxu0 %v10952_v10  ;;  %v12307_v26 = vld [vmem:[%s16937_s0 + $0x38] sm:$0xff]   ;;  %v9133_v51 = vld [vmem:[%s16940_s3] ss:$0 sm:$0xff]  ;;  %v10965_v62 = vld [vmem:[%s16939_s2 + $0x10] sm:$0xff]  }
  0x18   :  { %79 = vperm.xlu0 %10936, %v65_v14   ;;  %89 = vperm.xlu1 %10937, %v67_v17   ;;  %v10964_v32 = vld [vmem:[%s16939_s2 + $0x18] sm:$0xff]  }
  0x19   :  { %9125 = vmatmul.mubr.msk.bf16.vlgmr.msra.gmra.mxu0 %vm172_vm0, %v10944_v8  ;;  %9129 = vmatmul.mubr.msk.bf16.vlgmr.msra.gmra.mxu1 %vm172_vm0, %v10944_v8 }
  0x1a   :  { %227 = vmatprep.mubr.bf16.mxu0 %v16947_v0  ;;  %9984 = vmatpush3.bf16.msra.mxu0 %v10952_v10 }
  0x1b   :  { %9985 = vmatprep.subr.bf16.mxu0 %v10955_v11  ;;  %300 = vmatprep.mubr.bf16.mxu1 %v16947_v0 }
  0x1e   :  { %9986 = vmatpush3.bf16.msra.mxu0 %v10955_v11 }
  0x21   :  { %9126 = vmatmul.mubr.msk.bf16.gmra.mxu0 %vm172_vm0, %v10951_v12  ;;  %9130 = vmatmul.mubr.msk.bf16.gmra.mxu1 %vm172_vm0, %v10951_v12 }
  0x22   :  { %237 = vmatprep.mubr.bf16.mxu0 %v16947_v0  ;;  %310 = vmatprep.mubr.bf16.mxu1 %v16947_v0 }
  0x29   :  { %9127 = vmatmul.mubr.msk.bf16.gmra.mxu0 %vm172_vm0, %v10953_v15  ;;  %9131 = vmatmul.mubr.msk.bf16.gmra.mxu1 %vm172_vm0, %v10953_v15 }
  0x2a   :  { %247 = vmatprep.mubr.bf16.mxu0 %v16947_v0  ;;  %320 = vmatprep.mubr.bf16.mxu1 %v16947_v0 }
  0x31   :  { %9128 = vmatmul.mubr.msk.bf16.gmra.mxu0 %vm172_vm0, %v10954_v18  ;;  %9132 = vmatmul.mubr.msk.bf16.gmra.mxu1 %vm172_vm0, %v10954_v18 }
  0x32   :  { %9987 = vmatprep.mubr.msk.bf16.mxu0 %vm172_vm0, %v12254_v19 }
  0x39   :  { %9988 = vmatmul.mubr.msk.bf16.vlgmr.msra.gmra.mxu0 %vm172_vm0, %v12264_v20 }
  0x3a   :  { %9991 = vmatprep.mubr.msk.bf16.mxu0 %vm172_vm0, %v12269_v21 }
  0x41   :  { %9992 = vmatmul.mubr.msk.bf16.gmra.mxu0 %vm172_vm0, %v12279_v22 }
  0x42   :  { %9995 = vmatprep.mubr.msk.bf16.mxu0 %vm172_vm0, %v12284_v23 }
  0x49   :  { %9996 = vmatmul.mubr.msk.bf16.gmra.mxu0 %vm172_vm0, %v12293_v24 }
  0x4a   :  { %9999 = vmatprep.mubr.msk.bf16.mxu0 %vm172_vm0, %v12298_v25 }
  0x51   :  { %10000 = vmatmul.mubr.msk.bf16.gmra.mxu0 %vm172_vm0, %v12307_v26 }
  0x8f   :  { %v12311_v27 = vpop.permute.xlu0 %74 }
  0x90   :  { %17068 = vst [vmem:[#allocation10_spill] sm:$0xff] %v12311_v27 }
  0x93   :  { %v12350_v58 = vpop.permute.xlu0 %79 }
  0x94   :  { %17081 = vst [vmem:[#allocation23_spill] sm:$0xff] %v12350_v58 }
  0xd9   :  { %v219_v28 = vpop.f32.mrf.mxu0 }
  0xda   :  { %v220_v29 = vadd.f32 %v219_v28, %v12311_v27 }
  0xdb   :  { %v12314_v30 = vpop.f32.mrf.mxu0 }
  0xdc   :  { %17069 = vst [vmem:[#allocation11_spill] sm:$0xff] %v12314_v30  ;;  %v572_v31 = vpack.c.bf16 %v220_v29, %v220_v29 }
  0xdd   :  { %v223_v33 = vpop.f32.mrf.mxu0 }
  0xde   :  { %v618_v34 = vsel %vm616_vm1, %v572_v31, 0  ;;  %10911 = vmatprep.subr.msk.bf16.mxu1 %vm616_vm1, %v572_v31  ;;  %v224_v63 = vadd.f32 %v223_v33, %v12350_v58 }
  0xdf   :  { %v12321_v35 = vpop.f32.mrf.mxu0  ;;  %10004 = vmatpush3.bf16.msra.mxu1 %v618_v34 }
  0xe0   :  { %17070 = vst [vmem:[#allocation12_spill] sm:$0xff] %v12321_v35  ;;  %10041 = vmatprep.subr.bf16.mxu1 %v10964_v32  ;;  %v1089_v6 = vpack.c.bf16 %v224_v63, %v224_v63 }
  0xe1   :  { %v12323_v36 = vpop.f32.mrf.mxu0 }
  0xe3   :  { %v12325_v37 = vpop.f32.mrf.mxu0 }
  0xe4   :  { %17071 = vst [vmem:[#allocation13_spill] sm:$0xff] %v12325_v37 }
  0xe5   :  { %v12327_v38 = vpop.f32.mrf.mxu0 }
  0xe7   :  { %v12329_v39 = vpop.f32.mrf.mxu0 }
  0xe8   :  { %17072 = vst [vmem:[#allocation14_spill] sm:$0xff] %v12329_v39 }
  0xe9   :  { %v12331_v40 = vpop.f32.mrf.mxu0 }
  0xea   :  { %17073 = vst [vmem:[#allocation15_spill] sm:$0xff] %v12331_v40 }
  0xeb   :  { %v12333_v41 = vpop.f32.mrf.mxu0 }
  0xec   :  { %17074 = vst [vmem:[#allocation16_spill] sm:$0xff] %v12333_v41 }
  0xed   :  { %v12335_v42 = vpop.f32.mrf.mxu0 }
  0xee   :  { %17075 = vst [vmem:[#allocation17_spill] sm:$0xff] %v12335_v42 }
  0xef   :  { %v12337_v43 = vpop.f32.mrf.mxu0 }
  0xf0   :  { %17076 = vst [vmem:[#allocation18_spill] sm:$0xff] %v12337_v43 }
  0xf1   :  { %v12339_v44 = vpop.f32.mrf.mxu0 }
  0xf2   :  { %17077 = vst [vmem:[#allocation19_spill] sm:$0xff] %v12339_v44 }
  0xf3   :  { %v12341_v45 = vpop.f32.mrf.mxu0 }
  0xf4   :  { %17078 = vst [vmem:[#allocation20_spill] sm:$0xff] %v12341_v45 }
  0xf5   :  { %v12343_v46 = vpop.f32.mrf.mxu0 }
  0xf6   :  { %17079 = vst [vmem:[#allocation21_spill] sm:$0xff] %v12343_v46 }
  0xf7   :  { %v12345_v47 = vpop.f32.mrf.mxu0 }
  0xf8   :  { %17080 = vst [vmem:[#allocation22_spill] sm:$0xff] %v12345_v47 }
  0xf9   :  { %v9989_v48 = vpop.f32.mrf.mxu0 }
  0xfa   :  { %v509_v56 = vadd.f32 %v9989_v48, %v9133_v51 }
  0xfb   :  { %v500_v49 = vpop.f32.mrf.mxu0 }
  0xfc   :  { %v501_v54 = vadd.f32 %v9133_v51, %v500_v49 }
  0xfd   :  { %v9990_v50 = vpop.f32.mrf.mxu0 }
  0xfe   :  { %v512_v52 = vadd.f32 %v9990_v50, %v9133_v51 }
  0xff   :  { %v503_v53 = vpop.f32.mrf.mxu0 }
 0x100   :  { %v504_v55 = vadd.f32 %v9133_v51, %v503_v53  ;;  %v564_v60 = vpack.c.bf16 %v512_v52, %v509_v56 }
 0x101   :  { %v9993_v57 = vpop.f32.mrf.mxu0 }
 0x102   :  { %v563_v59 = vpack.c.bf16 %v504_v55, %v501_v54  ;;  %v525_v7 = vadd.f32 %v9993_v57, %v9133_v51  ;;  %v1134_v54 = vsel %vm616_vm1, %v1089_v6, 0  ;;  %v12388_v55 = vpop.f32.mrf.mxu1 }
 0x103   :  { %v516_v61 = vpop.f32.mrf.mxu0  ;;  %17082 = vst [vmem:[#allocation24_spill] sm:$0xff] %v12388_v55 }
 0x104   :  { %10005 = vmatprep.mubr.msk.bf16.mxu1 %vm591_vm2, %v563_v59  ;;  %v517_v4 = vadd.f32 %v9133_v51, %v516_v61  ;;  %v12390_v56 = vpop.f32.mrf.mxu1 }
 0x105   :  { %v9994_v1 = vpop.f32.mrf.mxu0  ;;  %10006 = vmatmul.mubr.msk.bf16.vlgmr.msra.gmra.mxu1 %vm591_vm2, %v564_v60  ;;  %17083 = vst [vmem:[#allocation25_spill] sm:$0xff] %v12390_v56 }
 0x106   :  { %10042 = vmatpush3.bf16.msra.mxu1 %v10964_v32  ;;  %v528_v2 = vadd.f32 %v9994_v1, %v9133_v51  ;;  %v12392_v57 = vpop.f32.mrf.mxu1 }
 0x107   :  { %v519_v3 = vpop.f32.mrf.mxu0  ;;  %10043 = vmatprep.subr.bf16.mxu1 %v10965_v62  ;;  %17084 = vst [vmem:[#allocation26_spill] sm:$0xff] %v12392_v57 }
 0x108   :  { %v520_v5 = vadd.f32 %v9133_v51, %v519_v3  ;;  %v566_v10 = vpack.c.bf16 %v528_v2, %v525_v7  ;;  %v12394_v59 = vpop.f32.mrf.mxu1 }
 0x109   :  { %v9997_v8 = vpop.f32.mrf.mxu0  ;;  %17085 = vst [vmem:[#allocation27_spill] sm:$0xff] %v12394_v59  ;;  %v10967_v59 = vld [vmem:[%s16939_s2 + $0x20] sm:$0xff]  }
 0x10a   :  { %v565_v9 = vpack.c.bf16 %v520_v5, %v517_v4  ;;  %10044 = vmatpush3.bf16.msra.mxu1 %v10965_v62  ;;  %v541_v17 = vadd.f32 %v9997_v8, %v9133_v51  ;;  %v12396_v60 = vpop.f32.mrf.mxu1 }
 0x10b   :  { %10912 = vmatprep.subr.msk.bf16.mxu1 %vm616_vm1, %v1089_v6  ;;  %v532_v11 = vpop.f32.mrf.mxu0  ;;  %17086 = vst [vmem:[#allocation28_spill] sm:$0xff] %v12396_v60 }
 0x10c   :  { %10009 = vmatprep.mubr.msk.bf16.mxu1 %vm591_vm2, %v565_v9  ;;  %v533_v15 = vadd.f32 %v9133_v51, %v532_v11  ;;  %v12398_v61 = vpop.f32.mrf.mxu1  ;;  %v577_v9 = vld [vmem:[#allocation4 + $0x10] sm:$0xff] }
 0x10d   :  { %v9998_v12 = vpop.f32.mrf.mxu0  ;;  %10010 = vmatmul.mubr.msk.bf16.gmra.mxu1 %vm591_vm2, %v566_v10  ;;  %17087 = vst [vmem:[#allocation29_spill] sm:$0xff] %v12398_v61 }
 0x10e   :  { %v544_v13 = vadd.f32 %v9998_v12, %v9133_v51  ;;  %v12400_v62 = vpop.f32.mrf.mxu1 }
 0x10f   :  { %v535_v14 = vpop.f32.mrf.mxu0  ;;  %17088 = vst [vmem:[#allocation30_spill] sm:$0xff] %v12400_v62 }
 0x110   :  { %v536_v16 = vadd.f32 %v9133_v51, %v535_v14  ;;  %v568_v29 = vpack.c.bf16 %v544_v13, %v541_v17  ;;  %v12402_v63 = vpop.f32.mrf.mxu1  ;;  %v575_v13 = vld [vmem:[#allocation4] sm:$0xff]  ;;  %v578_v14 = vld [vmem:[#allocation4 + $0x18] sm:$0xff] }
 0x111   :  { %v10001_v18 = vpop.f32.mrf.mxu0  ;;  %17089 = vst [vmem:[#allocation31_spill] sm:$0xff] %v12402_v63 }
 0x112   :  { %v567_v28 = vpack.c.bf16 %v536_v16, %v533_v15  ;;  %v557_v50 = vadd.f32 %v10001_v18, %v9133_v51  ;;  %v12404_v1 = vpop.f32.mrf.mxu1 }
 0x113   :  { %v548_v31 = vpop.f32.mrf.mxu0  ;;  %17090 = vst [vmem:[#allocation32_spill] sm:$0xff] %v12404_v1 }
 0x114   :  { %10013 = vmatprep.mubr.msk.bf16.mxu1 %vm591_vm2, %v567_v28  ;;  %v549_v48 = vadd.f32 %v9133_v51, %v548_v31  ;;  %v12406_v2 = vpop.f32.mrf.mxu1  ;;  %v581_v28 = vld [vmem:[#allocation4 + $0x30] sm:$0xff] }
 0x115   :  { %v10002_v32 = vpop.f32.mrf.mxu0  ;;  %10014 = vmatmul.mubr.msk.bf16.gmra.mxu1 %vm591_vm2, %v568_v29  ;;  %17091 = vst [vmem:[#allocation33_spill] sm:$0xff] %v12406_v2  ;;  %v576_v29 = vld [vmem:[#allocation4 + $0x8] sm:$0xff] }
 0x116   :  { %v560_v33 = vadd.f32 %v10002_v32, %v9133_v51  ;;  %v12408_v3 = vpop.f32.mrf.mxu1 }
 0x117   :  { %v551_v34 = vpop.f32.mrf.mxu0  ;;  %17092 = vst [vmem:[#allocation34_spill] sm:$0xff] %v12408_v3 }
 0x118   :  { %v552_v49 = vadd.f32 %v9133_v51, %v551_v34  ;;  %v570_v53 = vpack.c.bf16 %v560_v33, %v557_v50  ;;  %v12385_v51 = vld [vmem:[%s16939_s2 + $0x28] sm:$0xff]   ;;  %v12410_v4 = vpop.f32.mrf.mxu1 }
 0x119   :  { %17093 = vst [vmem:[#allocation35_spill] sm:$0xff] %v12410_v4 }
 0x11a   :  { %v569_v52 = vpack.c.bf16 %v552_v49, %v549_v48  ;;  %v12412_v5 = vpop.f32.mrf.mxu1  ;;  %v579_v48 = vld [vmem:[#allocation4 + $0x20] sm:$0xff]  ;;  %v582_v49 = vld [vmem:[#allocation4 + $0x38] sm:$0xff] }
 0x11b   :  { %17094 = vst [vmem:[#allocation36_spill] sm:$0xff] %v12412_v5 }
 0x11c   :  { %10017 = vmatprep.mubr.msk.bf16.mxu1 %vm591_vm2, %v569_v52  ;;  %v12414_v6 = vpop.f32.mrf.mxu1 }
 0x11d   :  { %10018 = vmatmul.mubr.msk.bf16.gmra.mxu1 %vm591_vm2, %v570_v53  ;;  %17095 = vst [vmem:[#allocation37_spill] sm:$0xff] %v12414_v6 }
 0x11e   :  { %10045 = vmatprep.mubr.msk.bf16.mxu1 %vm172_vm0, %v12254_v19  ;;  %v12416_v7 = vpop.f32.mrf.mxu1 }
 0x11f   :  { %17096 = vst [vmem:[#allocation38_spill] sm:$0xff] %v12416_v7 }
 0x120   :  { %v12418_v8 = vpop.f32.mrf.mxu1 }
 0x121   :  { %17097 = vst [vmem:[#allocation39_spill] sm:$0xff] %v12418_v8 }
 0x125   :  { %10046 = vmatmul.mubr.msk.bf16.vlgmr.msra.gmra.mxu1 %vm172_vm0, %v12264_v20 }
 0x126   :  { %10062 = vmatpush3.bf16.msra.mxu1 %v1134_v54  ;;  %10049 = vmatprep.mubr.msk.bf16.mxu1 %vm172_vm0, %v12269_v21 }
 0x127   :  { %10099 = vmatprep.subr.bf16.mxu1 %v12385_v51 }
 0x12d   :  { %10050 = vmatmul.mubr.msk.bf16.gmra.mxu1 %vm172_vm0, %v12279_v22 }
 0x12e   :  { %10053 = vmatprep.mubr.msk.bf16.mxu1 %vm172_vm0, %v12284_v23 }
 0x135   :  { %10054 = vmatmul.mubr.msk.bf16.gmra.mxu1 %vm172_vm0, %v12293_v24 }
 0x136   :  { %10057 = vmatprep.mubr.msk.bf16.mxu1 %vm172_vm0, %v12298_v25 }
 0x13d   :  { %10058 = vmatmul.mubr.msk.bf16.gmra.mxu1 %vm172_vm0, %v12307_v26 }
 0x1c5   :  { %v10007_v10 = vpop.f32.mrf.mxu1 }
 0x1c6   :  { %v12420_v11 = vadd.f32 %v10007_v10, %v577_v9  ;;  %v585_v9 = vld [vmem:[#allocation4 + $0x50] sm:$0xff]  ;;  %v580_v10 = vld [vmem:[#allocation4 + $0x28] sm:$0xff] }
 0x1c7   :  { %v654_v12 = vpop.f32.mrf.mxu1 }
 0x1c8   :  { %721 = vmax.xlane.f32.xlu1 %v12420_v11  ;;  %v12423_v16 = vadd.f32 %v654_v12, %v575_v13 }
 0x1c9   :  { %v10008_v15 = vpop.f32.mrf.mxu1 }
 0x1ca   :  { %v12425_v17 = vadd.f32 %v10008_v15, %v578_v14 }
 0x1cb   :  { %v657_v18 = vpop.f32.mrf.mxu1 }
 0x1cc   :  { %723 = vmax.xlane.f32.xlu0 %v12425_v17  ;;  %717 = vmax.xlane.f32.xlu1 %v12423_v16  ;;  %v12431_v33 = vadd.f32 %v657_v18, %v576_v29  ;;  %v583_v18 = vld [vmem:[#allocation4 + $0x40] sm:$0xff] }
 0x1cd   :  { %v10011_v31 = vpop.f32.mrf.mxu1 }
 0x1ce   :  { %v12429_v32 = vadd.f32 %v10011_v31, %v581_v28  ;;  %v586_v28 = vld [vmem:[#allocation4 + $0x58] sm:$0xff] }
 0x1cf   :  { %v670_v34 = vpop.f32.mrf.mxu1 }
 0x1d0   :  { %719 = vmax.xlane.f32.xlu0 %v12431_v33  ;;  %729 = vmax.xlane.f32.xlu1 %v12429_v32  ;;  %v12435_v52 = vadd.f32 %v670_v34, %v579_v48 }
 0x1d1   :  { %v10012_v50 = vpop.f32.mrf.mxu1 }
 0x1d2   :  { %v12437_v53 = vadd.f32 %v10012_v50, %v582_v49  ;;  %v584_v49 = vld [vmem:[#allocation4 + $0x48] sm:$0xff] }
 0x1d3   :  { %v673_v54 = vpop.f32.mrf.mxu1 }
 0x1d4   :  { %731 = vmax.xlane.f32.xlu0 %v12437_v53  ;;  %725 = vmax.xlane.f32.xlu1 %v12435_v52  ;;  %v12443_v14 = vadd.f32 %v673_v54, %v580_v10 }
 0x1d5   :  { %v10015_v12 = vpop.f32.mrf.mxu1 }
 0x1d6   :  { %v12441_v13 = vadd.f32 %v10015_v12, %v585_v9  ;;  %v589_v9 = vld [vmem:[#allocation4 + $0x70] sm:$0xff]  ;;  %v590_v12 = vld [vmem:[#allocation4 + $0x78] sm:$0xff] }
 0x1d7   :  { %v686_v15 = vpop.f32.mrf.mxu1 }
 0x1d8   :  { %727 = vmax.xlane.f32.xlu0 %v12443_v14  ;;  %737 = vmax.xlane.f32.xlu1 %v12441_v13  ;;  %v12447_v31 = vadd.f32 %v686_v15, %v583_v18  ;;  %v587_v18 = vld [vmem:[#allocation4 + $0x60] sm:$0xff] }
 0x1d9   :  { %v10016_v29 = vpop.f32.mrf.mxu1 }
 0x1da   :  { %v12449_v34 = vadd.f32 %v10016_v29, %v586_v28 }
 0x1db   :  { %v689_v48 = vpop.f32.mrf.mxu1 }
 0x1dc   :  { %739 = vmax.xlane.f32.xlu0 %v12449_v34  ;;  %733 = vmax.xlane.f32.xlu1 %v12447_v31  ;;  %v12453_v54 = vadd.f32 %v689_v48, %v584_v49  ;;  %v588_v49 = vld [vmem:[#allocation4 + $0x68] sm:$0xff] }
 0x1dd   :  { %v10019_v50 = vpop.f32.mrf.mxu1 }
 0x1de   :  { %v12456_v8 = vadd.f32 %v10019_v50, %v589_v9  ;;  %v9165_v50 = vld [vmem:[%s16940_s3 + $0x1] ss:$0 sm:$0xff] }
 0x1df   :  { %v702_v10 = vpop.f32.mrf.mxu1 }
 0x1e0   :  { %735 = vmax.xlane.f32.xlu0 %v12453_v54  ;;  %v12462_v6 = vadd.f32 %v702_v10, %v587_v18  ;;  %v12471_v18 = vpop.permute.xlu1 %84 }
 0x1e1   :  { %v10020_v0 = vpop.f32.mrf.mxu1  ;;  %17098 = vst [vmem:[#allocation40_spill] sm:$0xff] %v12471_v18 }
 0x1e2   :  { %v12458_v15 = vadd.f32 %v10020_v0, %v590_v12 }
 0x1e3   :  { %v705_v28 = vpop.f32.mrf.mxu1 }
 0x1e4   :  { %745 = vmax.xlane.f32.xlu0 %v12456_v8  ;;  %747 = vmax.xlane.f32.xlu1 %v12458_v15  ;;  %v12468_v0 = vadd.f32 %v705_v28, %v588_v49 }
 0x1e5   :  { %v10047_v29 = vpop.f32.mrf.mxu1 }
 0x1e6   :  { %v1026_v63 = vadd.f32 %v10047_v29, %v9165_v50 }
 0x1e7   :  { %v1017_v48 = vpop.f32.mrf.mxu1 }
 0x1e8   :  { %741 = vmax.xlane.f32.xlu0 %v12462_v6  ;;  %v1018_v2 = vadd.f32 %v9165_v50, %v1017_v48 }
 0x1e9   :  { %v10048_v4 = vpop.f32.mrf.mxu1 }
 0x1ea   :  { %v1029_v9 = vadd.f32 %v10048_v4, %v9165_v50  ;;  %v230_v4 = vadd.f32 %v12323_v36, %v12471_v18 }
 0x1eb   :  { %v1020_v12 = vpop.f32.mrf.mxu1 }
 0x1ec   :  { %v1021_v7 = vadd.f32 %v9165_v50, %v1020_v12  ;;  %743 = vmax.xlane.f32.xlu0 %v12468_v0  ;;  %v1081_v61 = vpack.c.bf16 %v1029_v9, %v1026_v63 }
 0x1ed   :  { %v10051_v10 = vpop.f32.mrf.mxu1 }
 0x1ee   :  { %v1080_v5 = vpack.c.bf16 %v1021_v7, %v1018_v2  ;;  %v1605_v7 = vpack.c.bf16 %v230_v4, %v230_v4  ;;  %v1042_v49 = vadd.f32 %v10051_v10, %v9165_v50 }
 0x1ef   :  { %v1033_v3 = vpop.f32.mrf.mxu1 }
 0x1f0   :  { %10063 = vmatprep.mubr.msk.bf16.mxu1 %vm591_vm2, %v1080_v5  ;;  %v1034_v2 = vadd.f32 %v9165_v50, %v1033_v3 }
 0x1f1   :  { %v10052_v28 = vpop.f32.mrf.mxu1  ;;  %10064 = vmatmul.mubr.msk.bf16.vlgmr.msra.gmra.mxu1 %vm591_vm2, %v1081_v61 }
 0x1f2   :  { %10100 = vmatpush3.bf16.msra.mxu1 %v12385_v51  ;;  %v1045_v29 = vadd.f32 %v10052_v28, %v9165_v50 }
 0x1f3   :  { %v1036_v48 = vpop.f32.mrf.mxu1  ;;  %10101 = vmatprep.subr.bf16.mxu1 %v10967_v59 }
 0x1f4   :  { %v1037_v63 = vadd.f32 %v9165_v50, %v1036_v48  ;;  %v1083_v1 = vpack.c.bf16 %v1045_v29, %v1042_v49 }
 0x1f5   :  { %v10055_v9 = vpop.f32.mrf.mxu1 }
 0x1f6   :  { %v1082_v12 = vpack.c.bf16 %v1037_v63, %v1034_v2  ;;  %10102 = vmatpush3.bf16.msra.mxu1 %v10967_v59  ;;  %v1058_v3 = vadd.f32 %v10055_v9, %v9165_v50 }
 0x1f7   :  { %10913 = vmatprep.subr.msk.bf16.mxu1 %vm616_vm1, %v1605_v7  ;;  %v1049_v5 = vpop.f32.mrf.mxu1 }
 0x1f8   :  { %10067 = vmatprep.mubr.msk.bf16.mxu1 %vm591_vm2, %v1082_v12  ;;  %v1050_v28 = vadd.f32 %v9165_v50, %v1049_v5 }
 0x1f9   :  { %v10056_v36 = vpop.f32.mrf.mxu1  ;;  %10068 = vmatmul.mubr.msk.bf16.gmra.mxu1 %vm591_vm2, %v1083_v1 }
 0x1fa   :  { %v1061_v51 = vadd.f32 %v10056_v36, %v9165_v50 }
 0x1fb   :  { %v1052_v61 = vpop.f32.mrf.mxu1 }
 0x1fc   :  { %v1053_v56 = vadd.f32 %v9165_v50, %v1052_v61  ;;  %v1085_v10 = vpack.c.bf16 %v1061_v51, %v1058_v3 }
 0x1fd   :  { %v10059_v48 = vpop.f32.mrf.mxu1 }
 0x1fe   :  { %v1084_v4 = vpack.c.bf16 %v1053_v56, %v1050_v28  ;;  %v1074_v12 = vadd.f32 %v10059_v48, %v9165_v50  ;;  %v1650_v56 = vsel %vm616_vm1, %v1605_v7, 0 }
 0x1ff   :  { %v1065_v47 = vpop.f32.mrf.mxu1 }
 0x200   :  { %10071 = vmatprep.mubr.msk.bf16.mxu1 %vm591_vm2, %v1084_v4  ;;  %v1066_v63 = vadd.f32 %v9165_v50, %v1065_v47 }
 0x201   :  { %v10060_v59 = vpop.f32.mrf.mxu1  ;;  %10072 = vmatmul.mubr.msk.bf16.gmra.mxu1 %vm591_vm2, %v1085_v10 }
 0x202   :  { %v1077_v29 = vadd.f32 %v10060_v59, %v9165_v50 }
 0x203   :  { %v1068_v2 = vpop.f32.mrf.mxu1 }
 0x204   :  { %v1069_v49 = vadd.f32 %v9165_v50, %v1068_v2  ;;  %v1087_v36 = vpack.c.bf16 %v1077_v29, %v1074_v12 }
 0x206   :  { %v1086_v1 = vpack.c.bf16 %v1069_v49, %v1066_v63 }
 0x208   :  { %10075 = vmatprep.mubr.msk.bf16.mxu1 %vm591_vm2, %v1086_v1 }
 0x209   :  { %10076 = vmatmul.mubr.msk.bf16.gmra.mxu1 %vm591_vm2, %v1087_v36 }
 0x20a   :  { %10103 = vmatprep.mubr.msk.bf16.mxu1 %vm172_vm0, %v12254_v19  ;;  %v12505_v19 = vpop.permute.xlu1 %89 }
 0x20b   :  { %17099 = vst [vmem:[#allocation41_spill] sm:$0xff] %v12505_v19 }
 0x211   :  { %10104 = vmatmul.mubr.msk.bf16.vlgmr.msra.gmra.mxu1 %vm172_vm0, %v12264_v20 }
 0x212   :  { %10120 = vmatpush3.bf16.msra.mxu1 %v1650_v56  ;;  %10107 = vmatprep.mubr.msk.bf16.mxu1 %vm172_vm0, %v12269_v21 }
 0x219   :  { %10108 = vmatmul.mubr.msk.bf16.gmra.mxu1 %vm172_vm0, %v12279_v22 }
 0x21a   :  { %10111 = vmatprep.mubr.msk.bf16.mxu1 %vm172_vm0, %v12284_v23 }
 0x221   :  { %10112 = vmatmul.mubr.msk.bf16.gmra.mxu1 %vm172_vm0, %v12293_v24 }
 0x222   :  { %10115 = vmatprep.mubr.msk.bf16.mxu1 %vm172_vm0, %v12298_v25 }
 0x229   :  { %10116 = vmatmul.mubr.msk.bf16.gmra.mxu1 %vm172_vm0, %v12307_v26 }
 0x251   :  { %v722_v20 = vpop.xlane.xlu1 %721 }
 0x252   :  { %v751_v21 = vsub.f32 %v12420_v11, %v722_v20  ;;  %v12515_v11 = vld [vmem:[%s16939_s2 + $0x38] sm:$0xff]  }
 0x253   :  { %10157 = vmatprep.subr.bf16.mxu1 %v12515_v11 }
 0x254   :  { %v769_v47 = vmul.f32 1.442695, %v751_v21 }
 0x255   :  { %v724_v50 = vpop.xlane.xlu0 %723  ;;  %v718_v22 = vpop.xlane.xlu1 %717 }
 0x256   :  { %11020 = vpow2.f32 %v769_v47  ;;  %v752_v23 = vsub.f32 %v12425_v17, %v724_v50  ;;  %v749_v7 = vsub.f32 %v12423_v16, %v718_v22 }
 0x258   :  { %v771_v24 = vmul.f32 1.442695, %v752_v23  ;;  %v765_v9 = vmul.f32 1.442695, %v749_v7 }
 0x259   :  { %v720_v5 = vpop.xlane.xlu0 %719  ;;  %v730_v25 = vpop.xlane.xlu1 %729 }
 0x25a   :  { %11022 = vpow2.f32 %v771_v24  ;;  %v750_v51 = vsub.f32 %v12431_v33, %v720_v5  ;;  %v755_v61 = vsub.f32 %v12429_v32, %v730_v25 }
 0x25b   :  { %11024 = vpow2.f32 %v765_v9 }
 0x25c   :  { %v767_v28 = vmul.f32 1.442695, %v750_v51  ;;  %v777_v3 = vmul.f32 1.442695, %v755_v61 }
 0x25d   :  { %v732_v17 = vpop.xlane.xlu0 %731  ;;  %v726_v48 = vpop.xlane.xlu1 %725 }
 0x25e   :  { %11026 = vpow2.f32 %v767_v28  ;;  %v756_v16 = vsub.f32 %v12437_v53, %v732_v17  ;;  %v753_v4 = vsub.f32 %v12435_v52, %v726_v48 }
 0x25f   :  { %11028 = vpow2.f32 %v777_v3 }
 0x260   :  { %v779_v33 = vmul.f32 1.442695, %v756_v16  ;;  %v773_v32 = vmul.f32 1.442695, %v753_v4 }
 0x261   :  { %v728_v10 = vpop.xlane.xlu0 %727  ;;  %v738_v59 = vpop.xlane.xlu1 %737 }
 0x262   :  { %11030 = vpow2.f32 %v779_v33  ;;  %v754_v29 = vsub.f32 %v12443_v14, %v728_v10  ;;  %v759_v2 = vsub.f32 %v12441_v13, %v738_v59  ;;  %v16949_v59 = vmov 0.0  }
 0x263   :  { %v12522_v63 = vpop.eup %11020  ;;  %11032 = vpow2.f32 %v773_v32  ;;  %10021 = vmatprep.subr.bf16.mxu0 %v16949_v59 }
 0x264   :  { %v775_v49 = vmul.f32 1.442695, %v754_v29  ;;  %v785_v12 = vmul.f32 1.442695, %v759_v2  ;;  %801 = vadd.xlane.f32.xlu1 %v12522_v63  ;;  %v1095_v29 = vld [vmem:[#allocation4 + $0x110] sm:$0xff] }
 0x265   :  { %v740_v53 = vpop.xlane.xlu0 %739  ;;  %v734_v1 = vpop.xlane.xlu1 %733 }
 0x266   :  { %11034 = vpow2.f32 %v775_v49  ;;  %v760_v52 = vsub.f32 %v12449_v34, %v740_v53  ;;  %v757_v36 = vsub.f32 %v12447_v31, %v734_v1  ;;  %v1093_v53 = vld [vmem:[#allocation4 + $0x100] sm:$0xff]  ;;  %v1096_v1 = vld [vmem:[#allocation4 + $0x118] sm:$0xff] }
 0x267   :  { %v12527_v56 = vpop.eup %11022  ;;  %11036 = vpow2.f32 %v785_v12 }
 0x268   :  { %v12529_v14 = vpop.eup %11024  ;;  %v787_v13 = vmul.f32 1.442695, %v760_v52  ;;  %v781_v20 = vmul.f32 1.442695, %v757_v36  ;;  %803 = vadd.xlane.f32.xlu0 %v12527_v56 }
 0x269   :  { %797 = vadd.xlane.f32.xlu1 %v12529_v14  ;;  %v736_v21 = vpop.xlane.xlu0 %735 }
 0x26a   :  { %11038 = vpow2.f32 %v787_v13  ;;  %v758_v47 = vsub.f32 %v12453_v54, %v736_v21  ;;  %v1099_v21 = vld [vmem:[#allocation4 + $0x130] sm:$0xff] }
 0x26b   :  { %v12534_v50 = vpop.eup %11026  ;;  %11040 = vpow2.f32 %v781_v20 }
 0x26c   :  { %v12536_v34 = vpop.eup %11028  ;;  %v783_v31 = vmul.f32 1.442695, %v758_v47  ;;  %799 = vadd.xlane.f32.xlu0 %v12534_v50  ;;  %v1094_v47 = vld [vmem:[#allocation4 + $0x108] sm:$0xff] }
 0x26d   :  { %809 = vadd.xlane.f32.xlu1 %v12536_v34  ;;  %v746_v22 = vpop.xlane.xlu0 %745  ;;  %v748_v23 = vpop.xlane.xlu1 %747 }
 0x26e   :  { %11042 = vpow2.f32 %v783_v31  ;;  %v763_v7 = vsub.f32 %v12456_v8, %v746_v22  ;;  %v764_v24 = vsub.f32 %v12458_v15, %v748_v23 }
 0x26f   :  { %v12542_v9 = vpop.eup %11030 }
 0x270   :  { %v12544_v54 = vpop.eup %11032  ;;  %v793_v5 = vmul.f32 1.442695, %v763_v7  ;;  %v795_v25 = vmul.f32 1.442695, %v764_v24  ;;  %811 = vadd.xlane.f32.xlu0 %v12542_v9  ;;  %v1097_v24 = vld [vmem:[#allocation4 + $0x120] sm:$0xff] }
 0x271   :  { %805 = vadd.xlane.f32.xlu1 %v12544_v54  ;;  %v742_v51 = vpop.xlane.xlu0 %741 }
 0x272   :  { %11044 = vpow2.f32 %v793_v5  ;;  %v761_v61 = vsub.f32 %v12462_v6, %v742_v51  ;;  %v1100_v5 = vld [vmem:[#allocation4 + $0x138] sm:$0xff] }
 0x273   :  { %v12549_v28 = vpop.eup %11034  ;;  %11046 = vpow2.f32 %v795_v25 }
 0x274   :  { %v12551_v8 = vpop.eup %11036  ;;  %v789_v15 = vmul.f32 1.442695, %v761_v61  ;;  %807 = vadd.xlane.f32.xlu0 %v12549_v28 }
 0x275   :  { %817 = vadd.xlane.f32.xlu1 %v12551_v8  ;;  %v744_v3 = vpop.xlane.xlu0 %743 }
 0x276   :  { %11048 = vpow2.f32 %v789_v15  ;;  %v762_v17 = vsub.f32 %v12468_v0, %v744_v3  ;;  %v1103_v3 = vld [vmem:[#allocation4 + $0x150] sm:$0xff] }
 0x277   :  { %v12556_v48 = vpop.eup %11038 }
 0x278   :  { %v12558_v16 = vpop.eup %11040  ;;  %v791_v4 = vmul.f32 1.442695, %v762_v17  ;;  %819 = vadd.xlane.f32.xlu0 %v12556_v48  ;;  %v1098_v17 = vld [vmem:[#allocation4 + $0x128] sm:$0xff] }
 0x279   :  { %813 = vadd.xlane.f32.xlu1 %v12558_v16 }
 0x27a   :  { %11050 = vpow2.f32 %v791_v4 }
 0x27b   :  { %v12562_v6 = vpop.eup %11042 }
 0x27c   :  { %815 = vadd.xlane.f32.xlu0 %v12562_v6 }
 0x27f   :  { %v12565_v33 = vpop.eup %11044 }
 0x280   :  { %v12567_v32 = vpop.eup %11046  ;;  %825 = vadd.xlane.f32.xlu1 %v12565_v33 }
 0x281   :  { %827 = vadd.xlane.f32.xlu0 %v12567_v32 }
 0x283   :  { %v12571_v0 = vpop.eup %11048 }
 0x284   :  { %821 = vadd.xlane.f32.xlu1 %v12571_v0 }
 0x287   :  { %v12574_v10 = vpop.eup %11050 }
 0x288   :  { %823 = vadd.xlane.f32.xlu0 %v12574_v10 }
 0x2b1   :  { %v10065_v2 = vpop.f32.mrf.mxu1 }
 0x2b2   :  { %v12578_v49 = vadd.f32 %v10065_v2, %v1095_v29 }
 0x2b3   :  { %v1170_v12 = vpop.f32.mrf.mxu1 }
 0x2b4   :  { %1237 = vmax.xlane.f32.xlu1 %v12578_v49  ;;  %v12581_v36 = vadd.f32 %v1170_v12, %v1093_v53  ;;  %v1101_v53 = vld [vmem:[#allocation4 + $0x140] sm:$0xff] }
 0x2b5   :  { %v10066_v52 = vpop.f32.mrf.mxu1 }
 0x2b6   :  { %v12583_v13 = vadd.f32 %v10066_v52, %v1096_v1  ;;  %v1104_v1 = vld [vmem:[#allocation4 + $0x158] sm:$0xff] }
 0x2b7   :  { %v1173_v20 = vpop.f32.mrf.mxu1 }
 0x2b8   :  { %1233 = vmax.xlane.f32.xlu1 %v12581_v36  ;;  %1239 = vmax.xlane.f32.xlu0 %v12583_v13  ;;  %v12589_v23 = vadd.f32 %v1173_v20, %v1094_v47 }
 0x2b9   :  { %v10069_v31 = vpop.f32.mrf.mxu1 }
 0x2ba   :  { %v12587_v22 = vadd.f32 %v10069_v31, %v1099_v21  ;;  %v1107_v31 = vld [vmem:[#allocation4 + $0x170] sm:$0xff] }
 0x2bb   :  { %v1186_v7 = vpop.f32.mrf.mxu1 }
 0x2bc   :  { %1245 = vmax.xlane.f32.xlu1 %v12587_v22  ;;  %1235 = vmax.xlane.f32.xlu0 %v12589_v23  ;;  %v12593_v51 = vadd.f32 %v1186_v7, %v1097_v24  ;;  %v1102_v7 = vld [vmem:[#allocation4 + $0x148] sm:$0xff] }
 0x2bd   :  { %v10070_v25 = vpop.f32.mrf.mxu1 }
 0x2be   :  { %v12595_v61 = vadd.f32 %v10070_v25, %v1100_v5 }
 0x2bf   :  { %v1189_v15 = vpop.f32.mrf.mxu1 }
 0x2c0   :  { %1241 = vmax.xlane.f32.xlu1 %v12593_v51  ;;  %1247 = vmax.xlane.f32.xlu0 %v12595_v61  ;;  %v12601_v2 = vadd.f32 %v1189_v15, %v1098_v17  ;;  %v1108_v17 = vld [vmem:[#allocation4 + $0x178] sm:$0xff] }
 0x2c1   :  { %v10073_v4 = vpop.f32.mrf.mxu1 }
 0x2c2   :  { %v12599_v29 = vadd.f32 %v10073_v4, %v1103_v3  ;;  %v1105_v3 = vld [vmem:[#allocation4 + $0x160] sm:$0xff] }
 0x2c3   :  { %v1202_v12 = vpop.f32.mrf.mxu1 }
 0x2c4   :  { %1253 = vmax.xlane.f32.xlu1 %v12599_v29  ;;  %1243 = vmax.xlane.f32.xlu0 %v12601_v2  ;;  %v12605_v20 = vadd.f32 %v1202_v12, %v1101_v53 }
 0x2c5   :  { %v10074_v52 = vpop.f32.mrf.mxu1 }
 0x2c6   :  { %v12607_v21 = vadd.f32 %v10074_v52, %v1104_v1  ;;  %v1106_v52 = vld [vmem:[#allocation4 + $0x168] sm:$0xff] }
 0x2c7   :  { %v1205_v47 = vpop.f32.mrf.mxu1 }
 0x2c8   :  { %1249 = vmax.xlane.f32.xlu1 %v12605_v20  ;;  %1255 = vmax.xlane.f32.xlu0 %v12607_v21  ;;  %v12613_v25 = vadd.f32 %v1205_v47, %v1102_v7 }
 0x2c9   :  { %v10077_v24 = vpop.f32.mrf.mxu1 }
 0x2ca   :  { %v12611_v5 = vadd.f32 %v10077_v24, %v1107_v31  ;;  %17100 = vst [vmem:[#allocation42_spill] sm:$0xff] %v12613_v25 }
 0x2cb   :  { %v1218_v15 = vpop.f32.mrf.mxu1 }
 0x2cc   :  { %1261 = vmax.xlane.f32.xlu1 %v12611_v5  ;;  %1251 = vmax.xlane.f32.xlu0 %v12613_v25  ;;  %v12617_v12 = vadd.f32 %v1218_v15, %v1105_v3  ;;  %v9189_v15 = vld [vmem:[%s16940_s3 + $0x2] ss:$0 sm:$0xff] }
 0x2cd   :  { %v10078_v4 = vpop.f32.mrf.mxu1 }
 0x2ce   :  { %v12619_v53 = vadd.f32 %v10078_v4, %v1108_v17 }
 0x2cf   :  { %v1221_v1 = vpop.f32.mrf.mxu1 }
 0x2d0   :  { %17101 = vst [vmem:[#allocation43_spill] sm:$0xff] %v12619_v53  ;;  %1257 = vmax.xlane.f32.xlu1 %v12617_v12  ;;  %1263 = vmax.xlane.f32.xlu0 %v12619_v53  ;;  %v12623_v31 = vadd.f32 %v1221_v1, %v1106_v52  ;;  %v10969_v1 = vld [vmem:[%s16939_s2 + $0x30] sm:$0xff]   ;;  %v234_v52 = vadd.f32 %v12327_v38, %v12505_v19  ;;  %v17103_v38 = vmov 0.0  }
 0x2d1   :  { %v10105_v47 = vpop.f32.mrf.mxu1  ;;  %10037 = vmatprep.mubr.msk.bf16.mxu0 %vm12126_vm3, %v17103_v38 }
 0x2d2   :  { %17102 = vst [vmem:[#allocation44_spill] sm:$0xff] %v12623_v31  ;;  %v1542_v62 = vadd.f32 %v10105_v47, %v9189_v15 }
 0x2d3   :  { %v1533_v7 = vpop.f32.mrf.mxu1 }
 0x2d4   :  { %1259 = vmax.xlane.f32.xlu0 %v12623_v31  ;;  %v1534_v4 = vadd.f32 %v9189_v15, %v1533_v7 }
 0x2d5   :  { %v10106_v24 = vpop.f32.mrf.mxu1 }
 0x2d6   :  { %v1545_v3 = vadd.f32 %v10106_v24, %v9189_v15 }
 0x2d7   :  { %v1536_v17 = vpop.f32.mrf.mxu1 }
 0x2d8   :  { %v1537_v59 = vadd.f32 %v9189_v15, %v1536_v17  ;;  %v1597_v43 = vpack.c.bf16 %v1545_v3, %v1542_v62  ;;  %v2121_v3 = vpack.c.bf16 %v234_v52, %v234_v52 }
 0x2d9   :  { %v10109_v45 = vpop.f32.mrf.mxu1 }
 0x2da   :  { %v1596_v60 = vpack.c.bf16 %v1537_v59, %v1534_v4  ;;  %v68_v59 = vld [vmem:[%s16942_s5 + $0x20] sm:$0xff]  ;;  %v1558_v17 = vadd.f32 %v10109_v45, %v9189_v15 }
 0x2db   :  { %v1549_v57 = vpop.f32.mrf.mxu1 }
 0x2dc   :  { %10121 = vmatprep.mubr.msk.bf16.mxu1 %vm591_vm2, %v1596_v60  ;;  %v1550_v7 = vadd.f32 %v9189_v15, %v1549_v57 }
 0x2dd   :  { %v10110_v41 = vpop.f32.mrf.mxu1  ;;  %10122 = vmatmul.mubr.msk.bf16.vlgmr.msra.gmra.mxu1 %vm591_vm2, %v1597_v43 }
 0x2de   :  { %10158 = vmatpush3.bf16.msra.mxu1 %v12515_v11  ;;  %v1561_v62 = vadd.f32 %v10110_v41, %v9189_v15 }
 0x2df   :  { %v1552_v47 = vpop.f32.mrf.mxu1  ;;  %10159 = vmatprep.subr.bf16.mxu1 %v10969_v1 }
 0x2e0   :  { %v1553_v24 = vadd.f32 %v9189_v15, %v1552_v47  ;;  %v1599_v43 = vpack.c.bf16 %v1561_v62, %v1558_v17 }
 0x2e1   :  { %v10113_v60 = vpop.f32.mrf.mxu1  ;;  %94 = vperm.xlu1 %10937, %v68_v59  }
 0x2e2   :  { %v1598_v4 = vpack.c.bf16 %v1553_v24, %v1550_v7  ;;  %10160 = vmatpush3.bf16.msra.mxu1 %v10969_v1  ;;  %v1574_v59 = vadd.f32 %v10113_v60, %v9189_v15 }
 0x2e3   :  { %10914 = vmatprep.subr.msk.bf16.mxu1 %vm616_vm1, %v2121_v3  ;;  %v1565_v11 = vpop.f32.mrf.mxu1 }
 0x2e4   :  { %10125 = vmatprep.mubr.msk.bf16.mxu1 %vm591_vm2, %v1598_v4  ;;  %v1566_v45 = vadd.f32 %v9189_v15, %v1565_v11 }
 0x2e5   :  { %v10114_v41 = vpop.f32.mrf.mxu1  ;;  %10126 = vmatmul.mubr.msk.bf16.gmra.mxu1 %vm591_vm2, %v1599_v43 }
 0x2e6   :  { %v1577_v57 = vadd.f32 %v10114_v41, %v9189_v15 }
 0x2e7   :  { %v1568_v52 = vpop.f32.mrf.mxu1 }
 0x2e8   :  { %v1569_v47 = vadd.f32 %v9189_v15, %v1568_v52  ;;  %v1601_v24 = vpack.c.bf16 %v1577_v57, %v1574_v59 }
 0x2e9   :  { %v10117_v7 = vpop.f32.mrf.mxu1 }
 0x2ea   :  { %v1600_v1 = vpack.c.bf16 %v1569_v47, %v1566_v45  ;;  %v1590_v41 = vadd.f32 %v10117_v7, %v9189_v15  ;;  %v12045_v47 = vld [vmem:[%s16937_s0 + $0x8] sm:$0xff]   ;;  %v12046_v7 = vld [vmem:[%s16937_s0 + $0x10] sm:$0xff]  }
 0x2eb   :  { %v1581_v55 = vpop.f32.mrf.mxu1 }
 0x2ec   :  { %10129 = vmatprep.mubr.msk.bf16.mxu1 %vm591_vm2, %v1600_v1  ;;  %v1582_v39 = vadd.f32 %v9189_v15, %v1581_v55  ;;  %v12044_v55 = vld [vmem:[%s16937_s0] sm:$0xff]  }
 0x2ed   :  { %v10118_v62 = vpop.f32.mrf.mxu1  ;;  %10130 = vmatmul.mubr.msk.bf16.gmra.mxu1 %vm591_vm2, %v1601_v24  ;;  %v12647_v17 = vpop.xlane.xlu1 %801 }
 0x2ee   :  { %v1593_v4 = vadd.f32 %v10118_v62, %v9189_v15 }
 0x2ef   :  { %v1584_v46 = vpop.f32.mrf.mxu1 }
 0x2f0   :  { %v1585_v43 = vadd.f32 %v9189_v15, %v1584_v46  ;;  %v1603_v52 = vpack.c.bf16 %v1593_v4, %v1590_v41  ;;  %v2166_v15 = vsel %vm616_vm1, %v2121_v3, 0  ;;  %v12047_v3 = vld [vmem:[%s16937_s0 + $0x18] sm:$0xff]  }
 0x2f1   :  { %v12649_v19 = vpop.xlane.xlu0 %803 }
 0x2f2   :  { %v1602_v11 = vpack.c.bf16 %v1585_v43, %v1582_v39  ;;  %v12651_v60 = vpop.xlane.xlu1 %797  ;;  %v12048_v43 = vld [vmem:[%s16937_s0 + $0x20] sm:$0xff]  }
 0x2f4   :  { %10133 = vmatprep.mubr.msk.bf16.mxu1 %vm591_vm2, %v1602_v11 }
 0x2f5   :  { %10134 = vmatmul.mubr.msk.bf16.gmra.mxu1 %vm591_vm2, %v1603_v52  ;;  %v12655_v57 = vpop.xlane.xlu0 %799  ;;  %v12049_v52 = vld [vmem:[%s16937_s0 + $0x28] sm:$0xff]  }
 0x2f6   :  { %v12657_v45 = vpop.xlane.xlu1 %809  ;;  %10161 = vmatprep.mubr.msk.bf16.mxu1 %vm172_vm0, %v12044_v55 }
 0x2f9   :  { %v12663_v46 = vpop.xlane.xlu0 %811 }
 0x2fa   :  { %v12665_v39 = vpop.xlane.xlu1 %805 }
 0x2fd   :  { %10162 = vmatmul.mubr.msk.bf16.vlgmr.msra.gmra.mxu1 %vm172_vm0, %v12045_v47  ;;  %v12672_v59 = vpop.xlane.xlu0 %807 }
 0x2fe   :  { %10178 = vmatpush3.bf16.msra.mxu1 %v2166_v15  ;;  %10165 = vmatprep.mubr.msk.bf16.mxu1 %vm172_vm0, %v12046_v7  ;;  %v818_v1 = vpop.xlane.xlu1 %817  ;;  %v12050_v15 = vld [vmem:[%s16937_s0 + $0x30] sm:$0xff]  }
 0x301   :  { %v820_v24 = vpop.xlane.xlu0 %819 }
 0x302   :  { %v814_v62 = vpop.xlane.xlu1 %813 }
 0x305   :  { %10166 = vmatmul.mubr.msk.bf16.gmra.mxu1 %vm172_vm0, %v12047_v3  ;;  %v816_v4 = vpop.xlane.xlu0 %815 }
 0x306   :  { %10169 = vmatprep.mubr.msk.bf16.mxu1 %vm172_vm0, %v12048_v43 }
 0x309   :  { %v826_v41 = vpop.xlane.xlu1 %825 }
 0x30a   :  { %v828_v11 = vpop.xlane.xlu0 %827  ;;  %11052 = vrcp.f32 %v826_v41 }
 0x30b   :  { %11054 = vrcp.f32 %v828_v11 }
 0x30d   :  { %10170 = vmatmul.mubr.msk.bf16.gmra.mxu1 %vm172_vm0, %v12049_v52  ;;  %v822_v55 = vpop.xlane.xlu1 %821 }
 0x30e   :  { %11056 = vrcp.f32 %v822_v55  ;;  %10173 = vmatprep.mubr.msk.bf16.mxu1 %vm172_vm0, %v12050_v15 }
 0x30f   :  { %11058 = vrcp.f32 %v820_v24 }
 0x311   :  { %v824_v47 = vpop.xlane.xlu0 %823 }
 0x312   :  { %11060 = vrcp.f32 %v824_v47 }
 0x313   :  { %11062 = vrcp.f32 %v818_v1 }
 0x314   :  { %11064 = vrcp.f32 %v816_v4 }
 0x315   :  { %10174 = vmatmul.mubr.msk.bf16.gmra.mxu1 %vm172_vm0, %v12307_v26  ;;  %11066 = vrcp.f32 %v814_v62 }
 0x316   :  { %11068 = vrcp.f32 %v12663_v46 }
 0x317   :  { %v11053_v7 = vpop.eup %11052  ;;  %11070 = vrcp.f32 %v12657_v45 }
 0x318   :  { %v11055_v3 = vpop.eup %11054  ;;  %v859_v43 = vmul.f32 %v11053_v7, %v826_v41  ;;  %11072 = vrcp.f32 %v12672_v59 }
 0x319   :  { %v860_v52 = vmul.f32 %v11055_v3, %v828_v11  ;;  %11074 = vrcp.f32 %v12665_v39 }
 0x31a   :  { %v875_v44 = vsub.f32 2.0, %v859_v43  ;;  %11076 = vrcp.f32 %v12649_v19 }
 0x31b   :  { %v11057_v37 = vpop.eup %11056  ;;  %v876_v18 = vsub.f32 2.0, %v860_v52  ;;  %11078 = vrcp.f32 %v12647_v17 }
 0x31c   :  { %v891_v42 = vmul.f32 %v11053_v7, %v875_v44  ;;  %v857_v35 = vmul.f32 %v11057_v37, %v822_v55  ;;  %v11059_v15 = vpop.eup %11058  ;;  %11080 = vrcp.f32 %v12655_v57 }
 0x31d   :  { %v892_v58 = vmul.f32 %v11055_v3, %v876_v18  ;;  %v856_v41 = vmul.f32 %v11059_v15, %v820_v24  ;;  %11082 = vrcp.f32 %v12651_v60 }
 0x31e   :  { %v907_v30 = vmul.f32 %v12565_v33, %v891_v42  ;;  %v873_v27 = vsub.f32 2.0, %v857_v35 }
 0x31f   :  { %v11061_v31 = vpop.eup %11060  ;;  %v908_v53 = vmul.f32 %v12567_v32, %v892_v58  ;;  %v872_v42 = vsub.f32 2.0, %v856_v41 }
 0x320   :  { %v11063_v26 = vpop.eup %11062  ;;  %v858_v40 = vmul.f32 %v11061_v31, %v824_v47  ;;  %v889_v43 = vmul.f32 %v11057_v37, %v873_v27 }
 0x321   :  { %v916_v11 = vpack.c.bf16 %v908_v53, %v907_v30  ;;  %v855_v44 = vmul.f32 %v11063_v26, %v818_v1  ;;  %v11065_v35 = vpop.eup %11064  ;;  %v888_v27 = vmul.f32 %v11059_v15, %v872_v42 }
 0x322   :  { %v874_v25 = vsub.f32 2.0, %v858_v40  ;;  %v905_v33 = vmul.f32 %v12571_v0, %v889_v43  ;;  %v11067_v55 = vpop.eup %11066  ;;  %v854_v30 = vmul.f32 %v11065_v35, %v816_v4 }
 0x323   :  { %10022 = vmatpush3.bf16.xpose.msra.mxu0 %v916_v11  ;;  %v871_v32 = vsub.f32 2.0, %v855_v44  ;;  %v853_v40 = vmul.f32 %v11067_v55, %v814_v62  ;;  %v11069_v0 = vpop.eup %11068 }
 0x324   :  { %v890_v18 = vmul.f32 %v11061_v31, %v874_v25  ;;  %10023 = vmatprep.subr.bf16.mxu0 %v17103_v38  ;;  %v904_v25 = vmul.f32 %v12556_v48, %v888_v27  ;;  %v870_v53 = vsub.f32 2.0, %v854_v30  ;;  %v11071_v1 = vpop.eup %11070  ;;  %v852_v24 = vmul.f32 %v11069_v0, %v12663_v46 }
 0x325   :  { %v887_v37 = vmul.f32 %v11063_v26, %v871_v32  ;;  %v869_v31 = vsub.f32 2.0, %v853_v40  ;;  %v851_v62 = vmul.f32 %v11071_v1, %v12657_v45 }
 0x326   :  { %v906_v58 = vmul.f32 %v12574_v10, %v890_v18  ;;  %v886_v4 = vmul.f32 %v11065_v35, %v870_v53  ;;  %v868_v48 = vsub.f32 2.0, %v852_v24 }
 0x327   :  { %v903_v10 = vmul.f32 %v12551_v8, %v887_v37  ;;  %v885_v3 = vmul.f32 %v11067_v55, %v869_v31  ;;  %v11073_v8 = vpop.eup %11072  ;;  %v867_v15 = vsub.f32 2.0, %v851_v62 }
 0x328   :  { %v915_v47 = vpack.c.bf16 %v906_v58, %v905_v33  ;;  %v902_v52 = vmul.f32 %v12562_v6, %v886_v4  ;;  %v11075_v41 = vpop.eup %11074  ;;  %v884_v46 = vmul.f32 %v11069_v0, %v868_v48  ;;  %v850_v11 = vmul.f32 %v11073_v8, %v12672_v59 }
 0x329   :  { %v914_v7 = vpack.c.bf16 %v904_v25, %v903_v10  ;;  %v901_v26 = vmul.f32 %v12558_v16, %v885_v3  ;;  %v883_v45 = vmul.f32 %v11071_v1, %v867_v15  ;;  %v849_v44 = vmul.f32 %v11075_v41, %v12665_v39  ;;  %v11077_v16 = vpop.eup %11076 }
 0x32a   :  { %v900_v6 = vmul.f32 %v12542_v9, %v884_v46  ;;  %v866_v18 = vsub.f32 2.0, %v850_v11  ;;  %v11079_v59 = vpop.eup %11078  ;;  %v848_v55 = vmul.f32 %v11077_v16, %v12649_v19 }
 0x32b   :  { %10024 = vmatpush3.bf16.xpose.msra.mxu0 %v915_v47  ;;  %v913_v43 = vpack.c.bf16 %v902_v52, %v901_v26  ;;  %v899_v33 = vmul.f32 %v12536_v34, %v883_v45  ;;  %v865_v58 = vsub.f32 2.0, %v849_v44  ;;  %v847_v9 = vmul.f32 %v11079_v59, %v12647_v17  ;;  %v11081_v10 = vpop.eup %11080 }
 0x32c   :  { %10025 = vmatprep.subr.bf16.mxu0 %v17103_v38  ;;  %v882_v47 = vmul.f32 %v11073_v8, %v866_v18  ;;  %v864_v34 = vsub.f32 2.0, %v848_v55  ;;  %v11083_v17 = vpop.eup %11082 }
 0x32d   :  { %v912_v30 = vpack.c.bf16 %v900_v6, %v899_v33  ;;  %v881_v40 = vmul.f32 %v11075_v41, %v865_v58  ;;  %v863_v1 = vsub.f32 2.0, %v847_v9  ;;  %v845_v8 = vmul.f32 %v11083_v17, %v12651_v60 }
 0x32e   :  { %v898_v53 = vmul.f32 %v12549_v28, %v882_v47  ;;  %v880_v4 = vmul.f32 %v11077_v16, %v864_v34 }
 0x32f   :  { %v879_v52 = vmul.f32 %v11079_v59, %v863_v1  ;;  %v861_v45 = vsub.f32 2.0, %v845_v8 }
 0x331   :  { %v895_v60 = vmul.f32 %v12522_v63, %v879_v52 }
 0x333   :  { %10026 = vmatpush3.bf16.xpose.msra.mxu0 %v914_v7  ;;  %v846_v7 = vmul.f32 %v11081_v10, %v12655_v57  ;;  %v896_v57 = vmul.f32 %v12527_v56, %v880_v4 }
 0x334   :  { %10027 = vmatprep.subr.bf16.mxu0 %v17103_v38 }
 0x335   :  { %v862_v26 = vsub.f32 2.0, %v846_v7  ;;  %v17108_v7 = vld [vmem:[#allocation44_spill] sm:$0xff] }
 0x337   :  { %v878_v6 = vmul.f32 %v11081_v10, %v862_v26  ;;  %v17107_v10 = vld [vmem:[#allocation43_spill] sm:$0xff]  ;;  %v1611_v26 = vld [vmem:[#allocation4 + $0x210] sm:$0xff] }
 0x339   :  { %v894_v58 = vmul.f32 %v12534_v50, %v878_v6  ;;  %v1615_v6 = vld [vmem:[#allocation4 + $0x230] sm:$0xff] }
 0x33b   :  { %10028 = vmatpush3.bf16.xpose.msra.mxu0 %v913_v43 }
 0x33c   :  { %10029 = vmatprep.subr.bf16.mxu0 %v17103_v38 }
 0x33d   :  { %v1238_v42 = vpop.xlane.xlu1 %1237 }
 0x33e   :  { %v1267_v35 = vsub.f32 %v12578_v49, %v1238_v42  ;;  %v910_v42 = vpack.c.bf16 %v896_v57, %v895_v60  ;;  %v1612_v60 = vld [vmem:[#allocation4 + $0x218] sm:$0xff] }
 0x340   :  { %v1285_v32 = vmul.f32 1.442695, %v1267_v35 }
 0x341   :  { %v1240_v27 = vpop.xlane.xlu0 %1239  ;;  %v1234_v39 = vpop.xlane.xlu1 %1233 }
 0x342   :  { %11084 = vpow2.f32 %v1285_v32  ;;  %v1265_v37 = vsub.f32 %v12581_v36, %v1234_v39  ;;  %v1268_v25 = vsub.f32 %v12583_v13, %v1240_v27  ;;  %v897_v36 = vmul.f32 %v12544_v54, %v881_v40  ;;  %v12734_v13 = vld [vmem:[%s16939_s2 + $0x8] sm:$0xff]  }
 0x343   :  { %10030 = vmatpush3.bf16.xpose.msra.mxu0 %v912_v30  ;;  %10215 = vmatprep.subr.bf16.mxu1 %v12734_v13 }
 0x344   :  { %v1281_v49 = vmul.f32 1.442695, %v1265_v37  ;;  %10031 = vmatprep.subr.bf16.mxu0 %v17103_v38  ;;  %v1287_v24 = vmul.f32 1.442695, %v1268_v25  ;;  %v911_v3 = vpack.c.bf16 %v898_v53, %v897_v36 }
 0x345   :  { %v1236_v19 = vpop.xlane.xlu0 %1235  ;;  %v1246_v0 = vpop.xlane.xlu1 %1245 }
 0x346   :  { %v1266_v31 = vsub.f32 %v12589_v23, %v1236_v19  ;;  %11086 = vpow2.f32 %v1281_v49  ;;  %v1271_v48 = vsub.f32 %v12587_v22, %v1246_v0 }
 0x347   :  { %11088 = vpow2.f32 %v1287_v24 }
 0x348   :  { %v1283_v23 = vmul.f32 1.442695, %v1266_v31  ;;  %v1293_v11 = vmul.f32 1.442695, %v1271_v48 }
 0x349   :  { %v1248_v28 = vpop.xlane.xlu0 %1247  ;;  %v1242_v62 = vpop.xlane.xlu1 %1241 }
 0x34a   :  { %v1269_v54 = vsub.f32 %v12593_v51, %v1242_v62  ;;  %11090 = vpow2.f32 %v1283_v23  ;;  %v1272_v43 = vsub.f32 %v12595_v61, %v1248_v28 }
 0x34b   :  { %10032 = vmatpush3.bf16.xpose.msra.mxu0 %v911_v3 }
 0x34c   :  { %v1289_v15 = vmul.f32 1.442695, %v1269_v54  ;;  %10033 = vmatprep.subr.bf16.mxu0 %v17103_v38  ;;  %v1295_v16 = vmul.f32 1.442695, %v1272_v43 }
 0x34d   :  { %v1244_v41 = vpop.xlane.xlu0 %1243  ;;  %v1254_v46 = vpop.xlane.xlu1 %1253 }
 0x34e   :  { %v1275_v22 = vsub.f32 %v12599_v29, %v1254_v46  ;;  %11092 = vpow2.f32 %v1289_v15  ;;  %v1270_v35 = vsub.f32 %v12601_v2, %v1244_v41  ;;  %v877_v29 = vmul.f32 %v11083_v17, %v861_v45  ;;  %v1609_v46 = vld [vmem:[#allocation4 + $0x200] sm:$0xff] }
 0x34f   :  { %v12745_v51 = vpop.eup %11084  ;;  %11094 = vpow2.f32 %v1293_v11 }
 0x350   :  { %v1301_v44 = vmul.f32 1.442695, %v1275_v22  ;;  %1317 = vadd.xlane.f32.xlu0 %v12745_v51  ;;  %v1291_v55 = vmul.f32 1.442695, %v1270_v35  ;;  %v893_v47 = vmul.f32 %v12529_v14, %v877_v29 }
 0x351   :  { %v1256_v56 = vpop.xlane.xlu0 %1255  ;;  %v1250_v18 = vpop.xlane.xlu1 %1249 }
 0x352   :  { %v1273_v61 = vsub.f32 %v12605_v20, %v1250_v18  ;;  %11096 = vpow2.f32 %v1301_v44  ;;  %v1276_v2 = vsub.f32 %v12607_v21, %v1256_v56  ;;  %v909_v50 = vpack.c.bf16 %v894_v58, %v893_v47  ;;  %v17104_v21 = vld [vmem:[#allocation42_spill] sm:$0xff]  ;;  %v1614_v47 = vld [vmem:[#allocation4 + $0x228] sm:$0xff] }
 0x353   :  { %10034 = vmatpush3.bf16.xpose.msra.mxu0 %v910_v42  ;;  %v12751_v33 = vpop.eup %11086  ;;  %11098 = vpow2.f32 %v1295_v16  ;;  %v1610_v42 = vld [vmem:[#allocation4 + $0x208] sm:$0xff] }
 0x354   :  { %v1297_v63 = vmul.f32 1.442695, %v1273_v61  ;;  %10035 = vmatprep.subr.bf16.mxu0 %v17103_v38  ;;  %1313 = vadd.xlane.f32.xlu0 %v12751_v33  ;;  %v12759_v27 = vpop.eup %11088  ;;  %v1303_v37 = vmul.f32 1.442695, %v1276_v2  ;;  %v1613_v61 = vld [vmem:[#allocation4 + $0x220] sm:$0xff] }
 0x355   :  { %v1252_v59 = vpop.xlane.xlu0 %1251  ;;  %v1262_v32 = vpop.xlane.xlu1 %1261 }
 0x356   :  { %v1279_v20 = vsub.f32 %v12611_v5, %v1262_v32  ;;  %11100 = vpow2.f32 %v1297_v63  ;;  %v1274_v49 = vsub.f32 %v17104_v21, %v1252_v59  ;;  %v1616_v63 = vld [vmem:[#allocation4 + $0x238] sm:$0xff] }
 0x357   :  { %11102 = vpow2.f32 %v1291_v55  ;;  %v12763_v25 = vpop.eup %11090  ;;  %v1619_v55 = vld [vmem:[#allocation4 + $0x250] sm:$0xff] }
 0x358   :  { %v1309_v39 = vmul.f32 1.442695, %v1279_v20  ;;  %1319 = vadd.xlane.f32.xlu0 %v12759_v27  ;;  %v1299_v0 = vmul.f32 1.442695, %v1274_v49 }
 0x359   :  { %v1258_v30 = vpop.xlane.xlu1 %1257  ;;  %v1264_v9 = vpop.xlane.xlu0 %1263 }
 0x35a   :  { %v1277_v40 = vsub.f32 %v12617_v12, %v1258_v30  ;;  %11104 = vpow2.f32 %v1309_v39  ;;  %v17106_v12 = vld [vmem:[#allocation15_spill] sm:$0xff]  ;;  %v1280_v31 = vsub.f32 %v17107_v10, %v1264_v9  ;;  %v1620_v9 = vld [vmem:[#allocation4 + $0x258] sm:$0xff] }
 0x35b   :  { %10036 = vmatpush3.bf16.xpose.msra.mxu0 %v909_v50  ;;  %v12766_v14 = vpop.eup %11092  ;;  %11106 = vpow2.f32 %v1303_v37  ;;  %v1617_v50 = vld [vmem:[#allocation4 + $0x240] sm:$0xff] }
 0x35c   :  { %v1305_v5 = vmul.f32 1.442695, %v1277_v40  ;;  %10079 = vmatprep.subr.bf16.mxu0 %v17103_v38  ;;  %1315 = vadd.xlane.f32.xlu0 %v12763_v25  ;;  %v12775_v19 = vpop.eup %11094  ;;  %v1311_v4 = vmul.f32 1.442695, %v1280_v31 }
 0x35d   :  { %1321 = vadd.xlane.f32.xlu1 %v12766_v14  ;;  %v12771_v34 = vpop.permute.xlu1 %94  ;;  %v1260_v36 = vpop.xlane.xlu0 %1259 }
 0x35e   :  { %17105 = vst [vmem:[#allocation42_spill] sm:$0xff] %v12771_v34  ;;  %v240_v53 = vadd.f32 %v17106_v12, %v12771_v34  ;;  %11108 = vpow2.f32 %v1305_v5  ;;  %v1278_v28 = vsub.f32 %v17108_v7, %v1260_v36  ;;  %v1623_v5 = vld [vmem:[#allocation4 + $0x270] sm:$0xff]  ;;  %v1621_v36 = vld [vmem:[#allocation4 + $0x260] sm:$0xff] }
 0x35f   :  { %v12778_v1 = vpop.eup %11096  ;;  %11110 = vpow2.f32 %v1299_v0  ;;  %v1618_v0 = vld [vmem:[#allocation4 + $0x248] sm:$0xff] }
 0x360   :  { %v574_v24 = vpack.c.bf16 %v240_v53, %v240_v53  ;;  %1325 = vadd.xlane.f32.xlu0 %v12775_v19  ;;  %v12782_v17 = vpop.eup %11098  ;;  %11112 = vpow2.f32 %v1311_v4  ;;  %v1307_v23 = vmul.f32 1.442695, %v1278_v28  ;;  %v1624_v4 = vld [vmem:[#allocation4 + $0x278] sm:$0xff] }
 0x361   :  { %1333 = vadd.xlane.f32.xlu1 %v12778_v1 }
 0x362   :  { %10038 = vmatmul.mubr.bf16.vlgmr.msra.gmra.mxu0 %v574_v24  ;;  %11114 = vpow2.f32 %v1307_v23 }
 0x363   :  { %10095 = vmatprep.mubr.msk.bf16.mxu0 %vm12126_vm3, %v17103_v38  ;;  %v12787_v62 = vpop.eup %11100 }
 0x364   :  { %1327 = vadd.xlane.f32.xlu0 %v12782_v17  ;;  %v12791_v3 = vpop.eup %11102 }
 0x365   :  { %1329 = vadd.xlane.f32.xlu1 %v12787_v62 }
 0x367   :  { %v12793_v48 = vpop.eup %11104 }
 0x368   :  { %1323 = vadd.xlane.f32.xlu0 %v12791_v3  ;;  %v12797_v54 = vpop.eup %11106 }
 0x369   :  { %1341 = vadd.xlane.f32.xlu1 %v12793_v48 }
 0x36b   :  { %v12799_v52 = vpop.eup %11108 }
 0x36c   :  { %1335 = vadd.xlane.f32.xlu0 %v12797_v54  ;;  %v12803_v8 = vpop.eup %11110 }
 0x36d   :  { %1337 = vadd.xlane.f32.xlu1 %v12799_v52  ;;  %v12806_v15 = vpop.eup %11112 }
 0x36f   :  { %v12809_v57 = vpop.eup %11114 }
 0x370   :  { %1331 = vadd.xlane.f32.xlu0 %v12803_v8 }
 0x374   :  { %1343 = vadd.xlane.f32.xlu0 %v12806_v15 }
 0x378   :  { %1339 = vadd.xlane.f32.xlu0 %v12809_v57 }
 0x39d   :  { %v10123_v41 = vpop.f32.mrf.mxu1 }
 0x39e   :  { %v12812_v11 = vadd.f32 %v10123_v41, %v1611_v26 }
 0x39f   :  { %v1686_v43 = vpop.f32.mrf.mxu1 }
 0x3a0   :  { %v12814_v22 = vadd.f32 %v1686_v43, %v1609_v46  ;;  %1753 = vmax.xlane.f32.xlu1 %v12812_v11  ;;  %v1622_v46 = vld [vmem:[#allocation4 + $0x268] sm:$0xff] }
 0x3a1   :  { %v10124_v45 = vpop.f32.mrf.mxu1 }
 0x3a2   :  { %17109 = vst [vmem:[#allocation15_spill] sm:$0xff] %v12814_v22  ;;  %1749 = vmax.xlane.f32.xlu0 %v12814_v22  ;;  %v12818_v56 = vadd.f32 %v10124_v45, %v1612_v60 }
 0x3a3   :  { %v1689_v44 = vpop.f32.mrf.mxu1 }
 0x3a4   :  { %v12824_v29 = vadd.f32 %v1689_v44, %v1610_v42  ;;  %v9213_v44 = vld [vmem:[%s16940_s3 + $0x3] ss:$0 sm:$0xff] }
 0x3a5   :  { %v10127_v18 = vpop.f32.mrf.mxu1 }
 0x3a6   :  { %v12820_v16 = vadd.f32 %v10127_v18, %v1615_v6  ;;  %1755 = vmax.xlane.f32.xlu0 %v12818_v56  ;;  %17110 = vst [vmem:[#allocation43_spill] sm:$0xff] %v12824_v29 }
 0x3a7   :  { %v1702_v35 = vpop.f32.mrf.mxu1 }
 0x3a8   :  { %1761 = vmax.xlane.f32.xlu1 %v12820_v16  ;;  %v12826_v59 = vadd.f32 %v1702_v35, %v1613_v61 }
 0x3a9   :  { %v10128_v58 = vpop.f32.mrf.mxu1 }
 0x3aa   :  { %17111 = vst [vmem:[#allocation44_spill] sm:$0xff] %v12826_v59  ;;  %1751 = vmax.xlane.f32.xlu0 %v12824_v29  ;;  %v12829_v2 = vadd.f32 %v10128_v58, %v1616_v63 }
 0x3ab   :  { %v1705_v32 = vpop.f32.mrf.mxu1 }
 0x3ac   :  { %1757 = vmax.xlane.f32.xlu1 %v12826_v59  ;;  %v12836_v37 = vadd.f32 %v1705_v32, %v1614_v47  ;;  %v17112_v47 = vld [vmem:[#allocation10_spill] sm:$0xff] }
 0x3ad   :  { %v10131_v20 = vpop.f32.mrf.mxu1 }
 0x3ae   :  { %v12832_v39 = vadd.f32 %v10131_v20, %v1619_v55  ;;  %1763 = vmax.xlane.f32.xlu0 %v12829_v2  ;;  %v10971_v20 = vld [vmem:[%s16939_s2] sm:$0xff]  }
 0x3af   :  { %v1718_v30 = vpop.f32.mrf.mxu1 }
 0x3b0   :  { %1769 = vmax.xlane.f32.xlu1 %v12832_v39  ;;  %v12838_v21 = vadd.f32 %v1718_v30, %v1617_v50  ;;  %v17113_v30 = vld [vmem:[#allocation11_spill] sm:$0xff] }
 0x3b1   :  { %v10132_v40 = vpop.f32.mrf.mxu1  ;;  %v222_v50 = vadd.f32 %v17113_v30, %v17112_v47 }
 0x3b2   :  { %1759 = vmax.xlane.f32.xlu0 %v12836_v37  ;;  %v12841_v12 = vadd.f32 %v10132_v40, %v1620_v9 }
 0x3b3   :  { %v1721_v49 = vpop.f32.mrf.mxu1 }
 0x3b4   :  { %1765 = vmax.xlane.f32.xlu1 %v12838_v21  ;;  %v12848_v24 = vadd.f32 %v1721_v49, %v1618_v0  ;;  %v2715_v0 = vpack.c.bf16 %v222_v50, %v222_v50 }
 0x3b5   :  { %v10135_v53 = vpop.f32.mrf.mxu1 }
 0x3b6   :  { %v12844_v10 = vadd.f32 %v10135_v53, %v1623_v5  ;;  %1771 = vmax.xlane.f32.xlu0 %v12841_v12 }
 0x3b7   :  { %v1734_v31 = vpop.f32.mrf.mxu1 }
 0x3b8   :  { %1777 = vmax.xlane.f32.xlu1 %v12844_v10  ;;  %v12850_v28 = vadd.f32 %v1734_v31, %v1621_v36 }
 0x3b9   :  { %v10136_v7 = vpop.f32.mrf.mxu1 }
 0x3ba   :  { %1767 = vmax.xlane.f32.xlu0 %v12848_v24  ;;  %v12853_v26 = vadd.f32 %v10136_v7, %v1624_v4 }
 0x3bb   :  { %v1737_v23 = vpop.f32.mrf.mxu1 }
 0x3bc   :  { %1773 = vmax.xlane.f32.xlu1 %v12850_v28  ;;  %v12857_v60 = vadd.f32 %v1737_v23, %v1622_v46 }
 0x3bd   :  { %v10163_v41 = vpop.f32.mrf.mxu1 }
 0x3be   :  { %1779 = vmax.xlane.f32.xlu0 %v12853_v26  ;;  %v2058_v61 = vadd.f32 %v10163_v41, %v9213_v44 }
 0x3bf   :  { %v2049_v43 = vpop.f32.mrf.mxu1 }
 0x3c0   :  { %v2050_v42 = vadd.f32 %v9213_v44, %v2049_v43 }
 0x3c1   :  { %v10164_v45 = vpop.f32.mrf.mxu1 }
 0x3c2   :  { %1775 = vmax.xlane.f32.xlu0 %v12857_v60  ;;  %v2061_v6 = vadd.f32 %v10164_v45, %v9213_v44 }
 0x3c3   :  { %v2052_v18 = vpop.f32.mrf.mxu1 }
 0x3c4   :  { %v2053_v35 = vadd.f32 %v9213_v44, %v2052_v18  ;;  %v2113_v32 = vpack.c.bf16 %v2061_v6, %v2058_v61 }
 0x3c5   :  { %v10167_v63 = vpop.f32.mrf.mxu1 }
 0x3c6   :  { %v2112_v58 = vpack.c.bf16 %v2053_v35, %v2050_v42  ;;  %v2074_v31 = vadd.f32 %v10167_v63, %v9213_v44 }
 0x3c7   :  { %v2065_v55 = vpop.f32.mrf.mxu1 }
 0x3c8   :  { %10179 = vmatprep.mubr.msk.bf16.mxu1 %vm591_vm2, %v2112_v58  ;;  %v2066_v5 = vadd.f32 %v9213_v44, %v2065_v55 }
 0x3c9   :  { %v10168_v9 = vpop.f32.mrf.mxu1  ;;  %10180 = vmatmul.mubr.msk.bf16.vlgmr.msra.gmra.mxu1 %vm591_vm2, %v2113_v32 }
 0x3ca   :  { %10216 = vmatpush3.bf16.msra.mxu1 %v12734_v13  ;;  %v2077_v40 = vadd.f32 %v10168_v9, %v9213_v44 }
 0x3cb   :  { %v2068_v49 = vpop.f32.mrf.mxu1  ;;  %10217 = vmatprep.subr.bf16.mxu1 %v10971_v20 }
 0x3cc   :  { %v2069_v53 = vadd.f32 %v9213_v44, %v2068_v49  ;;  %v2115_v7 = vpack.c.bf16 %v2077_v40, %v2074_v31  ;;  %v12883_v49 = vld [vmem:[%s16937_s0 + $0x40] sm:$0xff]  }
 0x3cd   :  { %v10171_v36 = vpop.f32.mrf.mxu1  ;;  %17114 = vst [vmem:[#allocation11_spill] sm:$0xff] %v12883_v49 }
 0x3ce   :  { %v2114_v4 = vpack.c.bf16 %v2069_v53, %v2066_v5  ;;  %10218 = vmatpush3.bf16.msra.mxu1 %v10971_v20  ;;  %v2090_v6 = vadd.f32 %v10171_v36, %v9213_v44 }
 0x3cf   :  { %10915 = vmatprep.subr.msk.bf16.mxu1 %vm616_vm1, %v2715_v0  ;;  %v2081_v23 = vpop.f32.mrf.mxu1 }
 0x3d0   :  { %10183 = vmatprep.mubr.msk.bf16.mxu1 %vm591_vm2, %v2114_v4  ;;  %v2082_v43 = vadd.f32 %v9213_v44, %v2081_v23  ;;  %v12903_v4 = vld [vmem:[%s16937_s0 + $0x50] sm:$0xff]  }
 0x3d1   :  { %v10172_v41 = vpop.f32.mrf.mxu1  ;;  %10184 = vmatmul.mubr.msk.bf16.gmra.mxu1 %vm591_vm2, %v2115_v7  ;;  %17116 = vst [vmem:[#allocation46_spill] sm:$0xff] %v12903_v4  ;;  %v2760_v7 = vsel %vm616_vm1, %v2715_v0, 0  ;;  %v12924_v0 = vld [vmem:[%s16937_s0 + $0x60] sm:$0xff]  }
 0x3d2   :  { %v2093_v13 = vadd.f32 %v10172_v41, %v9213_v44  ;;  %17118 = vst [vmem:[#allocation48_spill] sm:$0xff] %v12924_v0 }
 0x3d3   :  { %v2084_v46 = vpop.f32.mrf.mxu1 }
 0x3d4   :  { %v2085_v45 = vadd.f32 %v9213_v44, %v2084_v46  ;;  %v2117_v35 = vpack.c.bf16 %v2093_v13, %v2090_v6  ;;  %v12915_v13 = vld [vmem:[%s16937_s0 + $0x58] sm:$0xff]  }
 0x3d5   :  { %v10175_v18 = vpop.f32.mrf.mxu1  ;;  %17117 = vst [vmem:[#allocation47_spill] sm:$0xff] %v12915_v13 }
 0x3d6   :  { %v2116_v42 = vpack.c.bf16 %v2085_v45, %v2082_v43  ;;  %v2106_v50 = vadd.f32 %v10175_v18, %v9213_v44  ;;  %v12935_v18 = vld [vmem:[%s16937_s0 + $0x68] sm:$0xff]  }
 0x3d7   :  { %v2097_v61 = vpop.f32.mrf.mxu1  ;;  %17119 = vst [vmem:[#allocation49_spill] sm:$0xff] %v12935_v18 }
 0x3d8   :  { %10187 = vmatprep.mubr.msk.bf16.mxu1 %vm591_vm2, %v2116_v42  ;;  %v2098_v20 = vadd.f32 %v9213_v44, %v2097_v61 }
 0x3d9   :  { %v10176_v63 = vpop.f32.mrf.mxu1  ;;  %10188 = vmatmul.mubr.msk.bf16.gmra.mxu1 %vm591_vm2, %v2117_v35  ;;  %v12876_v58 = vpop.xlane.xlu0 %1317  ;;  %v12940_v35 = vld [vmem:[%s16937_s0 + $0x70] sm:$0xff]  }
 0x3da   :  { %v2109_v32 = vadd.f32 %v10176_v63, %v9213_v44  ;;  %17120 = vst [vmem:[#allocation50_spill] sm:$0xff] %v12940_v35 }
 0x3db   :  { %v2100_v55 = vpop.f32.mrf.mxu1 }
 0x3dc   :  { %v2101_v30 = vadd.f32 %v9213_v44, %v2100_v55  ;;  %v2119_v5 = vpack.c.bf16 %v2109_v32, %v2106_v50  ;;  %v12894_v44 = vld [vmem:[%s16937_s0 + $0x48] sm:$0xff]   ;;  %v12949_v32 = vld [vmem:[%s16937_s0 + $0x78] sm:$0xff]  }
 0x3dd   :  { %v12878_v40 = vpop.xlane.xlu0 %1313  ;;  %17115 = vst [vmem:[#allocation45_spill] sm:$0xff] %v12894_v44  ;;  %17121 = vst [vmem:[#allocation51_spill] sm:$0xff] %v12949_v32 }
 0x3de   :  { %v2118_v9 = vpack.c.bf16 %v2101_v30, %v2098_v20 }
 0x3e0   :  { %10191 = vmatprep.mubr.msk.bf16.mxu1 %vm591_vm2, %v2118_v9 }
 0x3e1   :  { %10192 = vmatmul.mubr.msk.bf16.gmra.mxu1 %vm591_vm2, %v2119_v5  ;;  %v12887_v53 = vpop.xlane.xlu0 %1319 }
 0x3e2   :  { %10219 = vmatprep.mubr.msk.bf16.mxu1 %vm172_vm0, %v12883_v49 }
 0x3e5   :  { %v12896_v31 = vpop.xlane.xlu0 %1315 }
 0x3e6   :  { %v12898_v36 = vpop.xlane.xlu1 %1321 }
 0x3e9   :  { %10220 = vmatmul.mubr.msk.bf16.vlgmr.msra.gmra.mxu1 %vm172_vm0, %v12894_v44  ;;  %v12908_v23 = vpop.xlane.xlu0 %1325 }
 0x3ea   :  { %10236 = vmatpush3.bf16.msra.mxu1 %v2760_v7  ;;  %v1334_v41 = vpop.xlane.xlu1 %1333  ;;  %10223 = vmatprep.mubr.msk.bf16.mxu1 %vm172_vm0, %v12903_v4 }
 0x3ed   :  { %v12917_v46 = vpop.xlane.xlu0 %1327 }
 0x3ee   :  { %v12919_v43 = vpop.xlane.xlu1 %1329 }
 0x3f1   :  { %10224 = vmatmul.mubr.msk.bf16.gmra.mxu1 %vm172_vm0, %v12915_v13  ;;  %v12928_v45 = vpop.xlane.xlu0 %1323 }
 0x3f2   :  { %10227 = vmatprep.mubr.msk.bf16.mxu1 %vm172_vm0, %v12924_v0  ;;  %v1342_v6 = vpop.xlane.xlu1 %1341 }
 0x3f3   :  { %11116 = vrcp.f32 %v1342_v6 }
 0x3f5   :  { %v1336_v42 = vpop.xlane.xlu0 %1335 }
 0x3f6   :  { %v1338_v63 = vpop.xlane.xlu1 %1337 }
 0x3f7   :  { %11118 = vrcp.f32 %v1338_v63 }
 0x3f9   :  { %10228 = vmatmul.mubr.msk.bf16.gmra.mxu1 %vm172_vm0, %v12935_v18  ;;  %v1332_v61 = vpop.xlane.xlu0 %1331 }
 0x3fa   :  { %10231 = vmatprep.mubr.msk.bf16.mxu1 %vm172_vm0, %v12940_v35 }
 0x3fd   :  { %v1344_v55 = vpop.xlane.xlu0 %1343 }
 0x3fe   :  { %11120 = vrcp.f32 %v1344_v55 }
 0x400   :  { %v11117_v30 = vpop.eup %11116 }
 0x401   :  { %10232 = vmatmul.mubr.msk.bf16.gmra.mxu1 %vm172_vm0, %v12949_v32  ;;  %v1340_v20 = vpop.xlane.xlu0 %1339  ;;  %v1375_v50 = vmul.f32 %v11117_v30, %v1342_v6 }
 0x402   :  { %11122 = vrcp.f32 %v1340_v20 }
 0x403   :  { %11124 = vrcp.f32 %v1336_v42  ;;  %v1391_v5 = vsub.f32 2.0, %v1375_v50 }
 0x404   :  { %11126 = vrcp.f32 %v1334_v41  ;;  %v11119_v9 = vpop.eup %11118 }
 0x405   :  { %11128 = vrcp.f32 %v1332_v61  ;;  %v1407_v47 = vmul.f32 %v11117_v30, %v1391_v5  ;;  %v1373_v35 = vmul.f32 %v11119_v9, %v1338_v63 }
 0x406   :  { %11130 = vrcp.f32 %v12919_v43 }
 0x407   :  { %v1423_v44 = vmul.f32 %v12793_v48, %v1407_v47  ;;  %v1389_v49 = vsub.f32 2.0, %v1373_v35  ;;  %11132 = vrcp.f32 %v12917_v46 }
 0x408   :  { %11134 = vrcp.f32 %v12908_v23 }
 0x409   :  { %11136 = vrcp.f32 %v12928_v45 }
 0x40a   :  { %11138 = vrcp.f32 %v12898_v36 }
 0x40b   :  { %v11121_v7 = vpop.eup %11120  ;;  %11140 = vrcp.f32 %v12887_v53 }
 0x40c   :  { %v1376_v34 = vmul.f32 %v11121_v7, %v1344_v55  ;;  %11142 = vrcp.f32 %v12876_v58 }
 0x40d   :  { %11144 = vrcp.f32 %v12896_v31 }
 0x40e   :  { %v1392_v18 = vsub.f32 2.0, %v1376_v34  ;;  %v1405_v34 = vmul.f32 %v11119_v9, %v1389_v49  ;;  %11146 = vrcp.f32 %v12878_v40 }
 0x40f   :  { %v11123_v0 = vpop.eup %11122 }
 0x410   :  { %v1408_v13 = vmul.f32 %v11121_v7, %v1392_v18  ;;  %v1374_v4 = vmul.f32 %v11123_v0, %v1340_v20  ;;  %v11125_v32 = vpop.eup %11124 }
 0x411   :  { %v11127_v29 = vpop.eup %11126  ;;  %v1372_v50 = vmul.f32 %v11125_v32, %v1336_v42 }
 0x412   :  { %v1424_v59 = vmul.f32 %v12806_v15, %v1408_v13  ;;  %v1390_v6 = vsub.f32 2.0, %v1374_v4  ;;  %v1371_v63 = vmul.f32 %v11127_v29, %v1334_v41  ;;  %v11129_v47 = vpop.eup %11128  ;;  %v1421_v15 = vmul.f32 %v12799_v52, %v1405_v34 }
 0x413   :  { %v1388_v18 = vsub.f32 2.0, %v1372_v50  ;;  %v11131_v4 = vpop.eup %11130 }
 0x414   :  { %v1406_v55 = vmul.f32 %v11123_v0, %v1390_v6  ;;  %v1432_v22 = vpack.c.bf16 %v1424_v59, %v1423_v44  ;;  %v1387_v35 = vsub.f32 2.0, %v1371_v63  ;;  %v1370_v0 = vmul.f32 %v11129_v47, %v1332_v61  ;;  %v11133_v41 = vpop.eup %11132 }
 0x415   :  { %v1404_v13 = vmul.f32 %v11125_v32, %v1388_v18  ;;  %v11135_v32 = vpop.eup %11134 }
 0x416   :  { %10080 = vmatpush3.bf16.xpose.msra.mxu0 %v1432_v22  ;;  %v1422_v48 = vmul.f32 %v12809_v57, %v1406_v55  ;;  %v1403_v44 = vmul.f32 %v11127_v29, %v1387_v35  ;;  %v1369_v22 = vmul.f32 %v11131_v4, %v12919_v43  ;;  %v1386_v49 = vsub.f32 2.0, %v1370_v0  ;;  %v11137_v50 = vpop.eup %11136 }
 0x417   :  { %10081 = vmatprep.subr.bf16.mxu0 %v17103_v38  ;;  %v1420_v57 = vmul.f32 %v12797_v54, %v1404_v13  ;;  %v1368_v29 = vmul.f32 %v11133_v41, %v12917_v46  ;;  %v1367_v54 = vmul.f32 %v11135_v32, %v12908_v23  ;;  %v11139_v34 = vpop.eup %11138  ;;  %v1366_v23 = vmul.f32 %v11137_v50, %v12928_v45 }
 0x418   :  { %v1431_v59 = vpack.c.bf16 %v1422_v48, %v1421_v15  ;;  %v1419_v52 = vmul.f32 %v12778_v1, %v1403_v44  ;;  %v1385_v20 = vsub.f32 2.0, %v1369_v22  ;;  %v1402_v30 = vmul.f32 %v11129_v47, %v1386_v49  ;;  %v11141_v0 = vpop.eup %11140 }
 0x419   :  { %v1384_v1 = vsub.f32 2.0, %v1368_v29  ;;  %v1383_v55 = vsub.f32 2.0, %v1367_v54  ;;  %v1365_v35 = vmul.f32 %v11139_v34, %v12898_v36  ;;  %v11143_v22 = vpop.eup %11142  ;;  %v12996_v36 = vld [vmem:[%s16939_s2 + $0x18] sm:$0xff]  }
 0x41a   :  { %v1430_v43 = vpack.c.bf16 %v1420_v57, %v1419_v52  ;;  %v1401_v5 = vmul.f32 %v11131_v4, %v1385_v20  ;;  %v1418_v6 = vmul.f32 %v12803_v8, %v1402_v30  ;;  %v1382_v4 = vsub.f32 2.0, %v1366_v23  ;;  %10273 = vmatprep.subr.bf16.mxu1 %v12996_v36  ;;  %v11145_v30 = vpop.eup %11144 }
 0x41b   :  { %v1400_v18 = vmul.f32 %v11133_v41, %v1384_v1  ;;  %v1399_v8 = vmul.f32 %v11135_v32, %v1383_v55  ;;  %v1381_v45 = vsub.f32 2.0, %v1365_v35  ;;  %v1364_v57 = vmul.f32 %v11141_v0, %v12887_v53 }
 0x41c   :  { %v1417_v63 = vmul.f32 %v12787_v62, %v1401_v5  ;;  %v1398_v49 = vmul.f32 %v11137_v50, %v1382_v4  ;;  %v1363_v52 = vmul.f32 %v11143_v22, %v12876_v58  ;;  %v11147_v5 = vpop.eup %11146  ;;  %v1362_v1 = vmul.f32 %v11145_v30, %v12896_v31 }
 0x41d   :  { %v1416_v62 = vmul.f32 %v12782_v17, %v1400_v18  ;;  %v1397_v20 = vmul.f32 %v11139_v34, %v1381_v45  ;;  %v1380_v32 = vsub.f32 2.0, %v1364_v57 }
 0x41e   :  { %10082 = vmatpush3.bf16.xpose.msra.mxu0 %v1431_v59  ;;  %v1429_v47 = vpack.c.bf16 %v1418_v6, %v1417_v63  ;;  %v1415_v59 = vmul.f32 %v12775_v19, %v1399_v8  ;;  %v1361_v63 = vmul.f32 %v11147_v5, %v12878_v40  ;;  %v1378_v23 = vsub.f32 2.0, %v1362_v1  ;;  %v2128_v1 = vld [vmem:[#allocation4 + $0x318] sm:$0xff] }
 0x41f   :  { %10083 = vmatprep.subr.bf16.mxu0 %v17103_v38 }
 0x420   :  { %v1428_v17 = vpack.c.bf16 %v1416_v62, %v1415_v59  ;;  %v1377_v8 = vsub.f32 2.0, %v1361_v63 }
 0x422   :  { %v12966_v42 = vpop.f32.mrf.mxu0 }
 0x423   :  { %17122 = vst [vmem:[#allocation52_spill] sm:$0xff] %v12966_v42 }
 0x424   :  { %v10039_v61 = vpop.f32.mrf.mxu0 }
 0x425   :  { %v1414_v61 = vmul.f32 %v12791_v3, %v1398_v49 }
 0x426   :  { %v954_v9 = vpop.f32.mrf.mxu0  ;;  %10084 = vmatpush3.bf16.xpose.msra.mxu0 %v1430_v43  ;;  %v1379_v43 = vsub.f32 2.0, %v1363_v52 }
 0x427   :  { %10085 = vmatprep.subr.bf16.mxu0 %v17103_v38  ;;  %v1413_v9 = vmul.f32 %v12766_v14, %v1397_v20 }
 0x428   :  { %v10040_v7 = vpop.f32.mrf.mxu0  ;;  %v1395_v3 = vmul.f32 %v11143_v22, %v1379_v43  ;;  %v1393_v22 = vmul.f32 %v11147_v5, %v1377_v8  ;;  %v2127_v43 = vld [vmem:[#allocation4 + $0x310] sm:$0xff] }
 0x429   :  { %v12980_v48 = vpop.xlane.xlu1 %1753  ;;  %v1396_v7 = vmul.f32 %v11141_v0, %v1380_v32  ;;  %v1427_v50 = vpack.c.bf16 %v1414_v61, %v1413_v9  ;;  %v1394_v0 = vmul.f32 %v11145_v30, %v1378_v23  ;;  %v2132_v23 = vld [vmem:[#allocation4 + $0x338] sm:$0xff] }
 0x42a   :  { %v1409_v52 = vmul.f32 %v12751_v33, %v1393_v22 }
 0x42b   :  { %v12976_v46 = vpop.xlane.xlu0 %1749  ;;  %v1412_v18 = vmul.f32 %v12759_v27, %v1396_v7  ;;  %v1410_v49 = vmul.f32 %v12763_v25, %v1394_v0 }
 0x42d   :  { %v1425_v32 = vpack.c.bf16 %v1410_v49, %v1409_v52 }
 0x42e   :  { %10086 = vmatpush3.bf16.xpose.msra.mxu0 %v1429_v47 }
 0x42f   :  { %v12984_v15 = vpop.xlane.xlu0 %1755  ;;  %10087 = vmatprep.subr.bf16.mxu0 %v17103_v38 }
 0x431   :  { %v12988_v13 = vpop.xlane.xlu1 %1761 }
 0x432   :  { %v1787_v5 = vsub.f32 %v12820_v16, %v12988_v13 }
 0x433   :  { %v12991_v44 = vpop.xlane.xlu0 %1751 }
 0x435   :  { %v12999_v41 = vpop.xlane.xlu1 %1757 }
 0x436   :  { %10088 = vmatpush3.bf16.xpose.msra.mxu0 %v1428_v17 }
 0x437   :  { %v13003_v19 = vpop.xlane.xlu0 %1763  ;;  %10089 = vmatprep.subr.bf16.mxu0 %v17103_v38 }
 0x439   :  { %v1770_v29 = vpop.xlane.xlu1 %1769 }
 0x43a   :  { %v1791_v53 = vsub.f32 %v12832_v39, %v1770_v29 }
 0x43b   :  { %v13009_v54 = vpop.xlane.xlu0 %1759 }
 0x43c   :  { %v1817_v58 = vmul.f32 1.442695, %v1791_v53 }
 0x43d   :  { %v1766_v6 = vpop.xlane.xlu1 %1765 }
 0x43e   :  { %11148 = vpow2.f32 %v1817_v58  ;;  %v1789_v55 = vsub.f32 %v12838_v21, %v1766_v6  ;;  %10090 = vmatpush3.bf16.xpose.msra.mxu0 %v1427_v50  ;;  %v1411_v21 = vmul.f32 %v12745_v51, %v1395_v3  ;;  %v1809_v50 = vmul.f32 1.442695, %v1787_v5 }
 0x43f   :  { %v1772_v39 = vpop.xlane.xlu0 %1771  ;;  %10091 = vmatprep.subr.bf16.mxu0 %v17103_v38 }
 0x440   :  { %v1813_v34 = vmul.f32 1.442695, %v1789_v55  ;;  %v1792_v14 = vsub.f32 %v12841_v12, %v1772_v39  ;;  %v1426_v45 = vpack.c.bf16 %v1412_v18, %v1411_v21  ;;  %v1788_v55 = vsub.f32 %v12829_v2, %v13003_v19  ;;  %v2131_v39 = vld [vmem:[#allocation4 + $0x330] sm:$0xff]  ;;  %v2129_v18 = vld [vmem:[#allocation4 + $0x320] sm:$0xff] }
 0x441   :  { %v1778_v47 = vpop.xlane.xlu1 %1777  ;;  %v2135_v21 = vld [vmem:[#allocation4 + $0x350] sm:$0xff] }
 0x442   :  { %11150 = vpow2.f32 %v1813_v34  ;;  %v1819_v31 = vmul.f32 1.442695, %v1792_v14  ;;  %v1795_v35 = vsub.f32 %v12844_v10, %v1778_v47  ;;  %v1811_v16 = vmul.f32 1.442695, %v1788_v55 }
 0x443   :  { %v1768_v62 = vpop.xlane.xlu0 %1767 }
 0x444   :  { %11152 = vpow2.f32 %v1819_v31  ;;  %v1825_v40 = vmul.f32 1.442695, %v1795_v35  ;;  %v1790_v4 = vsub.f32 %v12848_v24, %v1768_v62  ;;  %v2130_v35 = vld [vmem:[#allocation4 + $0x328] sm:$0xff]  ;;  %v1786_v62 = vsub.f32 %v12836_v37, %v13009_v54 }
 0x445   :  { %v1774_v12 = vpop.xlane.xlu1 %1773 }
 0x446   :  { %11154 = vpow2.f32 %v1825_v40  ;;  %v1815_v59 = vmul.f32 1.442695, %v1790_v4  ;;  %v1793_v27 = vsub.f32 %v12850_v28, %v1774_v12  ;;  %10092 = vmatpush3.bf16.xpose.msra.mxu0 %v1426_v45  ;;  %v1783_v45 = vsub.f32 %v12812_v11, %v12980_v48  ;;  %v17124_v48 = vld [vmem:[#allocation15_spill] sm:$0xff] }
 0x447   :  { %v1780_v57 = vpop.xlane.xlu0 %1779  ;;  %10093 = vmatprep.subr.bf16.mxu0 %v17103_v38 }
 0x448   :  { %11156 = vpow2.f32 %v1815_v59  ;;  %v1821_v10 = vmul.f32 1.442695, %v1793_v27  ;;  %v1796_v51 = vsub.f32 %v12853_v26, %v1780_v57  ;;  %v1807_v59 = vmul.f32 1.442695, %v1786_v62 }
 0x449   :  { %v1801_v54 = vmul.f32 1.442695, %v1783_v45  ;;  %v1784_v57 = vsub.f32 %v12818_v56, %v12984_v15 }
 0x44a   :  { %11158 = vpow2.f32 %v1821_v10  ;;  %v1827_v24 = vmul.f32 1.442695, %v1796_v51  ;;  %v2125_v51 = vld [vmem:[#allocation4 + $0x300] sm:$0xff] }
 0x44b   :  { %v13024_v17 = vpop.eup %11148  ;;  %v1776_v20 = vpop.xlane.xlu0 %1775  ;;  %v1803_v52 = vmul.f32 1.442695, %v1784_v57 }
 0x44c   :  { %11160 = vpow2.f32 %v1827_v24  ;;  %v1794_v28 = vsub.f32 %v12857_v60, %v1776_v20  ;;  %1849 = vadd.xlane.f32.xlu1 %v13024_v17  ;;  %v1781_v24 = vsub.f32 %v17124_v48, %v12976_v46  ;;  %v69_v46 = vld [vmem:[%s16942_s5 + $0x28] sm:$0xff] }
 0x44e   :  { %v1823_v61 = vmul.f32 1.442695, %v1794_v28  ;;  %10094 = vmatpush3.bf16.xpose.msra.mxu0 %v1425_v32  ;;  %v2126_v28 = vld [vmem:[#allocation4 + $0x308] sm:$0xff]  ;;  %v1797_v15 = vmul.f32 1.442695, %v1781_v24 }
 0x44f   :  { %v13029_v29 = vpop.eup %11150  ;;  %10137 = vmatprep.subr.bf16.mxu0 %v17103_v38 }
 0x450   :  { %11162 = vpow2.f32 %v1823_v61  ;;  %1845 = vadd.xlane.f32.xlu1 %v13029_v29  ;;  %v17125_v61 = vld [vmem:[#allocation43_spill] sm:$0xff] }
 0x451   :  { %v13033_v25 = vpop.eup %11152  ;;  %11164 = vpow2.f32 %v1809_v50 }
 0x452   :  { %1851 = vadd.xlane.f32.xlu0 %v13033_v25  ;;  %11166 = vpow2.f32 %v1811_v16 }
 0x453   :  { %v13036_v33 = vpop.eup %11154  ;;  %11168 = vpow2.f32 %v1807_v59 }
 0x454   :  { %1857 = vadd.xlane.f32.xlu1 %v13036_v33  ;;  %11170 = vpow2.f32 %v1801_v54 }
 0x455   :  { %v13039_v26 = vpop.eup %11156  ;;  %11172 = vpow2.f32 %v1803_v52 }
 0x456   :  { %1847 = vadd.xlane.f32.xlu0 %v13039_v26  ;;  %11174 = vpow2.f32 %v1797_v15 }
 0x457   :  { %v13042_v60 = vpop.eup %11158 }
 0x458   :  { %1853 = vadd.xlane.f32.xlu1 %v13042_v60 }
 0x459   :  { %v13045_v30 = vpop.eup %11160 }
 0x45a   :  { %1859 = vadd.xlane.f32.xlu0 %v13045_v30 }
 0x45d   :  { %v13048_v53 = vpop.eup %11162 }
 0x45e   :  { %1855 = vadd.xlane.f32.xlu0 %v13048_v53  ;;  %v13084_v27 = vpop.eup %11164 }
 0x45f   :  { %v13093_v10 = vpop.eup %11166 }
 0x460   :  { %v13120_v50 = vpop.eup %11168 }
 0x489   :  { %v10181_v9 = vpop.f32.mrf.mxu1 }
 0x48a   :  { %v13053_v58 = vadd.f32 %v10181_v9, %v2127_v43  ;;  %v1782_v43 = vsub.f32 %v17125_v61, %v12991_v44 }
 0x48b   :  { %v2202_v7 = vpop.f32.mrf.mxu1 }
 0x48c   :  { %2269 = vmax.xlane.f32.xlu1 %v13053_v58  ;;  %v13102_v20 = vadd.f32 %v2202_v7, %v2125_v51 }
 0x48d   :  { %v10182_v6 = vpop.f32.mrf.mxu1 }
 0x48e   :  { %v13058_v3 = vadd.f32 %v10182_v6, %v2128_v1  ;;  %v1799_v1 = vmul.f32 1.442695, %v1782_v43  ;;  %v13118_v6 = vld [vmem:[%s16940_s3] ss:$0 sm:$0xff] }
 0x48f   :  { %v2205_v63 = vpop.f32.mrf.mxu1 }
 0x490   :  { %2271 = vmax.xlane.f32.xlu0 %v13058_v3  ;;  %v13109_v9 = vadd.f32 %v2205_v63, %v2126_v28  ;;  %11176 = vpow2.f32 %v1799_v1 }
 0x491   :  { %v10185_v34 = vpop.f32.mrf.mxu1 }
 0x492   :  { %v13061_v13 = vadd.f32 %v10185_v34, %v2131_v39  ;;  %17126 = vst [vmem:[#allocation15_spill] sm:$0xff] %v13109_v9 }
 0x493   :  { %v2218_v14 = vpop.f32.mrf.mxu1 }
 0x494   :  { %2277 = vmax.xlane.f32.xlu1 %v13061_v13  ;;  %v13064_v31 = vadd.f32 %v2218_v14, %v2129_v18  ;;  %v13127_v18 = vpop.eup %11170 }
 0x495   :  { %v10186_v47 = vpop.f32.mrf.mxu1  ;;  %v13138_v45 = vpop.eup %11172 }
 0x496   :  { %v13066_v2 = vadd.f32 %v10186_v47, %v2132_v23 }
 0x497   :  { %v2221_v19 = vpop.f32.mrf.mxu1 }
 0x498   :  { %2279 = vmax.xlane.f32.xlu0 %v13066_v2  ;;  %2273 = vmax.xlane.f32.xlu1 %v13064_v31  ;;  %v13072_v40 = vadd.f32 %v2221_v19, %v2130_v35  ;;  %v10981_v19 = vld [vmem:[%s16939_s2 + $0x10] sm:$0xff]   ;;  %v17127_v35 = vld [vmem:[#allocation23_spill] sm:$0xff] }
 0x499   :  { %v10189_v8 = vpop.f32.mrf.mxu1 }
 0x49a   :  { %17123 = vst [vmem:[#allocation53_spill] sm:$0xff] %v13072_v40  ;;  %v13074_v4 = vadd.f32 %v10189_v8, %v2135_v21  ;;  %v17128_v21 = vld [vmem:[#allocation12_spill] sm:$0xff] }
 0x49b   :  { %v13076_v0 = vpop.f32.mrf.mxu1  ;;  %v226_v8 = vadd.f32 %v17128_v21, %v17127_v35 }
 0x49c   :  { %2275 = vmax.xlane.f32.xlu0 %v13072_v40  ;;  %2285 = vmax.xlane.f32.xlu1 %v13074_v4 }
 0x49d   :  { %v13080_v12 = vpop.f32.mrf.mxu1  ;;  %v3229_v48 = vpack.c.bf16 %v226_v8, %v226_v8 }
 0x49f   :  { %v13086_v22 = vpop.f32.mrf.mxu1 }
 0x4a0   :  { %1841 = vadd.xlane.f32.xlu0 %v13084_v27 }
 0x4a1   :  { %v13089_v37 = vpop.f32.mrf.mxu1 }
 0x4a3   :  { %v13095_v49 = vpop.f32.mrf.mxu1 }
 0x4a4   :  { %1843 = vadd.xlane.f32.xlu0 %v13093_v10 }
 0x4a5   :  { %v13098_v11 = vpop.f32.mrf.mxu1 }
 0x4a7   :  { %v13104_v32 = vpop.f32.mrf.mxu1 }
 0x4a8   :  { %2265 = vmax.xlane.f32.xlu0 %v13102_v20 }
 0x4a9   :  { %v10221_v56 = vpop.f32.mrf.mxu1 }
 0x4aa   :  { %v2652_v34 = vadd.f32 %v10221_v56, %v13118_v6  ;;  %v13145_v56 = vpop.eup %11174 }
 0x4ab   :  { %v2643_v5 = vpop.f32.mrf.mxu1  ;;  %v13151_v43 = vpop.eup %11176 }
 0x4ac   :  { %2267 = vmax.xlane.f32.xlu0 %v13109_v9  ;;  %v2644_v63 = vadd.f32 %v13118_v6, %v2643_v5 }
 0x4ad   :  { %v10222_v7 = vpop.f32.mrf.mxu1  ;;  %99 = vperm.xlu1 %10937, %v69_v46   ;;  %v17129_v46 = vld [vmem:[#allocation44_spill] sm:$0xff] }
 0x4ae   :  { %v2655_v44 = vadd.f32 %v10222_v7, %v13118_v6  ;;  %v1785_v5 = vsub.f32 %v17129_v46, %v12999_v41  ;;  %v2136_v7 = vld [vmem:[#allocation4 + $0x358] sm:$0xff] }
 0x4af   :  { %v2646_v55 = vpop.f32.mrf.mxu1 }
 0x4b0   :  { %v2647_v39 = vadd.f32 %v13118_v6, %v2646_v55  ;;  %1839 = vadd.xlane.f32.xlu0 %v13120_v50  ;;  %v2707_v23 = vpack.c.bf16 %v2655_v44, %v2652_v34 }
 0x4b1   :  { %v10225_v16 = vpop.f32.mrf.mxu1 }
 0x4b2   :  { %v2706_v14 = vpack.c.bf16 %v2647_v39, %v2644_v63  ;;  %v2668_v24 = vadd.f32 %v10225_v16, %v13118_v6  ;;  %v13161_v16 = vadd.f32 %v13080_v12, %v2136_v7 }
 0x4b3   :  { %v2659_v47 = vpop.f32.mrf.mxu1 }
 0x4b4   :  { %10237 = vmatprep.mubr.msk.bf16.mxu1 %vm591_vm2, %v2706_v14  ;;  %1833 = vadd.xlane.f32.xlu0 %v13127_v18  ;;  %v2660_v57 = vadd.f32 %v13118_v6, %v2659_v47  ;;  %v2134_v47 = vld [vmem:[#allocation4 + $0x348] sm:$0xff] }
 0x4b5   :  { %v10226_v62 = vpop.f32.mrf.mxu1  ;;  %10238 = vmatmul.mubr.msk.bf16.vlgmr.msra.gmra.mxu1 %vm591_vm2, %v2707_v23  ;;  %v1805_v23 = vmul.f32 1.442695, %v1785_v5  ;;  %v13167_v8 = vadd.f32 %v13086_v22, %v2134_v47  ;;  %v2138_v5 = vld [vmem:[#allocation4 + $0x368] sm:$0xff] }
 0x4b6   :  { %10274 = vmatpush3.bf16.msra.mxu1 %v12996_v36  ;;  %v2671_v59 = vadd.f32 %v10226_v62, %v13118_v6  ;;  %v2139_v62 = vld [vmem:[#allocation4 + $0x370] sm:$0xff] }
 0x4b7   :  { %v2662_v54 = vpop.f32.mrf.mxu1  ;;  %10275 = vmatprep.subr.bf16.mxu1 %v10981_v19  ;;  %11178 = vpow2.f32 %v1805_v23 }
 0x4b8   :  { %v2663_v51 = vadd.f32 %v13118_v6, %v2662_v54  ;;  %1835 = vadd.xlane.f32.xlu0 %v13138_v45  ;;  %v2709_v36 = vpack.c.bf16 %v2671_v59, %v2668_v24  ;;  %v13175_v24 = vadd.f32 %v13089_v37, %v2139_v62  ;;  %v2140_v37 = vld [vmem:[#allocation4 + $0x378] sm:$0xff] }
 0x4b9   :  { %v10229_v52 = vpop.f32.mrf.mxu1  ;;  %v13191_v46 = vadd.f32 %v13098_v11, %v2140_v37  ;;  %v17133_v11 = vld [vmem:[#allocation47_spill] sm:$0xff] }
 0x4ba   :  { %v2708_v28 = vpack.c.bf16 %v2663_v51, %v2660_v57  ;;  %10276 = vmatpush3.bf16.msra.mxu1 %v10981_v19  ;;  %v2684_v39 = vadd.f32 %v10229_v52, %v13118_v6 }
 0x4bb   :  { %10916 = vmatprep.subr.msk.bf16.mxu1 %vm616_vm1, %v3229_v48  ;;  %v2675_v15 = vpop.f32.mrf.mxu1 }
 0x4bc   :  { %10241 = vmatprep.mubr.msk.bf16.mxu1 %vm591_vm2, %v2708_v28  ;;  %1829 = vadd.xlane.f32.xlu0 %v13145_v56  ;;  %v2676_v55 = vadd.f32 %v13118_v6, %v2675_v15  ;;  %v2137_v28 = vld [vmem:[#allocation4 + $0x360] sm:$0xff] }
 0x4bd   :  { %v10230_v61 = vpop.f32.mrf.mxu1  ;;  %10242 = vmatmul.mubr.msk.bf16.gmra.mxu1 %vm591_vm2, %v2709_v36  ;;  %v2133_v36 = vld [vmem:[#allocation4 + $0x340] sm:$0xff]  ;;  %v13181_v15 = vadd.f32 %v13095_v49, %v2137_v28  ;;  %v3274_v49 = vsel %vm616_vm1, %v3229_v48, 0  ;;  %v17135_v48 = vld [vmem:[#allocation49_spill] sm:$0xff]  ;;  %v13229_v28 = vld [vmem:[%s16939_s2 + $0x28] sm:$0xff]  }
 0x4be   :  { %v2687_v1 = vadd.f32 %v10230_v61, %v13118_v6  ;;  %v17130_v61 = vld [vmem:[#allocation11_spill] sm:$0xff] }
 0x4bf   :  { %v2678_v44 = vpop.f32.mrf.mxu1 }
 0x4c0   :  { %v2679_v63 = vadd.f32 %v13118_v6, %v2678_v44  ;;  %1831 = vadd.xlane.f32.xlu0 %v13151_v43  ;;  %v2711_v41 = vpack.c.bf16 %v2687_v1, %v2684_v39  ;;  %v17131_v1 = vld [vmem:[#allocation45_spill] sm:$0xff]  ;;  %v17132_v44 = vld [vmem:[#allocation46_spill] sm:$0xff] }
 0x4c1   :  { %v10233_v34 = vpop.f32.mrf.mxu1 }
 0x4c2   :  { %v2710_v14 = vpack.c.bf16 %v2679_v63, %v2676_v55  ;;  %v2700_v51 = vadd.f32 %v10233_v34, %v13118_v6  ;;  %v17134_v55 = vld [vmem:[#allocation48_spill] sm:$0xff]  ;;  %v17136_v63 = vld [vmem:[#allocation50_spill] sm:$0xff] }
 0x4c3   :  { %v2691_v19 = vpop.f32.mrf.mxu1 }
 0x4c4   :  { %10245 = vmatprep.mubr.msk.bf16.mxu1 %vm591_vm2, %v2710_v14  ;;  %2287 = vmax.xlane.f32.xlu0 %v13161_v16  ;;  %v2692_v54 = vadd.f32 %v13118_v6, %v2691_v19  ;;  %v13193_v7 = vpop.eup %11178 }
 0x4c5   :  { %v10234_v21 = vpop.f32.mrf.mxu1  ;;  %10246 = vmatmul.mubr.msk.bf16.gmra.mxu1 %vm591_vm2, %v2711_v41 }
 0x4c6   :  { %v2703_v12 = vadd.f32 %v10234_v21, %v13118_v6 }
 0x4c7   :  { %v2694_v59 = vpop.f32.mrf.mxu1 }
 0x4c8   :  { %v2695_v57 = vadd.f32 %v13118_v6, %v2694_v59  ;;  %2283 = vmax.xlane.f32.xlu0 %v13167_v8  ;;  %v2713_v22 = vpack.c.bf16 %v2703_v12, %v2700_v51  ;;  %v13186_v6 = vadd.f32 %v13076_v0, %v2133_v36  ;;  %v13201_v0 = vadd.f32 %v13104_v32, %v2138_v5  ;;  %v17137_v32 = vld [vmem:[#allocation51_spill] sm:$0xff] }
 0x4ca   :  { %v2712_v52 = vpack.c.bf16 %v2695_v57, %v2692_v54 }
 0x4cc   :  { %10249 = vmatprep.mubr.msk.bf16.mxu1 %vm591_vm2, %v2712_v52  ;;  %2293 = vmax.xlane.f32.xlu0 %v13175_v24 }
 0x4cd   :  { %10250 = vmatmul.mubr.msk.bf16.gmra.mxu1 %vm591_vm2, %v2713_v22 }
 0x4ce   :  { %10277 = vmatprep.mubr.msk.bf16.mxu1 %vm172_vm0, %v17130_v61 }
 0x4d0   :  { %2289 = vmax.xlane.f32.xlu0 %v13181_v15 }
 0x4d1   :  { %2281 = vmax.xlane.f32.xlu1 %v13186_v6 }
 0x4d4   :  { %2295 = vmax.xlane.f32.xlu0 %v13191_v46 }
 0x4d5   :  { %10278 = vmatmul.mubr.msk.bf16.vlgmr.msra.gmra.mxu1 %vm172_vm0, %v17131_v1  ;;  %1837 = vadd.xlane.f32.xlu1 %v13193_v7  ;;  %v1850_v34 = vpop.xlane.xlu1 %1849 }
 0x4d6   :  { %10294 = vmatpush3.bf16.msra.mxu1 %v3274_v49  ;;  %10281 = vmatprep.mubr.msk.bf16.mxu1 %vm172_vm0, %v17132_v44 }
 0x4d7   :  { %10331 = vmatprep.subr.bf16.mxu1 %v13229_v28 }
 0x4d8   :  { %2291 = vmax.xlane.f32.xlu0 %v13201_v0 }
 0x4d9   :  { %v13218_v23 = vpop.xlane.xlu1 %1845 }
 0x4db   :  { %v1852_v39 = vpop.xlane.xlu0 %1851 }
 0x4dd   :  { %10282 = vmatmul.mubr.msk.bf16.gmra.mxu1 %vm172_vm0, %v17133_v11  ;;  %v1858_v41 = vpop.xlane.xlu1 %1857 }
 0x4de   :  { %10285 = vmatprep.mubr.msk.bf16.mxu1 %vm172_vm0, %v17134_v55 }
 0x4df   :  { %v13216_v14 = vpop.xlane.xlu0 %1847 }
 0x4e1   :  { %v1854_v21 = vpop.xlane.xlu1 %1853 }
 0x4e3   :  { %v1860_v47 = vpop.xlane.xlu0 %1859 }
 0x4e4   :  { %11180 = vrcp.f32 %v1860_v47 }
 0x4e5   :  { %10286 = vmatmul.mubr.msk.bf16.gmra.mxu1 %vm172_vm0, %v17135_v48  ;;  %11182 = vrcp.f32 %v1858_v41 }
 0x4e6   :  { %10289 = vmatprep.mubr.msk.bf16.mxu1 %vm172_vm0, %v17136_v63 }
 0x4e7   :  { %v1856_v19 = vpop.xlane.xlu0 %1855 }
 0x4e8   :  { %11184 = vrcp.f32 %v1856_v19 }
 0x4e9   :  { %11186 = vrcp.f32 %v1854_v21 }
 0x4ea   :  { %11188 = vrcp.f32 %v1852_v39 }
 0x4eb   :  { %11190 = vrcp.f32 %v1850_v34 }
 0x4ec   :  { %11192 = vrcp.f32 %v13216_v14 }
 0x4ed   :  { %10290 = vmatmul.mubr.msk.bf16.gmra.mxu1 %vm172_vm0, %v17137_v32  ;;  %11194 = vrcp.f32 %v13218_v23 }
 0x4f1   :  { %v11181_v12 = vpop.eup %11180 }
 0x4f2   :  { %v11183_v59 = vpop.eup %11182  ;;  %v1892_v54 = vmul.f32 %v11181_v12, %v1860_v47 }
 0x4f3   :  { %v1891_v52 = vmul.f32 %v11183_v59, %v1858_v41 }
 0x4f4   :  { %v1908_v22 = vsub.f32 2.0, %v1892_v54 }
 0x4f5   :  { %v11185_v37 = vpop.eup %11184  ;;  %v1907_v5 = vsub.f32 2.0, %v1891_v52 }
 0x4f6   :  { %v11187_v49 = vpop.eup %11186  ;;  %v1924_v1 = vmul.f32 %v11181_v12, %v1908_v22  ;;  %v1890_v44 = vmul.f32 %v11185_v37, %v1856_v19  ;;  %v17139_v12 = vld [vmem:[#allocation17_spill] sm:$0xff] }
 0x4f7   :  { %v1923_v63 = vmul.f32 %v11183_v59, %v1907_v5  ;;  %v1889_v32 = vmul.f32 %v11187_v49, %v1854_v21  ;;  %v11189_v35 = vpop.eup %11188 }
 0x4f8   :  { %v1940_v41 = vmul.f32 %v13045_v30, %v1924_v1  ;;  %v1906_v54 = vsub.f32 2.0, %v1890_v44  ;;  %v1888_v40 = vmul.f32 %v11189_v35, %v1852_v39 }
 0x4f9   :  { %v1939_v22 = vmul.f32 %v13036_v33, %v1923_v63  ;;  %v1905_v9 = vsub.f32 2.0, %v1889_v32 }
 0x4fa   :  { %v1922_v59 = vmul.f32 %v11185_v37, %v1906_v54  ;;  %v1904_v33 = vsub.f32 2.0, %v1888_v40 }
 0x4fb   :  { %v1948_v5 = vpack.c.bf16 %v1940_v41, %v1939_v22  ;;  %v1921_v1 = vmul.f32 %v11187_v49, %v1905_v9 }
 0x4fc   :  { %v1938_v44 = vmul.f32 %v13048_v53, %v1922_v59 }
 0x4fd   :  { %v1937_v63 = vmul.f32 %v13042_v60, %v1921_v1 }
 0x4ff   :  { %v1947_v49 = vpack.c.bf16 %v1938_v44, %v1937_v63 }
 0x515   :  { %v13220_v62 = vpop.xlane.xlu1 %2269 }
 0x519   :  { %v13222_v57 = vpop.xlane.xlu0 %2271 }
 0x51d   :  { %v13224_v51 = vpop.xlane.xlu1 %2277 }
 0x521   :  { %v13231_v36 = vpop.xlane.xlu0 %2279  ;;  %v13233_v61 = vpop.xlane.xlu1 %2273 }
 0x525   :  { %v13237_v11 = vpop.xlane.xlu0 %2275  ;;  %v2286_v55 = vpop.xlane.xlu1 %2285 }
 0x526   :  { %v2307_v48 = vsub.f32 %v13074_v4, %v2286_v55  ;;  %v11191_v4 = vpop.eup %11190 }
 0x527   :  { %v1887_v30 = vmul.f32 %v11191_v4, %v1850_v34  ;;  %v11193_v39 = vpop.eup %11192 }
 0x528   :  { %v2333_v47 = vmul.f32 1.442695, %v2307_v48  ;;  %v11195_v32 = vpop.eup %11194  ;;  %v1886_v9 = vmul.f32 %v11193_v39, %v13216_v14 }
 0x529   :  { %v1842_v42 = vpop.xlane.xlu0 %1841  ;;  %v13242_v52 = vpop.permute.xlu1 %99  ;;  %v1903_v37 = vsub.f32 2.0, %v1887_v30  ;;  %v1885_v54 = vmul.f32 %v11195_v32, %v13218_v23 }
 0x52a   :  { %17138 = vst [vmem:[#allocation43_spill] sm:$0xff] %v13242_v52  ;;  %v244_v19 = vadd.f32 %v17139_v12, %v13242_v52  ;;  %11196 = vpow2.f32 %v2333_v47  ;;  %v1920_v47 = vmul.f32 %v11189_v35, %v1904_v33  ;;  %v1902_v12 = vsub.f32 2.0, %v1886_v9 }
 0x52b   :  { %v1919_v41 = vmul.f32 %v11191_v4, %v1903_v37 }
 0x52c   :  { %v1091_v55 = vpack.c.bf16 %v244_v19, %v244_v19  ;;  %v1936_v53 = vmul.f32 %v13033_v25, %v1920_v47  ;;  %v1901_v19 = vsub.f32 2.0, %v1885_v54  ;;  %v1918_v4 = vmul.f32 %v11193_v39, %v1902_v12 }
 0x52d   :  { %v1844_v21 = vpop.xlane.xlu0 %1843  ;;  %v1935_v14 = vmul.f32 %v13024_v17, %v1919_v41 }
 0x52e   :  { %11198 = vrcp.f32 %v1844_v21  ;;  %10096 = vmatmul.mubr.bf16.vlgmr.msra.gmra.mxu0 %v1091_v55  ;;  %v1934_v25 = vmul.f32 %v13039_v26, %v1918_v4 }
 0x52f   :  { %11200 = vrcp.f32 %v1842_v42  ;;  %10138 = vmatpush3.bf16.xpose.msra.mxu0 %v1948_v5  ;;  %10153 = vmatprep.mubr.msk.bf16.mxu0 %vm12126_vm3, %v17103_v38  ;;  %v1946_v59 = vpack.c.bf16 %v1936_v53, %v1935_v14  ;;  %v1917_v5 = vmul.f32 %v11195_v32, %v1901_v19 }
 0x530   :  { %10139 = vmatprep.subr.bf16.mxu0 %v17103_v38 }
 0x531   :  { %v13251_v48 = vpop.xlane.xlu0 %2265  ;;  %v1933_v44 = vmul.f32 %v13029_v29, %v1917_v5 }
 0x533   :  { %v1945_v39 = vpack.c.bf16 %v1934_v25, %v1933_v44 }
 0x535   :  { %v13255_v34 = vpop.xlane.xlu0 %2267 }
 0x537   :  { %10140 = vmatpush3.bf16.xpose.msra.mxu0 %v1947_v49  ;;  %v13258_v40 = vpop.eup %11196 }
 0x538   :  { %10141 = vmatprep.subr.bf16.mxu0 %v17103_v38  ;;  %2365 = vadd.xlane.f32.xlu1 %v13258_v40 }
 0x539   :  { %v13263_v60 = vpop.xlane.xlu0 %1839 }
 0x53b   :  { %v11199_v35 = vpop.eup %11198 }
 0x53c   :  { %v11201_v22 = vpop.eup %11200  ;;  %v1884_v55 = vmul.f32 %v11199_v35, %v1844_v21 }
 0x53d   :  { %v13266_v23 = vpop.xlane.xlu0 %1833  ;;  %v1883_v30 = vmul.f32 %v11201_v22, %v1842_v42 }
 0x53e   :  { %v1900_v1 = vsub.f32 2.0, %v1884_v55 }
 0x53f   :  { %10142 = vmatpush3.bf16.xpose.msra.mxu0 %v1946_v59  ;;  %v1899_v37 = vsub.f32 2.0, %v1883_v30 }
 0x540   :  { %10143 = vmatprep.subr.bf16.mxu0 %v17103_v38  ;;  %v1916_v17 = vmul.f32 %v11199_v35, %v1900_v1 }
 0x541   :  { %v1836_v33 = vpop.xlane.xlu0 %1835  ;;  %v1915_v21 = vmul.f32 %v11201_v22, %v1899_v37 }
 0x542   :  { %v1932_v42 = vmul.f32 %v13093_v10, %v1916_v17 }
 0x543   :  { %v1931_v47 = vmul.f32 %v13084_v27, %v1915_v21 }
 0x545   :  { %v13271_v63 = vpop.xlane.xlu0 %1829  ;;  %v1944_v9 = vpack.c.bf16 %v1932_v42, %v1931_v47 }
 0x547   :  { %10144 = vmatpush3.bf16.xpose.msra.mxu0 %v1945_v39 }
 0x548   :  { %10145 = vmatprep.subr.bf16.mxu0 %v17103_v38 }
 0x549   :  { %v13275_v32 = vpop.xlane.xlu0 %1831 }
 0x54d   :  { %v2288_v26 = vpop.xlane.xlu0 %2287 }
 0x54e   :  { %v2308_v49 = vsub.f32 %v13161_v16, %v2288_v26 }
 0x54f   :  { %10146 = vmatpush3.bf16.xpose.msra.mxu0 %v1944_v9 }
 0x550   :  { %v2335_v29 = vmul.f32 1.442695, %v2308_v49  ;;  %10147 = vmatprep.subr.bf16.mxu0 %v17103_v38 }
 0x551   :  { %v2284_v41 = vpop.xlane.xlu0 %2283 }
 0x552   :  { %11202 = vpow2.f32 %v2335_v29  ;;  %v2306_v54 = vsub.f32 %v13167_v8, %v2284_v41 }
 0x554   :  { %v2331_v53 = vmul.f32 1.442695, %v2306_v54 }
 0x555   :  { %v2294_v12 = vpop.xlane.xlu0 %2293 }
 0x556   :  { %11204 = vpow2.f32 %v2331_v53  ;;  %v2311_v27 = vsub.f32 %v13175_v24, %v2294_v12  ;;  %v2721_v12 = vld [vmem:[#allocation4 + $0x90] sm:$0xff] }
 0x557   :  { %11206 = vrcp.f32 %v13263_v60 }
 0x558   :  { %11208 = vrcp.f32 %v13266_v23  ;;  %v2341_v55 = vmul.f32 1.442695, %v2311_v27 }
 0x559   :  { %v2290_v10 = vpop.xlane.xlu0 %2289  ;;  %11210 = vrcp.f32 %v1836_v33 }
 0x55a   :  { %v2282_v35 = vpop.xlane.xlu1 %2281  ;;  %v2309_v59 = vsub.f32 %v13181_v15, %v2290_v10 }
 0x55b   :  { %v2305_v14 = vsub.f32 %v13186_v6, %v2282_v35 }
 0x55c   :  { %v2337_v25 = vmul.f32 1.442695, %v2309_v59 }
 0x55d   :  { %v2329_v16 = vmul.f32 1.442695, %v2305_v14  ;;  %v2296_v19 = vpop.xlane.xlu0 %2295  ;;  %v2303_v14 = vsub.f32 %v13061_v13, %v13224_v51  ;;  %v2304_v13 = vsub.f32 %v13066_v2, %v13231_v36  ;;  %v2723_v36 = vld [vmem:[#allocation4 + $0xa0] sm:$0xff] }
 0x55e   :  { %v2312_v22 = vsub.f32 %v13191_v46, %v2296_v19  ;;  %v1838_v4 = vpop.xlane.xlu1 %1837 }
 0x55f   :  { %v13286_v8 = vpop.eup %11202  ;;  %11212 = vpow2.f32 %v2329_v16 }
 0x560   :  { %v2343_v5 = vmul.f32 1.442695, %v2312_v22  ;;  %11214 = vrcp.f32 %v1838_v4  ;;  %2367 = vadd.xlane.f32.xlu0 %v13286_v8 }
 0x561   :  { %v2292_v24 = vpop.xlane.xlu0 %2291 }
 0x562   :  { %11216 = vpow2.f32 %v2343_v5  ;;  %v2310_v6 = vsub.f32 %v13201_v0, %v2292_v24  ;;  %v2325_v24 = vmul.f32 1.442695, %v2303_v14  ;;  %v2727_v14 = vld [vmem:[#allocation4 + $0xc0] sm:$0xff] }
 0x563   :  { %v13291_v30 = vpop.eup %11204  ;;  %11218 = vpow2.f32 %v2341_v55 }
 0x564   :  { %v2339_v46 = vmul.f32 1.442695, %v2310_v6  ;;  %2363 = vadd.xlane.f32.xlu0 %v13291_v30  ;;  %v11207_v1 = vpop.eup %11206  ;;  %11220 = vrcp.f32 %v13275_v32 }
 0x565   :  { %v1882_v15 = vmul.f32 %v11207_v1, %v13263_v60  ;;  %v11209_v44 = vpop.eup %11208 }
 0x566   :  { %11222 = vpow2.f32 %v2339_v46  ;;  %v11211_v37 = vpop.eup %11210  ;;  %v1879_v49 = vmul.f32 %v11209_v44, %v13266_v23 }
 0x567   :  { %11224 = vpow2.f32 %v2337_v25  ;;  %v1898_v0 = vsub.f32 2.0, %v1882_v15  ;;  %v1880_v21 = vmul.f32 %v11211_v37, %v1836_v33 }
 0x568   :  { %11226 = vrcp.f32 %v13271_v63  ;;  %v1895_v35 = vsub.f32 2.0, %v1879_v49 }
 0x569   :  { %v1914_v9 = vmul.f32 %v11207_v1, %v1898_v0  ;;  %v1896_v41 = vsub.f32 2.0, %v1880_v21  ;;  %v2725_v1 = vld [vmem:[#allocation4 + $0xb0] sm:$0xff]  ;;  %11228 = vpow2.f32 %v2325_v24 }
 0x56a   :  { %v1911_v5 = vmul.f32 %v11209_v44, %v1895_v35 }
 0x56b   :  { %v1930_v10 = vmul.f32 %v13120_v50, %v1914_v9  ;;  %v1912_v19 = vmul.f32 %v11211_v37, %v1896_v41  ;;  %v2722_v50 = vld [vmem:[#allocation4 + $0x98] sm:$0xff]  ;;  %v2327_v37 = vmul.f32 1.442695, %v2304_v13  ;;  %v2724_v41 = vld [vmem:[#allocation4 + $0xa8] sm:$0xff] }
 0x56c   :  { %v13297_v17 = vpop.eup %11212  ;;  %v1927_v15 = vmul.f32 %v13127_v18, %v1911_v5  ;;  %v2719_v5 = vld [vmem:[#allocation4 + $0x80] sm:$0xff]  ;;  %v2720_v13 = vld [vmem:[#allocation4 + $0x88] sm:$0xff] }
 0x56d   :  { %v11215_v39 = vpop.eup %11214  ;;  %2361 = vadd.xlane.f32.xlu1 %v13297_v17  ;;  %v1928_v51 = vmul.f32 %v13138_v45, %v1912_v19  ;;  %v2726_v45 = vld [vmem:[#allocation4 + $0xb8] sm:$0xff]  ;;  %11230 = vpow2.f32 %v2327_v37  ;;  %v2301_v37 = vsub.f32 %v13064_v31, %v13233_v61 }
 0x56e   :  { %v1881_v42 = vmul.f32 %v11215_v39, %v1838_v4 }
 0x56f   :  { %v13300_v47 = vpop.eup %11216  ;;  %v1942_v21 = vpack.c.bf16 %v1928_v51, %v1927_v15  ;;  %v2730_v15 = vld [vmem:[#allocation4 + $0xd8] sm:$0xff] }
 0x570   :  { %v13302_v26 = vpop.eup %11218  ;;  %v1897_v60 = vsub.f32 2.0, %v1881_v42  ;;  %2375 = vadd.xlane.f32.xlu0 %v13300_v47 }
 0x571   :  { %2373 = vadd.xlane.f32.xlu1 %v13302_v26  ;;  %v11221_v29 = vpop.eup %11220 }
 0x572   :  { %v1913_v54 = vmul.f32 %v11215_v39, %v1897_v60  ;;  %v1878_v22 = vmul.f32 %v11221_v29, %v13275_v32 }
 0x573   :  { %v13307_v53 = vpop.eup %11222 }
 0x574   :  { %v13309_v33 = vpop.eup %11224  ;;  %v1929_v27 = vmul.f32 %v13193_v7, %v1913_v54  ;;  %2371 = vadd.xlane.f32.xlu0 %v13307_v53  ;;  %v1894_v32 = vsub.f32 2.0, %v1878_v22  ;;  %v2729_v54 = vld [vmem:[#allocation4 + $0xd0] sm:$0xff] }
 0x575   :  { %v11227_v23 = vpop.eup %11226  ;;  %v10239_v16 = vpop.f32.mrf.mxu1  ;;  %2369 = vadd.xlane.f32.xlu1 %v13309_v33 }
 0x576   :  { %v13318_v4 = vadd.f32 %v10239_v16, %v2721_v12  ;;  %v1943_v55 = vpack.c.bf16 %v1930_v10, %v1929_v27  ;;  %v1877_v7 = vmul.f32 %v11227_v23, %v13271_v63  ;;  %v1910_v0 = vmul.f32 %v11221_v29, %v1894_v32 }
 0x577   :  { %v13320_v59 = vpop.f32.mrf.mxu1 }
 0x578   :  { %10148 = vmatpush3.bf16.xpose.msra.mxu0 %v1943_v55  ;;  %v1893_v63 = vsub.f32 2.0, %v1877_v7  ;;  %v1926_v18 = vmul.f32 %v13151_v43, %v1910_v0 }
 0x579   :  { %v10240_v6 = vpop.f32.mrf.mxu1  ;;  %2863 = vmax.xlane.f32.xlu1 %v13318_v4  ;;  %10149 = vmatprep.subr.bf16.mxu0 %v17103_v38 }
 0x57a   :  { %v13328_v25 = vadd.f32 %v10240_v6, %v2722_v50  ;;  %v1909_v42 = vmul.f32 %v11227_v23, %v1893_v63  ;;  %v13363_v6 = vadd.f32 %v13320_v59, %v2719_v5  ;;  %v13378_v59 = vld [vmem:[%s16940_s3 + $0x1] ss:$0 sm:$0xff] }
 0x57b   :  { %v2799_v46 = vpop.f32.mrf.mxu1 }
 0x57c   :  { %2865 = vmax.xlane.f32.xlu0 %v13328_v25  ;;  %v1925_v12 = vmul.f32 %v13145_v56, %v1909_v42  ;;  %v13351_v56 = vpop.eup %11228  ;;  %17140 = vst [vmem:[#allocation12_spill] sm:$0xff] %v13363_v6 }
 0x57d   :  { %v10243_v44 = vpop.f32.mrf.mxu1  ;;  %v13357_v50 = vpop.eup %11230 }
 0x57e   :  { %v13332_v39 = vadd.f32 %v10243_v44, %v2725_v1  ;;  %v1941_v23 = vpack.c.bf16 %v1926_v18, %v1925_v12  ;;  %v13368_v1 = vadd.f32 %v2799_v46, %v2720_v13  ;;  %v2731_v13 = vld [vmem:[#allocation4 + $0xe0] sm:$0xff] }
 0x57f   :  { %v2812_v2 = vpop.f32.mrf.mxu1 }
 0x580   :  { %10150 = vmatpush3.bf16.xpose.msra.mxu0 %v1942_v21  ;;  %2871 = vmax.xlane.f32.xlu1 %v13332_v39  ;;  %v13337_v49 = vadd.f32 %v2812_v2, %v2723_v36  ;;  %17141 = vst [vmem:[#allocation44_spill] sm:$0xff] %v13368_v1  ;;  %v2728_v21 = vld [vmem:[#allocation4 + $0xc8] sm:$0xff]  ;;  %v70_v36 = vld [vmem:[%s16942_s5 + $0x30] sm:$0xff] }
 0x581   :  { %v10244_v9 = vpop.f32.mrf.mxu1  ;;  %10151 = vmatprep.subr.bf16.mxu0 %v17103_v38 }
 0x582   :  { %v13339_v60 = vadd.f32 %v10244_v9, %v2726_v45  ;;  %v2321_v9 = vmul.f32 1.442695, %v2301_v37 }
 0x583   :  { %v2815_v29 = vpop.f32.mrf.mxu1 }
 0x584   :  { %2873 = vmax.xlane.f32.xlu0 %v13339_v60  ;;  %2867 = vmax.xlane.f32.xlu1 %v13337_v49  ;;  %v13344_v35 = vadd.f32 %v2815_v29, %v2724_v41  ;;  %v2733_v41 = vld [vmem:[#allocation4 + $0xf0] sm:$0xff]  ;;  %11232 = vpow2.f32 %v2321_v9  ;;  %v17144_v9 = vld [vmem:[#allocation53_spill] sm:$0xff] }
 0x585   :  { %v10247_v10 = vpop.f32.mrf.mxu1 }
 0x586   :  { %v13346_v27 = vadd.f32 %v10247_v10, %v2729_v54  ;;  %v10983_v10 = vld [vmem:[%s16939_s2 + $0x20] sm:$0xff]  }
 0x587   :  { %v2828_v43 = vpop.f32.mrf.mxu1 }
 0x588   :  { %10152 = vmatpush3.bf16.xpose.msra.mxu0 %v1941_v23  ;;  %2869 = vmax.xlane.f32.xlu0 %v13344_v35  ;;  %v13353_v19 = vadd.f32 %v2828_v43, %v2727_v14  ;;  %v17142_v23 = vld [vmem:[#allocation40_spill] sm:$0xff]  ;;  %v17143_v43 = vld [vmem:[#allocation13_spill] sm:$0xff] }
 0x589   :  { %2879 = vmax.xlane.f32.xlu1 %v13346_v27  ;;  %v10248_v16 = vpop.f32.mrf.mxu1  ;;  %10195 = vmatprep.subr.bf16.mxu0 %v17103_v38  ;;  %v232_v14 = vadd.f32 %v17143_v43, %v17142_v23 }
 0x58a   :  { %v13373_v0 = vadd.f32 %v10248_v16, %v2730_v15 }
 0x58b   :  { %v2831_v22 = vpop.f32.mrf.mxu1  ;;  %v13407_v37 = vpack.c.bf16 %v232_v14, %v232_v14 }
 0x58c   :  { %2357 = vadd.xlane.f32.xlu0 %v13351_v56  ;;  %v13388_v18 = vadd.f32 %v2831_v22, %v2728_v21  ;;  %v2299_v22 = vsub.f32 %v13053_v58, %v13220_v62 }
 0x58d   :  { %2875 = vmax.xlane.f32.xlu1 %v13353_v19  ;;  %v10251_v55 = vpop.f32.mrf.mxu1 }
 0x58e   :  { %v13400_v5 = vadd.f32 %v10251_v55, %v2733_v41  ;;  %v2317_v55 = vmul.f32 1.442695, %v2299_v22 }
 0x58f   :  { %v2844_v7 = vpop.f32.mrf.mxu1 }
 0x590   :  { %2359 = vadd.xlane.f32.xlu0 %v13357_v50  ;;  %v13412_v21 = vadd.f32 %v2844_v7, %v2731_v13  ;;  %11234 = vpow2.f32 %v2317_v55 }
 0x591   :  { %v13360_v24 = vpop.f32.mrf.mxu1  ;;  %v13433_v14 = vpop.eup %11232 }
 0x593   :  { %v13365_v51 = vpop.f32.mrf.mxu1 }
 0x594   :  { %2859 = vmax.xlane.f32.xlu0 %v13363_v6 }
 0x595   :  { %v10279_v32 = vpop.f32.mrf.mxu1 }
 0x596   :  { %v3166_v31 = vadd.f32 %v10279_v32, %v13378_v59 }
 0x597   :  { %v3157_v63 = vpop.f32.mrf.mxu1 }
 0x598   :  { %2861 = vmax.xlane.f32.xlu0 %v13368_v1  ;;  %v3158_v45 = vadd.f32 %v13378_v59, %v3157_v63 }
 0x599   :  { %v10280_v44 = vpop.f32.mrf.mxu1 }
 0x59a   :  { %v3169_v2 = vadd.f32 %v10280_v44, %v13378_v59 }
 0x59b   :  { %v3160_v46 = vpop.f32.mrf.mxu1 }
 0x59c   :  { %v3161_v42 = vadd.f32 %v13378_v59, %v3160_v46  ;;  %2881 = vmax.xlane.f32.xlu0 %v13373_v0  ;;  %v3221_v54 = vpack.c.bf16 %v3169_v2, %v3166_v31  ;;  %v2734_v46 = vld [vmem:[#allocation4 + $0xf8] sm:$0xff] }
 0x59d   :  { %v10283_v61 = vpop.f32.mrf.mxu1 }
 0x59e   :  { %v3220_v29 = vpack.c.bf16 %v3161_v42, %v3158_v45  ;;  %104 = vperm.xlu1 %10937, %v70_v36   ;;  %v3182_v58 = vadd.f32 %v10283_v61, %v13378_v59 }
 0x59f   :  { %v3173_v12 = vpop.f32.mrf.mxu1 }
 0x5a0   :  { %10295 = vmatprep.mubr.msk.bf16.mxu1 %vm591_vm2, %v3220_v29  ;;  %2877 = vmax.xlane.f32.xlu0 %v13388_v18  ;;  %v3174_v63 = vadd.f32 %v13378_v59, %v3173_v12  ;;  %v2302_v29 = vsub.f32 %v17144_v9, %v13237_v11  ;;  %v13503_v9 = vld [vmem:[%s16937_s0 + $0x68] sm:$0xff]  }
 0x5a1   :  { %v10284_v16 = vpop.f32.mrf.mxu1  ;;  %10296 = vmatmul.mubr.msk.bf16.vlgmr.msra.gmra.mxu1 %vm591_vm2, %v3221_v54  ;;  %17151 = vst [vmem:[#allocation49_spill] sm:$0xff] %v13503_v9 }
 0x5a2   :  { %10332 = vmatpush3.bf16.msra.mxu1 %v13229_v28  ;;  %v3185_v32 = vadd.f32 %v10284_v16, %v13378_v59  ;;  %v2300_v28 = vsub.f32 %v13058_v3, %v13222_v57  ;;  %v2297_v3 = vsub.f32 %v13102_v20, %v13251_v48  ;;  %v13422_v57 = vadd.f32 %v13360_v24, %v2734_v46  ;;  %v17145_v48 = vld [vmem:[#allocation15_spill] sm:$0xff] }
 0x5a3   :  { %v3176_v15 = vpop.f32.mrf.mxu1  ;;  %10333 = vmatprep.subr.bf16.mxu1 %v10983_v10  ;;  %v2298_v24 = vsub.f32 %v17145_v48, %v13255_v34  ;;  %v2732_v16 = vld [vmem:[#allocation4 + $0xe8] sm:$0xff]  ;;  %v2323_v13 = vmul.f32 1.442695, %v2302_v29  ;;  %v13510_v29 = vld [vmem:[%s16937_s0 + $0x70] sm:$0xff]  }
 0x5a4   :  { %v3177_v44 = vadd.f32 %v13378_v59, %v3176_v15  ;;  %2887 = vmax.xlane.f32.xlu0 %v13400_v5  ;;  %v3223_v36 = vpack.c.bf16 %v3185_v32, %v3182_v58  ;;  %v2319_v31 = vmul.f32 1.442695, %v2300_v28  ;;  %v2313_v20 = vmul.f32 1.442695, %v2297_v3  ;;  %17152 = vst [vmem:[#allocation50_spill] sm:$0xff] %v13510_v29 }
 0x5a5   :  { %v10287_v62 = vpop.f32.mrf.mxu1  ;;  %v2315_v15 = vmul.f32 1.442695, %v2298_v24 }
 0x5a6   :  { %v3222_v2 = vpack.c.bf16 %v3177_v44, %v3174_v63  ;;  %10334 = vmatpush3.bf16.msra.mxu1 %v10983_v10  ;;  %v3198_v12 = vadd.f32 %v10287_v62, %v13378_v59  ;;  %11236 = vpow2.f32 %v2319_v31  ;;  %v13439_v63 = vadd.f32 %v13365_v51, %v2732_v16  ;;  %v13454_v51 = vld [vmem:[%s16937_s0 + $0x40] sm:$0xff]   ;;  %v13471_v31 = vld [vmem:[%s16937_s0 + $0x48] sm:$0xff]  }
 0x5a7   :  { %10917 = vmatprep.subr.msk.bf16.mxu1 %vm616_vm1, %v13407_v37  ;;  %v3189_v45 = vpop.f32.mrf.mxu1  ;;  %11238 = vpow2.f32 %v2313_v20  ;;  %17146 = vst [vmem:[#allocation11_spill] sm:$0xff] %v13454_v51  ;;  %17147 = vst [vmem:[#allocation45_spill] sm:$0xff] %v13471_v31 }
 0x5a8   :  { %10299 = vmatprep.mubr.msk.bf16.mxu1 %vm591_vm2, %v3222_v2  ;;  %2883 = vmax.xlane.f32.xlu0 %v13412_v21  ;;  %v3190_v41 = vadd.f32 %v13378_v59, %v3189_v45  ;;  %11240 = vpow2.f32 %v2323_v13  ;;  %v13446_v2 = vpop.eup %11234 }
 0x5a9   :  { %v10288_v42 = vpop.f32.mrf.mxu1  ;;  %10300 = vmatmul.mubr.msk.bf16.gmra.mxu1 %vm591_vm2, %v3223_v36  ;;  %11242 = vpow2.f32 %v2315_v15 }
 0x5aa   :  { %v3201_v7 = vadd.f32 %v10288_v42, %v13378_v59  ;;  %v3788_v42 = vsel %vm616_vm1, %v13407_v37, 0  ;;  %v13489_v37 = vld [vmem:[%s16937_s0 + $0x58] sm:$0xff]  }
 0x5ab   :  { %v3192_v61 = vpop.f32.mrf.mxu1  ;;  %17149 = vst [vmem:[#allocation47_spill] sm:$0xff] %v13489_v37 }
 0x5ac   :  { %v3193_v54 = vadd.f32 %v13378_v59, %v3192_v61  ;;  %2889 = vmax.xlane.f32.xlu0 %v13422_v57  ;;  %v3225_v22 = vpack.c.bf16 %v3201_v7, %v3198_v12  ;;  %v13481_v7 = vld [vmem:[%s16937_s0 + $0x50] sm:$0xff]   ;;  %v13496_v61 = vld [vmem:[%s16937_s0 + $0x60] sm:$0xff]  }
 0x5ad   :  { %v10291_v10 = vpop.f32.mrf.mxu1  ;;  %17148 = vst [vmem:[#allocation46_spill] sm:$0xff] %v13481_v7  ;;  %17150 = vst [vmem:[#allocation48_spill] sm:$0xff] %v13496_v61 }
 0x5ae   :  { %v3224_v43 = vpack.c.bf16 %v3193_v54, %v3190_v41  ;;  %v3214_v55 = vadd.f32 %v10291_v10, %v13378_v59  ;;  %v13517_v41 = vld [vmem:[%s16937_s0 + $0x78] sm:$0xff]  }
 0x5af   :  { %v3205_v11 = vpop.f32.mrf.mxu1  ;;  %17153 = vst [vmem:[#allocation51_spill] sm:$0xff] %v13517_v41 }
 0x5b0   :  { %10303 = vmatprep.mubr.msk.bf16.mxu1 %vm591_vm2, %v3224_v43  ;;  %2353 = vadd.xlane.f32.xlu0 %v13433_v14  ;;  %v3206_v58 = vadd.f32 %v13378_v59, %v3205_v11 }
 0x5b1   :  { %v10292_v32 = vpop.f32.mrf.mxu1  ;;  %10304 = vmatmul.mubr.msk.bf16.gmra.mxu1 %vm591_vm2, %v3225_v22 }
 0x5b2   :  { %v3217_v34 = vadd.f32 %v10292_v32, %v13378_v59 }
 0x5b3   :  { %v3208_v44 = vpop.f32.mrf.mxu1 }
 0x5b4   :  { %v3209_v62 = vadd.f32 %v13378_v59, %v3208_v44  ;;  %2885 = vmax.xlane.f32.xlu0 %v13439_v63  ;;  %v3227_v46 = vpack.c.bf16 %v3217_v34, %v3214_v55  ;;  %v13458_v59 = vpop.eup %11236  ;;  %v13536_v55 = vld [vmem:[%s16939_s2 + $0x38] sm:$0xff]  }
 0x5b5   :  { %v13461_v36 = vpop.eup %11238  ;;  %17155 = vst [vmem:[#allocation13_spill] sm:$0xff] %v13536_v55 }
 0x5b6   :  { %v3226_v28 = vpack.c.bf16 %v3209_v62, %v3206_v58  ;;  %v13464_v45 = vpop.eup %11240 }
 0x5b7   :  { %v13476_v3 = vpop.eup %11242 }
 0x5b8   :  { %10307 = vmatprep.mubr.msk.bf16.mxu1 %vm591_vm2, %v3226_v28  ;;  %2349 = vadd.xlane.f32.xlu0 %v13446_v2 }
 0x5b9   :  { %10308 = vmatmul.mubr.msk.bf16.gmra.mxu1 %vm591_vm2, %v3227_v46 }
 0x5ba   :  { %10335 = vmatprep.mubr.msk.bf16.mxu1 %vm172_vm0, %v13454_v51 }
 0x5bc   :  { %2351 = vadd.xlane.f32.xlu0 %v13458_v59 }
 0x5c0   :  { %2345 = vadd.xlane.f32.xlu0 %v13461_v36 }
 0x5c1   :  { %10336 = vmatmul.mubr.msk.bf16.vlgmr.msra.gmra.mxu1 %vm172_vm0, %v13471_v31  ;;  %v2366_v20 = vpop.xlane.xlu1 %2365 }
 0x5c2   :  { %10352 = vmatpush3.bf16.msra.mxu1 %v3788_v42  ;;  %2355 = vadd.xlane.f32.xlu1 %v13464_v45 }
 0x5c3   :  { %10339 = vmatprep.mubr.msk.bf16.mxu1 %vm172_vm0, %v13481_v7  ;;  %10389 = vmatprep.subr.bf16.mxu1 %v13536_v55 }
 0x5c4   :  { %2347 = vadd.xlane.f32.xlu0 %v13476_v3 }
 0x5c9   :  { %10340 = vmatmul.mubr.msk.bf16.gmra.mxu1 %vm172_vm0, %v13489_v37 }
 0x5ca   :  { %10343 = vmatprep.mubr.msk.bf16.mxu1 %vm172_vm0, %v13496_v61 }
 0x5d1   :  { %10344 = vmatmul.mubr.msk.bf16.gmra.mxu1 %vm172_vm0, %v13503_v9 }
 0x5d2   :  { %10347 = vmatprep.mubr.msk.bf16.mxu1 %vm172_vm0, %v13510_v29 }
 0x5d9   :  { %10348 = vmatmul.mubr.msk.bf16.gmra.mxu1 %vm172_vm0, %v13517_v41 }
 0x5e9   :  { %v2368_v12 = vpop.xlane.xlu0 %2367 }
 0x5ed   :  { %v13523_v43 = vpop.xlane.xlu0 %2363 }
 0x5ee   :  { %v13521_v54 = vpop.f32.mrf.mxu0 }
 0x5ef   :  { %17154 = vst [vmem:[#allocation17_spill] sm:$0xff] %v13521_v54 }
 0x5f0   :  { %v10097_v10 = vpop.f32.mrf.mxu0 }
 0x5f2   :  { %v1470_v48 = vpop.f32.mrf.mxu0 }
 0x5f4   :  { %v10098_v24 = vpop.f32.mrf.mxu0 }
 0x5f6   :  { %v13525_v16 = vpop.xlane.xlu1 %2361 }
 0x5f9   :  { %v2376_v22 = vpop.xlane.xlu0 %2375 }
 0x5fa   :  { %v2374_v11 = vpop.xlane.xlu1 %2373  ;;  %11244 = vrcp.f32 %v2376_v22 }
 0x5fb   :  { %11246 = vrcp.f32 %v2374_v11 }
 0x5fd   :  { %v2372_v32 = vpop.xlane.xlu0 %2371 }
 0x5fe   :  { %v2370_v13 = vpop.xlane.xlu1 %2369  ;;  %11248 = vrcp.f32 %v2372_v32 }
 0x5ff   :  { %11250 = vrcp.f32 %v2370_v13 }
 0x600   :  { %11252 = vrcp.f32 %v2368_v12 }
 0x601   :  { %11254 = vrcp.f32 %v2366_v20 }
 0x602   :  { %v13527_v15 = vpop.xlane.xlu1 %2863  ;;  %11256 = vrcp.f32 %v13525_v16 }
 0x605   :  { %v13529_v34 = vpop.xlane.xlu0 %2865 }
 0x607   :  { %v11245_v58 = vpop.eup %11244 }
 0x608   :  { %v11247_v62 = vpop.eup %11246  ;;  %v2408_v42 = vmul.f32 %v11245_v58, %v2376_v22 }
 0x609   :  { %v13531_v44 = vpop.xlane.xlu1 %2871  ;;  %v2407_v10 = vmul.f32 %v11247_v62, %v2374_v11 }
 0x60a   :  { %v2424_v54 = vsub.f32 2.0, %v2408_v42 }
 0x60b   :  { %v11249_v24 = vpop.eup %11248  ;;  %v2423_v23 = vsub.f32 2.0, %v2407_v10 }
 0x60c   :  { %v11251_v1 = vpop.eup %11250  ;;  %v2440_v9 = vmul.f32 %v11245_v58, %v2424_v54  ;;  %v2406_v11 = vmul.f32 %v11249_v24, %v2372_v32  ;;  %v17157_v54 = vld [vmem:[#allocation19_spill] sm:$0xff] }
 0x60d   :  { %v13538_v28 = vpop.xlane.xlu0 %2873  ;;  %v13540_v46 = vpop.xlane.xlu1 %2867  ;;  %v2439_v22 = vmul.f32 %v11247_v62, %v2423_v23  ;;  %v2405_v61 = vmul.f32 %v11251_v1, %v2370_v13 }
 0x60e   :  { %v11253_v10 = vpop.eup %11252  ;;  %v2456_v7 = vmul.f32 %v13300_v47, %v2440_v9 }
 0x60f   :  { %v2421_v31 = vsub.f32 2.0, %v2405_v61  ;;  %v11255_v32 = vpop.eup %11254  ;;  %v2404_v13 = vmul.f32 %v11253_v10, %v2368_v12 }
 0x610   :  { %v2403_v47 = vmul.f32 %v11255_v32, %v2366_v20  ;;  %v11257_v61 = vpop.eup %11256 }
 0x611   :  { %v13543_v48 = vpop.xlane.xlu0 %2869  ;;  %v2437_v51 = vmul.f32 %v11251_v1, %v2421_v31  ;;  %v2420_v9 = vsub.f32 2.0, %v2404_v13 }
 0x612   :  { %v2880_v52 = vpop.xlane.xlu1 %2879 }
 0x613   :  { %v2901_v6 = vsub.f32 %v13346_v27, %v2880_v52  ;;  %v2455_v52 = vmul.f32 %v13302_v26, %v2439_v22  ;;  %v2422_v27 = vsub.f32 2.0, %v2406_v11  ;;  %v2453_v1 = vmul.f32 %v13309_v33, %v2437_v51 }
 0x614   :  { %v2401_v22 = vmul.f32 %v11257_v61, %v13525_v16 }
 0x615   :  { %v2927_v41 = vmul.f32 1.442695, %v2901_v6  ;;  %v13547_v29 = vpop.xlane.xlu0 %2357  ;;  %v2438_v62 = vmul.f32 %v11249_v24, %v2422_v27  ;;  %v2464_v55 = vpack.c.bf16 %v2456_v7, %v2455_v52  ;;  %v2419_v7 = vsub.f32 2.0, %v2403_v47 }
 0x616   :  { %v13549_v37 = vpop.xlane.xlu1 %2875  ;;  %v2436_v24 = vmul.f32 %v11253_v10, %v2420_v9  ;;  %v2417_v51 = vsub.f32 2.0, %v2401_v22 }
 0x617   :  { %11258 = vpow2.f32 %v2927_v41  ;;  %v2454_v12 = vmul.f32 %v13307_v53, %v2438_v62  ;;  %v2435_v27 = vmul.f32 %v11255_v32, %v2419_v7 }
 0x618   :  { %11260 = vrcp.f32 %v13523_v43  ;;  %v2452_v33 = vmul.f32 %v13286_v8, %v2436_v24  ;;  %v2433_v62 = vmul.f32 %v11257_v61, %v2417_v51 }
 0x619   :  { %v2360_v42 = vpop.xlane.xlu0 %2359  ;;  %v2463_v52 = vpack.c.bf16 %v2454_v12, %v2453_v1  ;;  %v2451_v10 = vmul.f32 %v13258_v40, %v2435_v27 }
 0x61a   :  { %v13554_v6 = vpop.permute.xlu1 %104  ;;  %11262 = vrcp.f32 %v2360_v42  ;;  %v2449_v8 = vmul.f32 %v13297_v17, %v2433_v62 }
 0x61b   :  { %17156 = vst [vmem:[#allocation53_spill] sm:$0xff] %v13554_v6  ;;  %v250_v23 = vadd.f32 %v17157_v54, %v13554_v6  ;;  %11264 = vrcp.f32 %v13547_v29  ;;  %v2462_v47 = vpack.c.bf16 %v2452_v33, %v2451_v10 }
 0x61d   :  { %v13558_v58 = vpop.xlane.xlu0 %2859  ;;  %v1607_v41 = vpack.c.bf16 %v250_v23, %v250_v23 }
 0x61f   :  { %10154 = vmatmul.mubr.bf16.vlgmr.msra.gmra.mxu0 %v1607_v41 }
 0x620   :  { %10196 = vmatpush3.bf16.xpose.msra.mxu0 %v2464_v55  ;;  %10211 = vmatprep.mubr.msk.bf16.mxu0 %vm12126_vm3, %v17103_v38 }
 0x621   :  { %v13563_v26 = vpop.xlane.xlu0 %2861  ;;  %10197 = vmatprep.subr.bf16.mxu0 %v17103_v38 }
 0x624   :  { %v13568_v31 = vpop.eup %11258 }
 0x625   :  { %v11261_v20 = vpop.eup %11260  ;;  %2959 = vadd.xlane.f32.xlu0 %v13568_v31  ;;  %v2882_v55 = vpop.xlane.xlu0 %2881 }
 0x626   :  { %v2902_v11 = vsub.f32 %v13373_v0, %v2882_v55  ;;  %v2402_v54 = vmul.f32 %v11261_v20, %v13523_v43 }
 0x627   :  { %v11263_v13 = vpop.eup %11262 }
 0x628   :  { %v2929_v23 = vmul.f32 1.442695, %v2902_v11  ;;  %10198 = vmatpush3.bf16.xpose.msra.mxu0 %v2463_v52  ;;  %v2418_v16 = vsub.f32 2.0, %v2402_v54  ;;  %v11265_v41 = vpop.eup %11264  ;;  %v2400_v32 = vmul.f32 %v11263_v13, %v2360_v42 }
 0x629   :  { %v13574_v53 = vpop.xlane.xlu0 %2877  ;;  %10199 = vmatprep.subr.bf16.mxu0 %v17103_v38  ;;  %v2399_v12 = vmul.f32 %v11265_v41, %v13547_v29 }
 0x62a   :  { %11266 = vpow2.f32 %v2929_v23  ;;  %v2434_v9 = vmul.f32 %v11261_v20, %v2418_v16  ;;  %v2416_v55 = vsub.f32 2.0, %v2400_v32 }
 0x62b   :  { %v2415_v42 = vsub.f32 2.0, %v2399_v12 }
 0x62c   :  { %v2450_v61 = vmul.f32 %v13291_v30, %v2434_v9  ;;  %v2432_v22 = vmul.f32 %v11263_v13, %v2416_v55 }
 0x62d   :  { %v2888_v0 = vpop.xlane.xlu0 %2887  ;;  %v2431_v52 = vmul.f32 %v11265_v41, %v2415_v42 }
 0x62e   :  { %v2905_v43 = vsub.f32 %v13400_v5, %v2888_v0  ;;  %v2461_v20 = vpack.c.bf16 %v2450_v61, %v2449_v8  ;;  %v2448_v30 = vmul.f32 %v13357_v50, %v2432_v22 }
 0x630   :  { %v2935_v1 = vmul.f32 1.442695, %v2905_v43  ;;  %10200 = vmatpush3.bf16.xpose.msra.mxu0 %v2462_v47 }
 0x631   :  { %v2884_v7 = vpop.xlane.xlu0 %2883  ;;  %10201 = vmatprep.subr.bf16.mxu0 %v17103_v38 }
 0x632   :  { %11268 = vpow2.f32 %v2935_v1  ;;  %v2903_v40 = vsub.f32 %v13412_v21, %v2884_v7  ;;  %v2447_v21 = vmul.f32 %v13351_v56, %v2431_v52 }
 0x634   :  { %v2931_v24 = vmul.f32 1.442695, %v2903_v40 }
 0x635   :  { %v2890_v5 = vpop.xlane.xlu0 %2889 }
 0x636   :  { %11270 = vpow2.f32 %v2931_v24  ;;  %v2906_v29 = vsub.f32 %v13422_v57, %v2890_v5  ;;  %v2460_v57 = vpack.c.bf16 %v2448_v30, %v2447_v21 }
 0x637   :  { %v13586_v11 = vpop.eup %11266 }
 0x638   :  { %v2937_v27 = vmul.f32 1.442695, %v2906_v29  ;;  %10202 = vmatpush3.bf16.xpose.msra.mxu0 %v2461_v20  ;;  %2961 = vadd.xlane.f32.xlu1 %v13586_v11 }
 0x639   :  { %v2354_v17 = vpop.xlane.xlu0 %2353  ;;  %10203 = vmatprep.subr.bf16.mxu0 %v17103_v38 }
 0x63a   :  { %11272 = vpow2.f32 %v2937_v27 }
 0x63d   :  { %v2886_v54 = vpop.xlane.xlu0 %2885 }
 0x63e   :  { %v2904_v23 = vsub.f32 %v13439_v63, %v2886_v54 }
 0x63f   :  { %v13593_v33 = vpop.eup %11268 }
 0x640   :  { %v2933_v51 = vmul.f32 1.442695, %v2904_v23  ;;  %10204 = vmatpush3.bf16.xpose.msra.mxu0 %v2460_v57  ;;  %2967 = vadd.xlane.f32.xlu0 %v13593_v33 }
 0x641   :  { %v2350_v13 = vpop.xlane.xlu0 %2349  ;;  %10205 = vmatprep.subr.bf16.mxu0 %v17103_v38 }
 0x642   :  { %11274 = vpow2.f32 %v2933_v51 }
 0x643   :  { %v13597_v10 = vpop.eup %11270  ;;  %11276 = vrcp.f32 %v2354_v17 }
 0x644   :  { %2963 = vadd.xlane.f32.xlu0 %v13597_v10 }
 0x645   :  { %v2352_v56 = vpop.xlane.xlu0 %2351 }
 0x646   :  { %11278 = vrcp.f32 %v2352_v56 }
 0x647   :  { %v13600_v50 = vpop.eup %11272  ;;  %11280 = vrcp.f32 %v2350_v13 }
 0x648   :  { %2969 = vadd.xlane.f32.xlu1 %v13600_v50 }
 0x649   :  { %v2346_v63 = vpop.xlane.xlu0 %2345 }
 0x64b   :  { %v2356_v16 = vpop.xlane.xlu1 %2355 }
 0x64c   :  { %11282 = vrcp.f32 %v2356_v16 }
 0x64d   :  { %v2348_v0 = vpop.xlane.xlu0 %2347 }
 0x64e   :  { %11284 = vrcp.f32 %v2348_v0 }
 0x64f   :  { %v13603_v41 = vpop.eup %11274  ;;  %11286 = vrcp.f32 %v2346_v63 }
 0x650   :  { %2965 = vadd.xlane.f32.xlu1 %v13603_v41  ;;  %v11277_v62 = vpop.eup %11276 }
 0x651   :  { %v2397_v32 = vmul.f32 %v11277_v62, %v2354_v17 }
 0x653   :  { %v11279_v43 = vpop.eup %11278  ;;  %v2413_v9 = vsub.f32 2.0, %v2397_v32 }
 0x654   :  { %v11281_v47 = vpop.eup %11280  ;;  %v2396_v1 = vmul.f32 %v11279_v43, %v2352_v56 }
 0x655   :  { %v2429_v8 = vmul.f32 %v11277_v62, %v2413_v9  ;;  %v2395_v55 = vmul.f32 %v11281_v47, %v2350_v13  ;;  %v2900_v62 = vsub.f32 %v13388_v18, %v13574_v53  ;;  %v3237_v9 = vld [vmem:[#allocation4 + $0x1a0] sm:$0xff] }
 0x656   :  { %v2412_v61 = vsub.f32 2.0, %v2396_v1 }
 0x657   :  { %v2445_v5 = vmul.f32 %v13433_v14, %v2429_v8  ;;  %v2411_v22 = vsub.f32 2.0, %v2395_v55  ;;  %v3238_v55 = vld [vmem:[#allocation4 + $0x1a8] sm:$0xff] }
 0x658   :  { %v2428_v27 = vmul.f32 %v11279_v43, %v2412_v61 }
 0x659   :  { %v11283_v12 = vpop.eup %11282  ;;  %v2427_v54 = vmul.f32 %v11281_v47, %v2411_v22 }
 0x65a   :  { %v2398_v7 = vmul.f32 %v11283_v12, %v2356_v16  ;;  %v2444_v14 = vmul.f32 %v13458_v59, %v2428_v27  ;;  %v3244_v27 = vld [vmem:[#allocation4 + $0x1d8] sm:$0xff] }
 0x65b   :  { %v11285_v24 = vpop.eup %11284  ;;  %v2443_v56 = vmul.f32 %v13446_v2, %v2427_v54  ;;  %v2925_v2 = vmul.f32 1.442695, %v2900_v62 }
 0x65c   :  { %v2414_v40 = vsub.f32 2.0, %v2398_v7  ;;  %v11287_v20 = vpop.eup %11286  ;;  %v2394_v17 = vmul.f32 %v11285_v24, %v2348_v0 }
 0x65d   :  { %v2393_v23 = vmul.f32 %v11287_v20, %v2346_v63  ;;  %v2458_v43 = vpack.c.bf16 %v2444_v14, %v2443_v56  ;;  %11288 = vpow2.f32 %v2925_v2  ;;  %v3247_v14 = vld [vmem:[#allocation4 + $0x1f0] sm:$0xff] }
 0x65e   :  { %v2430_v42 = vmul.f32 %v11283_v12, %v2414_v40  ;;  %v2410_v51 = vsub.f32 2.0, %v2394_v17  ;;  %v3240_v12 = vld [vmem:[#allocation4 + $0x1b8] sm:$0xff]  ;;  %v3243_v40 = vld [vmem:[#allocation4 + $0x1d0] sm:$0xff] }
 0x65f   :  { %v2409_v16 = vsub.f32 2.0, %v2393_v23 }
 0x660   :  { %v2446_v29 = vmul.f32 %v13464_v45, %v2430_v42  ;;  %v3239_v45 = vld [vmem:[#allocation4 + $0x1b0] sm:$0xff]  ;;  %v2426_v32 = vmul.f32 %v11285_v24, %v2410_v51  ;;  %v2897_v42 = vsub.f32 %v13332_v39, %v13531_v44  ;;  %v2898_v44 = vsub.f32 %v13339_v60, %v13538_v28  ;;  %v3245_v28 = vld [vmem:[#allocation4 + $0x1e0] sm:$0xff] }
 0x661   :  { %v13608_v52 = vpop.f32.mrf.mxu1  ;;  %v2425_v1 = vmul.f32 %v11287_v20, %v2409_v16 }
 0x662   :  { %v2459_v30 = vpack.c.bf16 %v2446_v29, %v2445_v5  ;;  %v2442_v7 = vmul.f32 %v13476_v3, %v2426_v32  ;;  %v2899_v29 = vsub.f32 %v13353_v19, %v13549_v37  ;;  %v2919_v39 = vmul.f32 1.442695, %v2897_v42  ;;  %v3242_v37 = vld [vmem:[#allocation4 + $0x1c8] sm:$0xff]  ;;  %v3236_v32 = vld [vmem:[#allocation4 + $0x198] sm:$0xff] }
 0x663   :  { %v13610_v21 = vpop.f32.mrf.mxu1  ;;  %v2441_v61 = vmul.f32 %v13461_v36, %v2425_v1  ;;  %v3241_v36 = vld [vmem:[#allocation4 + $0x1c0] sm:$0xff]  ;;  %v2895_v1 = vsub.f32 %v13337_v49, %v13540_v46 }
 0x664   :  { %10206 = vmatpush3.bf16.xpose.msra.mxu0 %v2459_v30  ;;  %v2923_v54 = vmul.f32 1.442695, %v2899_v29  ;;  %11290 = vpow2.f32 %v2919_v39  ;;  %v3233_v39 = vld [vmem:[#allocation4 + $0x180] sm:$0xff] }
 0x665   :  { %v13612_v57 = vpop.f32.mrf.mxu1  ;;  %10207 = vmatprep.subr.bf16.mxu0 %v17103_v38  ;;  %v2457_v22 = vpack.c.bf16 %v2442_v7, %v2441_v61  ;;  %v13678_v61 = vld [vmem:[%s16940_s3 + $0x2] ss:$0 sm:$0xff] }
 0x666   :  { %11292 = vpow2.f32 %v2923_v54 }
 0x667   :  { %v13616_v13 = vpop.f32.mrf.mxu1 }
 0x669   :  { %v10301_v0 = vpop.f32.mrf.mxu1 }
 0x66a   :  { %v13621_v63 = vadd.f32 %v10301_v0, %v3239_v45  ;;  %v2921_v45 = vmul.f32 1.442695, %v2898_v44  ;;  %v13658_v62 = vpop.eup %11288 }
 0x66b   :  { %v3326_v47 = vpop.f32.mrf.mxu1 }
 0x66c   :  { %17158 = vst [vmem:[#allocation15_spill] sm:$0xff] %v13621_v63  ;;  %10208 = vmatpush3.bf16.xpose.msra.mxu0 %v2458_v43  ;;  %3385 = vmax.xlane.f32.xlu0 %v13621_v63  ;;  %v13626_v8 = vadd.f32 %v3326_v47, %v3237_v9  ;;  %11294 = vpow2.f32 %v2921_v45  ;;  %v3248_v9 = vld [vmem:[#allocation4 + $0x1f8] sm:$0xff] }
 0x66d   :  { %v10302_v59 = vpop.f32.mrf.mxu1  ;;  %10209 = vmatprep.subr.bf16.mxu0 %v17103_v38 }
 0x66e   :  { %17159 = vst [vmem:[#allocation19_spill] sm:$0xff] %v13626_v8  ;;  %v13628_v18 = vadd.f32 %v10302_v59, %v3240_v12  ;;  %v13667_v59 = vadd.f32 %v13612_v57, %v3236_v32  ;;  %v17165_v32 = vld [vmem:[#allocation13_spill] sm:$0xff] }
 0x66f   :  { %v3329_v53 = vpop.f32.mrf.mxu1 }
 0x670   :  { %3387 = vmax.xlane.f32.xlu1 %v13628_v18  ;;  %3381 = vmax.xlane.f32.xlu0 %v13626_v8  ;;  %v13635_v5 = vadd.f32 %v3329_v53, %v3238_v55  ;;  %17161 = vst [vmem:[#allocation55_spill] sm:$0xff] %v13667_v59  ;;  %v2915_v55 = vmul.f32 1.442695, %v2895_v1 }
 0x671   :  { %v10305_v24 = vpop.f32.mrf.mxu1  ;;  %v13680_v49 = vpop.eup %11290 }
 0x672   :  { %v13637_v3 = vadd.f32 %v10305_v24, %v3243_v40  ;;  %v2896_v40 = vsub.f32 %v13344_v35, %v13543_v48  ;;  %v3246_v24 = vld [vmem:[#allocation4 + $0x1e8] sm:$0xff]  ;;  %11296 = vpow2.f32 %v2915_v55 }
 0x673   :  { %v3342_v20 = vpop.f32.mrf.mxu1  ;;  %v13683_v42 = vpop.eup %11292 }
 0x674   :  { %10210 = vmatpush3.bf16.xpose.msra.mxu0 %v2457_v22  ;;  %3383 = vmax.xlane.f32.xlu1 %v13635_v5  ;;  %v13648_v23 = vadd.f32 %v3342_v20, %v3241_v36  ;;  %v2893_v20 = vsub.f32 %v13318_v4, %v13527_v15  ;;  %v17162_v4 = vld [vmem:[#allocation41_spill] sm:$0xff]  ;;  %v17163_v15 = vld [vmem:[#allocation14_spill] sm:$0xff] }
 0x675   :  { %3393 = vmax.xlane.f32.xlu0 %v13637_v3  ;;  %v10306_v17 = vpop.f32.mrf.mxu1  ;;  %10253 = vmatprep.subr.bf16.mxu0 %v17103_v38 }
 0x676   :  { %v13646_v30 = vadd.f32 %v10306_v17, %v3244_v27  ;;  %17160 = vst [vmem:[#allocation54_spill] sm:$0xff] %v13648_v23  ;;  %v2917_v27 = vmul.f32 1.442695, %v2896_v40 }
 0x677   :  { %v3345_v19 = vpop.f32.mrf.mxu1 }
 0x678   :  { %3395 = vmax.xlane.f32.xlu1 %v13646_v30  ;;  %v13652_v56 = vadd.f32 %v3345_v19, %v3242_v37  ;;  %v10985_v37 = vld [vmem:[%s16939_s2 + $0x30] sm:$0xff]   ;;  %11298 = vpow2.f32 %v2917_v27 }
 0x679   :  { %3389 = vmax.xlane.f32.xlu0 %v13648_v23  ;;  %v10309_v51 = vpop.f32.mrf.mxu1  ;;  %v13692_v17 = vpop.eup %11294 }
 0x67a   :  { %v13654_v16 = vadd.f32 %v10309_v51, %v3247_v14  ;;  %v3235_v14 = vld [vmem:[#allocation4 + $0x190] sm:$0xff]  ;;  %v236_v51 = vadd.f32 %v17163_v15, %v17162_v4 }
 0x67b   :  { %v3358_v60 = vpop.f32.mrf.mxu1 }
 0x67c   :  { %3391 = vmax.xlane.f32.xlu1 %v13652_v56  ;;  %v13660_v43 = vadd.f32 %v3358_v60, %v3245_v28  ;;  %v2911_v60 = vmul.f32 1.442695, %v2893_v20  ;;  %v2894_v28 = vsub.f32 %v13328_v25, %v13529_v34  ;;  %v4257_v25 = vpack.c.bf16 %v236_v51, %v236_v51 }
 0x67d   :  { %3401 = vmax.xlane.f32.xlu0 %v13654_v16  ;;  %v10310_v0 = vpop.f32.mrf.mxu1 }
 0x67e   :  { %v13669_v2 = vadd.f32 %v10310_v0, %v3248_v9  ;;  %v13708_v0 = vadd.f32 %v13610_v21, %v3233_v39  ;;  %v3234_v9 = vld [vmem:[#allocation4 + $0x188] sm:$0xff]  ;;  %11300 = vpow2.f32 %v2911_v60 }
 0x67f   :  { %v3361_v47 = vpop.f32.mrf.mxu1  ;;  %v13721_v55 = vadd.f32 %v13616_v13, %v3234_v9 }
 0x680   :  { %2957 = vadd.xlane.f32.xlu1 %v13658_v62  ;;  %v13694_v44 = vadd.f32 %v3361_v47, %v3246_v24  ;;  %17164 = vst [vmem:[#allocation14_spill] sm:$0xff] %v13708_v0  ;;  %v13712_v47 = vadd.f32 %v13608_v52, %v3235_v14  ;;  %v2913_v52 = vmul.f32 1.442695, %v2894_v28 }
 0x681   :  { %3397 = vmax.xlane.f32.xlu0 %v13660_v43  ;;  %v10337_v12 = vpop.f32.mrf.mxu1  ;;  %17167 = vst [vmem:[#allocation56_spill] sm:$0xff] %v13721_v55 }
 0x682   :  { %v3680_v35 = vadd.f32 %v10337_v12, %v13678_v61  ;;  %17166 = vst [vmem:[#allocation13_spill] sm:$0xff] %v13712_v47  ;;  %11302 = vpow2.f32 %v2913_v52  ;;  %v17172_v52 = vld [vmem:[#allocation48_spill] sm:$0xff] }
 0x683   :  { %v3671_v7 = vpop.f32.mrf.mxu1 }
 0x684   :  { %3379 = vmax.xlane.f32.xlu1 %v13667_v59  ;;  %v3672_v22 = vadd.f32 %v13678_v61, %v3671_v7 }
 0x685   :  { %3403 = vmax.xlane.f32.xlu0 %v13669_v2  ;;  %v10338_v53 = vpop.f32.mrf.mxu1 }
 0x686   :  { %v3683_v46 = vadd.f32 %v10338_v53, %v13678_v61 }
 0x687   :  { %v3674_v57 = vpop.f32.mrf.mxu1 }
 0x688   :  { %v3675_v29 = vadd.f32 %v13678_v61, %v3674_v57  ;;  %2951 = vadd.xlane.f32.xlu1 %v13680_v49  ;;  %v3735_v54 = vpack.c.bf16 %v3683_v46, %v3680_v35 }
 0x689   :  { %2955 = vadd.xlane.f32.xlu0 %v13683_v42  ;;  %v10341_v48 = vpop.f32.mrf.mxu1 }
 0x68a   :  { %v3734_v36 = vpack.c.bf16 %v3675_v29, %v3672_v22  ;;  %v3696_v34 = vadd.f32 %v10341_v48, %v13678_v61  ;;  %v13727_v22 = vpop.eup %11296 }
 0x68b   :  { %v3687_v19 = vpop.f32.mrf.mxu1  ;;  %v13734_v39 = vpop.eup %11298 }
 0x68c   :  { %10353 = vmatprep.mubr.msk.bf16.mxu1 %vm591_vm2, %v3734_v36  ;;  %2953 = vadd.xlane.f32.xlu1 %v13692_v17  ;;  %v3688_v7 = vadd.f32 %v13678_v61, %v3687_v19  ;;  %v13739_v14 = vpop.eup %11300 }
 0x68d   :  { %3399 = vmax.xlane.f32.xlu0 %v13694_v44  ;;  %v10342_v45 = vpop.f32.mrf.mxu1  ;;  %10354 = vmatmul.mubr.msk.bf16.vlgmr.msra.gmra.mxu1 %vm591_vm2, %v3735_v54 }
 0x68e   :  { %10390 = vmatpush3.bf16.msra.mxu1 %v17165_v32  ;;  %v3699_v12 = vadd.f32 %v10342_v45, %v13678_v61 }
 0x68f   :  { %v3690_v1 = vpop.f32.mrf.mxu1  ;;  %10391 = vmatprep.subr.bf16.mxu1 %v10985_v37  ;;  %v13746_v9 = vpop.eup %11302 }
 0x690   :  { %v3691_v53 = vadd.f32 %v13678_v61, %v3690_v1  ;;  %3373 = vmax.xlane.f32.xlu1 %v13708_v0  ;;  %v3737_v46 = vpack.c.bf16 %v3699_v12, %v3696_v34  ;;  %v71_v1 = vld [vmem:[%s16942_s5 + $0x38] sm:$0xff]  ;;  %v17170_v34 = vld [vmem:[#allocation46_spill] sm:$0xff] }
 0x691   :  { %3377 = vmax.xlane.f32.xlu0 %v13712_v47  ;;  %v10345_v21 = vpop.f32.mrf.mxu1 }
 0x692   :  { %v3736_v40 = vpack.c.bf16 %v3691_v53, %v3688_v7  ;;  %10392 = vmatpush3.bf16.msra.mxu1 %v10985_v37  ;;  %v3712_v20 = vadd.f32 %v10345_v21, %v13678_v61  ;;  %v17168_v7 = vld [vmem:[#allocation11_spill] sm:$0xff]  ;;  %v17169_v53 = vld [vmem:[#allocation45_spill] sm:$0xff] }
 0x693   :  { %10918 = vmatprep.subr.msk.bf16.mxu1 %vm616_vm1, %v4257_v25  ;;  %v3703_v57 = vpop.f32.mrf.mxu1  ;;  %v17171_v21 = vld [vmem:[#allocation47_spill] sm:$0xff] }
 0x694   :  { %10357 = vmatprep.mubr.msk.bf16.mxu1 %vm591_vm2, %v3736_v40  ;;  %3375 = vmax.xlane.f32.xlu1 %v13721_v55  ;;  %v3704_v35 = vadd.f32 %v13678_v61, %v3703_v57  ;;  %v17173_v40 = vld [vmem:[#allocation49_spill] sm:$0xff] }
 0x695   :  { %v10346_v24 = vpop.f32.mrf.mxu1  ;;  %10358 = vmatmul.mubr.msk.bf16.gmra.mxu1 %vm591_vm2, %v3737_v46  ;;  %v17174_v46 = vld [vmem:[#allocation50_spill] sm:$0xff] }
 0x696   :  { %v3715_v29 = vadd.f32 %v10346_v24, %v13678_v61 }
 0x697   :  { %v3706_v13 = vpop.f32.mrf.mxu1 }
 0x698   :  { %v3707_v48 = vadd.f32 %v13678_v61, %v3706_v13  ;;  %2947 = vadd.xlane.f32.xlu1 %v13727_v22  ;;  %v3739_v54 = vpack.c.bf16 %v3715_v29, %v3712_v20 }
 0x699   :  { %v10349_v27 = vpop.f32.mrf.mxu1 }
 0x69a   :  { %v3738_v36 = vpack.c.bf16 %v3707_v48, %v3704_v35  ;;  %v3728_v28 = vadd.f32 %v10349_v27, %v13678_v61 }
 0x69b   :  { %v3719_v19 = vpop.f32.mrf.mxu1 }
 0x69c   :  { %10361 = vmatprep.mubr.msk.bf16.mxu1 %vm591_vm2, %v3738_v36  ;;  %2949 = vadd.xlane.f32.xlu1 %v13734_v39  ;;  %v3720_v45 = vadd.f32 %v13678_v61, %v3719_v19 }
 0x69d   :  { %v10350_v37 = vpop.f32.mrf.mxu1  ;;  %10362 = vmatmul.mubr.msk.bf16.gmra.mxu1 %vm591_vm2, %v3739_v54 }
 0x69e   :  { %v3731_v15 = vadd.f32 %v10350_v37, %v13678_v61  ;;  %v13780_v37 = vld [vmem:[%s16939_s2 + $0x8] sm:$0xff]  }
 0x69f   :  { %v3722_v51 = vpop.f32.mrf.mxu1 }
 0x6a0   :  { %v3723_v60 = vadd.f32 %v13678_v61, %v3722_v51  ;;  %2943 = vadd.xlane.f32.xlu1 %v13739_v14  ;;  %v3741_v12 = vpack.c.bf16 %v3731_v15, %v3728_v28  ;;  %v4302_v61 = vsel %vm616_vm1, %v4257_v25, 0  ;;  %v17175_v25 = vld [vmem:[#allocation51_spill] sm:$0xff] }
 0x6a2   :  { %v3740_v32 = vpack.c.bf16 %v3723_v60, %v3720_v45 }
 0x6a4   :  { %10365 = vmatprep.mubr.msk.bf16.mxu1 %vm591_vm2, %v3740_v32  ;;  %2945 = vadd.xlane.f32.xlu1 %v13746_v9 }
 0x6a5   :  { %10366 = vmatmul.mubr.msk.bf16.gmra.mxu1 %vm591_vm2, %v3741_v12 }
 0x6a6   :  { %10393 = vmatprep.mubr.msk.bf16.mxu1 %vm172_vm0, %v17168_v7 }
 0x6a7   :  { %109 = vperm.xlu0 %10936, %v71_v1  }
 0x6ad   :  { %10394 = vmatmul.mubr.msk.bf16.vlgmr.msra.gmra.mxu1 %vm172_vm0, %v17169_v53 }
 0x6ae   :  { %10410 = vmatpush3.bf16.msra.mxu1 %v4302_v61  ;;  %10397 = vmatprep.mubr.msk.bf16.mxu1 %vm172_vm0, %v17170_v34  ;;  %v13773_v35 = vpop.xlane.xlu0 %2959 }
 0x6af   :  { %10447 = vmatprep.subr.bf16.mxu1 %v13780_v37 }
 0x6b5   :  { %10398 = vmatmul.mubr.msk.bf16.gmra.mxu1 %vm172_vm0, %v17171_v21 }
 0x6b6   :  { %10401 = vmatprep.mubr.msk.bf16.mxu1 %vm172_vm0, %v17172_v52 }
 0x6bd   :  { %10402 = vmatmul.mubr.msk.bf16.gmra.mxu1 %vm172_vm0, %v17173_v40 }
 0x6be   :  { %10405 = vmatprep.mubr.msk.bf16.mxu1 %vm172_vm0, %v17174_v46 }
 0x6c1   :  { %v2962_v20 = vpop.xlane.xlu1 %2961 }
 0x6c5   :  { %10406 = vmatmul.mubr.msk.bf16.gmra.mxu1 %vm172_vm0, %v17175_v25 }
 0x6c9   :  { %v2968_v48 = vpop.xlane.xlu0 %2967 }
 0x6cd   :  { %v2964_v27 = vpop.xlane.xlu0 %2963 }
 0x6d1   :  { %v2970_v36 = vpop.xlane.xlu1 %2969 }
 0x6d2   :  { %11304 = vrcp.f32 %v2970_v36 }
 0x6d3   :  { %11306 = vrcp.f32 %v2968_v48 }
 0x6d9   :  { %v2966_v54 = vpop.xlane.xlu1 %2965 }
 0x6da   :  { %11308 = vrcp.f32 %v2966_v54 }
 0x6db   :  { %11310 = vrcp.f32 %v2964_v27 }
 0x6dc   :  { %11312 = vrcp.f32 %v2962_v20 }
 0x6dd   :  { %11314 = vrcp.f32 %v13773_v35 }
 0x6df   :  { %v13771_v57 = vpop.f32.mrf.mxu0  ;;  %v11305_v40 = vpop.eup %11304 }
 0x6e0   :  { %17176 = vst [vmem:[#allocation11_spill] sm:$0xff] %v13771_v57  ;;  %v11307_v46 = vpop.eup %11306 }
 0x6e1   :  { %v10155_v24 = vpop.f32.mrf.mxu0 }
 0x6e2   :  { %v3002_v24 = vmul.f32 %v11305_v40, %v2970_v36 }
 0x6e3   :  { %v1986_v29 = vpop.f32.mrf.mxu0 }
 0x6e4   :  { %v3001_v29 = vmul.f32 %v11307_v46, %v2968_v48  ;;  %v3018_v4 = vsub.f32 2.0, %v3002_v24 }
 0x6e5   :  { %v10156_v13 = vpop.f32.mrf.mxu0 }
 0x6e6   :  { %v3017_v55 = vsub.f32 2.0, %v3001_v29 }
 0x6e7   :  { %v11309_v6 = vpop.eup %11308 }
 0x6e8   :  { %v11311_v0 = vpop.eup %11310  ;;  %v3000_v47 = vmul.f32 %v11309_v6, %v2966_v54 }
 0x6e9   :  { %v2999_v36 = vmul.f32 %v11311_v0, %v2964_v27  ;;  %v11313_v29 = vpop.eup %11312 }
 0x6eb   :  { %v3015_v54 = vsub.f32 2.0, %v2999_v36 }
 0x6f5   :  { %v13775_v19 = vpop.xlane.xlu0 %3385 }
 0x6f6   :  { %17177 = vst [vmem:[#allocation45_spill] sm:$0xff] %v13775_v19  ;;  %v17184_v19 = vld [vmem:[#allocation21_spill] sm:$0xff] }
 0x6f9   :  { %v13782_v15 = vpop.xlane.xlu0 %3381  ;;  %v13784_v51 = vpop.xlane.xlu1 %3387 }
 0x6fa   :  { %17178 = vst [vmem:[#allocation46_spill] sm:$0xff] %v13782_v15  ;;  %v3033_v15 = vmul.f32 %v11307_v46, %v3017_v55  ;;  %v2998_v55 = vmul.f32 %v11313_v29, %v2962_v20 }
 0x6fd   :  { %v13787_v45 = vpop.xlane.xlu1 %3383 }
 0x6fe   :  { %v13789_v60 = vpop.xlane.xlu0 %3393 }
 0x701   :  { %v13791_v28 = vpop.xlane.xlu1 %3395 }
 0x702   :  { %v13793_v32 = vpop.xlane.xlu0 %3389 }
 0x705   :  { %v13795_v12 = vpop.xlane.xlu1 %3391 }
 0x706   :  { %v13797_v1 = vpop.xlane.xlu0 %3401 }
 0x709   :  { %v13799_v7 = vpop.xlane.xlu1 %2957 }
 0x70a   :  { %v13801_v61 = vpop.xlane.xlu0 %3397 }
 0x70d   :  { %v13803_v53 = vpop.xlane.xlu1 %3379 }
 0x70e   :  { %17179 = vst [vmem:[#allocation47_spill] sm:$0xff] %v13803_v53  ;;  %v13805_v34 = vpop.xlane.xlu0 %3403  ;;  %v3034_v53 = vmul.f32 %v11305_v40, %v3018_v4  ;;  %v3049_v4 = vmul.f32 %v13593_v33, %v3033_v15  ;;  %v11315_v40 = vpop.eup %11314  ;;  %v3014_v33 = vsub.f32 2.0, %v2998_v55 }
 0x710   :  { %v3050_v63 = vmul.f32 %v13600_v50, %v3034_v53  ;;  %v2997_v50 = vmul.f32 %v11315_v40, %v13773_v35 }
 0x711   :  { %v13807_v21 = vpop.xlane.xlu1 %2951 }
 0x712   :  { %v2956_v52 = vpop.xlane.xlu0 %2955  ;;  %v3058_v46 = vpack.c.bf16 %v3050_v63, %v3049_v4 }
 0x713   :  { %11316 = vrcp.f32 %v2956_v52 }
 0x714   :  { %11318 = vrcp.f32 %v13799_v7 }
 0x715   :  { %v13809_v25 = vpop.xlane.xlu1 %2953 }
 0x716   :  { %v13812_v13 = vpop.xlane.xlu0 %3399  ;;  %11320 = vrcp.f32 %v13809_v25 }
 0x717   :  { %11322 = vrcp.f32 %v13807_v21 }
 0x719   :  { %v13814_v57 = vpop.xlane.xlu1 %3373 }
 0x71a   :  { %17180 = vst [vmem:[#allocation48_spill] sm:$0xff] %v13814_v57  ;;  %v13818_v8 = vpop.xlane.xlu0 %3377  ;;  %v3016_v57 = vsub.f32 2.0, %v3000_v47  ;;  %v3031_v47 = vmul.f32 %v11311_v0, %v3015_v54 }
 0x71b   :  { %17182 = vst [vmem:[#allocation50_spill] sm:$0xff] %v13818_v8 }
 0x71c   :  { %v3032_v27 = vmul.f32 %v11309_v6, %v3016_v57  ;;  %v3013_v57 = vsub.f32 2.0, %v2997_v50  ;;  %v3047_v63 = vmul.f32 %v13597_v10, %v3031_v47 }
 0x71d   :  { %v13816_v59 = vpop.xlane.xlu1 %3375 }
 0x71e   :  { %17181 = vst [vmem:[#allocation49_spill] sm:$0xff] %v13816_v59  ;;  %v3029_v15 = vmul.f32 %v11315_v40, %v3013_v57 }
 0x720   :  { %v11317_v6 = vpop.eup %11316  ;;  %v3045_v10 = vmul.f32 %v13568_v31, %v3029_v15 }
 0x721   :  { %v13821_v48 = vpop.xlane.xlu1 %2947  ;;  %v11319_v20 = vpop.eup %11318  ;;  %v2995_v35 = vmul.f32 %v11317_v6, %v2956_v52 }
 0x722   :  { %v13824_v24 = vpop.permute.xlu0 %109  ;;  %v2996_v53 = vmul.f32 %v11319_v20, %v13799_v7 }
 0x723   :  { %17183 = vst [vmem:[#allocation51_spill] sm:$0xff] %v13824_v24  ;;  %v254_v59 = vadd.f32 %v17184_v19, %v13824_v24  ;;  %v3030_v19 = vmul.f32 %v11313_v29, %v3014_v33  ;;  %v3011_v36 = vsub.f32 2.0, %v2995_v35  ;;  %v11321_v4 = vpop.eup %11320 }
 0x724   :  { %v3012_v55 = vsub.f32 2.0, %v2996_v53  ;;  %v11323_v29 = vpop.eup %11322 }
 0x725   :  { %v2123_v8 = vpack.c.bf16 %v254_v59, %v254_v59  ;;  %v2950_v23 = vpop.xlane.xlu1 %2949  ;;  %v3048_v59 = vmul.f32 %v13603_v41, %v3032_v27  ;;  %v3046_v41 = vmul.f32 %v13586_v11, %v3030_v19  ;;  %v3027_v52 = vmul.f32 %v11317_v6, %v3011_v36 }
 0x726   :  { %11324 = vrcp.f32 %v2950_v23  ;;  %v2994_v27 = vmul.f32 %v11321_v4, %v13809_v25  ;;  %v3028_v7 = vmul.f32 %v11319_v20, %v3012_v55 }
 0x727   :  { %10212 = vmatmul.mubr.bf16.vlgmr.msra.gmra.mxu0 %v2123_v8  ;;  %v3057_v0 = vpack.c.bf16 %v3048_v59, %v3047_v63  ;;  %11326 = vrcp.f32 %v13821_v48  ;;  %v3056_v40 = vpack.c.bf16 %v3046_v41, %v3045_v10  ;;  %v3043_v11 = vmul.f32 %v13683_v42, %v3027_v52 }
 0x728   :  { %10254 = vmatpush3.bf16.xpose.msra.mxu0 %v3058_v46  ;;  %10269 = vmatprep.mubr.msk.bf16.mxu0 %vm12126_vm3, %v17103_v38  ;;  %v2993_v46 = vmul.f32 %v11323_v29, %v13807_v21  ;;  %v3010_v50 = vsub.f32 2.0, %v2994_v27  ;;  %v3044_v31 = vmul.f32 %v13658_v62, %v3028_v7 }
 0x729   :  { %10255 = vmatprep.subr.bf16.mxu0 %v17103_v38  ;;  %v2944_v8 = vpop.xlane.xlu1 %2943 }
 0x72a   :  { %v3009_v33 = vsub.f32 2.0, %v2993_v46  ;;  %v3026_v6 = vmul.f32 %v11321_v4, %v3010_v50  ;;  %v3055_v25 = vpack.c.bf16 %v3044_v31, %v3043_v11  ;;  %v3420_v50 = vsub.f32 %v13669_v2, %v13805_v34  ;;  %v17186_v2 = vld [vmem:[#allocation44_spill] sm:$0xff] }
 0x72b   :  { %v2892_v34 = vsub.f32 %v17186_v2, %v13563_v26  ;;  %v3419_v26 = vsub.f32 %v13654_v16, %v13797_v1  ;;  %v3760_v16 = vld [vmem:[#allocation4 + $0x2e8] sm:$0xff] }
 0x72c   :  { %v3025_v63 = vmul.f32 %v11323_v29, %v3009_v33  ;;  %v3042_v21 = vmul.f32 %v13692_v17, %v3026_v6 }
 0x72d   :  { %v2946_v54 = vpop.xlane.xlu1 %2945 }
 0x72e   :  { %11328 = vrcp.f32 %v2946_v54  ;;  %v3041_v42 = vmul.f32 %v13680_v49, %v3025_v63 }
 0x72f   :  { %11330 = vrcp.f32 %v2944_v8 }
 0x730   :  { %10256 = vmatpush3.bf16.xpose.msra.mxu0 %v3057_v0  ;;  %v3054_v41 = vpack.c.bf16 %v3042_v21, %v3041_v42  ;;  %v3758_v42 = vld [vmem:[#allocation4 + $0x2d8] sm:$0xff] }
 0x731   :  { %10257 = vmatprep.subr.bf16.mxu0 %v17103_v38 }
 0x733   :  { %v11325_v47 = vpop.eup %11324 }
 0x734   :  { %v11327_v59 = vpop.eup %11326  ;;  %v2992_v57 = vmul.f32 %v11325_v47, %v2950_v23 }
 0x735   :  { %v2991_v20 = vmul.f32 %v11327_v59, %v13821_v48 }
 0x736   :  { %v3008_v19 = vsub.f32 2.0, %v2992_v57 }
 0x737   :  { %v3007_v0 = vsub.f32 2.0, %v2991_v20  ;;  %v3761_v20 = vld [vmem:[#allocation4 + $0x2f0] sm:$0xff] }
 0x738   :  { %10258 = vmatpush3.bf16.xpose.msra.mxu0 %v3056_v40  ;;  %v3024_v62 = vmul.f32 %v11325_v47, %v3008_v19  ;;  %v3759_v19 = vld [vmem:[#allocation4 + $0x2e0] sm:$0xff] }
 0x739   :  { %10259 = vmatprep.subr.bf16.mxu0 %v17103_v38  ;;  %v3023_v36 = vmul.f32 %v11327_v59, %v3007_v0 }
 0x73a   :  { %v3040_v48 = vmul.f32 %v13734_v39, %v3024_v62 }
 0x73b   :  { %v11329_v35 = vpop.eup %11328  ;;  %v3039_v10 = vmul.f32 %v13727_v22, %v3023_v36 }
 0x73c   :  { %v11331_v15 = vpop.eup %11330  ;;  %v2990_v53 = vmul.f32 %v11329_v35, %v2946_v54 }
 0x73d   :  { %v2989_v23 = vmul.f32 %v11331_v15, %v2944_v8  ;;  %v3053_v49 = vpack.c.bf16 %v3040_v48, %v3039_v10 }
 0x73e   :  { %v3006_v4 = vsub.f32 2.0, %v2990_v53  ;;  %v3762_v53 = vld [vmem:[#allocation4 + $0x2f8] sm:$0xff] }
 0x73f   :  { %v3005_v17 = vsub.f32 2.0, %v2989_v23 }
 0x740   :  { %10260 = vmatpush3.bf16.xpose.msra.mxu0 %v3055_v25  ;;  %v3022_v29 = vmul.f32 %v11329_v35, %v3006_v4  ;;  %v3418_v25 = vsub.f32 %v13694_v44, %v13812_v13  ;;  %v3416_v13 = vsub.f32 %v13646_v30, %v13791_v28  ;;  %v3449_v30 = vmul.f32 1.442695, %v3419_v26  ;;  %v3756_v28 = vld [vmem:[#allocation4 + $0x2c8] sm:$0xff] }
 0x741   :  { %10261 = vmatprep.subr.bf16.mxu0 %v17103_v38  ;;  %v3021_v27 = vmul.f32 %v11331_v15, %v3005_v17  ;;  %v2909_v15 = vmul.f32 1.442695, %v2892_v34 }
 0x742   :  { %v3038_v8 = vmul.f32 %v13746_v9, %v3022_v29  ;;  %v17185_v9 = vld [vmem:[#allocation12_spill] sm:$0xff]  ;;  %v3443_v4 = vmul.f32 1.442695, %v3416_v13 }
 0x743   :  { %v3037_v39 = vmul.f32 %v13739_v14, %v3021_v27  ;;  %v2891_v31 = vsub.f32 %v17185_v9, %v13558_v58  ;;  %v3451_v14 = vmul.f32 1.442695, %v3420_v50  ;;  %v3447_v58 = vmul.f32 1.442695, %v3418_v25 }
 0x744   :  { %v3417_v50 = vsub.f32 %v13660_v43, %v13801_v61  ;;  %v10987_v61 = vld [vmem:[%s16939_s2] sm:$0xff]  }
 0x745   :  { %v3052_v7 = vpack.c.bf16 %v3038_v8, %v3037_v39  ;;  %v2907_v6 = vmul.f32 1.442695, %v2891_v31  ;;  %11332 = vpow2.f32 %v3451_v14  ;;  %v13914_v8 = vld [vmem:[%s16940_s3 + $0x3] ss:$0 sm:$0xff] }
 0x746   :  { %v3445_v2 = vmul.f32 1.442695, %v3417_v50 }
 0x747   :  { %11334 = vpow2.f32 %v2907_v6 }
 0x748   :  { %10262 = vmatpush3.bf16.xpose.msra.mxu0 %v3054_v41  ;;  %11336 = vpow2.f32 %v3447_v58 }
 0x749   :  { %10263 = vmatprep.subr.bf16.mxu0 %v17103_v38  ;;  %11338 = vpow2.f32 %v2909_v15  ;;  %v3412_v15 = vsub.f32 %v13628_v18, %v13784_v51 }
 0x74a   :  { %11340 = vpow2.f32 %v3443_v4 }
 0x74b   :  { %11342 = vpow2.f32 %v3449_v30  ;;  %v3752_v30 = vld [vmem:[#allocation4 + $0x2a8] sm:$0xff] }
 0x74d   :  { %v13854_v55 = vpop.f32.mrf.mxu1 }
 0x74f   :  { %v13856_v52 = vpop.f32.mrf.mxu1 }
 0x750   :  { %10264 = vmatpush3.bf16.xpose.msra.mxu0 %v3053_v49  ;;  %v3414_v49 = vsub.f32 %v13652_v56, %v13795_v12 }
 0x751   :  { %v13858_v54 = vpop.f32.mrf.mxu1  ;;  %10265 = vmatprep.subr.bf16.mxu0 %v17103_v38 }
 0x752   :  { %v13902_v10 = vpop.eup %11332  ;;  %v3439_v6 = vmul.f32 1.442695, %v3414_v49 }
 0x753   :  { %v13862_v40 = vpop.f32.mrf.mxu1 }
 0x754   :  { %v13905_v29 = vpop.eup %11334  ;;  %11344 = vpow2.f32 %v3439_v6 }
 0x755   :  { %v13865_v22 = vpop.f32.mrf.mxu1  ;;  %v13927_v25 = vpop.eup %11336  ;;  %11346 = vpow2.f32 %v3445_v2 }
 0x756   :  { %v13934_v34 = vpop.eup %11338 }
 0x757   :  { %v13867_v46 = vpop.f32.mrf.mxu1  ;;  %v13959_v4 = vpop.eup %11340 }
 0x758   :  { %10266 = vmatpush3.bf16.xpose.msra.mxu0 %v3052_v7 }
 0x759   :  { %v13869_v11 = vpop.f32.mrf.mxu1  ;;  %10267 = vmatprep.subr.bf16.mxu0 %v17103_v38 }
 0x75b   :  { %v13874_v47 = vpop.f32.mrf.mxu1 }
 0x75d   :  { %v13878_v33 = vpop.f32.mrf.mxu1 }
 0x75f   :  { %v13880_v59 = vpop.f32.mrf.mxu1 }
 0x761   :  { %v10364_v57 = vpop.f32.mrf.mxu1 }
 0x762   :  { %v13893_v41 = vadd.f32 %v10364_v57, %v3758_v42  ;;  %v3757_v42 = vld [vmem:[#allocation4 + $0x2d0] sm:$0xff] }
 0x763   :  { %v3859_v63 = vpop.f32.mrf.mxu1 }
 0x764   :  { %v13909_v27 = vadd.f32 %v3859_v63, %v3756_v28  ;;  %v3754_v63 = vld [vmem:[#allocation4 + $0x2b8] sm:$0xff] }
 0x765   :  { %v10367_v21 = vpop.f32.mrf.mxu1 }
 0x766   :  { %v13886_v35 = vadd.f32 %v10367_v21, %v3761_v20  ;;  %v17187_v21 = vld [vmem:[#allocation10_spill] sm:$0xff] }
 0x767   :  { %v3872_v0 = vpop.f32.mrf.mxu1 }
 0x768   :  { %v13888_v62 = vadd.f32 %v3872_v0, %v3759_v19  ;;  %3915 = vmax.xlane.f32.xlu0 %v13886_v35  ;;  %v17188_v19 = vld [vmem:[#allocation24_spill] sm:$0xff] }
 0x769   :  { %v10368_v44 = vpop.f32.mrf.mxu1  ;;  %v293_v58 = vadd.f32 %v17188_v19, %v17187_v21  ;;  %v3753_v19 = vld [vmem:[#allocation4 + $0x2b0] sm:$0xff] }
 0x76a   :  { %3911 = vmax.xlane.f32.xlu1 %v13888_v62  ;;  %v13898_v23 = vadd.f32 %v10368_v44, %v3762_v53  ;;  %v13942_v53 = vadd.f32 %v13869_v11, %v3754_v63  ;;  %v3415_v44 = vsub.f32 %v13637_v3, %v13789_v60  ;;  %v3435_v3 = vmul.f32 1.442695, %v3412_v15  ;;  %v17192_v15 = vld [vmem:[#allocation15_spill] sm:$0xff] }
 0x76b   :  { %v3875_v36 = vpop.f32.mrf.mxu1 }
 0x76c   :  { %3909 = vmax.xlane.f32.xlu0 %v13893_v41  ;;  %v13920_v9 = vadd.f32 %v3875_v36, %v3760_v16  ;;  %v13950_v36 = vadd.f32 %v13878_v33, %v3757_v42  ;;  %v3441_v33 = vmul.f32 1.442695, %v3415_v44  ;;  %v13963_v16 = vpop.eup %11342  ;;  %11348 = vpow2.f32 %v3435_v3  ;;  %v14010_v3 = vld [vmem:[%s16937_s0 + $0x80] sm:$0xff]  }
 0x76d   :  { %v10395_v48 = vpop.f32.mrf.mxu1 }
 0x76e   :  { %3917 = vmax.xlane.f32.xlu1 %v13898_v23  ;;  %v4194_v31 = vadd.f32 %v10395_v48, %v13914_v8  ;;  %11350 = vpow2.f32 %v3441_v33 }
 0x76f   :  { %v4185_v17 = vpop.f32.mrf.mxu1 }
 0x770   :  { %3483 = vadd.xlane.f32.xlu0 %v13902_v10  ;;  %v4186_v56 = vadd.f32 %v13914_v8, %v4185_v17 }
 0x771   :  { %v10396_v1 = vpop.f32.mrf.mxu1 }
 0x772   :  { %2939 = vadd.xlane.f32.xlu1 %v13905_v29  ;;  %v4197_v39 = vadd.f32 %v10396_v1, %v13914_v8  ;;  %v3755_v1 = vld [vmem:[#allocation4 + $0x2c0] sm:$0xff] }
 0x773   :  { %v4188_v7 = vpop.f32.mrf.mxu1 }
 0x774   :  { %v4189_v12 = vadd.f32 %v13914_v8, %v4188_v7  ;;  %3905 = vmax.xlane.f32.xlu0 %v13909_v27  ;;  %v4249_v20 = vpack.c.bf16 %v4197_v39, %v4194_v31  ;;  %v3410_v39 = vsub.f32 %v13635_v5, %v13787_v45  ;;  %v13971_v7 = vadd.f32 %v13874_v47, %v3752_v30 }
 0x775   :  { %v10399_v14 = vpop.f32.mrf.mxu1 }
 0x776   :  { %v4248_v57 = vpack.c.bf16 %v4189_v12, %v4186_v56  ;;  %3913 = vmax.xlane.f32.xlu1 %v13920_v9  ;;  %v4210_v11 = vadd.f32 %v10399_v14, %v13914_v8  ;;  %v17189_v12 = vld [vmem:[#allocation54_spill] sm:$0xff]  ;;  %v13978_v14 = vadd.f32 %v13880_v59, %v3755_v1  ;;  %v3431_v47 = vmul.f32 1.442695, %v3410_v39 }
 0x777   :  { %v4201_v43 = vpop.f32.mrf.mxu1  ;;  %v3413_v31 = vsub.f32 %v17189_v12, %v13793_v32  ;;  %v17194_v1 = vld [vmem:[#allocation46_spill] sm:$0xff]  ;;  %v14042_v12 = vld [vmem:[%s16937_s0 + $0x90] sm:$0xff]  }
 0x778   :  { %10411 = vmatprep.mubr.msk.bf16.mxu1 %vm591_vm2, %v4248_v57  ;;  %3479 = vadd.xlane.f32.xlu0 %v13927_v25  ;;  %v4202_v18 = vadd.f32 %v13914_v8, %v4201_v43  ;;  %v3750_v43 = vld [vmem:[#allocation4 + $0x298] sm:$0xff]  ;;  %11352 = vpow2.f32 %v3431_v47  ;;  %17197 = vst [vmem:[#allocation24_spill] sm:$0xff] %v14042_v12 }
 0x779   :  { %v10400_v0 = vpop.f32.mrf.mxu1  ;;  %10412 = vmatmul.mubr.msk.bf16.vlgmr.msra.gmra.mxu1 %vm591_vm2, %v4249_v20  ;;  %v13985_v20 = vpop.eup %11344  ;;  %v3437_v59 = vmul.f32 1.442695, %v3413_v31  ;;  %v13993_v42 = vadd.f32 %v13858_v54, %v3750_v43  ;;  %v14081_v43 = vld [vmem:[%s16937_s0 + $0xa8] sm:$0xff]  }
 0x77a   :  { %10448 = vmatpush3.bf16.msra.mxu1 %v13780_v37  ;;  %2941 = vadd.xlane.f32.xlu1 %v13934_v34  ;;  %v4213_v13 = vadd.f32 %v10400_v0, %v13914_v8  ;;  %v13955_v37 = vpack.c.bf16 %v293_v58, %v293_v58  ;;  %v13989_v2 = vpop.eup %11346  ;;  %v17191_v0 = vld [vmem:[#allocation45_spill] sm:$0xff] }
 0x77b   :  { %v4204_v26 = vpop.f32.mrf.mxu1  ;;  %10449 = vmatprep.subr.bf16.mxu1 %v10987_v61  ;;  %17190 = vst [vmem:[#allocation21_spill] sm:$0xff] %v13993_v42  ;;  %v3411_v44 = vsub.f32 %v17192_v15, %v17191_v0  ;;  %11354 = vpow2.f32 %v3437_v59  ;;  %v14106_v59 = vld [vmem:[%s16939_s2 + $0x18] sm:$0xff]  }
 0x77c   :  { %v4205_v51 = vadd.f32 %v13914_v8, %v4204_v26  ;;  %3901 = vmax.xlane.f32.xlu0 %v13942_v53  ;;  %v4251_v28 = vpack.c.bf16 %v4213_v13, %v4210_v11 }
 0x77d   :  { %v10403_v48 = vpop.f32.mrf.mxu1 }
 0x77e   :  { %v4250_v60 = vpack.c.bf16 %v4205_v51, %v4202_v18  ;;  %10450 = vmatpush3.bf16.msra.mxu1 %v10987_v61  ;;  %3907 = vmax.xlane.f32.xlu1 %v13950_v36  ;;  %v4226_v5 = vadd.f32 %v10403_v48, %v13914_v8  ;;  %v14000_v18 = vadd.f32 %v13865_v22, %v3753_v19  ;;  %v3748_v22 = vld [vmem:[#allocation4 + $0x288] sm:$0xff] }
 0x77f   :  { %10919 = vmatprep.subr.msk.bf16.mxu1 %vm616_vm1, %v13955_v37  ;;  %v4217_v17 = vpop.f32.mrf.mxu1 }
 0x780   :  { %10415 = vmatprep.mubr.msk.bf16.mxu1 %vm591_vm2, %v4250_v60  ;;  %3475 = vadd.xlane.f32.xlu0 %v13959_v4  ;;  %v4218_v6 = vadd.f32 %v13914_v8, %v4217_v17  ;;  %v14012_v60 = vpop.eup %11348  ;;  %v14020_v17 = vadd.f32 %v13862_v40, %v3748_v22 }
 0x781   :  { %v10404_v49 = vpop.f32.mrf.mxu1  ;;  %10416 = vmatmul.mubr.msk.bf16.gmra.mxu1 %vm591_vm2, %v4251_v28  ;;  %v14014_v30 = vpop.eup %11350  ;;  %v3433_v28 = vmul.f32 1.442695, %v3411_v44 }
 0x782   :  { %3481 = vadd.xlane.f32.xlu1 %v13963_v16  ;;  %v4229_v50 = vadd.f32 %v10404_v49, %v13914_v8  ;;  %17193 = vst [vmem:[#allocation12_spill] sm:$0xff] %v14020_v17  ;;  %v17195_v49 = vld [vmem:[#allocation19_spill] sm:$0xff] }
 0x783   :  { %v4220_v56 = vpop.f32.mrf.mxu1  ;;  %11356 = vpow2.f32 %v3433_v28  ;;  %v3409_v39 = vsub.f32 %v17195_v49, %v17194_v1  ;;  %17202 = vst [vmem:[#allocation19_spill] sm:$0xff] %v14081_v43 }
 0x784   :  { %v4221_v57 = vadd.f32 %v13914_v8, %v4220_v56  ;;  %3897 = vmax.xlane.f32.xlu0 %v13971_v7  ;;  %v4253_v32 = vpack.c.bf16 %v4229_v50, %v4226_v5  ;;  %v14034_v56 = vld [vmem:[%s16937_s0 + $0x88] sm:$0xff]  }
 0x785   :  { %v10407_v45 = vpop.f32.mrf.mxu1  ;;  %17196 = vst [vmem:[#allocation44_spill] sm:$0xff] %v14034_v56  ;;  %v14037_v40 = vpop.eup %11352  ;;  %v3429_v31 = vmul.f32 1.442695, %v3409_v39 }
 0x786   :  { %v4252_v63 = vpack.c.bf16 %v4221_v57, %v4218_v6  ;;  %3903 = vmax.xlane.f32.xlu1 %v13978_v14  ;;  %v4242_v54 = vadd.f32 %v10407_v45, %v13914_v8  ;;  %v4895_v6 = vsel %vm616_vm1, %v13955_v37, 0  ;;  %v3749_v57 = vld [vmem:[#allocation4 + $0x290] sm:$0xff]  ;;  %v14060_v45 = vld [vmem:[%s16937_s0 + $0x98] sm:$0xff]   ;;  %v14066_v37 = vld [vmem:[%s16937_s0 + $0xa0] sm:$0xff]  }
 0x787   :  { %v4233_v61 = vpop.f32.mrf.mxu1  ;;  %11358 = vpow2.f32 %v3429_v31  ;;  %v14055_v5 = vadd.f32 %v13854_v55, %v3749_v57  ;;  %17199 = vst [vmem:[#allocation45_spill] sm:$0xff] %v14060_v45  ;;  %17200 = vst [vmem:[#allocation15_spill] sm:$0xff] %v14066_v37 }
 0x788   :  { %10419 = vmatprep.mubr.msk.bf16.mxu1 %vm591_vm2, %v4252_v63  ;;  %3471 = vadd.xlane.f32.xlu0 %v13985_v20  ;;  %v4234_v51 = vadd.f32 %v13914_v8, %v4233_v61  ;;  %v3747_v63 = vld [vmem:[#allocation4 + $0x280] sm:$0xff] }
 0x789   :  { %v10408_v58 = vpop.f32.mrf.mxu1  ;;  %10420 = vmatmul.mubr.msk.bf16.gmra.mxu1 %vm591_vm2, %v4253_v32  ;;  %17198 = vst [vmem:[#allocation54_spill] sm:$0xff] %v14055_v5  ;;  %v14076_v55 = vadd.f32 %v13856_v52, %v3747_v63  ;;  %v14087_v32 = vld [vmem:[%s16937_s0 + $0xb0] sm:$0xff]   ;;  %v14099_v52 = vld [vmem:[%s16937_s0 + $0xb8] sm:$0xff]  }
 0x78a   :  { %3477 = vadd.xlane.f32.xlu1 %v13989_v2  ;;  %v4245_v13 = vadd.f32 %v10408_v58, %v13914_v8  ;;  %17203 = vst [vmem:[#allocation57_spill] sm:$0xff] %v14087_v32  ;;  %17204 = vst [vmem:[#allocation58_spill] sm:$0xff] %v14099_v52 }
 0x78b   :  { %v4236_v26 = vpop.f32.mrf.mxu1  ;;  %17201 = vst [vmem:[#allocation46_spill] sm:$0xff] %v14076_v55 }
 0x78c   :  { %v4237_v11 = vadd.f32 %v13914_v8, %v4236_v26  ;;  %3893 = vmax.xlane.f32.xlu0 %v13993_v42  ;;  %v4255_v33 = vpack.c.bf16 %v4245_v13, %v4242_v54  ;;  %v3751_v8 = vld [vmem:[#allocation4 + $0x2a0] sm:$0xff] }
 0x78d   :  { %v14028_v50 = vadd.f32 %v13867_v46, %v3751_v8  ;;  %v14045_v46 = vpop.eup %11354 }
 0x78e   :  { %v4254_v48 = vpack.c.bf16 %v4237_v11, %v4234_v51  ;;  %3899 = vmax.xlane.f32.xlu1 %v14000_v18 }
 0x790   :  { %10423 = vmatprep.mubr.msk.bf16.mxu1 %vm591_vm2, %v4254_v48  ;;  %3467 = vadd.xlane.f32.xlu0 %v14012_v60  ;;  %v14068_v47 = vpop.eup %11356 }
 0x791   :  { %10424 = vmatmul.mubr.msk.bf16.gmra.mxu1 %vm591_vm2, %v4255_v33 }
 0x792   :  { %3473 = vadd.xlane.f32.xlu1 %v14014_v30  ;;  %10451 = vmatprep.mubr.msk.bf16.mxu1 %vm172_vm0, %v14010_v3 }
 0x794   :  { %3889 = vmax.xlane.f32.xlu0 %v14020_v17  ;;  %v14089_v61 = vpop.eup %11358 }
 0x796   :  { %3895 = vmax.xlane.f32.xlu1 %v14028_v50 }
 0x798   :  { %3463 = vadd.xlane.f32.xlu0 %v14037_v40 }
 0x799   :  { %10452 = vmatmul.mubr.msk.bf16.vlgmr.msra.gmra.mxu1 %vm172_vm0, %v14034_v56 }
 0x79a   :  { %10468 = vmatpush3.bf16.msra.mxu1 %v4895_v6  ;;  %3469 = vadd.xlane.f32.xlu1 %v14045_v46 }
 0x79b   :  { %10455 = vmatprep.mubr.msk.bf16.mxu1 %vm172_vm0, %v14042_v12  ;;  %10505 = vmatprep.subr.bf16.mxu1 %v14106_v59 }
 0x79e   :  { %3891 = vmax.xlane.f32.xlu1 %v14055_v5 }
 0x7a1   :  { %10456 = vmatmul.mubr.msk.bf16.gmra.mxu1 %vm172_vm0, %v14060_v45 }
 0x7a2   :  { %3465 = vadd.xlane.f32.xlu1 %v14068_v47  ;;  %10459 = vmatprep.mubr.msk.bf16.mxu1 %vm172_vm0, %v14066_v37 }
 0x7a6   :  { %3887 = vmax.xlane.f32.xlu1 %v14076_v55 }
 0x7a9   :  { %10460 = vmatmul.mubr.msk.bf16.gmra.mxu1 %vm172_vm0, %v14081_v43 }
 0x7aa   :  { %3461 = vadd.xlane.f32.xlu1 %v14089_v61  ;;  %10463 = vmatprep.mubr.msk.bf16.mxu1 %vm172_vm0, %v14087_v32 }
 0x7b1   :  { %10464 = vmatmul.mubr.msk.bf16.gmra.mxu1 %vm172_vm0, %v14099_v52 }
 0x7e7   :  { %v14109_v19 = vpop.f32.mrf.mxu0 }
 0x7e8   :  { %17205 = vst [vmem:[#allocation59_spill] sm:$0xff] %v14109_v19 }
 0x7e9   :  { %v10213_v58 = vpop.f32.mrf.mxu0 }
 0x7eb   :  { %v2502_v0 = vpop.f32.mrf.mxu0 }
 0x7ed   :  { %v10214_v15 = vpop.f32.mrf.mxu0 }
 0x7f1   :  { %v14111_v44 = vpop.xlane.xlu0 %3915 }
 0x7f3   :  { %v14113_v13 = vpop.xlane.xlu1 %3911 }
 0x7f5   :  { %v14115_v26 = vpop.xlane.xlu0 %3909 }
 0x7f7   :  { %v14117_v51 = vpop.xlane.xlu1 %3917 }
 0x7f9   :  { %v3484_v11 = vpop.xlane.xlu0 %3483 }
 0x7fb   :  { %v2940_v54 = vpop.xlane.xlu1 %2939 }
 0x7fc   :  { %11360 = vrcp.f32 %v2940_v54 }
 0x7fd   :  { %v14119_v48 = vpop.xlane.xlu0 %3905  ;;  %11362 = vrcp.f32 %v3484_v11 }
 0x7ff   :  { %v14121_v22 = vpop.xlane.xlu1 %3913 }
 0x801   :  { %v3480_v33 = vpop.xlane.xlu0 %3479 }
 0x803   :  { %v2942_v28 = vpop.xlane.xlu1 %2941 }
 0x804   :  { %11364 = vrcp.f32 %v2942_v28 }
 0x805   :  { %v14123_v8 = vpop.xlane.xlu0 %3901  ;;  %11366 = vrcp.f32 %v3480_v33 }
 0x807   :  { %v14125_v1 = vpop.xlane.xlu1 %3907 }
 0x809   :  { %v3476_v49 = vpop.xlane.xlu0 %3475  ;;  %v11361_v39 = vpop.eup %11360 }
 0x80a   :  { %v2987_v6 = vmul.f32 %v11361_v39, %v2940_v54  ;;  %v11363_v58 = vpop.eup %11362 }
 0x80b   :  { %v3482_v31 = vpop.xlane.xlu1 %3481  ;;  %v3516_v17 = vmul.f32 %v11363_v58, %v3484_v11 }
 0x80c   :  { %11368 = vrcp.f32 %v3482_v31  ;;  %v3003_v0 = vsub.f32 2.0, %v2987_v6 }
 0x80d   :  { %v14127_v57 = vpop.xlane.xlu0 %3897  ;;  %11370 = vrcp.f32 %v3476_v49  ;;  %v3532_v43 = vsub.f32 2.0, %v3516_v17 }
 0x80e   :  { %v3019_v55 = vmul.f32 %v11361_v39, %v3003_v0  ;;  %v17208_v0 = vld [vmem:[#allocation16_spill] sm:$0xff] }
 0x80f   :  { %v14129_v63 = vpop.xlane.xlu1 %3903  ;;  %v3548_v11 = vmul.f32 %v11363_v58, %v3532_v43 }
 0x810   :  { %v3035_v37 = vmul.f32 %v13905_v29, %v3019_v55 }
 0x811   :  { %v14131_v15 = vpop.xlane.xlu0 %3471  ;;  %v11365_v19 = vpop.eup %11364 }
 0x812   :  { %v2988_v21 = vmul.f32 %v11365_v19, %v2942_v28  ;;  %v11367_v32 = vpop.eup %11366 }
 0x813   :  { %v3478_v24 = vpop.xlane.xlu1 %3477 }
 0x814   :  { %v3004_v42 = vsub.f32 2.0, %v2988_v21  ;;  %11372 = vrcp.f32 %v3478_v24  ;;  %v3514_v21 = vmul.f32 %v11367_v32, %v3480_v33 }
 0x815   :  { %v14133_v52 = vpop.xlane.xlu0 %3893  ;;  %11374 = vrcp.f32 %v14131_v15 }
 0x816   :  { %v3020_v5 = vmul.f32 %v11365_v19, %v3004_v42  ;;  %17206 = vst [vmem:[#allocation60_spill] sm:$0xff] %v14133_v52  ;;  %v17207_v19 = vld [vmem:[#allocation42_spill] sm:$0xff] }
 0x817   :  { %v14135_v54 = vpop.xlane.xlu1 %3899  ;;  %v242_v52 = vadd.f32 %v17208_v0, %v17207_v19 }
 0x818   :  { %v3036_v6 = vmul.f32 %v13934_v34, %v3020_v5  ;;  %v3564_v5 = vmul.f32 %v13902_v10, %v3548_v11 }
 0x819   :  { %v11369_v45 = vpop.eup %11368  ;;  %v3468_v42 = vpop.xlane.xlu0 %3467  ;;  %v2717_v33 = vpack.c.bf16 %v242_v52, %v242_v52 }
 0x81a   :  { %v3515_v12 = vmul.f32 %v11369_v45, %v3482_v31  ;;  %v3051_v56 = vpack.c.bf16 %v3036_v6, %v3035_v37  ;;  %v11371_v34 = vpop.eup %11370  ;;  %v3530_v37 = vsub.f32 2.0, %v3514_v21 }
 0x81b   :  { %v3474_v28 = vpop.xlane.xlu1 %3473  ;;  %v3512_v0 = vmul.f32 %v11371_v34, %v3476_v49 }
 0x81c   :  { %v3531_v39 = vsub.f32 2.0, %v3515_v12  ;;  %11376 = vrcp.f32 %v3474_v28  ;;  %10268 = vmatpush3.bf16.xpose.msra.mxu0 %v3051_v56  ;;  %v3546_v6 = vmul.f32 %v11367_v32, %v3530_v37 }
 0x81d   :  { %10311 = vmatprep.subr.bf16.mxu0 %v17103_v38  ;;  %v14147_v31 = vpop.xlane.xlu0 %3889  ;;  %11378 = vrcp.f32 %v3468_v42  ;;  %v3528_v11 = vsub.f32 2.0, %v3512_v0 }
 0x81e   :  { %v3547_v29 = vmul.f32 %v11369_v45, %v3531_v39  ;;  %v3562_v52 = vmul.f32 %v13927_v25, %v3546_v6 }
 0x81f   :  { %v14143_v17 = vpop.xlane.xlu1 %3895  ;;  %v3544_v37 = vmul.f32 %v11371_v34, %v3528_v11 }
 0x820   :  { %v3563_v55 = vmul.f32 %v13963_v16, %v3547_v29 }
 0x821   :  { %v11373_v43 = vpop.eup %11372  ;;  %v3464_v39 = vpop.xlane.xlu0 %3463 }
 0x822   :  { %v3513_v12 = vmul.f32 %v11373_v43, %v3478_v24  ;;  %v3572_v58 = vpack.c.bf16 %v3564_v5, %v3563_v55  ;;  %v11375_v24 = vpop.eup %11374 }
 0x823   :  { %v3470_v56 = vpop.xlane.xlu1 %3469  ;;  %10270 = vmatmul.mubr.bf16.vlgmr.msra.gmra.mxu0 %v2717_v33  ;;  %v3510_v55 = vmul.f32 %v11375_v24, %v14131_v15 }
 0x824   :  { %v3529_v45 = vsub.f32 2.0, %v3513_v12  ;;  %11380 = vrcp.f32 %v3470_v56  ;;  %10312 = vmatpush3.bf16.xpose.msra.mxu0 %v3572_v58  ;;  %10327 = vmatprep.mubr.msk.bf16.mxu0 %vm12126_vm3, %v17103_v38 }
 0x825   :  { %10313 = vmatprep.subr.bf16.mxu0 %v17103_v38  ;;  %11382 = vrcp.f32 %v3464_v39  ;;  %v3526_v58 = vsub.f32 2.0, %v3510_v55 }
 0x826   :  { %v3545_v10 = vmul.f32 %v11373_v43, %v3529_v45 }
 0x827   :  { %v14152_v16 = vpop.xlane.xlu1 %3891 }
 0x828   :  { %v3561_v21 = vmul.f32 %v13989_v2, %v3545_v10  ;;  %v3560_v2 = vmul.f32 %v13959_v4, %v3544_v37  ;;  %v3542_v10 = vmul.f32 %v11375_v24, %v3526_v58 }
 0x829   :  { %v11377_v32 = vpop.eup %11376 }
 0x82a   :  { %v3511_v49 = vmul.f32 %v11377_v32, %v3474_v28  ;;  %v3571_v5 = vpack.c.bf16 %v3562_v52, %v3561_v21  ;;  %v11379_v25 = vpop.eup %11378 }
 0x82b   :  { %v3466_v29 = vpop.xlane.xlu1 %3465  ;;  %v3508_v15 = vmul.f32 %v11379_v25, %v3468_v42 }
 0x82c   :  { %v3527_v33 = vsub.f32 2.0, %v3511_v49  ;;  %11384 = vrcp.f32 %v3466_v29  ;;  %10314 = vmatpush3.bf16.xpose.msra.mxu0 %v3571_v5 }
 0x82d   :  { %10315 = vmatprep.subr.bf16.mxu0 %v17103_v38  ;;  %v3524_v49 = vsub.f32 2.0, %v3508_v15 }
 0x82e   :  { %v3543_v43 = vmul.f32 %v11377_v32, %v3527_v33  ;;  %v3558_v32 = vmul.f32 %v13985_v20, %v3542_v10 }
 0x82f   :  { %v14158_v12 = vpop.xlane.xlu1 %3887  ;;  %v3540_v42 = vmul.f32 %v11379_v25, %v3524_v49  ;;  %v17210_v25 = vld [vmem:[#allocation13_spill] sm:$0xff]  ;;  %v17211_v49 = vld [vmem:[#allocation47_spill] sm:$0xff] }
 0x830   :  { %v3559_v28 = vmul.f32 %v14014_v30, %v3543_v43 }
 0x831   :  { %v11381_v6 = vpop.eup %11380 }
 0x832   :  { %v3509_v0 = vmul.f32 %v11381_v6, %v3470_v56  ;;  %v3570_v34 = vpack.c.bf16 %v3560_v2, %v3559_v28  ;;  %v11383_v21 = vpop.eup %11382 }
 0x833   :  { %v3462_v45 = vpop.xlane.xlu1 %3461  ;;  %v3506_v55 = vmul.f32 %v11383_v21, %v3464_v39 }
 0x834   :  { %v3525_v52 = vsub.f32 2.0, %v3509_v0  ;;  %11386 = vrcp.f32 %v3462_v45  ;;  %10316 = vmatpush3.bf16.xpose.msra.mxu0 %v3570_v34  ;;  %v17209_v0 = vld [vmem:[#allocation50_spill] sm:$0xff] }
 0x835   :  { %10317 = vmatprep.subr.bf16.mxu0 %v17103_v38  ;;  %v3522_v58 = vsub.f32 2.0, %v3506_v55  ;;  %v3407_v39 = vsub.f32 %v17210_v25, %v17209_v0  ;;  %v17215_v0 = vld [vmem:[#allocation49_spill] sm:$0xff] }
 0x836   :  { %v3541_v11 = vmul.f32 %v11381_v6, %v3525_v52 }
 0x837   :  { %v3538_v52 = vmul.f32 %v11383_v21, %v3522_v58  ;;  %v17213_v21 = vld [vmem:[#allocation48_spill] sm:$0xff] }
 0x838   :  { %v3557_v4 = vmul.f32 %v14045_v46, %v3541_v11  ;;  %v3556_v46 = vmul.f32 %v14012_v60, %v3540_v42  ;;  %v17212_v60 = vld [vmem:[#allocation55_spill] sm:$0xff] }
 0x839   :  { %v14165_v5 = vpop.f32.mrf.mxu1  ;;  %v11385_v30 = vpop.eup %11384 }
 0x83a   :  { %v3507_v56 = vmul.f32 %v11385_v30, %v3466_v29  ;;  %v3569_v24 = vpack.c.bf16 %v3558_v32, %v3557_v4  ;;  %v3408_v4 = vsub.f32 %v17212_v60, %v17211_v49  ;;  %v4276_v60 = vld [vmem:[#allocation4 + $0x3f8] sm:$0xff] }
 0x83b   :  { %v14167_v37 = vpop.f32.mrf.mxu1 }
 0x83c   :  { %v3523_v33 = vsub.f32 2.0, %v3507_v56  ;;  %10318 = vmatpush3.bf16.xpose.msra.mxu0 %v3569_v24  ;;  %v3554_v24 = vmul.f32 %v14037_v40, %v3538_v52  ;;  %v3427_v55 = vmul.f32 1.442695, %v3408_v4  ;;  %v17216_v40 = vld [vmem:[#allocation56_spill] sm:$0xff] }
 0x83d   :  { %v14169_v43 = vpop.f32.mrf.mxu1  ;;  %10319 = vmatprep.subr.bf16.mxu0 %v17103_v38  ;;  %v3406_v25 = vsub.f32 %v17216_v40, %v17215_v0 }
 0x83e   :  { %v3539_v2 = vmul.f32 %v11385_v30, %v3523_v33  ;;  %v3425_v30 = vmul.f32 1.442695, %v3407_v39  ;;  %v17214_v33 = vld [vmem:[#allocation14_spill] sm:$0xff]  ;;  %v4275_v39 = vld [vmem:[#allocation4 + $0x3f0] sm:$0xff] }
 0x83f   :  { %v14172_v20 = vpop.f32.mrf.mxu1 }
 0x840   :  { %v3555_v28 = vmul.f32 %v14068_v47, %v3539_v2  ;;  %11388 = vpow2.f32 %v3425_v30  ;;  %v3405_v2 = vsub.f32 %v17214_v33, %v17213_v21 }
 0x841   :  { %v14176_v29 = vpop.f32.mrf.mxu1  ;;  %v11387_v6 = vpop.eup %11386  ;;  %11390 = vpow2.f32 %v3427_v55  ;;  %v4273_v55 = vld [vmem:[#allocation4 + $0x3e0] sm:$0xff] }
 0x842   :  { %v3505_v34 = vmul.f32 %v11387_v6, %v3462_v45  ;;  %v3568_v15 = vpack.c.bf16 %v3556_v46, %v3555_v28 }
 0x843   :  { %v14180_v10 = vpop.f32.mrf.mxu1 }
 0x844   :  { %v3521_v11 = vsub.f32 2.0, %v3505_v34  ;;  %10320 = vmatpush3.bf16.xpose.msra.mxu0 %v3568_v15  ;;  %v3933_v15 = vsub.f32 %v13886_v35, %v14111_v44  ;;  %v3931_v44 = vsub.f32 %v13888_v62, %v14113_v13  ;;  %v3932_v13 = vsub.f32 %v13920_v9, %v14121_v22 }
 0x845   :  { %v14182_v32 = vpop.f32.mrf.mxu1  ;;  %10321 = vmatprep.subr.bf16.mxu0 %v17103_v38 }
 0x846   :  { %v3537_v47 = vmul.f32 %v11387_v6, %v3521_v11  ;;  %v3421_v6 = vmul.f32 1.442695, %v3405_v2  ;;  %v3423_v11 = vmul.f32 1.442695, %v3406_v25  ;;  %v3963_v30 = vmul.f32 1.442695, %v3933_v15 }
 0x847   :  { %v14187_v56 = vpop.f32.mrf.mxu1  ;;  %v14228_v25 = vld [vmem:[%s16940_s3] ss:$0 sm:$0xff] }
 0x848   :  { %v3553_v45 = vmul.f32 %v14089_v61, %v3537_v47  ;;  %11392 = vpow2.f32 %v3421_v6  ;;  %v4274_v6 = vld [vmem:[#allocation4 + $0x3e8] sm:$0xff] }
 0x849   :  { %v10421_v42 = vpop.f32.mrf.mxu1  ;;  %11394 = vpow2.f32 %v3423_v11 }
 0x84a   :  { %v3567_v58 = vpack.c.bf16 %v3554_v24, %v3553_v45  ;;  %v3934_v45 = vsub.f32 %v13898_v23, %v14117_v51  ;;  %11396 = vpow2.f32 %v3963_v30  ;;  %v3959_v51 = vmul.f32 1.442695, %v3931_v44  ;;  %v10997_v44 = vld [vmem:[%s16939_s2 + $0x10] sm:$0xff]  }
 0x84b   :  { %v14193_v46 = vpop.f32.mrf.mxu1  ;;  %v3929_v30 = vsub.f32 %v13950_v36, %v14125_v1 }
 0x84c   :  { %10322 = vmatpush3.bf16.xpose.msra.mxu0 %v3567_v58  ;;  %v3965_v58 = vmul.f32 1.442695, %v3934_v45  ;;  %v3961_v45 = vmul.f32 1.442695, %v3932_v13  ;;  %v4269_v13 = vld [vmem:[#allocation4 + $0x3c0] sm:$0xff] }
 0x84d   :  { %v14195_v28 = vpop.f32.mrf.mxu1  ;;  %10323 = vmatprep.subr.bf16.mxu0 %v17103_v38  ;;  %v14209_v24 = vpop.eup %11388 }
 0x84e   :  { %v14219_v2 = vpop.eup %11390  ;;  %11398 = vpow2.f32 %v3965_v58 }
 0x84f   :  { %v14200_v61 = vpop.f32.mrf.mxu1  ;;  %11400 = vpow2.f32 %v3959_v51  ;;  %v3930_v51 = vsub.f32 %v13893_v41, %v14115_v26  ;;  %v3927_v26 = vsub.f32 %v13978_v14, %v14129_v63 }
 0x850   :  { %11402 = vpow2.f32 %v3961_v45 }
 0x851   :  { %v10425_v34 = vpop.f32.mrf.mxu1  ;;  %v3951_v63 = vmul.f32 1.442695, %v3927_v26  ;;  %v4268_v26 = vld [vmem:[#allocation4 + $0x3b8] sm:$0xff] }
 0x852   :  { %v14204_v52 = vadd.f32 %v10425_v34, %v4275_v39  ;;  %v4271_v39 = vld [vmem:[#allocation4 + $0x3d0] sm:$0xff] }
 0x853   :  { %v4386_v49 = vpop.f32.mrf.mxu1  ;;  %v14242_v9 = vadd.f32 %v10421_v42, %v4271_v39  ;;  %v3955_v42 = vmul.f32 1.442695, %v3929_v30 }
 0x854   :  { %4429 = vmax.xlane.f32.xlu1 %v14204_v52  ;;  %v14217_v33 = vadd.f32 %v4386_v49, %v4273_v55 }
 0x855   :  { %v10426_v4 = vpop.f32.mrf.mxu1  ;;  %v14230_v62 = vpop.eup %11392  ;;  %11404 = vpow2.f32 %v3955_v42 }
 0x856   :  { %v14207_v47 = vadd.f32 %v10426_v4, %v4276_v60  ;;  %v14247_v58 = vpop.eup %11394 }
 0x857   :  { %v4389_v21 = vpop.f32.mrf.mxu1 }
 0x858   :  { %3457 = vadd.xlane.f32.xlu1 %v14209_v24  ;;  %4431 = vmax.xlane.f32.xlu0 %v14207_v47  ;;  %v14223_v40 = vadd.f32 %v4389_v21, %v4274_v6  ;;  %v4272_v6 = vld [vmem:[#allocation4 + $0x3d8] sm:$0xff] }
 0x859   :  { %v10453_v35 = vpop.f32.mrf.mxu1  ;;  %v14261_v39 = vadd.f32 %v14195_v28, %v4272_v6  ;;  %v14274_v28 = vadd.f32 %v14193_v46, %v4269_v13  ;;  %v4267_v6 = vld [vmem:[#allocation4 + $0x3b0] sm:$0xff] }
 0x85a   :  { %v4788_v60 = vadd.f32 %v10453_v35, %v14228_v25  ;;  %v17217_v35 = vld [vmem:[#allocation23_spill] sm:$0xff] }
 0x85b   :  { %v4779_v0 = vpop.f32.mrf.mxu1 }
 0x85c   :  { %4425 = vmax.xlane.f32.xlu1 %v14217_v33  ;;  %3459 = vadd.xlane.f32.xlu0 %v14219_v2  ;;  %v4780_v11 = vadd.f32 %v14228_v25, %v4779_v0  ;;  %v17218_v0 = vld [vmem:[#allocation26_spill] sm:$0xff] }
 0x85d   :  { %v10454_v23 = vpop.f32.mrf.mxu1  ;;  %v297_v36 = vadd.f32 %v17218_v0, %v17217_v35 }
 0x85e   :  { %v4791_v34 = vadd.f32 %v10454_v23, %v14228_v25  ;;  %v14256_v23 = vpop.eup %11396 }
 0x85f   :  { %v4782_v15 = vpop.f32.mrf.mxu1 }
 0x860   :  { %v4783_v49 = vadd.f32 %v14228_v25, %v4782_v15  ;;  %4427 = vmax.xlane.f32.xlu0 %v14223_v40  ;;  %3453 = vadd.xlane.f32.xlu1 %v14230_v62  ;;  %v4843_v55 = vpack.c.bf16 %v4791_v34, %v4788_v60 }
 0x861   :  { %v10457_v4 = vpop.f32.mrf.mxu1 }
 0x862   :  { %v4842_v22 = vpack.c.bf16 %v4783_v49, %v4780_v11  ;;  %v4804_v60 = vadd.f32 %v10457_v4, %v14228_v25  ;;  %v4270_v4 = vld [vmem:[#allocation4 + $0x3c8] sm:$0xff] }
 0x863   :  { %v4795_v21 = vpop.f32.mrf.mxu1  ;;  %v14289_v0 = vadd.f32 %v14200_v61, %v4270_v4 }
 0x864   :  { %10469 = vmatprep.mubr.msk.bf16.mxu1 %vm591_vm2, %v4842_v22  ;;  %4421 = vmax.xlane.f32.xlu1 %v14242_v9  ;;  %v4796_v11 = vadd.f32 %v14228_v25, %v4795_v21  ;;  %v3957_v22 = vmul.f32 1.442695, %v3930_v51  ;;  %v14278_v21 = vpop.eup %11398 }
 0x865   :  { %3455 = vadd.xlane.f32.xlu0 %v14247_v58  ;;  %v10458_v1 = vpop.f32.mrf.mxu1  ;;  %10470 = vmatmul.mubr.msk.bf16.vlgmr.msra.gmra.mxu1 %vm591_vm2, %v4843_v55  ;;  %v14284_v46 = vpop.eup %11400 }
 0x866   :  { %10506 = vmatpush3.bf16.msra.mxu1 %v14106_v59  ;;  %v4807_v34 = vadd.f32 %v10458_v1, %v14228_v25  ;;  %v14267_v59 = vpack.c.bf16 %v297_v36, %v297_v36  ;;  %11406 = vpow2.f32 %v3957_v22  ;;  %v14313_v22 = vadd.f32 %v14182_v32, %v4268_v26  ;;  %v17224_v26 = vld [vmem:[#allocation15_spill] sm:$0xff] }
 0x867   :  { %v4798_v15 = vpop.f32.mrf.mxu1  ;;  %10507 = vmatprep.subr.bf16.mxu1 %v10997_v44  ;;  %11408 = vpow2.f32 %v3951_v63 }
 0x868   :  { %v4799_v49 = vadd.f32 %v14228_v25, %v4798_v15  ;;  %3995 = vadd.xlane.f32.xlu1 %v14256_v23  ;;  %v4845_v45 = vpack.c.bf16 %v4807_v34, %v4804_v60  ;;  %v14302_v60 = vpop.eup %11402 }
 0x869   :  { %4423 = vmax.xlane.f32.xlu0 %v14261_v39  ;;  %v10461_v41 = vpop.f32.mrf.mxu1 }
 0x86a   :  { %v4844_v30 = vpack.c.bf16 %v4799_v49, %v4796_v11  ;;  %10508 = vmatpush3.bf16.msra.mxu1 %v10997_v44  ;;  %v3928_v44 = vsub.f32 %v13909_v27, %v14119_v48  ;;  %v4820_v13 = vadd.f32 %v10461_v41, %v14228_v25  ;;  %v3925_v27 = vsub.f32 %v14000_v18, %v14135_v54  ;;  %v14308_v54 = vpop.eup %11404 }
 0x86b   :  { %10920 = vmatprep.subr.msk.bf16.mxu1 %vm616_vm1, %v14267_v59  ;;  %v4811_v55 = vpop.f32.mrf.mxu1  ;;  %v14300_v48 = vadd.f32 %v14176_v29, %v4267_v6  ;;  %v3926_v29 = vsub.f32 %v13942_v53, %v14123_v8  ;;  %v3923_v53 = vsub.f32 %v14028_v50, %v14143_v17  ;;  %v3924_v17 = vsub.f32 %v13971_v7, %v14127_v57  ;;  %v17219_v57 = vld [vmem:[#allocation44_spill] sm:$0xff] }
 0x86c   :  { %10473 = vmatprep.mubr.msk.bf16.mxu1 %vm591_vm2, %v4844_v30  ;;  %4417 = vmax.xlane.f32.xlu1 %v14274_v28  ;;  %v4812_v42 = vadd.f32 %v14228_v25, %v4811_v55  ;;  %v3953_v15 = vmul.f32 1.442695, %v3928_v44  ;;  %v3947_v18 = vmul.f32 1.442695, %v3925_v27  ;;  %v4265_v30 = vld [vmem:[#allocation4 + $0x3a0] sm:$0xff]  ;;  %v5408_v7 = vsel %vm616_vm1, %v14267_v59, 0 }
 0x86d   :  { %3997 = vadd.xlane.f32.xlu0 %v14278_v21  ;;  %v10462_v14 = vpop.f32.mrf.mxu1  ;;  %10474 = vmatmul.mubr.msk.bf16.gmra.mxu1 %vm591_vm2, %v4845_v45  ;;  %v14324_v8 = vadd.f32 %v14180_v10, %v4265_v30  ;;  %v3949_v44 = vmul.f32 1.442695, %v3926_v29  ;;  %v4263_v10 = vld [vmem:[#allocation4 + $0x390] sm:$0xff]  ;;  %v4261_v27 = vld [vmem:[#allocation4 + $0x380] sm:$0xff]  ;;  %v17227_v29 = vld [vmem:[#allocation57_spill] sm:$0xff] }
 0x86e   :  { %v4823_v36 = vadd.f32 %v10462_v14, %v14228_v25  ;;  %11410 = vpow2.f32 %v3953_v15  ;;  %v14364_v59 = vadd.f32 %v14167_v37, %v4261_v27  ;;  %v17228_v30 = vld [vmem:[#allocation58_spill] sm:$0xff] }
 0x86f   :  { %v4814_v1 = vpop.f32.mrf.mxu1  ;;  %11412 = vpow2.f32 %v3947_v18  ;;  %v17226_v18 = vld [vmem:[#allocation19_spill] sm:$0xff] }
 0x870   :  { %v4815_v51 = vadd.f32 %v14228_v25, %v4814_v1  ;;  %3991 = vadd.xlane.f32.xlu1 %v14284_v46  ;;  %v4847_v11 = vpack.c.bf16 %v4823_v36, %v4820_v13  ;;  %v4266_v1 = vld [vmem:[#allocation4 + $0x3a8] sm:$0xff]  ;;  %11414 = vpow2.f32 %v3949_v44  ;;  %v3945_v13 = vmul.f32 1.442695, %v3924_v17  ;;  %17222 = vst [vmem:[#allocation50_spill] sm:$0xff] %v14364_v59 }
 0x871   :  { %4419 = vmax.xlane.f32.xlu0 %v14289_v0  ;;  %v10465_v34 = vpop.f32.mrf.mxu1 }
 0x872   :  { %v4846_v61 = vpack.c.bf16 %v4815_v51, %v4812_v42  ;;  %v4836_v63 = vadd.f32 %v10465_v34, %v14228_v25  ;;  %v14339_v42 = vadd.f32 %v14187_v56, %v4266_v1  ;;  %v14344_v51 = vadd.f32 %v14165_v5, %v4263_v10  ;;  %v4264_v34 = vld [vmem:[#allocation4 + $0x398] sm:$0xff]  ;;  %v17220_v56 = vld [vmem:[#allocation24_spill] sm:$0xff] }
 0x873   :  { %v4827_v49 = vpop.f32.mrf.mxu1  ;;  %v14326_v36 = vpop.eup %11406 }
 0x874   :  { %10477 = vmatprep.mubr.msk.bf16.mxu1 %vm591_vm2, %v4846_v61  ;;  %4413 = vmax.xlane.f32.xlu1 %v14300_v48  ;;  %v4828_v4 = vadd.f32 %v14228_v25, %v4827_v49  ;;  %v14334_v50 = vpop.eup %11408  ;;  %v14359_v61 = vadd.f32 %v14169_v43, %v4264_v34  ;;  %v17223_v49 = vld [vmem:[#allocation45_spill] sm:$0xff] }
 0x875   :  { %3993 = vadd.xlane.f32.xlu0 %v14302_v60  ;;  %v10466_v41 = vpop.f32.mrf.mxu1  ;;  %10478 = vmatmul.mubr.msk.bf16.gmra.mxu1 %vm591_vm2, %v4847_v11  ;;  %v4262_v11 = vld [vmem:[#allocation4 + $0x388] sm:$0xff] }
 0x876   :  { %v4839_v45 = vadd.f32 %v10466_v41, %v14228_v25  ;;  %17221 = vst [vmem:[#allocation16_spill] sm:$0xff] %v14359_v61  ;;  %v14377_v41 = vadd.f32 %v14172_v20, %v4262_v11  ;;  %v14393_v20 = vld [vmem:[%s16939_s2 + $0x28] sm:$0xff]  }
 0x877   :  { %v4830_v55 = vpop.f32.mrf.mxu1 }
 0x878   :  { %v4831_v14 = vadd.f32 %v14228_v25, %v4830_v55  ;;  %3987 = vadd.xlane.f32.xlu1 %v14308_v54  ;;  %v4849_v6 = vpack.c.bf16 %v4839_v45, %v4836_v63  ;;  %v3943_v25 = vmul.f32 1.442695, %v3923_v53  ;;  %17225 = vst [vmem:[#allocation13_spill] sm:$0xff] %v14377_v41 }
 0x879   :  { %4415 = vmax.xlane.f32.xlu0 %v14313_v22 }
 0x87a   :  { %v4848_v32 = vpack.c.bf16 %v4831_v14, %v4828_v4  ;;  %11416 = vpow2.f32 %v3943_v25 }
 0x87b   :  { %11418 = vpow2.f32 %v3945_v13 }
 0x87c   :  { %10481 = vmatprep.mubr.msk.bf16.mxu1 %vm591_vm2, %v4848_v32  ;;  %4409 = vmax.xlane.f32.xlu1 %v14324_v8 }
 0x87d   :  { %3989 = vadd.xlane.f32.xlu0 %v14326_v36  ;;  %10482 = vmatmul.mubr.msk.bf16.gmra.mxu1 %vm591_vm2, %v4849_v6 }
 0x87e   :  { %10509 = vmatprep.mubr.msk.bf16.mxu1 %vm172_vm0, %v14010_v3  ;;  %v14346_v3 = vpop.eup %11410 }
 0x87f   :  { %v14356_v5 = vpop.eup %11412 }
 0x880   :  { %3983 = vadd.xlane.f32.xlu1 %v14334_v50  ;;  %v14366_v15 = vpop.eup %11414 }
 0x881   :  { %4411 = vmax.xlane.f32.xlu0 %v14339_v42 }
 0x884   :  { %4405 = vmax.xlane.f32.xlu1 %v14344_v51 }
 0x885   :  { %3985 = vadd.xlane.f32.xlu0 %v14346_v3  ;;  %10510 = vmatmul.mubr.msk.bf16.vlgmr.msra.gmra.mxu1 %vm172_vm0, %v17219_v57 }
 0x886   :  { %10526 = vmatpush3.bf16.msra.mxu1 %v5408_v7  ;;  %10513 = vmatprep.mubr.msk.bf16.mxu1 %vm172_vm0, %v17220_v56 }
 0x887   :  { %v14374_v43 = vpop.eup %11416  ;;  %10563 = vmatprep.subr.bf16.mxu1 %v14393_v20 }
 0x888   :  { %3979 = vadd.xlane.f32.xlu1 %v14356_v5  ;;  %v14381_v37 = vpop.eup %11418 }
 0x889   :  { %4407 = vmax.xlane.f32.xlu0 %v14359_v61 }
 0x88c   :  { %4401 = vmax.xlane.f32.xlu1 %v14364_v59 }
 0x88d   :  { %3981 = vadd.xlane.f32.xlu0 %v14366_v15  ;;  %10514 = vmatmul.mubr.msk.bf16.gmra.mxu1 %vm172_vm0, %v17223_v49 }
 0x88e   :  { %10517 = vmatprep.mubr.msk.bf16.mxu1 %vm172_vm0, %v17224_v26 }
 0x890   :  { %3975 = vadd.xlane.f32.xlu1 %v14374_v43 }
 0x891   :  { %4403 = vmax.xlane.f32.xlu0 %v14377_v41 }
 0x895   :  { %3977 = vadd.xlane.f32.xlu0 %v14381_v37  ;;  %10518 = vmatmul.mubr.msk.bf16.gmra.mxu1 %vm172_vm0, %v17226_v18 }
 0x896   :  { %10521 = vmatprep.mubr.msk.bf16.mxu1 %vm172_vm0, %v17227_v29 }
 0x89d   :  { %10522 = vmatmul.mubr.msk.bf16.gmra.mxu1 %vm172_vm0, %v17228_v30 }
 0x8dd   :  { %v14396_v45 = vpop.xlane.xlu1 %4429 }
 0x8e1   :  { %v14398_v55 = vpop.xlane.xlu0 %4431  ;;  %v3458_v4 = vpop.xlane.xlu1 %3457 }
 0x8e2   :  { %11420 = vrcp.f32 %v3458_v4 }
 0x8e3   :  { %v14400_v14 = vpop.f32.mrf.mxu0 }
 0x8e4   :  { %17229 = vst [vmem:[#allocation47_spill] sm:$0xff] %v14400_v14 }
 0x8e5   :  { %v3460_v63 = vpop.xlane.xlu0 %3459  ;;  %v14402_v53 = vpop.xlane.xlu1 %4425 }
 0x8e6   :  { %v10271_v32 = vpop.f32.mrf.mxu0  ;;  %11422 = vrcp.f32 %v3460_v63 }
 0x8e8   :  { %v3096_v44 = vpop.f32.mrf.mxu0 }
 0x8e9   :  { %v14404_v6 = vpop.xlane.xlu0 %4427  ;;  %v3454_v1 = vpop.xlane.xlu1 %3453 }
 0x8ea   :  { %v10272_v25 = vpop.f32.mrf.mxu0  ;;  %11424 = vrcp.f32 %v3454_v1 }
 0x8ed   :  { %v14406_v17 = vpop.xlane.xlu1 %4421 }
 0x8ee   :  { %v3456_v10 = vpop.xlane.xlu0 %3455 }
 0x8ef   :  { %11426 = vrcp.f32 %v3456_v10  ;;  %v11421_v13 = vpop.eup %11420 }
 0x8f0   :  { %v3503_v34 = vmul.f32 %v11421_v13, %v3458_v4 }
 0x8f1   :  { %v3996_v7 = vpop.xlane.xlu1 %3995 }
 0x8f2   :  { %v14408_v57 = vpop.xlane.xlu0 %4423  ;;  %v3519_v56 = vsub.f32 2.0, %v3503_v34  ;;  %11428 = vrcp.f32 %v3996_v7 }
 0x8f3   :  { %v11423_v27 = vpop.eup %11422 }
 0x8f4   :  { %v3504_v11 = vmul.f32 %v11423_v27, %v3460_v63  ;;  %v3535_v18 = vmul.f32 %v11421_v13, %v3519_v56 }
 0x8f5   :  { %v14410_v49 = vpop.xlane.xlu1 %4417 }
 0x8f6   :  { %v3998_v26 = vpop.xlane.xlu0 %3997  ;;  %v3520_v29 = vsub.f32 2.0, %v3504_v11  ;;  %v3551_v4 = vmul.f32 %v14209_v24, %v3535_v18 }
 0x8f7   :  { %v11425_v30 = vpop.eup %11424  ;;  %11430 = vrcp.f32 %v3998_v26 }
 0x8f8   :  { %v3536_v32 = vmul.f32 %v11423_v27, %v3520_v29  ;;  %v3501_v44 = vmul.f32 %v11425_v30, %v3454_v1 }
 0x8f9   :  { %v3992_v25 = vpop.xlane.xlu1 %3991 }
 0x8fa   :  { %v14412_v14 = vpop.xlane.xlu0 %4419  ;;  %v3552_v35 = vmul.f32 %v14219_v2, %v3536_v32  ;;  %v3517_v34 = vsub.f32 2.0, %v3501_v44  ;;  %11432 = vrcp.f32 %v3992_v25 }
 0x8fc   :  { %v11427_v19 = vpop.eup %11426  ;;  %v3566_v59 = vpack.c.bf16 %v3552_v35, %v3551_v4  ;;  %v3533_v56 = vmul.f32 %v11425_v30, %v3517_v34 }
 0x8fd   :  { %v3502_v63 = vmul.f32 %v11427_v19, %v3456_v10  ;;  %v14416_v41 = vpop.xlane.xlu1 %4413 }
 0x8fe   :  { %v3994_v13 = vpop.xlane.xlu0 %3993  ;;  %10324 = vmatpush3.bf16.xpose.msra.mxu0 %v3566_v59  ;;  %v3549_v2 = vmul.f32 %v14230_v62, %v3533_v56 }
 0x8ff   :  { %v3518_v11 = vsub.f32 2.0, %v3502_v63  ;;  %v11429_v27 = vpop.eup %11428  ;;  %11434 = vrcp.f32 %v3994_v13  ;;  %10325 = vmatprep.subr.bf16.mxu0 %v17103_v38 }
 0x900   :  { %v4029_v29 = vmul.f32 %v11429_v27, %v3996_v7  ;;  %v17230_v7 = vld [vmem:[#allocation43_spill] sm:$0xff] }
 0x901   :  { %v3534_v1 = vmul.f32 %v11427_v19, %v3518_v11  ;;  %v3988_v24 = vpop.xlane.xlu1 %3987  ;;  %v17231_v11 = vld [vmem:[#allocation18_spill] sm:$0xff] }
 0x902   :  { %v14419_v18 = vpop.xlane.xlu0 %4415  ;;  %11436 = vrcp.f32 %v3988_v24  ;;  %v4045_v32 = vsub.f32 2.0, %v4029_v29  ;;  %v246_v61 = vadd.f32 %v17231_v11, %v17230_v7 }
 0x903   :  { %v3550_v10 = vmul.f32 %v14247_v58, %v3534_v1 }
 0x904   :  { %v11431_v35 = vpop.eup %11430  ;;  %v4061_v63 = vmul.f32 %v11429_v27, %v4045_v32 }
 0x905   :  { %v14423_v44 = vpop.xlane.xlu1 %4409  ;;  %v3565_v30 = vpack.c.bf16 %v3550_v10, %v3549_v2  ;;  %v4030_v59 = vmul.f32 %v11431_v35, %v3998_v26  ;;  %v3231_v10 = vpack.c.bf16 %v246_v61, %v246_v61 }
 0x906   :  { %v3990_v4 = vpop.xlane.xlu0 %3989  ;;  %v4077_v29 = vmul.f32 %v14256_v23, %v4061_v63 }
 0x907   :  { %10326 = vmatpush3.bf16.xpose.msra.mxu0 %v3565_v30  ;;  %v11433_v34 = vpop.eup %11432  ;;  %v4046_v19 = vsub.f32 2.0, %v4030_v59  ;;  %11438 = vrcp.f32 %v3990_v4 }
 0x908   :  { %10369 = vmatprep.subr.bf16.mxu0 %v17103_v38  ;;  %v4027_v62 = vmul.f32 %v11433_v34, %v3992_v25 }
 0x909   :  { %v3984_v58 = vpop.xlane.xlu1 %3983  ;;  %v4062_v56 = vmul.f32 %v11431_v35, %v4046_v19 }
 0x90a   :  { %v14428_v1 = vpop.xlane.xlu0 %4411  ;;  %11440 = vrcp.f32 %v3984_v58  ;;  %v4043_v2 = vsub.f32 2.0, %v4027_v62 }
 0x90b   :  { %v4078_v26 = vmul.f32 %v14278_v21, %v4062_v56 }
 0x90c   :  { %v11435_v27 = vpop.eup %11434  ;;  %v4059_v35 = vmul.f32 %v11433_v34, %v4043_v2 }
 0x90d   :  { %v14432_v32 = vpop.xlane.xlu1 %4405  ;;  %v4028_v30 = vmul.f32 %v11435_v27, %v3994_v13  ;;  %v4086_v11 = vpack.c.bf16 %v4078_v26, %v4077_v29 }
 0x90e   :  { %v3986_v59 = vpop.xlane.xlu0 %3985  ;;  %10328 = vmatmul.mubr.bf16.vlgmr.msra.gmra.mxu0 %v3231_v10  ;;  %v4075_v13 = vmul.f32 %v14284_v46, %v4059_v35 }
 0x90f   :  { %10385 = vmatprep.mubr.msk.bf16.mxu0 %vm12126_vm3, %v17103_v38  ;;  %v11437_v25 = vpop.eup %11436  ;;  %v4044_v19 = vsub.f32 2.0, %v4028_v30  ;;  %11442 = vrcp.f32 %v3986_v59  ;;  %10370 = vmatpush3.bf16.xpose.msra.mxu0 %v4086_v11 }
 0x910   :  { %v4025_v23 = vmul.f32 %v11437_v25, %v3988_v24  ;;  %10371 = vmatprep.subr.bf16.mxu0 %v17103_v38 }
 0x911   :  { %v3980_v63 = vpop.xlane.xlu1 %3979  ;;  %v4060_v21 = vmul.f32 %v11435_v27, %v4044_v19 }
 0x912   :  { %v14437_v61 = vpop.xlane.xlu0 %4407  ;;  %11444 = vrcp.f32 %v3980_v63  ;;  %v4041_v56 = vsub.f32 2.0, %v4025_v23 }
 0x913   :  { %v4076_v62 = vmul.f32 %v14302_v60, %v4060_v21 }
 0x914   :  { %v11439_v29 = vpop.eup %11438  ;;  %v4057_v24 = vmul.f32 %v11437_v25, %v4041_v56 }
 0x915   :  { %v14441_v26 = vpop.xlane.xlu1 %4401  ;;  %v4026_v34 = vmul.f32 %v11439_v29, %v3990_v4  ;;  %v4085_v10 = vpack.c.bf16 %v4076_v62, %v4075_v13 }
 0x916   :  { %v3982_v2 = vpop.xlane.xlu0 %3981  ;;  %v4073_v60 = vmul.f32 %v14308_v54, %v4057_v24 }
 0x917   :  { %v11441_v30 = vpop.eup %11440  ;;  %v4042_v11 = vsub.f32 2.0, %v4026_v34  ;;  %11446 = vrcp.f32 %v3982_v2  ;;  %10372 = vmatpush3.bf16.xpose.msra.mxu0 %v4085_v10 }
 0x918   :  { %v4023_v27 = vmul.f32 %v11441_v30, %v3984_v58  ;;  %10373 = vmatprep.subr.bf16.mxu0 %v17103_v38 }
 0x919   :  { %v3976_v19 = vpop.xlane.xlu1 %3975  ;;  %v4058_v7 = vmul.f32 %v11439_v29, %v4042_v11 }
 0x91a   :  { %v14444_v46 = vpop.xlane.xlu0 %4403  ;;  %11448 = vrcp.f32 %v3976_v19  ;;  %v4039_v4 = vsub.f32 2.0, %v4023_v27 }
 0x91b   :  { %v4074_v35 = vmul.f32 %v14326_v36, %v4058_v7 }
 0x91c   :  { %v11443_v23 = vpop.eup %11442  ;;  %v4055_v56 = vmul.f32 %v11441_v30, %v4039_v4 }
 0x91d   :  { %v4024_v21 = vmul.f32 %v11443_v23, %v3986_v59  ;;  %v4084_v25 = vpack.c.bf16 %v4074_v35, %v4073_v60 }
 0x91e   :  { %v3978_v13 = vpop.xlane.xlu0 %3977  ;;  %v4071_v10 = vmul.f32 %v14334_v50, %v4055_v56 }
 0x91f   :  { %v11445_v62 = vpop.eup %11444  ;;  %v4040_v34 = vsub.f32 2.0, %v4024_v21  ;;  %11450 = vrcp.f32 %v3978_v13  ;;  %10374 = vmatpush3.bf16.xpose.msra.mxu0 %v4084_v25 }
 0x920   :  { %v4021_v58 = vmul.f32 %v11445_v62, %v3980_v63  ;;  %10375 = vmatprep.subr.bf16.mxu0 %v17103_v38 }
 0x921   :  { %v4056_v29 = vmul.f32 %v11443_v23, %v4040_v34 }
 0x922   :  { %v4037_v24 = vsub.f32 2.0, %v4021_v58 }
 0x923   :  { %v4072_v54 = vmul.f32 %v14346_v3, %v4056_v29 }
 0x924   :  { %v11447_v36 = vpop.eup %11446  ;;  %v4053_v60 = vmul.f32 %v11445_v62, %v4037_v24  ;;  %v17232_v62 = vld [vmem:[#allocation54_spill] sm:$0xff] }
 0x925   :  { %v14451_v7 = vpop.f32.mrf.mxu1  ;;  %v4022_v59 = vmul.f32 %v11447_v36, %v3982_v2  ;;  %v4083_v11 = vpack.c.bf16 %v4072_v54, %v4071_v10  ;;  %v3921_v34 = vsub.f32 %v17232_v62, %v14152_v16 }
 0x926   :  { %v4069_v3 = vmul.f32 %v14356_v5, %v4053_v60  ;;  %v17233_v5 = vld [vmem:[#allocation60_spill] sm:$0xff] }
 0x927   :  { %v14453_v27 = vpop.f32.mrf.mxu1  ;;  %v11449_v30 = vpop.eup %11448  ;;  %v4038_v35 = vsub.f32 2.0, %v4022_v59  ;;  %10376 = vmatpush3.bf16.xpose.msra.mxu0 %v4083_v11  ;;  %v3939_v59 = vmul.f32 1.442695, %v3921_v34  ;;  %v4868_v34 = vld [vmem:[#allocation4 + $0x70] sm:$0xff] }
 0x928   :  { %v4019_v63 = vmul.f32 %v11449_v30, %v3976_v19  ;;  %10377 = vmatprep.subr.bf16.mxu0 %v17103_v38 }
 0x929   :  { %v14455_v4 = vpop.f32.mrf.mxu1  ;;  %v4054_v50 = vmul.f32 %v11447_v36, %v4038_v35  ;;  %11452 = vpow2.f32 %v3939_v59 }
 0x92a   :  { %v4035_v2 = vsub.f32 2.0, %v4019_v63  ;;  %v17235_v63 = vld [vmem:[#allocation46_spill] sm:$0xff] }
 0x92b   :  { %v14458_v23 = vpop.f32.mrf.mxu1  ;;  %v4070_v21 = vmul.f32 %v14366_v15, %v4054_v50  ;;  %v17234_v15 = vld [vmem:[#allocation21_spill] sm:$0xff]  ;;  %v3919_v50 = vsub.f32 %v17235_v63, %v14158_v12 }
 0x92c   :  { %v11451_v25 = vpop.eup %11450  ;;  %v4051_v10 = vmul.f32 %v11449_v30, %v4035_v2  ;;  %v3922_v36 = vsub.f32 %v17234_v15, %v17233_v5  ;;  %v4869_v5 = vld [vmem:[#allocation4 + $0x78] sm:$0xff] }
 0x92d   :  { %v14462_v56 = vpop.f32.mrf.mxu1  ;;  %v4020_v58 = vmul.f32 %v11451_v25, %v3978_v13  ;;  %v4082_v19 = vpack.c.bf16 %v4070_v21, %v4069_v3 }
 0x92e   :  { %v4067_v16 = vmul.f32 %v14374_v43, %v4051_v10  ;;  %v3941_v30 = vmul.f32 1.442695, %v3922_v36  ;;  %v17236_v43 = vld [vmem:[#allocation12_spill] sm:$0xff]  ;;  %v4447_v10 = vsub.f32 %v14204_v52, %v14396_v45 }
 0x92f   :  { %v14466_v29 = vpop.f32.mrf.mxu1  ;;  %v4036_v54 = vsub.f32 2.0, %v4020_v58  ;;  %10378 = vmatpush3.bf16.xpose.msra.mxu0 %v4082_v19 }
 0x930   :  { %10379 = vmatprep.subr.bf16.mxu0 %v17103_v38  ;;  %11454 = vpow2.f32 %v3941_v30 }
 0x931   :  { %v14468_v24 = vpop.f32.mrf.mxu1  ;;  %v4052_v11 = vmul.f32 %v11451_v25, %v4036_v54  ;;  %v3920_v25 = vsub.f32 %v17236_v43, %v14147_v31  ;;  %v4448_v31 = vsub.f32 %v14207_v47, %v14398_v55  ;;  %v4445_v47 = vsub.f32 %v14217_v33, %v14402_v53  ;;  %v4867_v55 = vld [vmem:[#allocation4 + $0x68] sm:$0xff] }
 0x932   :  { %v4446_v43 = vsub.f32 %v14223_v40, %v14404_v6 }
 0x933   :  { %v14473_v60 = vpop.f32.mrf.mxu1  ;;  %v4068_v13 = vmul.f32 %v14381_v37, %v4052_v11  ;;  %v3935_v37 = vmul.f32 1.442695, %v3919_v50  ;;  %v3937_v19 = vmul.f32 1.442695, %v3920_v25  ;;  %v4477_v11 = vmul.f32 1.442695, %v4447_v10 }
 0x934   :  { %v4479_v45 = vmul.f32 1.442695, %v4448_v31  ;;  %v4473_v33 = vmul.f32 1.442695, %v4445_v47 }
 0x935   :  { %v14477_v35 = vpop.f32.mrf.mxu1  ;;  %v4081_v3 = vpack.c.bf16 %v4068_v13, %v4067_v16  ;;  %11456 = vpow2.f32 %v3935_v37  ;;  %v4866_v16 = vld [vmem:[#allocation4 + $0x60] sm:$0xff] }
 0x936   :  { %11458 = vpow2.f32 %v3937_v19  ;;  %v14499_v59 = vpop.eup %11452  ;;  %v14518_v37 = vld [vmem:[%s16940_s3 + $0x1] ss:$0 sm:$0xff]  ;;  %v4864_v19 = vld [vmem:[#allocation4 + $0x50] sm:$0xff] }
 0x937   :  { %v14481_v21 = vpop.f32.mrf.mxu1  ;;  %10380 = vmatpush3.bf16.xpose.msra.mxu0 %v4081_v3  ;;  %11460 = vpow2.f32 %v4477_v11  ;;  %v4443_v11 = vsub.f32 %v14242_v9, %v14406_v17  ;;  %v4444_v17 = vsub.f32 %v14261_v39, %v14408_v57 }
 0x938   :  { %10381 = vmatprep.subr.bf16.mxu0 %v17103_v38  ;;  %11462 = vpow2.f32 %v4479_v45 }
 0x939   :  { %v14483_v2 = vpop.f32.mrf.mxu1  ;;  %11464 = vpow2.f32 %v4473_v33 }
 0x93b   :  { %v14488_v62 = vpop.f32.mrf.mxu1 }
 0x93d   :  { %v10483_v58 = vpop.f32.mrf.mxu1  ;;  %v14505_v63 = vpop.eup %11454 }
 0x93e   :  { %v14490_v12 = vadd.f32 %v10483_v58, %v4868_v34 }
 0x93f   :  { %v4979_v54 = vpop.f32.mrf.mxu1 }
 0x940   :  { %5022 = vmax.xlane.f32.xlu1 %v14490_v12  ;;  %v14503_v30 = vadd.f32 %v4979_v54, %v4866_v16  ;;  %v14533_v16 = vadd.f32 %v14477_v35, %v4864_v19  ;;  %v4862_v19 = vld [vmem:[#allocation4 + $0x40] sm:$0xff] }
 0x941   :  { %v10484_v15 = vpop.f32.mrf.mxu1 }
 0x942   :  { %v14497_v36 = vadd.f32 %v10484_v15, %v4869_v5  ;;  %v14520_v34 = vpop.eup %11456  ;;  %v4475_v5 = vmul.f32 1.442695, %v4446_v43  ;;  %v4469_v43 = vmul.f32 1.442695, %v4443_v11  ;;  %v14565_v11 = vadd.f32 %v14481_v21, %v4862_v19 }
 0x943   :  { %v4982_v13 = vpop.f32.mrf.mxu1  ;;  %v14528_v31 = vpop.eup %11458  ;;  %v4439_v19 = vsub.f32 %v14300_v48, %v14416_v41 }
 0x944   :  { %5024 = vmax.xlane.f32.xlu0 %v14497_v36  ;;  %3971 = vadd.xlane.f32.xlu1 %v14499_v59  ;;  %v14513_v25 = vadd.f32 %v4982_v13, %v4867_v55  ;;  %v4865_v13 = vld [vmem:[#allocation4 + $0x58] sm:$0xff]  ;;  %v10999_v55 = vld [vmem:[%s16939_s2 + $0x20] sm:$0xff]   ;;  %11466 = vpow2.f32 %v4475_v5 }
 0x945   :  { %v10511_v52 = vpop.f32.mrf.mxu1  ;;  %v14547_v35 = vadd.f32 %v14483_v2, %v4865_v13  ;;  %v4471_v2 = vmul.f32 1.442695, %v4444_v17  ;;  %11468 = vpow2.f32 %v4469_v43  ;;  %v4863_v13 = vld [vmem:[#allocation4 + $0x48] sm:$0xff]  ;;  %v4461_v41 = vmul.f32 1.442695, %v4439_v19  ;;  %v4854_v19 = vld [vmem:[#allocation4] sm:$0xff] }
 0x946   :  { %v5301_v40 = vadd.f32 %v10511_v52, %v14518_v37  ;;  %v17237_v52 = vld [vmem:[#allocation40_spill] sm:$0xff] }
 0x947   :  { %v5292_v50 = vpop.f32.mrf.mxu1  ;;  %11470 = vpow2.f32 %v4471_v2 }
 0x948   :  { %3973 = vadd.xlane.f32.xlu0 %v14505_v63  ;;  %5018 = vmax.xlane.f32.xlu1 %v14503_v30  ;;  %v5293_v10 = vadd.f32 %v14518_v37, %v5292_v50  ;;  %v17238_v50 = vld [vmem:[#allocation28_spill] sm:$0xff] }
 0x949   :  { %v10512_v3 = vpop.f32.mrf.mxu1 }
 0x94a   :  { %v5304_v53 = vadd.f32 %v10512_v3, %v14518_v37  ;;  %v303_v3 = vadd.f32 %v17238_v50, %v17237_v52 }
 0x94b   :  { %v5295_v58 = vpop.f32.mrf.mxu1 }
 0x94c   :  { %v5296_v54 = vadd.f32 %v14518_v37, %v5295_v58  ;;  %5020 = vmax.xlane.f32.xlu0 %v14513_v25  ;;  %3967 = vadd.xlane.f32.xlu1 %v14520_v34  ;;  %v5356_v45 = vpack.c.bf16 %v5304_v53, %v5301_v40  ;;  %v14551_v58 = vpop.eup %11460  ;;  %v14556_v39 = vpack.c.bf16 %v303_v3, %v303_v3 }
 0x94d   :  { %v10515_v6 = vpop.f32.mrf.mxu1  ;;  %v14560_v5 = vpop.eup %11462 }
 0x94e   :  { %v5355_v15 = vpack.c.bf16 %v5296_v54, %v5293_v10  ;;  %v5317_v57 = vadd.f32 %v10515_v6, %v14518_v37  ;;  %v14579_v3 = vpop.eup %11464 }
 0x94f   :  { %v5308_v47 = vpop.f32.mrf.mxu1 }
 0x950   :  { %10527 = vmatprep.mubr.msk.bf16.mxu1 %vm591_vm2, %v5355_v15  ;;  %3969 = vadd.xlane.f32.xlu0 %v14528_v31  ;;  %v5309_v10 = vadd.f32 %v14518_v37, %v5308_v47  ;;  %v4441_v15 = vsub.f32 %v14274_v28, %v14410_v49  ;;  %v4442_v28 = vsub.f32 %v14289_v0, %v14412_v14 }
 0x951   :  { %5014 = vmax.xlane.f32.xlu1 %v14533_v16  ;;  %v10516_v9 = vpop.f32.mrf.mxu1  ;;  %10528 = vmatmul.mubr.msk.bf16.vlgmr.msra.gmra.mxu1 %vm591_vm2, %v5356_v45  ;;  %v14576_v49 = vadd.f32 %v14488_v62, %v4863_v13 }
 0x952   :  { %10564 = vmatpush3.bf16.msra.mxu1 %v14393_v20  ;;  %v5320_v33 = vadd.f32 %v10516_v9, %v14518_v37  ;;  %v4465_v21 = vmul.f32 1.442695, %v4441_v15  ;;  %v4860_v9 = vld [vmem:[#allocation4 + $0x30] sm:$0xff]  ;;  %v4467_v14 = vmul.f32 1.442695, %v4442_v28 }
 0x953   :  { %v5311_v53 = vpop.f32.mrf.mxu1  ;;  %10565 = vmatprep.subr.bf16.mxu1 %v10999_v55 }
 0x954   :  { %v5312_v54 = vadd.f32 %v14518_v37, %v5311_v53  ;;  %5016 = vmax.xlane.f32.xlu0 %v14547_v35  ;;  %v5358_v45 = vpack.c.bf16 %v5320_v33, %v5317_v57  ;;  %v14586_v53 = vpop.eup %11466  ;;  %11472 = vpow2.f32 %v4465_v21  ;;  %v4437_v21 = vsub.f32 %v14324_v8, %v14423_v44  ;;  %v14629_v8 = vld [vmem:[%s16937_s0 + $0x80] sm:$0xff]  }
 0x955   :  { %4509 = vadd.xlane.f32.xlu1 %v14551_v58  ;;  %v10519_v20 = vpop.f32.mrf.mxu1  ;;  %11474 = vpow2.f32 %v4467_v14  ;;  %v14603_v13 = vpop.eup %11468  ;;  %17240 = vst [vmem:[#allocation48_spill] sm:$0xff] %v14629_v8  ;;  %v14649_v14 = vld [vmem:[%s16937_s0 + $0x88] sm:$0xff]  }
 0x956   :  { %v5357_v40 = vpack.c.bf16 %v5312_v54, %v5309_v10  ;;  %10566 = vmatpush3.bf16.msra.mxu1 %v10999_v55  ;;  %v5333_v33 = vadd.f32 %v10519_v20, %v14518_v37  ;;  %v14591_v10 = vadd.f32 %v14462_v56, %v4860_v9  ;;  %v4861_v54 = vld [vmem:[#allocation4 + $0x38] sm:$0xff]  ;;  %11476 = vpow2.f32 %v4461_v41  ;;  %17242 = vst [vmem:[#allocation49_spill] sm:$0xff] %v14649_v14 }
 0x957   :  { %10921 = vmatprep.subr.msk.bf16.mxu1 %vm616_vm1, %v14556_v39  ;;  %v5324_v6 = vpop.f32.mrf.mxu1  ;;  %v14600_v48 = vadd.f32 %v14468_v24, %v4861_v54  ;;  %v14610_v24 = vpop.eup %11470  ;;  %v4457_v44 = vmul.f32 1.442695, %v4437_v21 }
 0x958   :  { %10531 = vmatprep.mubr.msk.bf16.mxu1 %vm591_vm2, %v5357_v40  ;;  %4511 = vadd.xlane.f32.xlu0 %v14560_v5  ;;  %v5325_v17 = vadd.f32 %v14518_v37, %v5324_v6  ;;  %v4440_v40 = vsub.f32 %v14313_v22, %v14419_v18 }
 0x959   :  { %5010 = vmax.xlane.f32.xlu1 %v14565_v11  ;;  %v10520_v47 = vpop.f32.mrf.mxu1  ;;  %10532 = vmatmul.mubr.msk.bf16.gmra.mxu1 %vm591_vm2, %v5358_v45  ;;  %v4858_v45 = vld [vmem:[#allocation4 + $0x20] sm:$0xff] }
 0x95a   :  { %v5336_v55 = vadd.f32 %v10520_v47, %v14518_v37  ;;  %v4463_v22 = vmul.f32 1.442695, %v4440_v40 }
 0x95b   :  { %v5327_v50 = vpop.f32.mrf.mxu1 }
 0x95c   :  { %v5328_v43 = vadd.f32 %v14518_v37, %v5327_v50  ;;  %5012 = vmax.xlane.f32.xlu0 %v14576_v49  ;;  %v5360_v57 = vpack.c.bf16 %v5336_v55, %v5333_v33  ;;  %v14615_v55 = vadd.f32 %v14466_v29, %v4858_v45  ;;  %v4859_v50 = vld [vmem:[#allocation4 + $0x28] sm:$0xff]  ;;  %11478 = vpow2.f32 %v4463_v22  ;;  %v4857_v33 = vld [vmem:[#allocation4 + $0x18] sm:$0xff] }
 0x95d   :  { %4505 = vadd.xlane.f32.xlu1 %v14579_v3  ;;  %v10523_v0 = vpop.f32.mrf.mxu1  ;;  %11480 = vpow2.f32 %v4457_v44  ;;  %v14722_v45 = vld [vmem:[%s16939_s2 + $0x38] sm:$0xff]  }
 0x95e   :  { %v5359_v62 = vpack.c.bf16 %v5328_v43, %v5325_v17  ;;  %v5349_v28 = vadd.f32 %v10523_v0, %v14518_v37  ;;  %v14624_v17 = vadd.f32 %v14473_v60, %v4859_v50  ;;  %v4856_v43 = vld [vmem:[#allocation4 + $0x10] sm:$0xff]  ;;  %v5921_v0 = vsel %vm616_vm1, %v14556_v39, 0 }
 0x95f   :  { %v5340_v2 = vpop.f32.mrf.mxu1  ;;  %v14640_v60 = vadd.f32 %v14451_v7, %v4856_v43  ;;  %v14654_v7 = vadd.f32 %v14455_v4, %v4857_v33  ;;  %v14670_v4 = vadd.f32 %v14453_v27, %v4854_v19  ;;  %v14687_v27 = vld [vmem:[%s16937_s0 + $0xa0] sm:$0xff]  }
 0x960   :  { %10535 = vmatprep.mubr.msk.bf16.mxu1 %vm591_vm2, %v5359_v62  ;;  %4507 = vadd.xlane.f32.xlu0 %v14586_v53  ;;  %v5341_v6 = vadd.f32 %v14518_v37, %v5340_v2  ;;  %17239 = vst [vmem:[#allocation55_spill] sm:$0xff] %v14624_v17  ;;  %v14659_v62 = vld [vmem:[%s16937_s0 + $0x90] sm:$0xff]   ;;  %v14677_v2 = vld [vmem:[%s16937_s0 + $0x98] sm:$0xff]   ;;  %17248 = vst [vmem:[#allocation15_spill] sm:$0xff] %v14687_v27 }
 0x961   :  { %5006 = vmax.xlane.f32.xlu1 %v14591_v10  ;;  %v10524_v20 = vpop.f32.mrf.mxu1  ;;  %10536 = vmatmul.mubr.msk.bf16.gmra.mxu1 %vm591_vm2, %v5360_v57  ;;  %v14633_v29 = vpop.eup %11472  ;;  %17241 = vst [vmem:[#allocation14_spill] sm:$0xff] %v14640_v60  ;;  %17243 = vst [vmem:[#allocation56_spill] sm:$0xff] %v14654_v7  ;;  %v4855_v57 = vld [vmem:[#allocation4 + $0x8] sm:$0xff] }
 0x962   :  { %v5352_v56 = vadd.f32 %v10524_v20, %v14518_v37  ;;  %17244 = vst [vmem:[#allocation26_spill] sm:$0xff] %v14659_v62  ;;  %17245 = vst [vmem:[#allocation44_spill] sm:$0xff] %v14670_v4  ;;  %v14682_v20 = vadd.f32 %v14458_v23, %v4855_v57  ;;  %v14701_v23 = vld [vmem:[%s16937_s0 + $0xa8] sm:$0xff]  }
 0x963   :  { %v5343_v15 = vpop.f32.mrf.mxu1  ;;  %17246 = vst [vmem:[#allocation24_spill] sm:$0xff] %v14677_v2  ;;  %17249 = vst [vmem:[#allocation19_spill] sm:$0xff] %v14701_v23 }
 0x964   :  { %v5344_v47 = vadd.f32 %v14518_v37, %v5343_v15  ;;  %5008 = vmax.xlane.f32.xlu0 %v14600_v48  ;;  %v5362_v9 = vpack.c.bf16 %v5352_v56, %v5349_v28  ;;  %v4438_v37 = vsub.f32 %v14339_v42, %v14428_v1  ;;  %v14637_v1 = vpop.eup %11474  ;;  %17247 = vst [vmem:[#allocation45_spill] sm:$0xff] %v14682_v20  ;;  %v14708_v56 = vld [vmem:[%s16937_s0 + $0xb0] sm:$0xff]   ;;  %v14715_v15 = vld [vmem:[%s16937_s0 + $0xb8] sm:$0xff]  }
 0x965   :  { %4501 = vadd.xlane.f32.xlu1 %v14603_v13  ;;  %v14663_v39 = vpop.eup %11476  ;;  %17250 = vst [vmem:[#allocation57_spill] sm:$0xff] %v14708_v56  ;;  %17251 = vst [vmem:[#allocation58_spill] sm:$0xff] %v14715_v15 }
 0x966   :  { %v5361_v18 = vpack.c.bf16 %v5344_v47, %v5341_v6  ;;  %v4459_v42 = vmul.f32 1.442695, %v4438_v37 }
 0x968   :  { %10539 = vmatprep.mubr.msk.bf16.mxu1 %vm591_vm2, %v5361_v18  ;;  %4503 = vadd.xlane.f32.xlu0 %v14610_v24  ;;  %11482 = vpow2.f32 %v4459_v42 }
 0x969   :  { %5002 = vmax.xlane.f32.xlu1 %v14615_v55  ;;  %10540 = vmatmul.mubr.msk.bf16.gmra.mxu1 %vm591_vm2, %v5362_v9  ;;  %v14667_v54 = vpop.eup %11478 }
 0x96a   :  { %10567 = vmatprep.mubr.msk.bf16.mxu1 %vm172_vm0, %v14629_v8  ;;  %v14691_v40 = vpop.eup %11480 }
 0x96c   :  { %5004 = vmax.xlane.f32.xlu0 %v14624_v17 }
 0x96d   :  { %4497 = vadd.xlane.f32.xlu1 %v14633_v29 }
 0x970   :  { %4499 = vadd.xlane.f32.xlu0 %v14637_v1 }
 0x971   :  { %4998 = vmax.xlane.f32.xlu1 %v14640_v60  ;;  %10568 = vmatmul.mubr.msk.bf16.vlgmr.msra.gmra.mxu1 %vm172_vm0, %v14649_v14 }
 0x972   :  { %10584 = vmatpush3.bf16.msra.mxu1 %v5921_v0  ;;  %10571 = vmatprep.mubr.msk.bf16.mxu1 %vm172_vm0, %v14659_v62 }
 0x973   :  { %10621 = vmatprep.subr.bf16.mxu1 %v14722_v45 }
 0x974   :  { %5000 = vmax.xlane.f32.xlu0 %v14654_v7 }
 0x975   :  { %4493 = vadd.xlane.f32.xlu1 %v14663_v39  ;;  %v14695_v41 = vpop.eup %11482 }
 0x978   :  { %4495 = vadd.xlane.f32.xlu0 %v14667_v54 }
 0x979   :  { %4994 = vmax.xlane.f32.xlu1 %v14670_v4  ;;  %10572 = vmatmul.mubr.msk.bf16.gmra.mxu1 %vm172_vm0, %v14677_v2 }
 0x97a   :  { %10575 = vmatprep.mubr.msk.bf16.mxu1 %vm172_vm0, %v14687_v27 }
 0x97c   :  { %4996 = vmax.xlane.f32.xlu0 %v14682_v20 }
 0x97d   :  { %4489 = vadd.xlane.f32.xlu1 %v14691_v40 }
 0x980   :  { %4491 = vadd.xlane.f32.xlu0 %v14695_v41 }
 0x981   :  { %10576 = vmatmul.mubr.msk.bf16.gmra.mxu1 %vm172_vm0, %v14701_v23 }
 0x982   :  { %10579 = vmatprep.mubr.msk.bf16.mxu1 %vm172_vm0, %v14708_v56 }
 0x989   :  { %10580 = vmatmul.mubr.msk.bf16.gmra.mxu1 %vm172_vm0, %v14715_v15 }
 0x9c9   :  { %v14725_v6 = vpop.xlane.xlu1 %5022 }
 0x9cd   :  { %v14727_v47 = vpop.xlane.xlu0 %5024  ;;  %v3972_v28 = vpop.xlane.xlu1 %3971 }
 0x9ce   :  { %v14729_v22 = vpop.f32.mrf.mxu0  ;;  %11484 = vrcp.f32 %v3972_v28 }
 0x9cf   :  { %17252 = vst [vmem:[#allocation18_spill] sm:$0xff] %v14729_v22 }
 0x9d0   :  { %v10329_v18 = vpop.f32.mrf.mxu0 }
 0x9d1   :  { %v3974_v21 = vpop.xlane.xlu0 %3973  ;;  %v14731_v50 = vpop.xlane.xlu1 %5018 }
 0x9d2   :  { %v3610_v9 = vpop.f32.mrf.mxu0  ;;  %11486 = vrcp.f32 %v3974_v21 }
 0x9d4   :  { %v10330_v37 = vpop.f32.mrf.mxu0 }
 0x9d5   :  { %v14733_v44 = vpop.xlane.xlu0 %5020  ;;  %v3968_v43 = vpop.xlane.xlu1 %3967 }
 0x9d6   :  { %11488 = vrcp.f32 %v3968_v43 }
 0x9d9   :  { %v3970_v42 = vpop.xlane.xlu0 %3969 }
 0x9da   :  { %v14735_v33 = vpop.xlane.xlu1 %5014  ;;  %11490 = vrcp.f32 %v3970_v42 }
 0x9db   :  { %v11485_v0 = vpop.eup %11484 }
 0x9dc   :  { %v4017_v19 = vmul.f32 %v11485_v0, %v3972_v28 }
 0x9dd   :  { %v14737_v57 = vpop.xlane.xlu0 %5016 }
 0x9de   :  { %v4510_v22 = vpop.xlane.xlu1 %4509  ;;  %v4033_v18 = vsub.f32 2.0, %v4017_v19 }
 0x9df   :  { %v11487_v52 = vpop.eup %11486  ;;  %11492 = vrcp.f32 %v4510_v22 }
 0x9e0   :  { %v4018_v20 = vmul.f32 %v11487_v52, %v3974_v21  ;;  %v4049_v37 = vmul.f32 %v11485_v0, %v4033_v18 }
 0x9e1   :  { %v4512_v9 = vpop.xlane.xlu0 %4511 }
 0x9e2   :  { %v14739_v4 = vpop.xlane.xlu1 %5010  ;;  %v4034_v7 = vsub.f32 2.0, %v4018_v20  ;;  %11494 = vrcp.f32 %v4512_v9  ;;  %v4065_v28 = vmul.f32 %v14499_v59, %v4049_v37 }
 0x9e3   :  { %v11489_v60 = vpop.eup %11488 }
 0x9e4   :  { %v4050_v15 = vmul.f32 %v11487_v52, %v4034_v7  ;;  %v4015_v56 = vmul.f32 %v11489_v60, %v3968_v43 }
 0x9e5   :  { %v14741_v23 = vpop.xlane.xlu0 %5012 }
 0x9e6   :  { %v4506_v27 = vpop.xlane.xlu1 %4505  ;;  %v4066_v2 = vmul.f32 %v14505_v63, %v4050_v15  ;;  %v4031_v19 = vsub.f32 2.0, %v4015_v56 }
 0x9e7   :  { %v11491_v62 = vpop.eup %11490  ;;  %11496 = vrcp.f32 %v4506_v27 }
 0x9e8   :  { %v4016_v21 = vmul.f32 %v11491_v62, %v3970_v42  ;;  %v4080_v8 = vpack.c.bf16 %v4066_v2, %v4065_v28  ;;  %v4047_v20 = vmul.f32 %v11489_v60, %v4031_v19 }
 0x9e9   :  { %v4508_v14 = vpop.xlane.xlu0 %4507 }
 0x9ea   :  { %v14745_v17 = vpop.xlane.xlu1 %5006  ;;  %v4032_v0 = vsub.f32 2.0, %v4016_v21  ;;  %11498 = vrcp.f32 %v4508_v14  ;;  %10382 = vmatpush3.bf16.xpose.msra.mxu0 %v4080_v8  ;;  %v4063_v56 = vmul.f32 %v14520_v34, %v4047_v20  ;;  %v17254_v21 = vld [vmem:[#allocation20_spill] sm:$0xff] }
 0x9eb   :  { %10383 = vmatprep.subr.bf16.mxu0 %v17103_v38 }
 0x9ec   :  { %v11493_v52 = vpop.eup %11492  ;;  %v4048_v7 = vmul.f32 %v11491_v62, %v4032_v0  ;;  %v17253_v62 = vld [vmem:[#allocation53_spill] sm:$0xff] }
 0x9ed   :  { %v14748_v43 = vpop.xlane.xlu0 %5008  ;;  %v4543_v59 = vmul.f32 %v11493_v52, %v4510_v22  ;;  %v252_v22 = vadd.f32 %v17254_v21, %v17253_v62 }
 0x9ee   :  { %v4502_v63 = vpop.xlane.xlu1 %4501  ;;  %v4064_v15 = vmul.f32 %v14528_v31, %v4048_v7 }
 0x9ef   :  { %v11495_v42 = vpop.eup %11494  ;;  %v4559_v2 = vsub.f32 2.0, %v4543_v59  ;;  %11500 = vrcp.f32 %v4502_v63 }
 0x9f0   :  { %v4544_v18 = vmul.f32 %v11495_v42, %v4512_v9  ;;  %v4079_v37 = vpack.c.bf16 %v4064_v15, %v4063_v56  ;;  %v3745_v15 = vpack.c.bf16 %v252_v22, %v252_v22 }
 0x9f1   :  { %v4504_v60 = vpop.xlane.xlu0 %4503  ;;  %v4575_v8 = vmul.f32 %v11493_v52, %v4559_v2 }
 0x9f2   :  { %v14752_v28 = vpop.xlane.xlu1 %5002  ;;  %v4560_v19 = vsub.f32 2.0, %v4544_v18  ;;  %11502 = vrcp.f32 %v4504_v60  ;;  %10384 = vmatpush3.bf16.xpose.msra.mxu0 %v4079_v37 }
 0x9f3   :  { %10427 = vmatprep.subr.bf16.mxu0 %v17103_v38  ;;  %v4591_v9 = vmul.f32 %v14551_v58, %v4575_v8 }
 0x9f4   :  { %v11497_v34 = vpop.eup %11496  ;;  %v4576_v20 = vmul.f32 %v11495_v42, %v4560_v19 }
 0x9f5   :  { %v14757_v31 = vpop.xlane.xlu0 %5004  ;;  %v4541_v0 = vmul.f32 %v11497_v34, %v4506_v27 }
 0x9f6   :  { %v4498_v7 = vpop.xlane.xlu1 %4497  ;;  %v4592_v59 = vmul.f32 %v14560_v5, %v4576_v20 }
 0x9f7   :  { %v11499_v56 = vpop.eup %11498  ;;  %v4557_v52 = vsub.f32 2.0, %v4541_v0  ;;  %11504 = vrcp.f32 %v4498_v7 }
 0x9f8   :  { %v4542_v2 = vmul.f32 %v11499_v56, %v4508_v14  ;;  %v4600_v37 = vpack.c.bf16 %v4592_v59, %v4591_v9 }
 0x9f9   :  { %v4500_v18 = vpop.xlane.xlu0 %4499  ;;  %10386 = vmatmul.mubr.bf16.vlgmr.msra.gmra.mxu0 %v3745_v15  ;;  %v4573_v62 = vmul.f32 %v11497_v34, %v4557_v52 }
 0x9fa   :  { %v14761_v21 = vpop.xlane.xlu1 %4998  ;;  %v4558_v42 = vsub.f32 2.0, %v4542_v2  ;;  %11506 = vrcp.f32 %v4500_v18  ;;  %10428 = vmatpush3.bf16.xpose.msra.mxu0 %v4600_v37  ;;  %10443 = vmatprep.mubr.msk.bf16.mxu0 %vm12126_vm3, %v17103_v38 }
 0x9fb   :  { %10429 = vmatprep.subr.bf16.mxu0 %v17103_v38  ;;  %v4589_v19 = vmul.f32 %v14579_v3, %v4573_v62 }
 0x9fc   :  { %v11501_v58 = vpop.eup %11500  ;;  %v4574_v5 = vmul.f32 %v11499_v56, %v4558_v42 }
 0x9fd   :  { %v14766_v27 = vpop.xlane.xlu0 %5000  ;;  %v4539_v8 = vmul.f32 %v11501_v58, %v4502_v63 }
 0x9fe   :  { %v4494_v14 = vpop.xlane.xlu1 %4493  ;;  %v4590_v22 = vmul.f32 %v14586_v53, %v4574_v5 }
 0x9ff   :  { %v11503_v20 = vpop.eup %11502  ;;  %v4555_v34 = vsub.f32 2.0, %v4539_v8  ;;  %11508 = vrcp.f32 %v4494_v14 }
 0xa00   :  { %v4540_v0 = vmul.f32 %v11503_v20, %v4504_v60  ;;  %v4599_v59 = vpack.c.bf16 %v4590_v22, %v4589_v19 }
 0xa01   :  { %v4496_v9 = vpop.xlane.xlu0 %4495  ;;  %v4571_v15 = vmul.f32 %v11501_v58, %v4555_v34 }
 0xa02   :  { %v14770_v52 = vpop.xlane.xlu1 %4994  ;;  %v4556_v2 = vsub.f32 2.0, %v4540_v0  ;;  %11510 = vrcp.f32 %v4496_v9  ;;  %10430 = vmatpush3.bf16.xpose.msra.mxu0 %v4599_v59 }
 0xa03   :  { %10431 = vmatprep.subr.bf16.mxu0 %v17103_v38  ;;  %v4587_v62 = vmul.f32 %v14603_v13, %v4571_v15 }
 0xa04   :  { %v11505_v63 = vpop.eup %11504  ;;  %v4572_v56 = vmul.f32 %v11503_v20, %v4556_v2 }
 0xa05   :  { %v14773_v37 = vpop.xlane.xlu0 %4996  ;;  %v4537_v3 = vmul.f32 %v11505_v63, %v4498_v7 }
 0xa06   :  { %v4490_v53 = vpop.xlane.xlu1 %4489  ;;  %v4588_v60 = vmul.f32 %v14610_v24, %v4572_v56 }
 0xa07   :  { %v11507_v42 = vpop.eup %11506  ;;  %v4553_v5 = vsub.f32 2.0, %v4537_v3  ;;  %11512 = vrcp.f32 %v4490_v53 }
 0xa08   :  { %v4538_v8 = vmul.f32 %v11507_v42, %v4500_v18  ;;  %v4598_v19 = vpack.c.bf16 %v4588_v60, %v4587_v62 }
 0xa09   :  { %v4492_v58 = vpop.xlane.xlu0 %4491  ;;  %v4569_v22 = vmul.f32 %v11505_v63, %v4553_v5 }
 0xa0a   :  { %v4554_v34 = vsub.f32 2.0, %v4538_v8  ;;  %11514 = vrcp.f32 %v4492_v58  ;;  %10432 = vmatpush3.bf16.xpose.msra.mxu0 %v4598_v19 }
 0xa0b   :  { %10433 = vmatprep.subr.bf16.mxu0 %v17103_v38  ;;  %v4585_v59 = vmul.f32 %v14633_v29, %v4569_v22 }
 0xa0c   :  { %v11509_v20 = vpop.eup %11508  ;;  %v4570_v0 = vmul.f32 %v11507_v42, %v4554_v34 }
 0xa0d   :  { %v4535_v7 = vmul.f32 %v11509_v20, %v4494_v14 }
 0xa0e   :  { %v4586_v13 = vmul.f32 %v14637_v1, %v4570_v0  ;;  %v4435_v0 = vsub.f32 %v14344_v51, %v14432_v32 }
 0xa0f   :  { %v11511_v24 = vpop.eup %11510  ;;  %v4551_v15 = vsub.f32 2.0, %v4535_v7 }
 0xa10   :  { %v4536_v2 = vmul.f32 %v11511_v24, %v4496_v9  ;;  %v4597_v18 = vpack.c.bf16 %v4586_v13, %v4585_v59 }
 0xa11   :  { %v14780_v56 = vpop.f32.mrf.mxu1  ;;  %v4567_v3 = vmul.f32 %v11509_v20, %v4551_v15 }
 0xa12   :  { %v4552_v63 = vsub.f32 2.0, %v4536_v2  ;;  %10434 = vmatpush3.bf16.xpose.msra.mxu0 %v4597_v18 }
 0xa13   :  { %v14782_v62 = vpop.f32.mrf.mxu1  ;;  %10435 = vmatprep.subr.bf16.mxu0 %v17103_v38  ;;  %v4583_v1 = vmul.f32 %v14663_v39, %v4567_v3 }
 0xa14   :  { %v11513_v60 = vpop.eup %11512  ;;  %v4568_v42 = vmul.f32 %v11511_v24, %v4552_v63  ;;  %v17255_v24 = vld [vmem:[#allocation16_spill] sm:$0xff]  ;;  %v17256_v63 = vld [vmem:[#allocation50_spill] sm:$0xff] }
 0xa15   :  { %v14785_v14 = vpop.f32.mrf.mxu1  ;;  %v4533_v29 = vmul.f32 %v11513_v60, %v4490_v53  ;;  %v4453_v53 = vmul.f32 1.442695, %v4435_v0  ;;  %v5382_v0 = vld [vmem:[#allocation4 + $0x178] sm:$0xff] }
 0xa16   :  { %v4584_v5 = vmul.f32 %v14667_v54, %v4568_v42 }
 0xa17   :  { %v14789_v9 = vpop.f32.mrf.mxu1  ;;  %v11515_v8 = vpop.eup %11514  ;;  %v4549_v19 = vsub.f32 2.0, %v4533_v29  ;;  %11516 = vpow2.f32 %v4453_v53 }
 0xa18   :  { %v4534_v22 = vmul.f32 %v11515_v8, %v4492_v58  ;;  %v4596_v20 = vpack.c.bf16 %v4584_v5, %v4583_v1  ;;  %v4436_v58 = vsub.f32 %v17255_v24, %v14437_v61  ;;  %v5381_v5 = vld [vmem:[#allocation4 + $0x170] sm:$0xff]  ;;  %v5379_v24 = vld [vmem:[#allocation4 + $0x160] sm:$0xff] }
 0xa19   :  { %v14791_v34 = vpop.f32.mrf.mxu1  ;;  %v4565_v7 = vmul.f32 %v11513_v60, %v4549_v19  ;;  %v4433_v60 = vsub.f32 %v17256_v63, %v14441_v26  ;;  %v5040_v26 = vsub.f32 %v14490_v12, %v14725_v6  ;;  %v5039_v63 = vsub.f32 %v14513_v25, %v14733_v44 }
 0xa1a   :  { %v4550_v59 = vsub.f32 2.0, %v4534_v22  ;;  %10436 = vmatpush3.bf16.xpose.msra.mxu0 %v4596_v20  ;;  %v4455_v3 = vmul.f32 1.442695, %v4436_v58 }
 0xa1b   :  { %v14795_v13 = vpop.f32.mrf.mxu1  ;;  %10437 = vmatprep.subr.bf16.mxu0 %v17103_v38  ;;  %v4581_v15 = vmul.f32 %v14691_v40, %v4565_v7  ;;  %v4449_v40 = vmul.f32 1.442695, %v4433_v60  ;;  %v5070_v53 = vmul.f32 1.442695, %v5040_v26  ;;  %v5068_v26 = vmul.f32 1.442695, %v5039_v63 }
 0xa1c   :  { %v4566_v39 = vmul.f32 %v11515_v8, %v4550_v59  ;;  %11518 = vpow2.f32 %v4455_v3 }
 0xa1d   :  { %v14798_v54 = vpop.f32.mrf.mxu1  ;;  %11520 = vpow2.f32 %v4449_v40  ;;  %v14847_v40 = vld [vmem:[%s16940_s3 + $0x2] ss:$0 sm:$0xff] }
 0xa1e   :  { %v4582_v2 = vmul.f32 %v14695_v41, %v4566_v39  ;;  %v17257_v41 = vld [vmem:[#allocation13_spill] sm:$0xff] }
 0xa1f   :  { %v14804_v18 = vpop.f32.mrf.mxu1  ;;  %v4434_v29 = vsub.f32 %v17257_v41, %v14444_v46  ;;  %v5041_v46 = vsub.f32 %v14497_v36, %v14727_v47  ;;  %v5038_v36 = vsub.f32 %v14503_v30, %v14731_v50  ;;  %v5380_v47 = vld [vmem:[#allocation4 + $0x168] sm:$0xff] }
 0xa20   :  { %v4595_v32 = vpack.c.bf16 %v4582_v2, %v4581_v15 }
 0xa21   :  { %v14806_v51 = vpop.f32.mrf.mxu1  ;;  %v4451_v19 = vmul.f32 1.442695, %v4434_v29  ;;  %v5072_v6 = vmul.f32 1.442695, %v5041_v46  ;;  %v5066_v30 = vmul.f32 1.442695, %v5038_v36 }
 0xa22   :  { %10438 = vmatpush3.bf16.xpose.msra.mxu0 %v4595_v32  ;;  %v17259_v36 = vld [vmem:[#allocation30_spill] sm:$0xff] }
 0xa23   :  { %v14810_v42 = vpop.f32.mrf.mxu1  ;;  %10439 = vmatprep.subr.bf16.mxu0 %v17103_v38  ;;  %11522 = vpow2.f32 %v4451_v19 }
 0xa24   :  { %v14828_v39 = vpop.eup %11516  ;;  %11524 = vpow2.f32 %v5070_v53  ;;  %v5378_v53 = vld [vmem:[#allocation4 + $0x158] sm:$0xff] }
 0xa25   :  { %v14813_v61 = vpop.f32.mrf.mxu1  ;;  %11526 = vpow2.f32 %v5072_v6  ;;  %v11001_v6 = vld [vmem:[%s16939_s2 + $0x30] sm:$0xff]  }
 0xa26   :  { %11528 = vpow2.f32 %v5066_v30 }
 0xa27   :  { %v14817_v1 = vpop.f32.mrf.mxu1  ;;  %11530 = vpow2.f32 %v5068_v26 }
 0xa29   :  { %v10541_v8 = vpop.f32.mrf.mxu1  ;;  %v14834_v2 = vpop.eup %11518 }
 0xa2a   :  { %v14819_v22 = vadd.f32 %v10541_v8, %v5381_v5  ;;  %v14849_v41 = vpop.eup %11520  ;;  %v5377_v5 = vld [vmem:[#allocation4 + $0x150] sm:$0xff] }
 0xa2b   :  { %v5492_v20 = vpop.f32.mrf.mxu1  ;;  %v14862_v46 = vadd.f32 %v14806_v51, %v5377_v5  ;;  %v14876_v51 = vadd.f32 %v14813_v61, %v5378_v53 }
 0xa2c   :  { %5535 = vmax.xlane.f32.xlu1 %v14819_v22  ;;  %v14832_v15 = vadd.f32 %v5492_v20, %v5379_v24 }
 0xa2d   :  { %v10542_v7 = vpop.f32.mrf.mxu1 }
 0xa2e   :  { %v14826_v59 = vadd.f32 %v10542_v7, %v5382_v0  ;;  %v5036_v7 = vsub.f32 %v14533_v16, %v14735_v33  ;;  %v5037_v33 = vsub.f32 %v14547_v35, %v14737_v57 }
 0xa2f   :  { %v5495_v58 = vpop.f32.mrf.mxu1 }
 0xa30   :  { %5537 = vmax.xlane.f32.xlu0 %v14826_v59  ;;  %4485 = vadd.xlane.f32.xlu1 %v14828_v39  ;;  %v14842_v60 = vadd.f32 %v5495_v58, %v5380_v47  ;;  %v14857_v0 = vpop.eup %11522  ;;  %v5064_v61 = vmul.f32 1.442695, %v5037_v33 }
 0xa31   :  { %v10569_v12 = vpop.f32.mrf.mxu1  ;;  %v14880_v30 = vpop.eup %11524 }
 0xa32   :  { %v5814_v25 = vadd.f32 %v10569_v12, %v14847_v40  ;;  %v17258_v12 = vld [vmem:[#allocation41_spill] sm:$0xff] }
 0xa33   :  { %v5805_v32 = vpop.f32.mrf.mxu1  ;;  %v307_v47 = vadd.f32 %v17259_v36, %v17258_v12  ;;  %v5373_v36 = vld [vmem:[#allocation4 + $0x130] sm:$0xff] }
 0xa34   :  { %4487 = vadd.xlane.f32.xlu0 %v14834_v2  ;;  %5531 = vmax.xlane.f32.xlu1 %v14832_v15  ;;  %v5806_v8 = vadd.f32 %v14847_v40, %v5805_v32  ;;  %v5062_v32 = vmul.f32 1.442695, %v5036_v7 }
 0xa35   :  { %v10570_v3 = vpop.f32.mrf.mxu1  ;;  %v14885_v35 = vpack.c.bf16 %v307_v47, %v307_v47 }
 0xa36   :  { %v5817_v50 = vadd.f32 %v10570_v3, %v14847_v40  ;;  %11532 = vpow2.f32 %v5062_v32 }
 0xa37   :  { %v5808_v29 = vpop.f32.mrf.mxu1  ;;  %11534 = vpow2.f32 %v5064_v61 }
 0xa38   :  { %v5809_v19 = vadd.f32 %v14847_v40, %v5808_v29  ;;  %5533 = vmax.xlane.f32.xlu0 %v14842_v60  ;;  %4481 = vadd.xlane.f32.xlu1 %v14849_v41  ;;  %v5869_v24 = vpack.c.bf16 %v5817_v50, %v5814_v25  ;;  %v5375_v50 = vld [vmem:[#allocation4 + $0x140] sm:$0xff]  ;;  %v5034_v25 = vsub.f32 %v14565_v11, %v14739_v4 }
 0xa39   :  { %v10573_v44 = vpop.f32.mrf.mxu1  ;;  %v14894_v26 = vadd.f32 %v14810_v42, %v5375_v50  ;;  %v5035_v11 = vsub.f32 %v14576_v49, %v14741_v23  ;;  %v5374_v50 = vld [vmem:[#allocation4 + $0x138] sm:$0xff] }
 0xa3a   :  { %v5868_v20 = vpack.c.bf16 %v5809_v19, %v5806_v8  ;;  %v5830_v57 = vadd.f32 %v10573_v44, %v14847_v40  ;;  %v14889_v19 = vpop.eup %11526  ;;  %v5058_v42 = vmul.f32 1.442695, %v5034_v25  ;;  %v5371_v25 = vld [vmem:[#allocation4 + $0x120] sm:$0xff] }
 0xa3b   :  { %v5821_v58 = vpop.f32.mrf.mxu1  ;;  %v5060_v23 = vmul.f32 1.442695, %v5035_v11  ;;  %v14944_v11 = vadd.f32 %v14795_v13, %v5371_v25  ;;  %v15011_v25 = vld [vmem:[%s16939_s2 + $0x8] sm:$0xff]  }
 0xa3c   :  { %10585 = vmatprep.mubr.msk.bf16.mxu1 %vm591_vm2, %v5868_v20  ;;  %4483 = vadd.xlane.f32.xlu0 %v14857_v0  ;;  %v5822_v29 = vadd.f32 %v14847_v40, %v5821_v58  ;;  %v5376_v20 = vld [vmem:[#allocation4 + $0x148] sm:$0xff]  ;;  %11536 = vpow2.f32 %v5058_v42 }
 0xa3d   :  { %5527 = vmax.xlane.f32.xlu1 %v14862_v46  ;;  %v10574_v16 = vpop.f32.mrf.mxu1  ;;  %10586 = vmatmul.mubr.msk.bf16.vlgmr.msra.gmra.mxu1 %vm591_vm2, %v5869_v24  ;;  %v14905_v4 = vadd.f32 %v14817_v1, %v5376_v20  ;;  %11538 = vpow2.f32 %v5060_v23  ;;  %v5372_v42 = vld [vmem:[#allocation4 + $0x128] sm:$0xff]  ;;  %v17263_v23 = vld [vmem:[#allocation49_spill] sm:$0xff] }
 0xa3e   :  { %10622 = vmatpush3.bf16.msra.mxu1 %v14722_v45  ;;  %v5833_v3 = vadd.f32 %v10574_v16, %v14847_v40 }
 0xa3f   :  { %v5824_v63 = vpop.f32.mrf.mxu1  ;;  %10623 = vmatprep.subr.bf16.mxu1 %v11001_v6 }
 0xa40   :  { %v5825_v5 = vadd.f32 %v14847_v40, %v5824_v63  ;;  %5529 = vmax.xlane.f32.xlu0 %v14876_v51  ;;  %v5871_v7 = vpack.c.bf16 %v5833_v3, %v5830_v57  ;;  %v5032_v3 = vsub.f32 %v14591_v10, %v14745_v17  ;;  %v14920_v63 = vadd.f32 %v14791_v34, %v5373_v36 }
 0xa41   :  { %5102 = vadd.xlane.f32.xlu1 %v14880_v30  ;;  %v10577_v45 = vpop.f32.mrf.mxu1  ;;  %v14929_v10 = vadd.f32 %v14798_v54, %v5374_v50  ;;  %v14953_v36 = vadd.f32 %v14804_v18, %v5372_v42  ;;  %v5370_v18 = vld [vmem:[#allocation4 + $0x118] sm:$0xff]  ;;  %v5367_v50 = vld [vmem:[#allocation4 + $0x100] sm:$0xff] }
 0xa42   :  { %v5870_v8 = vpack.c.bf16 %v5825_v5, %v5822_v29  ;;  %10624 = vmatpush3.bf16.msra.mxu1 %v11001_v6  ;;  %v14908_v6 = vpop.eup %11528  ;;  %v5846_v33 = vadd.f32 %v10577_v45, %v14847_v40  ;;  %v5033_v45 = vsub.f32 %v14600_v48, %v14748_v43  ;;  %v5054_v17 = vmul.f32 1.442695, %v5032_v3  ;;  %v17265_v3 = vld [vmem:[#allocation26_spill] sm:$0xff] }
 0xa43   :  { %10922 = vmatprep.subr.msk.bf16.mxu1 %vm616_vm1, %v14885_v35  ;;  %v5837_v44 = vpop.f32.mrf.mxu1  ;;  %v14915_v32 = vpop.eup %11530 }
 0xa44   :  { %10589 = vmatprep.mubr.msk.bf16.mxu1 %vm591_vm2, %v5870_v8  ;;  %5104 = vadd.xlane.f32.xlu0 %v14889_v19  ;;  %v5838_v47 = vadd.f32 %v14847_v40, %v5837_v44  ;;  %v14932_v8 = vpop.eup %11532  ;;  %v5056_v48 = vmul.f32 1.442695, %v5033_v45  ;;  %11540 = vpow2.f32 %v5054_v17  ;;  %v17269_v45 = vld [vmem:[#allocation15_spill] sm:$0xff] }
 0xa45   :  { %5523 = vmax.xlane.f32.xlu1 %v14894_v26  ;;  %v10578_v53 = vpop.f32.mrf.mxu1  ;;  %10590 = vmatmul.mubr.msk.bf16.gmra.mxu1 %vm591_vm2, %v5871_v7  ;;  %v14939_v54 = vpop.eup %11534 }
 0xa46   :  { %v5849_v24 = vadd.f32 %v10578_v53, %v14847_v40  ;;  %v5030_v53 = vsub.f32 %v14615_v55, %v14752_v28  ;;  %11542 = vpow2.f32 %v5056_v48  ;;  %v17261_v55 = vld [vmem:[#allocation48_spill] sm:$0xff] }
 0xa47   :  { %v5840_v58 = vpop.f32.mrf.mxu1 }
 0xa48   :  { %v5841_v16 = vadd.f32 %v14847_v40, %v5840_v58  ;;  %5525 = vmax.xlane.f32.xlu0 %v14905_v4  ;;  %v5873_v29 = vpack.c.bf16 %v5849_v24, %v5846_v33  ;;  %v5050_v28 = vmul.f32 1.442695, %v5030_v53 }
 0xa49   :  { %5098 = vadd.xlane.f32.xlu1 %v14908_v6  ;;  %v10581_v49 = vpop.f32.mrf.mxu1  ;;  %v14957_v13 = vpop.eup %11536 }
 0xa4a   :  { %v5872_v1 = vpack.c.bf16 %v5841_v16, %v5838_v47  ;;  %v5862_v44 = vadd.f32 %v10581_v49, %v14847_v40  ;;  %v5369_v47 = vld [vmem:[#allocation4 + $0x110] sm:$0xff]  ;;  %v14961_v33 = vpop.eup %11538  ;;  %11544 = vpow2.f32 %v5050_v28  ;;  %v6434_v49 = vsel %vm616_vm1, %v14885_v35, 0 }
 0xa4b   :  { %v5853_v5 = vpop.f32.mrf.mxu1 }
 0xa4c   :  { %10593 = vmatprep.mubr.msk.bf16.mxu1 %vm591_vm2, %v5872_v1  ;;  %5100 = vadd.xlane.f32.xlu0 %v14915_v32  ;;  %v5854_v20 = vadd.f32 %v14847_v40, %v5853_v5  ;;  %v14973_v1 = vadd.f32 %v14785_v14, %v5370_v18  ;;  %v5368_v5 = vld [vmem:[#allocation4 + $0x108] sm:$0xff]  ;;  %v17267_v14 = vld [vmem:[#allocation24_spill] sm:$0xff] }
 0xa4d   :  { %5519 = vmax.xlane.f32.xlu1 %v14920_v63  ;;  %v10582_v57 = vpop.f32.mrf.mxu1  ;;  %10594 = vmatmul.mubr.msk.bf16.gmra.mxu1 %vm591_vm2, %v5873_v29  ;;  %v14984_v29 = vadd.f32 %v14782_v62, %v5367_v50 }
 0xa4e   :  { %v5865_v34 = vadd.f32 %v10582_v57, %v14847_v40  ;;  %17264 = vst [vmem:[#allocation60_spill] sm:$0xff] %v14973_v1  ;;  %v14991_v57 = vadd.f32 %v14789_v9, %v5368_v5  ;;  %v17272_v9 = vld [vmem:[#allocation58_spill] sm:$0xff] }
 0xa4f   :  { %v5856_v61 = vpop.f32.mrf.mxu1  ;;  %17266 = vst [vmem:[#allocation21_spill] sm:$0xff] %v14984_v29 }
 0xa50   :  { %v5857_v7 = vadd.f32 %v14847_v40, %v5856_v61  ;;  %5521 = vmax.xlane.f32.xlu0 %v14929_v10  ;;  %v5875_v24 = vpack.c.bf16 %v5865_v34, %v5862_v44  ;;  %v17260_v40 = vld [vmem:[#allocation55_spill] sm:$0xff]  ;;  %17268 = vst [vmem:[#allocation46_spill] sm:$0xff] %v14991_v57  ;;  %v17271_v61 = vld [vmem:[#allocation57_spill] sm:$0xff] }
 0xa51   :  { %5094 = vadd.xlane.f32.xlu1 %v14932_v8  ;;  %v5031_v58 = vsub.f32 %v17260_v40, %v14757_v31  ;;  %v14964_v31 = vadd.f32 %v14780_v56, %v5369_v47  ;;  %v14977_v56 = vpop.eup %11540  ;;  %v17270_v34 = vld [vmem:[#allocation19_spill] sm:$0xff] }
 0xa52   :  { %v5874_v43 = vpack.c.bf16 %v5857_v7, %v5854_v20 }
 0xa53   :  { %v5052_v16 = vmul.f32 1.442695, %v5031_v58  ;;  %17262 = vst [vmem:[#allocation54_spill] sm:$0xff] %v14964_v31  ;;  %v14981_v35 = vpop.eup %11542 }
 0xa54   :  { %10597 = vmatprep.mubr.msk.bf16.mxu1 %vm591_vm2, %v5874_v43  ;;  %5096 = vadd.xlane.f32.xlu0 %v14939_v54 }
 0xa55   :  { %5515 = vmax.xlane.f32.xlu1 %v14944_v11  ;;  %10598 = vmatmul.mubr.msk.bf16.gmra.mxu1 %vm591_vm2, %v5875_v24  ;;  %11546 = vpow2.f32 %v5052_v16 }
 0xa56   :  { %10625 = vmatprep.mubr.msk.bf16.mxu1 %vm172_vm0, %v17261_v55 }
 0xa57   :  { %v14995_v17 = vpop.eup %11544 }
 0xa58   :  { %5517 = vmax.xlane.f32.xlu0 %v14953_v36 }
 0xa59   :  { %5090 = vadd.xlane.f32.xlu1 %v14957_v13 }
 0xa5c   :  { %5092 = vadd.xlane.f32.xlu0 %v14961_v33 }
 0xa5d   :  { %5511 = vmax.xlane.f32.xlu1 %v14964_v31  ;;  %10626 = vmatmul.mubr.msk.bf16.vlgmr.msra.gmra.mxu1 %vm172_vm0, %v17263_v23 }
 0xa5e   :  { %10642 = vmatpush3.bf16.msra.mxu1 %v6434_v49  ;;  %10629 = vmatprep.mubr.msk.bf16.mxu1 %vm172_vm0, %v17265_v3 }
 0xa5f   :  { %10679 = vmatprep.subr.bf16.mxu1 %v15011_v25 }
 0xa60   :  { %5513 = vmax.xlane.f32.xlu0 %v14973_v1 }
 0xa61   :  { %5086 = vadd.xlane.f32.xlu1 %v14977_v56 }
 0xa62   :  { %v14999_v62 = vpop.eup %11546 }
 0xa64   :  { %5088 = vadd.xlane.f32.xlu0 %v14981_v35 }
 0xa65   :  { %5507 = vmax.xlane.f32.xlu1 %v14984_v29  ;;  %10630 = vmatmul.mubr.msk.bf16.gmra.mxu1 %vm172_vm0, %v17267_v14 }
 0xa66   :  { %10633 = vmatprep.mubr.msk.bf16.mxu1 %vm172_vm0, %v17269_v45 }
 0xa68   :  { %5509 = vmax.xlane.f32.xlu0 %v14991_v57 }
 0xa69   :  { %5082 = vadd.xlane.f32.xlu1 %v14995_v17 }
 0xa6c   :  { %5084 = vadd.xlane.f32.xlu0 %v14999_v62 }
 0xa6d   :  { %10634 = vmatmul.mubr.msk.bf16.gmra.mxu1 %vm172_vm0, %v17270_v34 }
 0xa6e   :  { %10637 = vmatprep.mubr.msk.bf16.mxu1 %vm172_vm0, %v17271_v61 }
 0xa75   :  { %10638 = vmatmul.mubr.msk.bf16.gmra.mxu1 %vm172_vm0, %v17272_v9 }
 0xab5   :  { %v15014_v20 = vpop.xlane.xlu1 %5535 }
 0xab9   :  { %v15016_v7 = vpop.xlane.xlu0 %5537  ;;  %v4486_v44 = vpop.xlane.xlu1 %4485 }
 0xaba   :  { %v15018_v48 = vpop.f32.mrf.mxu0  ;;  %11548 = vrcp.f32 %v4486_v44 }
 0xabb   :  { %17273 = vst [vmem:[#allocation12_spill] sm:$0xff] %v15018_v48 }
 0xabc   :  { %v10387_v43 = vpop.f32.mrf.mxu0 }
 0xabd   :  { %v4488_v53 = vpop.xlane.xlu0 %4487  ;;  %v15020_v42 = vpop.xlane.xlu1 %5531 }
 0xabe   :  { %v4124_v24 = vpop.f32.mrf.mxu0  ;;  %11550 = vrcp.f32 %v4488_v53 }
 0xac0   :  { %v10388_v40 = vpop.f32.mrf.mxu0 }
 0xac1   :  { %v15022_v58 = vpop.xlane.xlu0 %5533  ;;  %v4482_v55 = vpop.xlane.xlu1 %4481 }
 0xac2   :  { %11552 = vrcp.f32 %v4482_v55 }
 0xac5   :  { %v4484_v28 = vpop.xlane.xlu0 %4483 }
 0xac6   :  { %v15024_v47 = vpop.xlane.xlu1 %5527  ;;  %11554 = vrcp.f32 %v4484_v28 }
 0xac7   :  { %v11549_v16 = vpop.eup %11548 }
 0xac8   :  { %v4531_v18 = vmul.f32 %v11549_v16, %v4486_v44 }
 0xac9   :  { %v15026_v49 = vpop.xlane.xlu0 %5529 }
 0xaca   :  { %v5103_v23 = vpop.xlane.xlu1 %5102  ;;  %v4547_v3 = vsub.f32 2.0, %v4531_v18 }
 0xacb   :  { %v11551_v50 = vpop.eup %11550  ;;  %11556 = vrcp.f32 %v5103_v23 }
 0xacc   :  { %v4532_v5 = vmul.f32 %v11551_v50, %v4488_v53  ;;  %v4563_v34 = vmul.f32 %v11549_v16, %v4547_v3 }
 0xacd   :  { %v5105_v14 = vpop.xlane.xlu0 %5104 }
 0xace   :  { %v15028_v45 = vpop.xlane.xlu1 %5523  ;;  %v4548_v61 = vsub.f32 2.0, %v4532_v5  ;;  %11558 = vrcp.f32 %v5105_v14  ;;  %v4579_v44 = vmul.f32 %v14828_v39, %v4563_v34 }
 0xacf   :  { %v11553_v9 = vpop.eup %11552 }
 0xad0   :  { %v4564_v43 = vmul.f32 %v11551_v50, %v4548_v61  ;;  %v4529_v24 = vmul.f32 %v11553_v9, %v4482_v55 }
 0xad1   :  { %v15030_v40 = vpop.xlane.xlu0 %5525 }
 0xad2   :  { %v5099_v48 = vpop.xlane.xlu1 %5098  ;;  %v4580_v12 = vmul.f32 %v14834_v2, %v4564_v43  ;;  %v4545_v18 = vsub.f32 2.0, %v4529_v24 }
 0xad3   :  { %v11555_v57 = vpop.eup %11554  ;;  %11560 = vrcp.f32 %v5099_v48 }
 0xad4   :  { %v4530_v53 = vmul.f32 %v11555_v57, %v4484_v28  ;;  %v4594_v1 = vpack.c.bf16 %v4580_v12, %v4579_v44  ;;  %v4561_v16 = vmul.f32 %v11553_v9, %v4545_v18 }
 0xad5   :  { %v5101_v29 = vpop.xlane.xlu0 %5100 }
 0xad6   :  { %v15034_v31 = vpop.xlane.xlu1 %5519  ;;  %v4546_v3 = vsub.f32 2.0, %v4530_v53  ;;  %11562 = vrcp.f32 %v5101_v29  ;;  %10440 = vmatpush3.bf16.xpose.msra.mxu0 %v4594_v1  ;;  %v4577_v34 = vmul.f32 %v14849_v41, %v4561_v16  ;;  %v17275_v53 = vld [vmem:[#allocation22_spill] sm:$0xff] }
 0xad7   :  { %10441 = vmatprep.subr.bf16.mxu0 %v17103_v38 }
 0xad8   :  { %v11557_v55 = vpop.eup %11556  ;;  %v4562_v50 = vmul.f32 %v11555_v57, %v4546_v3  ;;  %v17274_v57 = vld [vmem:[#allocation51_spill] sm:$0xff] }
 0xad9   :  { %v15037_v5 = vpop.xlane.xlu0 %5521  ;;  %v5136_v39 = vmul.f32 %v11557_v55, %v5103_v23  ;;  %v256_v23 = vadd.f32 %v17275_v53, %v17274_v57 }
 0xada   :  { %v5095_v2 = vpop.xlane.xlu1 %5094  ;;  %v4578_v28 = vmul.f32 %v14857_v0, %v4562_v50 }
 0xadb   :  { %v11559_v61 = vpop.eup %11558  ;;  %v5152_v12 = vsub.f32 2.0, %v5136_v39  ;;  %11564 = vrcp.f32 %v5095_v2 }
 0xadc   :  { %v5137_v43 = vmul.f32 %v11559_v61, %v5105_v14  ;;  %v4593_v24 = vpack.c.bf16 %v4578_v28, %v4577_v34  ;;  %v4259_v28 = vpack.c.bf16 %v256_v23, %v256_v23 }
 0xadd   :  { %v5097_v9 = vpop.xlane.xlu0 %5096  ;;  %v5168_v1 = vmul.f32 %v11557_v55, %v5152_v12 }
 0xade   :  { %v15041_v44 = vpop.xlane.xlu1 %5515  ;;  %v5153_v18 = vsub.f32 2.0, %v5137_v43  ;;  %11566 = vrcp.f32 %v5097_v9  ;;  %10442 = vmatpush3.bf16.xpose.msra.mxu0 %v4593_v24 }
 0xadf   :  { %10485 = vmatprep.subr.bf16.mxu0 %v17103_v38  ;;  %v5184_v14 = vmul.f32 %v14880_v30, %v5168_v1 }
 0xae0   :  { %v11561_v41 = vpop.eup %11560  ;;  %v5169_v16 = vmul.f32 %v11559_v61, %v5153_v18 }
 0xae1   :  { %v15046_v0 = vpop.xlane.xlu0 %5517  ;;  %v5134_v3 = vmul.f32 %v11561_v41, %v5099_v48 }
 0xae2   :  { %v5091_v50 = vpop.xlane.xlu1 %5090  ;;  %v5185_v39 = vmul.f32 %v14889_v19, %v5169_v16 }
 0xae3   :  { %v11563_v34 = vpop.eup %11562  ;;  %v5150_v55 = vsub.f32 2.0, %v5134_v3  ;;  %11568 = vrcp.f32 %v5091_v50 }
 0xae4   :  { %v5135_v12 = vmul.f32 %v11563_v34, %v5101_v29  ;;  %v5193_v24 = vpack.c.bf16 %v5185_v39, %v5184_v14 }
 0xae5   :  { %v5093_v43 = vpop.xlane.xlu0 %5092  ;;  %10444 = vmatmul.mubr.bf16.vlgmr.msra.gmra.mxu0 %v4259_v28  ;;  %v5166_v57 = vmul.f32 %v11561_v41, %v5150_v55 }
 0xae6   :  { %v15050_v53 = vpop.xlane.xlu1 %5511  ;;  %v5151_v61 = vsub.f32 2.0, %v5135_v12  ;;  %11570 = vrcp.f32 %v5093_v43  ;;  %10486 = vmatpush3.bf16.xpose.msra.mxu0 %v5193_v24  ;;  %10501 = vmatprep.mubr.msk.bf16.mxu0 %vm12126_vm3, %v17103_v38 }
 0xae7   :  { %10487 = vmatprep.subr.bf16.mxu0 %v17103_v38  ;;  %v5182_v18 = vmul.f32 %v14908_v6, %v5166_v57 }
 0xae8   :  { %v11565_v30 = vpop.eup %11564  ;;  %v5167_v19 = vmul.f32 %v11563_v34, %v5151_v61 }
 0xae9   :  { %v15055_v48 = vpop.xlane.xlu0 %5513  ;;  %v5132_v1 = vmul.f32 %v11565_v30, %v5095_v2 }
 0xaea   :  { %v5087_v29 = vpop.xlane.xlu1 %5086  ;;  %v5183_v23 = vmul.f32 %v14915_v32, %v5167_v19 }
 0xaeb   :  { %v11567_v16 = vpop.eup %11566  ;;  %v5148_v41 = vsub.f32 2.0, %v5132_v1  ;;  %11572 = vrcp.f32 %v5087_v29 }
 0xaec   :  { %v5133_v3 = vmul.f32 %v11567_v16, %v5097_v9  ;;  %v5192_v39 = vpack.c.bf16 %v5183_v23, %v5182_v18 }
 0xaed   :  { %v5089_v14 = vpop.xlane.xlu0 %5088  ;;  %v5164_v28 = vmul.f32 %v11565_v30, %v5148_v41 }
 0xaee   :  { %v15059_v55 = vpop.xlane.xlu1 %5507  ;;  %v5149_v12 = vsub.f32 2.0, %v5133_v3  ;;  %11574 = vrcp.f32 %v5089_v14  ;;  %10488 = vmatpush3.bf16.xpose.msra.mxu0 %v5192_v39 }
 0xaef   :  { %10489 = vmatprep.subr.bf16.mxu0 %v17103_v38  ;;  %v5180_v57 = vmul.f32 %v14932_v8, %v5164_v28 }
 0xaf0   :  { %v11569_v2 = vpop.eup %11568  ;;  %v5165_v34 = vmul.f32 %v11567_v16, %v5149_v12 }
 0xaf1   :  { %v15062_v24 = vpop.xlane.xlu0 %5509  ;;  %v5130_v6 = vmul.f32 %v11569_v2, %v5091_v50 }
 0xaf2   :  { %v5083_v32 = vpop.xlane.xlu1 %5082  ;;  %v5181_v9 = vmul.f32 %v14939_v54, %v5165_v34 }
 0xaf3   :  { %v11571_v61 = vpop.eup %11570  ;;  %v5146_v19 = vsub.f32 2.0, %v5130_v6  ;;  %11576 = vrcp.f32 %v5083_v32 }
 0xaf4   :  { %v5131_v1 = vmul.f32 %v11571_v61, %v5093_v43  ;;  %v5191_v18 = vpack.c.bf16 %v5181_v9, %v5180_v57 }
 0xaf5   :  { %v5085_v30 = vpop.xlane.xlu0 %5084  ;;  %v5162_v23 = vmul.f32 %v11569_v2, %v5146_v19 }
 0xaf6   :  { %v5147_v41 = vsub.f32 2.0, %v5131_v1  ;;  %11578 = vrcp.f32 %v5085_v30  ;;  %10490 = vmatpush3.bf16.xpose.msra.mxu0 %v5191_v18 }
 0xaf7   :  { %10491 = vmatprep.subr.bf16.mxu0 %v17103_v38  ;;  %v5178_v39 = vmul.f32 %v14957_v13, %v5162_v23 }
 0xaf8   :  { %v11573_v16 = vpop.eup %11572  ;;  %v5163_v3 = vmul.f32 %v11571_v61, %v5147_v41 }
 0xaf9   :  { %v5128_v50 = vmul.f32 %v11573_v16, %v5087_v29 }
 0xafa   :  { %v5179_v8 = vmul.f32 %v14961_v33, %v5163_v3  ;;  %v17276_v3 = vld [vmem:[#allocation14_spill] sm:$0xff] }
 0xafb   :  { %v11575_v54 = vpop.eup %11574  ;;  %v5144_v28 = vsub.f32 2.0, %v5128_v50  ;;  %v5028_v50 = vsub.f32 %v17276_v3, %v14761_v21 }
 0xafc   :  { %v5129_v12 = vmul.f32 %v11575_v54, %v5089_v14  ;;  %v5190_v43 = vpack.c.bf16 %v5179_v8, %v5178_v39 }
 0xafd   :  { %v15069_v34 = vpop.f32.mrf.mxu1  ;;  %v5160_v6 = vmul.f32 %v11573_v16, %v5144_v28  ;;  %v17277_v28 = vld [vmem:[#allocation56_spill] sm:$0xff] }
 0xafe   :  { %v5145_v2 = vsub.f32 2.0, %v5129_v12  ;;  %10492 = vmatpush3.bf16.xpose.msra.mxu0 %v5190_v43 }
 0xaff   :  { %v15071_v57 = vpop.f32.mrf.mxu1  ;;  %10493 = vmatprep.subr.bf16.mxu0 %v17103_v38  ;;  %v5176_v33 = vmul.f32 %v14977_v56, %v5160_v6 }
 0xb00   :  { %v11577_v9 = vpop.eup %11576  ;;  %v5161_v61 = vmul.f32 %v11575_v54, %v5145_v2 }
 0xb01   :  { %v15074_v29 = vpop.f32.mrf.mxu1  ;;  %v5126_v13 = vmul.f32 %v11577_v9, %v5083_v32  ;;  %v5046_v32 = vmul.f32 1.442695, %v5028_v50 }
 0xb02   :  { %v5177_v19 = vmul.f32 %v14981_v35, %v5161_v61  ;;  %v17278_v61 = vld [vmem:[#allocation44_spill] sm:$0xff] }
 0xb03   :  { %v15078_v14 = vpop.f32.mrf.mxu1  ;;  %v11579_v1 = vpop.eup %11578  ;;  %v5142_v18 = vsub.f32 2.0, %v5126_v13  ;;  %11580 = vpow2.f32 %v5046_v32  ;;  %v5026_v13 = vsub.f32 %v17278_v61, %v14770_v52  ;;  %v5553_v52 = vsub.f32 %v14819_v22, %v15014_v20 }
 0xb04   :  { %v5127_v23 = vmul.f32 %v11579_v1, %v5085_v30  ;;  %v5189_v16 = vpack.c.bf16 %v5177_v19, %v5176_v33  ;;  %v5029_v30 = vsub.f32 %v17277_v28, %v14766_v27 }
 0xb05   :  { %v15080_v41 = vpop.f32.mrf.mxu1  ;;  %v5158_v39 = vmul.f32 %v11577_v9, %v5142_v18  ;;  %v5894_v18 = vld [vmem:[#allocation4 + $0x270] sm:$0xff]  ;;  %v5583_v28 = vmul.f32 1.442695, %v5553_v52 }
 0xb06   :  { %v5143_v8 = vsub.f32 2.0, %v5127_v23  ;;  %10494 = vmatpush3.bf16.xpose.msra.mxu0 %v5189_v16  ;;  %v5048_v9 = vmul.f32 1.442695, %v5029_v30  ;;  %v5892_v30 = vld [vmem:[#allocation4 + $0x260] sm:$0xff] }
 0xb07   :  { %v15084_v54 = vpop.f32.mrf.mxu1  ;;  %10495 = vmatprep.subr.bf16.mxu0 %v17103_v38  ;;  %v5174_v12 = vmul.f32 %v14995_v17, %v5158_v39  ;;  %v5042_v17 = vmul.f32 1.442695, %v5026_v13  ;;  %v5895_v39 = vld [vmem:[#allocation4 + $0x278] sm:$0xff]  ;;  %v5552_v13 = vsub.f32 %v14842_v60, %v15022_v58 }
 0xb08   :  { %v5159_v56 = vmul.f32 %v11579_v1, %v5143_v8  ;;  %11582 = vpow2.f32 %v5048_v9 }
 0xb09   :  { %v15087_v35 = vpop.f32.mrf.mxu1  ;;  %11584 = vpow2.f32 %v5042_v17 }
 0xb0a   :  { %v5175_v43 = vmul.f32 %v14999_v62, %v5159_v56  ;;  %v17279_v62 = vld [vmem:[#allocation45_spill] sm:$0xff] }
 0xb0b   :  { %v15093_v6 = vpop.f32.mrf.mxu1  ;;  %v5027_v19 = vsub.f32 %v17279_v62, %v14773_v37  ;;  %v5554_v37 = vsub.f32 %v14826_v59, %v15016_v7  ;;  %v5551_v59 = vsub.f32 %v14832_v15, %v15020_v42  ;;  %v5893_v7 = vld [vmem:[#allocation4 + $0x268] sm:$0xff]  ;;  %v15136_v62 = vld [vmem:[%s16940_s3 + $0x3] ss:$0 sm:$0xff] }
 0xb0c   :  { %v5188_v2 = vpack.c.bf16 %v5175_v43, %v5174_v12 }
 0xb0d   :  { %v15095_v21 = vpop.f32.mrf.mxu1  ;;  %v5044_v16 = vmul.f32 1.442695, %v5027_v19  ;;  %v5585_v20 = vmul.f32 1.442695, %v5554_v37  ;;  %v5579_v15 = vmul.f32 1.442695, %v5551_v59  ;;  %v5549_v37 = vsub.f32 %v14862_v46, %v15024_v47 }
 0xb0e   :  { %10496 = vmatpush3.bf16.xpose.msra.mxu0 %v5188_v2  ;;  %v11003_v59 = vld [vmem:[%s16939_s2] sm:$0xff]   ;;  %v5550_v47 = vsub.f32 %v14876_v51, %v15026_v49 }
 0xb0f   :  { %v15099_v33 = vpop.f32.mrf.mxu1  ;;  %10497 = vmatprep.subr.bf16.mxu0 %v17103_v38  ;;  %11586 = vpow2.f32 %v5044_v16 }
 0xb10   :  { %v15117_v32 = vpop.eup %11580  ;;  %11588 = vpow2.f32 %v5583_v28 }
 0xb11   :  { %v15102_v27 = vpop.f32.mrf.mxu1  ;;  %11590 = vpow2.f32 %v5585_v20 }
 0xb12   :  { %11592 = vpow2.f32 %v5579_v15 }
 0xb13   :  { %v15106_v1 = vpop.f32.mrf.mxu1 }
 0xb15   :  { %v10599_v23 = vpop.f32.mrf.mxu1  ;;  %v15123_v2 = vpop.eup %11582 }
 0xb16   :  { %v15108_v3 = vadd.f32 %v10599_v23, %v5894_v18  ;;  %v15138_v19 = vpop.eup %11584  ;;  %v5890_v23 = vld [vmem:[#allocation4 + $0x250] sm:$0xff] }
 0xb17   :  { %v6005_v50 = vpop.f32.mrf.mxu1  ;;  %v15151_v28 = vadd.f32 %v15095_v21, %v5890_v23 }
 0xb18   :  { %6048 = vmax.xlane.f32.xlu1 %v15108_v3  ;;  %v15121_v43 = vadd.f32 %v6005_v50, %v5892_v30  ;;  %v5581_v50 = vmul.f32 1.442695, %v5552_v13  ;;  %v5891_v30 = vld [vmem:[#allocation4 + $0x258] sm:$0xff] }
 0xb19   :  { %v10600_v8 = vpop.f32.mrf.mxu1  ;;  %v15165_v21 = vadd.f32 %v15102_v27, %v5891_v30  ;;  %v5577_v27 = vmul.f32 1.442695, %v5550_v47 }
 0xb1a   :  { %v15115_v56 = vadd.f32 %v10600_v8, %v5895_v39  ;;  %11594 = vpow2.f32 %v5581_v50  ;;  %v5547_v50 = vsub.f32 %v14894_v26, %v15028_v45  ;;  %v5548_v26 = vsub.f32 %v14905_v4, %v15030_v40 }
 0xb1b   :  { %v6008_v12 = vpop.f32.mrf.mxu1 }
 0xb1c   :  { %6050 = vmax.xlane.f32.xlu0 %v15115_v56  ;;  %5078 = vadd.xlane.f32.xlu1 %v15117_v32  ;;  %v15131_v17 = vadd.f32 %v6008_v12, %v5893_v7  ;;  %v15146_v8 = vpop.eup %11586  ;;  %v17281_v7 = vld [vmem:[#allocation25_spill] sm:$0xff]  ;;  %v5573_v40 = vmul.f32 1.442695, %v5548_v26  ;;  %v5543_v26 = vsub.f32 %v14944_v11, %v15041_v44 }
 0xb1d   :  { %v10627_v22 = vpop.f32.mrf.mxu1 }
 0xb1e   :  { %v6327_v60 = vadd.f32 %v10627_v22, %v15136_v62  ;;  %v17280_v22 = vld [vmem:[#allocation10_spill] sm:$0xff]  ;;  %v5563_v11 = vmul.f32 1.442695, %v5543_v26 }
 0xb1f   :  { %v6318_v9 = vpop.f32.mrf.mxu1 }
 0xb20   :  { %5080 = vadd.xlane.f32.xlu0 %v15123_v2  ;;  %6044 = vmax.xlane.f32.xlu1 %v15121_v43  ;;  %v6319_v16 = vadd.f32 %v15136_v62, %v6318_v9  ;;  %v295_v9 = vadd.f32 %v17281_v7, %v17280_v22  ;;  %v5886_v7 = vld [vmem:[#allocation4 + $0x230] sm:$0xff] }
 0xb21   :  { %v10628_v61 = vpop.f32.mrf.mxu1 }
 0xb22   :  { %v6330_v42 = vadd.f32 %v10628_v61, %v15136_v62  ;;  %v5575_v61 = vmul.f32 1.442695, %v5549_v37  ;;  %v15174_v51 = vpack.c.bf16 %v295_v9, %v295_v9  ;;  %v5889_v37 = vld [vmem:[#allocation4 + $0x248] sm:$0xff] }
 0xb23   :  { %v6321_v18 = vpop.f32.mrf.mxu1  ;;  %v15194_v45 = vadd.f32 %v15106_v1, %v5889_v37 }
 0xb24   :  { %v6322_v52 = vadd.f32 %v15136_v62, %v6321_v18  ;;  %6046 = vmax.xlane.f32.xlu0 %v15131_v17  ;;  %5074 = vadd.xlane.f32.xlu1 %v15138_v19  ;;  %v6382_v12 = vpack.c.bf16 %v6330_v42, %v6327_v60  ;;  %v15169_v42 = vpop.eup %11588  ;;  %v5888_v18 = vld [vmem:[#allocation4 + $0x240] sm:$0xff]  ;;  %11596 = vpow2.f32 %v5575_v61 }
 0xb25   :  { %v10631_v58 = vpop.f32.mrf.mxu1  ;;  %v15178_v60 = vpop.eup %11590  ;;  %11598 = vpow2.f32 %v5577_v27 }
 0xb26   :  { %v6381_v39 = vpack.c.bf16 %v6322_v52, %v6319_v16  ;;  %v6343_v49 = vadd.f32 %v10631_v58, %v15136_v62  ;;  %v15197_v22 = vpop.eup %11592 }
 0xb27   :  { %v6334_v20 = vpop.f32.mrf.mxu1  ;;  %v15204_v61 = vpop.eup %11594 }
 0xb28   :  { %10643 = vmatprep.mubr.msk.bf16.mxu1 %vm591_vm2, %v6381_v39  ;;  %5076 = vadd.xlane.f32.xlu0 %v15146_v8  ;;  %v6335_v23 = vadd.f32 %v15136_v62, %v6334_v20  ;;  %v15183_v39 = vadd.f32 %v15099_v33, %v5888_v18  ;;  %v5571_v33 = vmul.f32 1.442695, %v5547_v50  ;;  %v5887_v18 = vld [vmem:[#allocation4 + $0x238] sm:$0xff]  ;;  %v5884_v50 = vld [vmem:[#allocation4 + $0x220] sm:$0xff] }
 0xb29   :  { %6040 = vmax.xlane.f32.xlu1 %v15151_v28  ;;  %v10632_v46 = vpop.f32.mrf.mxu1  ;;  %10644 = vmatmul.mubr.msk.bf16.vlgmr.msra.gmra.mxu1 %vm591_vm2, %v6382_v12 }
 0xb2a   :  { %10680 = vmatpush3.bf16.msra.mxu1 %v15011_v25  ;;  %v6346_v13 = vadd.f32 %v10632_v46, %v15136_v62  ;;  %11600 = vpow2.f32 %v5571_v33  ;;  %v15238_v33 = vadd.f32 %v15084_v54, %v5884_v50  ;;  %v5882_v54 = vld [vmem:[#allocation4 + $0x210] sm:$0xff] }
 0xb2b   :  { %v6337_v15 = vpop.f32.mrf.mxu1  ;;  %10681 = vmatprep.subr.bf16.mxu1 %v11003_v59  ;;  %11602 = vpow2.f32 %v5573_v40 }
 0xb2c   :  { %v6338_v16 = vadd.f32 %v15136_v62, %v6337_v15  ;;  %6042 = vmax.xlane.f32.xlu0 %v15165_v21  ;;  %v6384_v30 = vpack.c.bf16 %v6346_v13, %v6343_v49  ;;  %v5545_v13 = vsub.f32 %v14920_v63, %v15034_v31  ;;  %v15209_v15 = vadd.f32 %v15080_v41, %v5886_v7 }
 0xb2d   :  { %5615 = vadd.xlane.f32.xlu1 %v15169_v42  ;;  %v10635_v25 = vpop.f32.mrf.mxu1  ;;  %v15218_v63 = vadd.f32 %v15087_v35, %v5887_v18  ;;  %v15231_v35 = vld [vmem:[%s16937_s0 + $0xc0] sm:$0xff]  }
 0xb2e   :  { %v6383_v52 = vpack.c.bf16 %v6338_v16, %v6335_v23  ;;  %10682 = vmatpush3.bf16.msra.mxu1 %v11003_v59  ;;  %v6359_v47 = vadd.f32 %v10635_v25, %v15136_v62  ;;  %v5546_v25 = vsub.f32 %v14929_v10, %v15037_v5  ;;  %v5567_v31 = vmul.f32 1.442695, %v5545_v13  ;;  %17282 = vst [vmem:[#allocation28_spill] sm:$0xff] %v15231_v35 }
 0xb2f   :  { %10923 = vmatprep.subr.msk.bf16.mxu1 %vm616_vm1, %v15174_v51  ;;  %v6350_v58 = vpop.f32.mrf.mxu1 }
 0xb30   :  { %10647 = vmatprep.mubr.msk.bf16.mxu1 %vm591_vm2, %v6383_v52  ;;  %5617 = vadd.xlane.f32.xlu0 %v15178_v60  ;;  %v6351_v9 = vadd.f32 %v15136_v62, %v6350_v58  ;;  %v5569_v10 = vmul.f32 1.442695, %v5546_v25  ;;  %11604 = vpow2.f32 %v5567_v31  ;;  %v15321_v25 = vld [vmem:[%s16937_s0 + $0xf0] sm:$0xff]   ;;  %v15333_v31 = vld [vmem:[%s16937_s0 + $0xf8] sm:$0xff]  }
 0xb31   :  { %6036 = vmax.xlane.f32.xlu1 %v15183_v39  ;;  %v10636_v12 = vpop.f32.mrf.mxu1  ;;  %10648 = vmatmul.mubr.msk.bf16.gmra.mxu1 %vm591_vm2, %v6384_v30  ;;  %v15221_v52 = vpop.eup %11596  ;;  %17292 = vst [vmem:[#allocation24_spill] sm:$0xff] %v15321_v25  ;;  %17293 = vst [vmem:[#allocation15_spill] sm:$0xff] %v15333_v31 }
 0xb32   :  { %v6362_v20 = vadd.f32 %v10636_v12, %v15136_v62  ;;  %v15233_v12 = vpop.eup %11598  ;;  %11606 = vpow2.f32 %v5569_v10 }
 0xb33   :  { %v6353_v59 = vpop.f32.mrf.mxu1  ;;  %11608 = vpow2.f32 %v5563_v11 }
 0xb34   :  { %v6354_v46 = vadd.f32 %v15136_v62, %v6353_v59  ;;  %6038 = vmax.xlane.f32.xlu0 %v15194_v45  ;;  %v6386_v23 = vpack.c.bf16 %v6362_v20, %v6359_v47  ;;  %v5885_v20 = vld [vmem:[#allocation4 + $0x228] sm:$0xff]  ;;  %v5544_v59 = vsub.f32 %v14953_v36, %v15046_v0  ;;  %v15263_v0 = vld [vmem:[%s16937_s0 + $0xd0] sm:$0xff]   ;;  %v5883_v47 = vld [vmem:[#allocation4 + $0x218] sm:$0xff] }
 0xb35   :  { %5611 = vadd.xlane.f32.xlu1 %v15197_v22  ;;  %v10639_v4 = vpop.f32.mrf.mxu1  ;;  %v15247_v7 = vadd.f32 %v15093_v6, %v5885_v20  ;;  %17284 = vst [vmem:[#allocation16_spill] sm:$0xff] %v15263_v0  ;;  %v15277_v40 = vadd.f32 %v15074_v29, %v5883_v47  ;;  %v15293_v29 = vld [vmem:[%s16937_s0 + $0xe0] sm:$0xff]  }
 0xb36   :  { %v6385_v1 = vpack.c.bf16 %v6354_v46, %v6351_v9  ;;  %v6375_v58 = vadd.f32 %v10639_v4, %v15136_v62  ;;  %v15258_v9 = vld [vmem:[%s16937_s0 + $0xc8] sm:$0xff]   ;;  %v5565_v36 = vmul.f32 1.442695, %v5544_v59  ;;  %v15268_v46 = vadd.f32 %v15069_v34, %v5882_v54  ;;  %17288 = vst [vmem:[#allocation55_spill] sm:$0xff] %v15293_v29 }
 0xb37   :  { %v6366_v16 = vpop.f32.mrf.mxu1  ;;  %v15251_v44 = vpop.eup %11600  ;;  %17283 = vst [vmem:[#allocation20_spill] sm:$0xff] %v15258_v9  ;;  %v7027_v4 = vsel %vm616_vm1, %v15174_v51, 0  ;;  %17286 = vst [vmem:[#allocation13_spill] sm:$0xff] %v15277_v40  ;;  %v15288_v51 = vld [vmem:[%s16937_s0 + $0xd8] sm:$0xff]  }
 0xb38   :  { %10651 = vmatprep.mubr.msk.bf16.mxu1 %vm591_vm2, %v6385_v1  ;;  %5613 = vadd.xlane.f32.xlu0 %v15204_v61  ;;  %v6367_v37 = vadd.f32 %v15136_v62, %v6366_v16  ;;  %v15265_v6 = vpop.eup %11602  ;;  %17285 = vst [vmem:[#allocation50_spill] sm:$0xff] %v15268_v46  ;;  %11610 = vpow2.f32 %v5565_v36  ;;  %v5880_v1 = vld [vmem:[#allocation4 + $0x200] sm:$0xff]  ;;  %17287 = vst [vmem:[#allocation30_spill] sm:$0xff] %v15288_v51 }
 0xb39   :  { %6032 = vmax.xlane.f32.xlu1 %v15209_v15  ;;  %v10640_v49 = vpop.f32.mrf.mxu1  ;;  %10652 = vmatmul.mubr.msk.bf16.gmra.mxu1 %vm591_vm2, %v6386_v23  ;;  %v15298_v18 = vadd.f32 %v15071_v57, %v5880_v1  ;;  %v5881_v23 = vld [vmem:[#allocation4 + $0x208] sm:$0xff] }
 0xb3a   :  { %v6378_v41 = vadd.f32 %v10640_v49, %v15136_v62  ;;  %v15305_v16 = vadd.f32 %v15078_v14, %v5881_v23  ;;  %v15316_v57 = vld [vmem:[%s16937_s0 + $0xe8] sm:$0xff]  }
 0xb3b   :  { %v6369_v27 = vpop.f32.mrf.mxu1  ;;  %17289 = vst [vmem:[#allocation48_spill] sm:$0xff] %v15298_v18  ;;  %17291 = vst [vmem:[#allocation26_spill] sm:$0xff] %v15316_v57 }
 0xb3c   :  { %v6370_v30 = vadd.f32 %v15136_v62, %v6369_v27  ;;  %6034 = vmax.xlane.f32.xlu0 %v15218_v63  ;;  %v6388_v62 = vpack.c.bf16 %v6378_v41, %v6375_v58  ;;  %17290 = vst [vmem:[#allocation49_spill] sm:$0xff] %v15305_v16  ;;  %v15340_v41 = vld [vmem:[%s16939_s2 + $0x18] sm:$0xff]  }
 0xb3d   :  { %5607 = vadd.xlane.f32.xlu1 %v15221_v52  ;;  %v15281_v34 = vpop.eup %11604 }
 0xb3e   :  { %v6387_v5 = vpack.c.bf16 %v6370_v30, %v6367_v37 }
 0xb3f   :  { %v15295_v13 = vpop.eup %11606 }
 0xb40   :  { %10655 = vmatprep.mubr.msk.bf16.mxu1 %vm591_vm2, %v6387_v5  ;;  %5609 = vadd.xlane.f32.xlu0 %v15233_v12  ;;  %v15309_v49 = vpop.eup %11608 }
 0xb41   :  { %6028 = vmax.xlane.f32.xlu1 %v15238_v33  ;;  %10656 = vmatmul.mubr.msk.bf16.gmra.mxu1 %vm591_vm2, %v6388_v62 }
 0xb42   :  { %10683 = vmatprep.mubr.msk.bf16.mxu1 %vm172_vm0, %v15231_v35 }
 0xb44   :  { %6030 = vmax.xlane.f32.xlu0 %v15247_v7 }
 0xb45   :  { %5603 = vadd.xlane.f32.xlu1 %v15251_v44  ;;  %v15323_v14 = vpop.eup %11610 }
 0xb48   :  { %5605 = vadd.xlane.f32.xlu0 %v15265_v6 }
 0xb49   :  { %6024 = vmax.xlane.f32.xlu1 %v15268_v46  ;;  %10684 = vmatmul.mubr.msk.bf16.vlgmr.msra.gmra.mxu1 %vm172_vm0, %v15258_v9 }
 0xb4a   :  { %10700 = vmatpush3.bf16.msra.mxu1 %v7027_v4  ;;  %10687 = vmatprep.mubr.msk.bf16.mxu1 %vm172_vm0, %v15263_v0 }
 0xb4b   :  { %10737 = vmatprep.subr.bf16.mxu1 %v15340_v41 }
 0xb4c   :  { %6026 = vmax.xlane.f32.xlu0 %v15277_v40 }
 0xb4d   :  { %5599 = vadd.xlane.f32.xlu1 %v15281_v34 }
 0xb50   :  { %5601 = vadd.xlane.f32.xlu0 %v15295_v13 }
 0xb51   :  { %6020 = vmax.xlane.f32.xlu1 %v15298_v18  ;;  %10688 = vmatmul.mubr.msk.bf16.gmra.mxu1 %vm172_vm0, %v15288_v51 }
 0xb52   :  { %10691 = vmatprep.mubr.msk.bf16.mxu1 %vm172_vm0, %v15293_v29 }
 0xb54   :  { %6022 = vmax.xlane.f32.xlu0 %v15305_v16 }
 0xb55   :  { %5595 = vadd.xlane.f32.xlu1 %v15309_v49 }
 0xb58   :  { %5597 = vadd.xlane.f32.xlu0 %v15323_v14 }
 0xb59   :  { %10692 = vmatmul.mubr.msk.bf16.gmra.mxu1 %vm172_vm0, %v15316_v57 }
 0xb5a   :  { %10695 = vmatprep.mubr.msk.bf16.mxu1 %vm172_vm0, %v15321_v25 }
 0xb61   :  { %10696 = vmatmul.mubr.msk.bf16.gmra.mxu1 %vm172_vm0, %v15333_v31 }
 0xba1   :  { %v15343_v27 = vpop.xlane.xlu1 %6048 }
 0xba5   :  { %v15345_v50 = vpop.xlane.xlu0 %6050  ;;  %v5079_v37 = vpop.xlane.xlu1 %5078 }
 0xba6   :  { %v15347_v30 = vpop.f32.mrf.mxu0  ;;  %11612 = vrcp.f32 %v5079_v37 }
 0xba7   :  { %17294 = vst [vmem:[#allocation19_spill] sm:$0xff] %v15347_v30 }
 0xba8   :  { %v10445_v58 = vpop.f32.mrf.mxu0 }
 0xba9   :  { %v5081_v10 = vpop.xlane.xlu0 %5080  ;;  %v15349_v5 = vpop.xlane.xlu1 %6044 }
 0xbaa   :  { %v4638_v26 = vpop.f32.mrf.mxu0  ;;  %11614 = vrcp.f32 %v5081_v10 }
 0xbac   :  { %v10446_v20 = vpop.f32.mrf.mxu0 }
 0xbad   :  { %v15351_v62 = vpop.xlane.xlu0 %6046  ;;  %v5075_v59 = vpop.xlane.xlu1 %5074 }
 0xbae   :  { %11616 = vrcp.f32 %v5075_v59 }
 0xbb1   :  { %v5077_v11 = vpop.xlane.xlu0 %5076 }
 0xbb2   :  { %v15353_v54 = vpop.xlane.xlu1 %6040  ;;  %11618 = vrcp.f32 %v5077_v11 }
 0xbb3   :  { %v11613_v36 = vpop.eup %11612 }
 0xbb4   :  { %v5124_v47 = vmul.f32 %v11613_v36, %v5079_v37 }
 0xbb5   :  { %v15355_v4 = vpop.xlane.xlu0 %6042 }
 0xbb6   :  { %v5616_v1 = vpop.xlane.xlu1 %5615  ;;  %v5140_v23 = vsub.f32 2.0, %v5124_v47 }
 0xbb7   :  { %v11615_v58 = vpop.eup %11614  ;;  %11620 = vrcp.f32 %v5616_v1 }
 0xbb8   :  { %v5125_v30 = vmul.f32 %v11615_v58, %v5081_v10  ;;  %v5156_v20 = vmul.f32 %v11613_v36, %v5140_v23 }
 0xbb9   :  { %v5618_v26 = vpop.xlane.xlu0 %5617 }
 0xbba   :  { %v15357_v16 = vpop.xlane.xlu1 %6036  ;;  %v5141_v18 = vsub.f32 2.0, %v5125_v30  ;;  %11622 = vrcp.f32 %v5618_v26  ;;  %v5172_v37 = vmul.f32 %v15117_v32, %v5156_v20 }
 0xbbb   :  { %v11617_v40 = vpop.eup %11616 }
 0xbbc   :  { %v5157_v46 = vmul.f32 %v11615_v58, %v5141_v18  ;;  %v5122_v31 = vmul.f32 %v11617_v40, %v5075_v59 }
 0xbbd   :  { %v15359_v25 = vpop.xlane.xlu0 %6038 }
 0xbbe   :  { %v5612_v57 = vpop.xlane.xlu1 %5611  ;;  %v5173_v29 = vmul.f32 %v15123_v2, %v5157_v46  ;;  %v5138_v47 = vsub.f32 2.0, %v5122_v31 }
 0xbbf   :  { %v11619_v51 = vpop.eup %11618  ;;  %11624 = vrcp.f32 %v5612_v57 }
 0xbc0   :  { %v5123_v10 = vmul.f32 %v11619_v51, %v5077_v11  ;;  %v5187_v9 = vpack.c.bf16 %v5173_v29, %v5172_v37  ;;  %v5154_v30 = vmul.f32 %v11617_v40, %v5138_v47 }
 0xbc1   :  { %v5614_v0 = vpop.xlane.xlu0 %5613 }
 0xbc2   :  { %v15363_v35 = vpop.xlane.xlu1 %6032  ;;  %v5139_v36 = vsub.f32 2.0, %v5123_v10  ;;  %11626 = vrcp.f32 %v5614_v0  ;;  %10498 = vmatpush3.bf16.xpose.msra.mxu0 %v5187_v9  ;;  %v5170_v46 = vmul.f32 %v15138_v19, %v5154_v30  ;;  %v17296_v10 = vld [vmem:[#allocation32_spill] sm:$0xff] }
 0xbc3   :  { %10499 = vmatprep.subr.bf16.mxu0 %v17103_v38 }
 0xbc4   :  { %v11621_v18 = vpop.eup %11620  ;;  %v5155_v59 = vmul.f32 %v11619_v51, %v5139_v36  ;;  %v17295_v51 = vld [vmem:[#allocation42_spill] sm:$0xff] }
 0xbc5   :  { %v15366_v23 = vpop.xlane.xlu0 %6034  ;;  %v5649_v32 = vmul.f32 %v11621_v18, %v5616_v1  ;;  %v313_v1 = vadd.f32 %v17296_v10, %v17295_v51 }
 0xbc6   :  { %v5608_v2 = vpop.xlane.xlu1 %5607  ;;  %v5171_v31 = vmul.f32 %v15146_v8, %v5155_v59 }
 0xbc7   :  { %v11623_v11 = vpop.eup %11622  ;;  %v5665_v29 = vsub.f32 2.0, %v5649_v32  ;;  %11628 = vrcp.f32 %v5608_v2 }
 0xbc8   :  { %v5650_v58 = vmul.f32 %v11623_v11, %v5618_v26  ;;  %v5186_v20 = vpack.c.bf16 %v5171_v31, %v5170_v46  ;;  %v4853_v31 = vpack.c.bf16 %v313_v1, %v313_v1 }
 0xbc9   :  { %v5610_v40 = vpop.xlane.xlu0 %5609  ;;  %v5681_v9 = vmul.f32 %v11621_v18, %v5665_v29 }
 0xbca   :  { %v15370_v37 = vpop.xlane.xlu1 %6028  ;;  %v5666_v47 = vsub.f32 2.0, %v5650_v58  ;;  %11630 = vrcp.f32 %v5610_v40  ;;  %10500 = vmatpush3.bf16.xpose.msra.mxu0 %v5186_v20 }
 0xbcb   :  { %10543 = vmatprep.subr.bf16.mxu0 %v17103_v38  ;;  %v5697_v26 = vmul.f32 %v15169_v42, %v5681_v9 }
 0xbcc   :  { %v11625_v19 = vpop.eup %11624  ;;  %v5682_v30 = vmul.f32 %v11623_v11, %v5666_v47 }
 0xbcd   :  { %v15375_v8 = vpop.xlane.xlu0 %6030  ;;  %v5647_v36 = vmul.f32 %v11625_v19, %v5612_v57 }
 0xbce   :  { %v5604_v59 = vpop.xlane.xlu1 %5603  ;;  %v5698_v32 = vmul.f32 %v15178_v60, %v5682_v30 }
 0xbcf   :  { %v11627_v46 = vpop.eup %11626  ;;  %v5663_v18 = vsub.f32 2.0, %v5647_v36  ;;  %11632 = vrcp.f32 %v5604_v59 }
 0xbd0   :  { %v5648_v29 = vmul.f32 %v11627_v46, %v5614_v0  ;;  %v5706_v20 = vpack.c.bf16 %v5698_v32, %v5697_v26 }
 0xbd1   :  { %v5606_v58 = vpop.xlane.xlu0 %5605  ;;  %10502 = vmatmul.mubr.bf16.vlgmr.msra.gmra.mxu0 %v4853_v31  ;;  %v5679_v51 = vmul.f32 %v11625_v19, %v5663_v18 }
 0xbd2   :  { %v15379_v10 = vpop.xlane.xlu1 %6024  ;;  %v5664_v11 = vsub.f32 2.0, %v5648_v29  ;;  %11634 = vrcp.f32 %v5606_v58  ;;  %10544 = vmatpush3.bf16.xpose.msra.mxu0 %v5706_v20  ;;  %10559 = vmatprep.mubr.msk.bf16.mxu0 %vm12126_vm3, %v17103_v38 }
 0xbd3   :  { %10545 = vmatprep.subr.bf16.mxu0 %v17103_v38  ;;  %v5695_v47 = vmul.f32 %v15197_v22, %v5679_v51 }
 0xbd4   :  { %v11629_v42 = vpop.eup %11628  ;;  %v5680_v60 = vmul.f32 %v11627_v46, %v5664_v11 }
 0xbd5   :  { %v15384_v57 = vpop.xlane.xlu0 %6026  ;;  %v5645_v9 = vmul.f32 %v11629_v42, %v5608_v2 }
 0xbd6   :  { %v5600_v0 = vpop.xlane.xlu1 %5599  ;;  %v5696_v1 = vmul.f32 %v15204_v61, %v5680_v60 }
 0xbd7   :  { %v11631_v30 = vpop.eup %11630  ;;  %v5661_v19 = vsub.f32 2.0, %v5645_v9  ;;  %11636 = vrcp.f32 %v5600_v0 }
 0xbd8   :  { %v5646_v36 = vmul.f32 %v11631_v30, %v5610_v40  ;;  %v5705_v32 = vpack.c.bf16 %v5696_v1, %v5695_v47 }
 0xbd9   :  { %v5602_v26 = vpop.xlane.xlu0 %5601  ;;  %v5677_v31 = vmul.f32 %v11629_v42, %v5661_v19 }
 0xbda   :  { %v15388_v18 = vpop.xlane.xlu1 %6020  ;;  %v5662_v29 = vsub.f32 2.0, %v5646_v36  ;;  %11638 = vrcp.f32 %v5602_v26  ;;  %10546 = vmatpush3.bf16.xpose.msra.mxu0 %v5705_v32 }
 0xbdb   :  { %10547 = vmatprep.subr.bf16.mxu0 %v17103_v38  ;;  %v5693_v51 = vmul.f32 %v15221_v52, %v5677_v31 }
 0xbdc   :  { %v11633_v2 = vpop.eup %11632  ;;  %v5678_v46 = vmul.f32 %v11631_v30, %v5662_v29 }
 0xbdd   :  { %v15391_v20 = vpop.xlane.xlu0 %6022  ;;  %v5643_v22 = vmul.f32 %v11633_v2, %v5604_v59 }
 0xbde   :  { %v5596_v61 = vpop.xlane.xlu1 %5595  ;;  %v5694_v40 = vmul.f32 %v15233_v12, %v5678_v46 }
 0xbdf   :  { %v11635_v11 = vpop.eup %11634  ;;  %v5659_v60 = vsub.f32 2.0, %v5643_v22  ;;  %11640 = vrcp.f32 %v5596_v61 }
 0xbe0   :  { %v5644_v9 = vmul.f32 %v11635_v11, %v5606_v58  ;;  %v5704_v47 = vpack.c.bf16 %v5694_v40, %v5693_v51 }
 0xbe1   :  { %v5598_v42 = vpop.xlane.xlu0 %5597  ;;  %v5675_v1 = vmul.f32 %v11633_v2, %v5659_v60 }
 0xbe2   :  { %v5660_v19 = vsub.f32 2.0, %v5644_v9  ;;  %11642 = vrcp.f32 %v5598_v42  ;;  %10548 = vmatpush3.bf16.xpose.msra.mxu0 %v5704_v47 }
 0xbe3   :  { %10549 = vmatprep.subr.bf16.mxu0 %v17103_v38  ;;  %v5691_v32 = vmul.f32 %v15251_v44, %v5675_v1 }
 0xbe4   :  { %v11637_v30 = vpop.eup %11636  ;;  %v5676_v36 = vmul.f32 %v11635_v11, %v5660_v19 }
 0xbe5   :  { %v5641_v59 = vmul.f32 %v11637_v30, %v5600_v0 }
 0xbe6   :  { %v5692_v52 = vmul.f32 %v15265_v6, %v5676_v36  ;;  %v17297_v36 = vld [vmem:[#allocation54_spill] sm:$0xff] }
 0xbe7   :  { %v11639_v12 = vpop.eup %11638  ;;  %v5657_v31 = vsub.f32 2.0, %v5641_v59  ;;  %v5541_v59 = vsub.f32 %v17297_v36, %v15050_v53 }
 0xbe8   :  { %v5642_v29 = vmul.f32 %v11639_v12, %v5602_v26  ;;  %v5703_v58 = vpack.c.bf16 %v5692_v52, %v5691_v32 }
 0xbe9   :  { %v15398_v46 = vpop.f32.mrf.mxu1  ;;  %v5673_v22 = vmul.f32 %v11637_v30, %v5657_v31  ;;  %v17298_v31 = vld [vmem:[#allocation60_spill] sm:$0xff] }
 0xbea   :  { %v5658_v2 = vsub.f32 2.0, %v5642_v29  ;;  %10550 = vmatpush3.bf16.xpose.msra.mxu0 %v5703_v58 }
 0xbeb   :  { %v15400_v51 = vpop.f32.mrf.mxu1  ;;  %10551 = vmatprep.subr.bf16.mxu0 %v17103_v38  ;;  %v5689_v6 = vmul.f32 %v15281_v34, %v5673_v22 }
 0xbec   :  { %v11641_v40 = vpop.eup %11640  ;;  %v5674_v11 = vmul.f32 %v11639_v12, %v5658_v2 }
 0xbed   :  { %v15403_v0 = vpop.f32.mrf.mxu1  ;;  %v5639_v44 = vmul.f32 %v11641_v40, %v5596_v61  ;;  %v5559_v61 = vmul.f32 1.442695, %v5541_v59 }
 0xbee   :  { %v5690_v60 = vmul.f32 %v15295_v13, %v5674_v11  ;;  %v17299_v11 = vld [vmem:[#allocation21_spill] sm:$0xff] }
 0xbef   :  { %v15407_v26 = vpop.f32.mrf.mxu1  ;;  %v11643_v9 = vpop.eup %11642  ;;  %v5655_v47 = vsub.f32 2.0, %v5639_v44  ;;  %11644 = vpow2.f32 %v5559_v61  ;;  %v5539_v44 = vsub.f32 %v17299_v11, %v15059_v55  ;;  %v6066_v55 = vsub.f32 %v15108_v3, %v15343_v27 }
 0xbf0   :  { %v5640_v1 = vmul.f32 %v11643_v9, %v5598_v42  ;;  %v5702_v30 = vpack.c.bf16 %v5690_v60, %v5689_v6  ;;  %v5542_v42 = vsub.f32 %v17298_v31, %v15055_v48 }
 0xbf1   :  { %v15409_v19 = vpop.f32.mrf.mxu1  ;;  %v5671_v32 = vmul.f32 %v11641_v40, %v5655_v47  ;;  %v6407_v47 = vld [vmem:[#allocation4 + $0x370] sm:$0xff]  ;;  %v6096_v31 = vmul.f32 1.442695, %v6066_v55 }
 0xbf2   :  { %v5656_v52 = vsub.f32 2.0, %v5640_v1  ;;  %10552 = vmatpush3.bf16.xpose.msra.mxu0 %v5702_v30  ;;  %v5561_v40 = vmul.f32 1.442695, %v5542_v42  ;;  %v6405_v42 = vld [vmem:[#allocation4 + $0x360] sm:$0xff] }
 0xbf3   :  { %v15413_v12 = vpop.f32.mrf.mxu1  ;;  %10553 = vmatprep.subr.bf16.mxu0 %v17103_v38  ;;  %v5687_v29 = vmul.f32 %v15309_v49, %v5671_v32  ;;  %v5555_v49 = vmul.f32 1.442695, %v5539_v44  ;;  %v6408_v32 = vld [vmem:[#allocation4 + $0x378] sm:$0xff]  ;;  %v6065_v44 = vsub.f32 %v15131_v17, %v15351_v62 }
 0xbf4   :  { %v5672_v34 = vmul.f32 %v11643_v9, %v5656_v52  ;;  %11646 = vpow2.f32 %v5561_v40 }
 0xbf5   :  { %v15416_v13 = vpop.f32.mrf.mxu1  ;;  %11648 = vpow2.f32 %v5555_v49 }
 0xbf6   :  { %v5688_v58 = vmul.f32 %v15323_v14, %v5672_v34  ;;  %v17300_v14 = vld [vmem:[#allocation46_spill] sm:$0xff] }
 0xbf7   :  { %v15422_v22 = vpop.f32.mrf.mxu1  ;;  %v5540_v60 = vsub.f32 %v17300_v14, %v15062_v24  ;;  %v6067_v24 = vsub.f32 %v15115_v56, %v15345_v50  ;;  %v6064_v56 = vsub.f32 %v15121_v43, %v15349_v5  ;;  %v6406_v50 = vld [vmem:[#allocation4 + $0x368] sm:$0xff]  ;;  %v15465_v14 = vld [vmem:[%s16940_s3] ss:$0 sm:$0xff] }
 0xbf8   :  { %v5701_v2 = vpack.c.bf16 %v5688_v58, %v5687_v29 }
 0xbf9   :  { %v15424_v53 = vpop.f32.mrf.mxu1  ;;  %v5557_v30 = vmul.f32 1.442695, %v5540_v60  ;;  %v6098_v27 = vmul.f32 1.442695, %v6067_v24  ;;  %v6092_v43 = vmul.f32 1.442695, %v6064_v56  ;;  %v6062_v24 = vsub.f32 %v15151_v28, %v15353_v54 }
 0xbfa   :  { %10554 = vmatpush3.bf16.xpose.msra.mxu0 %v5701_v2  ;;  %v11013_v56 = vld [vmem:[%s16939_s2 + $0x10] sm:$0xff]   ;;  %v6063_v54 = vsub.f32 %v15165_v21, %v15355_v4 }
 0xbfb   :  { %v15428_v6 = vpop.f32.mrf.mxu1  ;;  %10555 = vmatprep.subr.bf16.mxu0 %v17103_v38  ;;  %11650 = vpow2.f32 %v5557_v30 }
 0xbfc   :  { %v15446_v61 = vpop.eup %11644  ;;  %11652 = vpow2.f32 %v6096_v31 }
 0xbfd   :  { %v15431_v48 = vpop.f32.mrf.mxu1  ;;  %11654 = vpow2.f32 %v6098_v27 }
 0xbfe   :  { %11656 = vpow2.f32 %v6092_v43 }
 0xbff   :  { %v15435_v9 = vpop.f32.mrf.mxu1 }
 0xc01   :  { %v10657_v1 = vpop.f32.mrf.mxu1  ;;  %v15452_v2 = vpop.eup %11646 }
 0xc02   :  { %v15437_v36 = vadd.f32 %v10657_v1, %v6407_v47  ;;  %v15467_v60 = vpop.eup %11648  ;;  %v6403_v1 = vld [vmem:[#allocation4 + $0x350] sm:$0xff] }
 0xc03   :  { %v6518_v59 = vpop.f32.mrf.mxu1  ;;  %v15480_v31 = vadd.f32 %v15424_v53, %v6403_v1 }
 0xc04   :  { %6561 = vmax.xlane.f32.xlu1 %v15437_v36  ;;  %v15450_v58 = vadd.f32 %v6518_v59, %v6405_v42  ;;  %v6094_v59 = vmul.f32 1.442695, %v6065_v44  ;;  %v6404_v42 = vld [vmem:[#allocation4 + $0x358] sm:$0xff] }
 0xc05   :  { %v10658_v52 = vpop.f32.mrf.mxu1  ;;  %v15494_v53 = vadd.f32 %v15431_v48, %v6404_v42  ;;  %v6090_v48 = vmul.f32 1.442695, %v6063_v54 }
 0xc06   :  { %v15444_v34 = vadd.f32 %v10658_v52, %v6408_v32  ;;  %11658 = vpow2.f32 %v6094_v59  ;;  %v6060_v59 = vsub.f32 %v15183_v39, %v15357_v16  ;;  %v6061_v39 = vsub.f32 %v15194_v45, %v15359_v25 }
 0xc07   :  { %v6521_v29 = vpop.f32.mrf.mxu1 }
 0xc08   :  { %6563 = vmax.xlane.f32.xlu0 %v15444_v34  ;;  %5591 = vadd.xlane.f32.xlu1 %v15446_v61  ;;  %v15460_v49 = vadd.f32 %v6521_v29, %v6406_v50  ;;  %v15475_v52 = vpop.eup %11650  ;;  %v17302_v50 = vld [vmem:[#allocation27_spill] sm:$0xff]  ;;  %v6086_v25 = vmul.f32 1.442695, %v6061_v39 }
 0xc09   :  { %v10685_v3 = vpop.f32.mrf.mxu1 }
 0xc0a   :  { %v6920_v17 = vadd.f32 %v10685_v3, %v15465_v14  ;;  %v17301_v3 = vld [vmem:[#allocation23_spill] sm:$0xff] }
 0xc0b   :  { %v6911_v40 = vpop.f32.mrf.mxu1 }
 0xc0c   :  { %5593 = vadd.xlane.f32.xlu0 %v15452_v2  ;;  %6557 = vmax.xlane.f32.xlu1 %v15450_v58  ;;  %v6912_v30 = vadd.f32 %v15465_v14, %v6911_v40  ;;  %v299_v40 = vadd.f32 %v17302_v50, %v17301_v3  ;;  %v6399_v50 = vld [vmem:[#allocation4 + $0x330] sm:$0xff] }
 0xc0d   :  { %v10686_v11 = vpop.f32.mrf.mxu1 }
 0xc0e   :  { %v6923_v5 = vadd.f32 %v10686_v11, %v15465_v14  ;;  %v6088_v11 = vmul.f32 1.442695, %v6062_v24  ;;  %v15503_v21 = vpack.c.bf16 %v299_v40, %v299_v40  ;;  %v6402_v24 = vld [vmem:[#allocation4 + $0x348] sm:$0xff] }
 0xc0f   :  { %v6914_v47 = vpop.f32.mrf.mxu1  ;;  %v15523_v16 = vadd.f32 %v15435_v9, %v6402_v24 }
 0xc10   :  { %v6915_v55 = vadd.f32 %v15465_v14, %v6914_v47  ;;  %6559 = vmax.xlane.f32.xlu0 %v15460_v49  ;;  %5587 = vadd.xlane.f32.xlu1 %v15467_v60  ;;  %v6975_v29 = vpack.c.bf16 %v6923_v5, %v6920_v17  ;;  %v15498_v5 = vpop.eup %11652  ;;  %v6401_v47 = vld [vmem:[#allocation4 + $0x340] sm:$0xff]  ;;  %11660 = vpow2.f32 %v6088_v11 }
 0xc11   :  { %v10689_v62 = vpop.f32.mrf.mxu1  ;;  %v15507_v17 = vpop.eup %11654  ;;  %11662 = vpow2.f32 %v6090_v48 }
 0xc12   :  { %v6974_v32 = vpack.c.bf16 %v6915_v55, %v6912_v30  ;;  %v6936_v4 = vadd.f32 %v10689_v62, %v15465_v14  ;;  %v15526_v3 = vpop.eup %11656 }
 0xc13   :  { %v6927_v27 = vpop.f32.mrf.mxu1  ;;  %v15533_v11 = vpop.eup %11658 }
 0xc14   :  { %10701 = vmatprep.mubr.msk.bf16.mxu1 %vm591_vm2, %v6974_v32  ;;  %5589 = vadd.xlane.f32.xlu0 %v15475_v52  ;;  %v6928_v1 = vadd.f32 %v15465_v14, %v6927_v27  ;;  %v15512_v32 = vadd.f32 %v15428_v6, %v6401_v47  ;;  %v6084_v6 = vmul.f32 1.442695, %v6060_v59  ;;  %v6400_v47 = vld [vmem:[#allocation4 + $0x338] sm:$0xff]  ;;  %v6397_v59 = vld [vmem:[#allocation4 + $0x320] sm:$0xff] }
 0xc15   :  { %6553 = vmax.xlane.f32.xlu1 %v15480_v31  ;;  %v10690_v28 = vpop.f32.mrf.mxu1  ;;  %10702 = vmatmul.mubr.msk.bf16.vlgmr.msra.gmra.mxu1 %vm591_vm2, %v6975_v29  ;;  %v15562_v39 = vadd.f32 %v15413_v12, %v6397_v59 }
 0xc16   :  { %10738 = vmatpush3.bf16.msra.mxu1 %v15340_v41  ;;  %v6939_v44 = vadd.f32 %v10690_v28, %v15465_v14  ;;  %11664 = vpow2.f32 %v6084_v6  ;;  %v6398_v6 = vld [vmem:[#allocation4 + $0x328] sm:$0xff] }
 0xc17   :  { %v6930_v43 = vpop.f32.mrf.mxu1  ;;  %10739 = vmatprep.subr.bf16.mxu1 %v11013_v56  ;;  %11666 = vpow2.f32 %v6086_v25  ;;  %v17307_v25 = vld [vmem:[#allocation16_spill] sm:$0xff] }
 0xc18   :  { %v6931_v30 = vadd.f32 %v15465_v14, %v6930_v43  ;;  %6555 = vmax.xlane.f32.xlu0 %v15494_v53  ;;  %v6977_v42 = vpack.c.bf16 %v6939_v44, %v6936_v4  ;;  %v6058_v44 = vsub.f32 %v15209_v15, %v15363_v35  ;;  %v15538_v43 = vadd.f32 %v15409_v19, %v6399_v50  ;;  %v6395_v50 = vld [vmem:[#allocation4 + $0x310] sm:$0xff] }
 0xc19   :  { %6128 = vadd.xlane.f32.xlu1 %v15498_v5  ;;  %v10693_v41 = vpop.f32.mrf.mxu1  ;;  %v15547_v15 = vadd.f32 %v15416_v13, %v6400_v47 }
 0xc1a   :  { %v6976_v55 = vpack.c.bf16 %v6931_v30, %v6928_v1  ;;  %10740 = vmatpush3.bf16.msra.mxu1 %v11013_v56  ;;  %v6952_v54 = vadd.f32 %v10693_v41, %v15465_v14  ;;  %v6059_v41 = vsub.f32 %v15218_v63, %v15366_v23  ;;  %v6080_v35 = vmul.f32 1.442695, %v6058_v44 }
 0xc1b   :  { %10924 = vmatprep.subr.msk.bf16.mxu1 %vm616_vm1, %v15503_v21  ;;  %v6943_v62 = vpop.f32.mrf.mxu1 }
 0xc1c   :  { %10705 = vmatprep.mubr.msk.bf16.mxu1 %vm591_vm2, %v6976_v55  ;;  %6130 = vadd.xlane.f32.xlu0 %v15507_v17  ;;  %v6944_v40 = vadd.f32 %v15465_v14, %v6943_v62  ;;  %v6082_v63 = vmul.f32 1.442695, %v6059_v41  ;;  %11668 = vpow2.f32 %v6080_v35  ;;  %v17312_v41 = vld [vmem:[#allocation26_spill] sm:$0xff]  ;;  %v17313_v35 = vld [vmem:[#allocation24_spill] sm:$0xff] }
 0xc1d   :  { %6549 = vmax.xlane.f32.xlu1 %v15512_v32  ;;  %v10694_v29 = vpop.f32.mrf.mxu1  ;;  %10706 = vmatmul.mubr.msk.bf16.gmra.mxu1 %vm591_vm2, %v6977_v42  ;;  %v15550_v55 = vpop.eup %11660 }
 0xc1e   :  { %v6955_v27 = vadd.f32 %v10694_v29, %v15465_v14  ;;  %v15557_v13 = vpop.eup %11662  ;;  %v6056_v29 = vsub.f32 %v15238_v33, %v15370_v37  ;;  %11670 = vpow2.f32 %v6082_v63  ;;  %v17303_v33 = vld [vmem:[#allocation28_spill] sm:$0xff] }
 0xc1f   :  { %v6946_v56 = vpop.f32.mrf.mxu1 }
 0xc20   :  { %v6947_v28 = vadd.f32 %v15465_v14, %v6946_v56  ;;  %6551 = vmax.xlane.f32.xlu0 %v15523_v16  ;;  %v6979_v1 = vpack.c.bf16 %v6955_v27, %v6952_v54  ;;  %v15571_v56 = vadd.f32 %v15422_v22, %v6398_v6  ;;  %v6076_v37 = vmul.f32 1.442695, %v6056_v29  ;;  %v17305_v22 = vld [vmem:[#allocation20_spill] sm:$0xff] }
 0xc21   :  { %6124 = vadd.xlane.f32.xlu1 %v15526_v3  ;;  %v10697_v45 = vpop.f32.mrf.mxu1  ;;  %v7540_v54 = vsel %vm616_vm1, %v15503_v21, 0  ;;  %v6394_v21 = vld [vmem:[#allocation4 + $0x308] sm:$0xff] }
 0xc22   :  { %v6978_v9 = vpack.c.bf16 %v6947_v28, %v6944_v40  ;;  %v6968_v62 = vadd.f32 %v10697_v45, %v15465_v14  ;;  %11672 = vpow2.f32 %v6076_v37 }
 0xc23   :  { %v6959_v30 = vpop.f32.mrf.mxu1  ;;  %v15575_v12 = vpop.eup %11664 }
 0xc24   :  { %10709 = vmatprep.mubr.msk.bf16.mxu1 %vm591_vm2, %v6978_v9  ;;  %6126 = vadd.xlane.f32.xlu0 %v15533_v11  ;;  %v6960_v24 = vadd.f32 %v15465_v14, %v6959_v30  ;;  %v15579_v28 = vpop.eup %11666  ;;  %v6393_v9 = vld [vmem:[#allocation4 + $0x300] sm:$0xff]  ;;  %v17311_v30 = vld [vmem:[#allocation55_spill] sm:$0xff] }
 0xc25   :  { %6545 = vmax.xlane.f32.xlu1 %v15538_v43  ;;  %v10698_v4 = vpop.f32.mrf.mxu1  ;;  %10710 = vmatmul.mubr.msk.bf16.gmra.mxu1 %vm591_vm2, %v6979_v1  ;;  %v15602_v47 = vadd.f32 %v15400_v51, %v6393_v9  ;;  %v15609_v1 = vadd.f32 %v15407_v26, %v6394_v21  ;;  %v17314_v26 = vld [vmem:[#allocation15_spill] sm:$0xff] }
 0xc26   :  { %v6971_v19 = vadd.f32 %v10698_v4, %v15465_v14 }
 0xc27   :  { %v6962_v48 = vpop.f32.mrf.mxu1  ;;  %17308 = vst [vmem:[#allocation22_spill] sm:$0xff] %v15602_v47  ;;  %17310 = vst [vmem:[#allocation14_spill] sm:$0xff] %v15609_v1 }
 0xc28   :  { %v6963_v42 = vadd.f32 %v15465_v14, %v6962_v48  ;;  %6547 = vmax.xlane.f32.xlu0 %v15547_v15  ;;  %v6981_v27 = vpack.c.bf16 %v6971_v19, %v6968_v62  ;;  %v6057_v14 = vsub.f32 %v15247_v7, %v15375_v8  ;;  %v15582_v7 = vadd.f32 %v15398_v46, %v6395_v50  ;;  %v6396_v8 = vld [vmem:[#allocation4 + $0x318] sm:$0xff]  ;;  %v15629_v19 = vld [vmem:[%s16939_s2 + $0x28] sm:$0xff]  }
 0xc29   :  { %6120 = vadd.xlane.f32.xlu1 %v15550_v55  ;;  %v15591_v45 = vadd.f32 %v15403_v0, %v6396_v8  ;;  %v15595_v46 = vpop.eup %11668  ;;  %v17309_v0 = vld [vmem:[#allocation30_spill] sm:$0xff] }
 0xc2a   :  { %v6980_v23 = vpack.c.bf16 %v6963_v42, %v6960_v24  ;;  %v6078_v40 = vmul.f32 1.442695, %v6057_v14  ;;  %17304 = vst [vmem:[#allocation57_spill] sm:$0xff] %v15582_v7 }
 0xc2b   :  { %17306 = vst [vmem:[#allocation58_spill] sm:$0xff] %v15591_v45  ;;  %v15599_v44 = vpop.eup %11670 }
 0xc2c   :  { %10713 = vmatprep.mubr.msk.bf16.mxu1 %vm591_vm2, %v6980_v23  ;;  %6122 = vadd.xlane.f32.xlu0 %v15557_v13  ;;  %11674 = vpow2.f32 %v6078_v40 }
 0xc2d   :  { %6541 = vmax.xlane.f32.xlu1 %v15562_v39  ;;  %10714 = vmatmul.mubr.msk.bf16.gmra.mxu1 %vm591_vm2, %v6981_v27 }
 0xc2e   :  { %10741 = vmatprep.mubr.msk.bf16.mxu1 %vm172_vm0, %v17303_v33 }
 0xc2f   :  { %v15613_v4 = vpop.eup %11672 }
 0xc30   :  { %6543 = vmax.xlane.f32.xlu0 %v15571_v56 }
 0xc31   :  { %6116 = vadd.xlane.f32.xlu1 %v15575_v12 }
 0xc34   :  { %6118 = vadd.xlane.f32.xlu0 %v15579_v28 }
 0xc35   :  { %6537 = vmax.xlane.f32.xlu1 %v15582_v7  ;;  %10742 = vmatmul.mubr.msk.bf16.vlgmr.msra.gmra.mxu1 %vm172_vm0, %v17305_v22 }
 0xc36   :  { %10758 = vmatpush3.bf16.msra.mxu1 %v7540_v54  ;;  %10745 = vmatprep.mubr.msk.bf16.mxu1 %vm172_vm0, %v17307_v25 }
 0xc37   :  { %10795 = vmatprep.subr.bf16.mxu1 %v15629_v19 }
 0xc38   :  { %6539 = vmax.xlane.f32.xlu0 %v15591_v45 }
 0xc39   :  { %6112 = vadd.xlane.f32.xlu1 %v15595_v46  ;;  %v15617_v51 = vpop.eup %11674 }
 0xc3c   :  { %6114 = vadd.xlane.f32.xlu0 %v15599_v44 }
 0xc3d   :  { %6533 = vmax.xlane.f32.xlu1 %v15602_v47  ;;  %10746 = vmatmul.mubr.msk.bf16.gmra.mxu1 %vm172_vm0, %v17309_v0 }
 0xc3e   :  { %10749 = vmatprep.mubr.msk.bf16.mxu1 %vm172_vm0, %v17311_v30 }
 0xc40   :  { %6535 = vmax.xlane.f32.xlu0 %v15609_v1 }
 0xc41   :  { %6108 = vadd.xlane.f32.xlu1 %v15613_v4 }
 0xc44   :  { %6110 = vadd.xlane.f32.xlu0 %v15617_v51 }
 0xc45   :  { %10750 = vmatmul.mubr.msk.bf16.gmra.mxu1 %vm172_vm0, %v17312_v41 }
 0xc46   :  { %10753 = vmatprep.mubr.msk.bf16.mxu1 %vm172_vm0, %v17313_v35 }
 0xc4d   :  { %10754 = vmatmul.mubr.msk.bf16.gmra.mxu1 %vm172_vm0, %v17314_v26 }
 0xc8d   :  { %v15632_v48 = vpop.xlane.xlu1 %6561 }
 0xc91   :  { %v15634_v59 = vpop.xlane.xlu0 %6563  ;;  %v5592_v24 = vpop.xlane.xlu1 %5591 }
 0xc92   :  { %v15636_v42 = vpop.f32.mrf.mxu0  ;;  %11676 = vrcp.f32 %v5592_v24 }
 0xc93   :  { %17315 = vst [vmem:[#allocation56_spill] sm:$0xff] %v15636_v42 }
 0xc94   :  { %v10503_v62 = vpop.f32.mrf.mxu0 }
 0xc95   :  { %v5594_v63 = vpop.xlane.xlu0 %5593  ;;  %v15638_v23 = vpop.xlane.xlu1 %6557 }
 0xc96   :  { %v5231_v29 = vpop.f32.mrf.mxu0  ;;  %11678 = vrcp.f32 %v5594_v63 }
 0xc98   :  { %v10504_v6 = vpop.f32.mrf.mxu0 }
 0xc99   :  { %v15640_v27 = vpop.xlane.xlu0 %6559  ;;  %v5588_v14 = vpop.xlane.xlu1 %5587 }
 0xc9a   :  { %11680 = vrcp.f32 %v5588_v14 }
 0xc9d   :  { %v5590_v33 = vpop.xlane.xlu0 %5589 }
 0xc9e   :  { %v15642_v37 = vpop.xlane.xlu1 %6553  ;;  %11682 = vrcp.f32 %v5590_v33 }
 0xc9f   :  { %v11677_v50 = vpop.eup %11676 }
 0xca0   :  { %v5637_v40 = vmul.f32 %v11677_v50, %v5592_v24 }
 0xca1   :  { %v15644_v8 = vpop.xlane.xlu0 %6555 }
 0xca2   :  { %v6129_v22 = vpop.xlane.xlu1 %6128  ;;  %v5653_v54 = vsub.f32 2.0, %v5637_v40 }
 0xca3   :  { %v11679_v25 = vpop.eup %11678  ;;  %11684 = vrcp.f32 %v6129_v22 }
 0xca4   :  { %v5638_v9 = vmul.f32 %v11679_v25, %v5594_v63  ;;  %v5669_v30 = vmul.f32 %v11677_v50, %v5653_v54 }
 0xca5   :  { %v6131_v21 = vpop.xlane.xlu0 %6130 }
 0xca6   :  { %v15646_v0 = vpop.xlane.xlu1 %6549  ;;  %v5654_v41 = vsub.f32 2.0, %v5638_v9  ;;  %11686 = vrcp.f32 %v6131_v21  ;;  %v5685_v24 = vmul.f32 %v15446_v61, %v5669_v30 }
 0xca7   :  { %v11681_v35 = vpop.eup %11680 }
 0xca8   :  { %v5670_v26 = vmul.f32 %v11679_v25, %v5654_v41  ;;  %v5635_v62 = vmul.f32 %v11681_v35, %v5588_v14 }
 0xca9   :  { %v15648_v29 = vpop.xlane.xlu0 %6551 }
 0xcaa   :  { %v6125_v6 = vpop.xlane.xlu1 %6124  ;;  %v5686_v42 = vmul.f32 %v15452_v2, %v5670_v26  ;;  %v5651_v40 = vsub.f32 2.0, %v5635_v62 }
 0xcab   :  { %v11683_v1 = vpop.eup %11682  ;;  %11688 = vrcp.f32 %v6125_v6 }
 0xcac   :  { %v5636_v63 = vmul.f32 %v11683_v1, %v5590_v33  ;;  %v5700_v45 = vpack.c.bf16 %v5686_v42, %v5685_v24  ;;  %v5667_v50 = vmul.f32 %v11681_v35, %v5651_v40 }
 0xcad   :  { %v6127_v47 = vpop.xlane.xlu0 %6126 }
 0xcae   :  { %v15652_v7 = vpop.xlane.xlu1 %6545  ;;  %v5652_v54 = vsub.f32 2.0, %v5636_v63  ;;  %11690 = vrcp.f32 %v6127_v47  ;;  %10556 = vmatpush3.bf16.xpose.msra.mxu0 %v5700_v45  ;;  %v5683_v30 = vmul.f32 %v15467_v60, %v5667_v50  ;;  %v17317_v63 = vld [vmem:[#allocation34_spill] sm:$0xff] }
 0xcaf   :  { %10557 = vmatprep.subr.bf16.mxu0 %v17103_v38 }
 0xcb0   :  { %v11685_v14 = vpop.eup %11684  ;;  %v5668_v25 = vmul.f32 %v11683_v1, %v5652_v54  ;;  %v17316_v1 = vld [vmem:[#allocation43_spill] sm:$0xff] }
 0xcb1   :  { %v15655_v9 = vpop.xlane.xlu0 %6547  ;;  %v6162_v61 = vmul.f32 %v11685_v14, %v6129_v22  ;;  %v317_v22 = vadd.f32 %v17317_v63, %v17316_v1 }
 0xcb2   :  { %v6121_v2 = vpop.xlane.xlu1 %6120  ;;  %v5684_v33 = vmul.f32 %v15475_v52, %v5668_v25 }
 0xcb3   :  { %v11687_v41 = vpop.eup %11686  ;;  %v6178_v42 = vsub.f32 2.0, %v6162_v61  ;;  %11692 = vrcp.f32 %v6121_v2 }
 0xcb4   :  { %v6163_v26 = vmul.f32 %v11687_v41, %v6131_v21  ;;  %v5699_v62 = vpack.c.bf16 %v5684_v33, %v5683_v30  ;;  %v5366_v33 = vpack.c.bf16 %v317_v22, %v317_v22 }
 0xcb5   :  { %v6123_v35 = vpop.xlane.xlu0 %6122  ;;  %v6194_v45 = vmul.f32 %v11685_v14, %v6178_v42 }
 0xcb6   :  { %v15659_v24 = vpop.xlane.xlu1 %6541  ;;  %v6179_v40 = vsub.f32 2.0, %v6163_v26  ;;  %11694 = vrcp.f32 %v6123_v35  ;;  %10558 = vmatpush3.bf16.xpose.msra.mxu0 %v5699_v62 }
 0xcb7   :  { %10601 = vmatprep.subr.bf16.mxu0 %v17103_v38  ;;  %v6210_v21 = vmul.f32 %v15498_v5, %v6194_v45 }
 0xcb8   :  { %v11689_v60 = vpop.eup %11688  ;;  %v6195_v50 = vmul.f32 %v11687_v41, %v6179_v40 }
 0xcb9   :  { %v15664_v52 = vpop.xlane.xlu0 %6543  ;;  %v6160_v54 = vmul.f32 %v11689_v60, %v6125_v6 }
 0xcba   :  { %v6117_v25 = vpop.xlane.xlu1 %6116  ;;  %v6211_v61 = vmul.f32 %v15507_v17, %v6195_v50 }
 0xcbb   :  { %v11691_v30 = vpop.eup %11690  ;;  %v6176_v14 = vsub.f32 2.0, %v6160_v54  ;;  %11696 = vrcp.f32 %v6117_v25 }
 0xcbc   :  { %v6161_v42 = vmul.f32 %v11691_v30, %v6127_v47  ;;  %v6219_v62 = vpack.c.bf16 %v6211_v61, %v6210_v21 }
 0xcbd   :  { %v6119_v26 = vpop.xlane.xlu0 %6118  ;;  %10560 = vmatmul.mubr.bf16.vlgmr.msra.gmra.mxu0 %v5366_v33  ;;  %v6192_v1 = vmul.f32 %v11689_v60, %v6176_v14 }
 0xcbe   :  { %v15668_v63 = vpop.xlane.xlu1 %6537  ;;  %v6177_v41 = vsub.f32 2.0, %v6161_v42  ;;  %11698 = vrcp.f32 %v6119_v26  ;;  %10602 = vmatpush3.bf16.xpose.msra.mxu0 %v6219_v62  ;;  %10617 = vmatprep.mubr.msk.bf16.mxu0 %vm12126_vm3, %v17103_v38 }
 0xcbf   :  { %10603 = vmatprep.subr.bf16.mxu0 %v17103_v38  ;;  %v6208_v40 = vmul.f32 %v15526_v3, %v6192_v1 }
 0xcc0   :  { %v11693_v5 = vpop.eup %11692  ;;  %v6193_v17 = vmul.f32 %v11691_v30, %v6177_v41 }
 0xcc1   :  { %v15673_v6 = vpop.xlane.xlu0 %6539  ;;  %v6158_v45 = vmul.f32 %v11693_v5, %v6121_v2 }
 0xcc2   :  { %v6113_v47 = vpop.xlane.xlu1 %6112  ;;  %v6209_v22 = vmul.f32 %v15533_v11, %v6193_v17 }
 0xcc3   :  { %v11695_v50 = vpop.eup %11694  ;;  %v6174_v60 = vsub.f32 2.0, %v6158_v45  ;;  %11700 = vrcp.f32 %v6113_v47 }
 0xcc4   :  { %v6159_v54 = vmul.f32 %v11695_v50, %v6123_v35  ;;  %v6218_v61 = vpack.c.bf16 %v6209_v22, %v6208_v40 }
 0xcc5   :  { %v6115_v21 = vpop.xlane.xlu0 %6114  ;;  %v6190_v33 = vmul.f32 %v11693_v5, %v6174_v60 }
 0xcc6   :  { %v15677_v14 = vpop.xlane.xlu1 %6533  ;;  %v6175_v42 = vsub.f32 2.0, %v6159_v54  ;;  %11702 = vrcp.f32 %v6115_v21  ;;  %10604 = vmatpush3.bf16.xpose.msra.mxu0 %v6218_v61 }
 0xcc7   :  { %10605 = vmatprep.subr.bf16.mxu0 %v17103_v38  ;;  %v6206_v1 = vmul.f32 %v15550_v55, %v6190_v33 }
 0xcc8   :  { %v11697_v2 = vpop.eup %11696  ;;  %v6191_v30 = vmul.f32 %v11695_v50, %v6175_v42 }
 0xcc9   :  { %v15680_v62 = vpop.xlane.xlu0 %6535  ;;  %v6156_v3 = vmul.f32 %v11697_v2, %v6117_v25 }
 0xcca   :  { %v6109_v11 = vpop.xlane.xlu1 %6108  ;;  %v6207_v35 = vmul.f32 %v15557_v13, %v6191_v30 }
 0xccb   :  { %v11699_v41 = vpop.eup %11698  ;;  %v6172_v17 = vsub.f32 2.0, %v6156_v3  ;;  %11704 = vrcp.f32 %v6109_v11 }
 0xccc   :  { %v6157_v45 = vmul.f32 %v11699_v41, %v6119_v26  ;;  %v6217_v40 = vpack.c.bf16 %v6207_v35, %v6206_v1 }
 0xccd   :  { %v6111_v5 = vpop.xlane.xlu0 %6110  ;;  %v6188_v22 = vmul.f32 %v11697_v2, %v6172_v17 }
 0xcce   :  { %v6173_v60 = vsub.f32 2.0, %v6157_v45  ;;  %11706 = vrcp.f32 %v6111_v5  ;;  %10606 = vmatpush3.bf16.xpose.msra.mxu0 %v6217_v40 }
 0xccf   :  { %10607 = vmatprep.subr.bf16.mxu0 %v17103_v38  ;;  %v6204_v61 = vmul.f32 %v15575_v12, %v6188_v22 }
 0xcd0   :  { %v11701_v50 = vpop.eup %11700  ;;  %v6189_v54 = vmul.f32 %v11699_v41, %v6173_v60 }
 0xcd1   :  { %v6154_v25 = vmul.f32 %v11701_v50, %v6113_v47 }
 0xcd2   :  { %v6205_v55 = vmul.f32 %v15579_v28, %v6189_v54  ;;  %v17318_v54 = vld [vmem:[#allocation50_spill] sm:$0xff] }
 0xcd3   :  { %v11703_v13 = vpop.eup %11702  ;;  %v6170_v33 = vsub.f32 2.0, %v6154_v25  ;;  %v6054_v25 = vsub.f32 %v17318_v54, %v15379_v10 }
 0xcd4   :  { %v6155_v42 = vmul.f32 %v11703_v13, %v6115_v21  ;;  %v6216_v26 = vpack.c.bf16 %v6205_v55, %v6204_v61 }
 0xcd5   :  { %v15687_v30 = vpop.f32.mrf.mxu1  ;;  %v6186_v3 = vmul.f32 %v11701_v50, %v6170_v33  ;;  %v17319_v33 = vld [vmem:[#allocation13_spill] sm:$0xff] }
 0xcd6   :  { %v6171_v2 = vsub.f32 2.0, %v6155_v42  ;;  %10608 = vmatpush3.bf16.xpose.msra.mxu0 %v6216_v26 }
 0xcd7   :  { %v15689_v1 = vpop.f32.mrf.mxu1  ;;  %10609 = vmatprep.subr.bf16.mxu0 %v17103_v38  ;;  %v6202_v28 = vmul.f32 %v15595_v46, %v6186_v3 }
 0xcd8   :  { %v11705_v35 = vpop.eup %11704  ;;  %v6187_v41 = vmul.f32 %v11703_v13, %v6171_v2 }
 0xcd9   :  { %v15692_v47 = vpop.f32.mrf.mxu1  ;;  %v6152_v12 = vmul.f32 %v11705_v35, %v6109_v11  ;;  %v6072_v11 = vmul.f32 1.442695, %v6054_v25 }
 0xcda   :  { %v6203_v17 = vmul.f32 %v15599_v44, %v6187_v41  ;;  %v17320_v41 = vld [vmem:[#allocation48_spill] sm:$0xff] }
 0xcdb   :  { %v15696_v21 = vpop.f32.mrf.mxu1  ;;  %v11707_v45 = vpop.eup %11706  ;;  %v6168_v40 = vsub.f32 2.0, %v6152_v12  ;;  %11708 = vpow2.f32 %v6072_v11  ;;  %v6052_v12 = vsub.f32 %v17320_v41, %v15388_v18  ;;  %v6579_v18 = vsub.f32 %v15437_v36, %v15632_v48 }
 0xcdc   :  { %v6153_v22 = vmul.f32 %v11707_v45, %v6111_v5  ;;  %v6215_v50 = vpack.c.bf16 %v6203_v17, %v6202_v28  ;;  %v6055_v5 = vsub.f32 %v17319_v33, %v15384_v57 }
 0xcdd   :  { %v15698_v60 = vpop.f32.mrf.mxu1  ;;  %v6184_v61 = vmul.f32 %v11705_v35, %v6168_v40  ;;  %v7000_v40 = vld [vmem:[#allocation4 + $0xf0] sm:$0xff]  ;;  %v6609_v33 = vmul.f32 1.442695, %v6579_v18 }
 0xcde   :  { %v6169_v55 = vsub.f32 2.0, %v6153_v22  ;;  %10610 = vmatpush3.bf16.xpose.msra.mxu0 %v6215_v50  ;;  %v6074_v35 = vmul.f32 1.442695, %v6055_v5  ;;  %v6998_v5 = vld [vmem:[#allocation4 + $0xe0] sm:$0xff] }
 0xcdf   :  { %v15702_v13 = vpop.f32.mrf.mxu1  ;;  %10611 = vmatprep.subr.bf16.mxu0 %v17103_v38  ;;  %v6200_v42 = vmul.f32 %v15613_v4, %v6184_v61  ;;  %v6068_v4 = vmul.f32 1.442695, %v6052_v12  ;;  %v7001_v61 = vld [vmem:[#allocation4 + $0xf8] sm:$0xff]  ;;  %v6578_v12 = vsub.f32 %v15460_v49, %v15640_v27 }
 0xce0   :  { %v6185_v46 = vmul.f32 %v11707_v45, %v6169_v55  ;;  %11710 = vpow2.f32 %v6074_v35 }
 0xce1   :  { %v15705_v44 = vpop.f32.mrf.mxu1  ;;  %11712 = vpow2.f32 %v6068_v4 }
 0xce2   :  { %v6201_v26 = vmul.f32 %v15617_v51, %v6185_v46  ;;  %v17321_v51 = vld [vmem:[#allocation49_spill] sm:$0xff] }
 0xce3   :  { %v15711_v3 = vpop.f32.mrf.mxu1  ;;  %v6053_v17 = vsub.f32 %v17321_v51, %v15391_v20  ;;  %v6580_v20 = vsub.f32 %v15444_v34, %v15634_v59  ;;  %v6577_v34 = vsub.f32 %v15450_v58, %v15638_v23  ;;  %v6999_v59 = vld [vmem:[#allocation4 + $0xe8] sm:$0xff]  ;;  %v15754_v51 = vld [vmem:[%s16940_s3 + $0x1] ss:$0 sm:$0xff] }
 0xce4   :  { %v6214_v2 = vpack.c.bf16 %v6201_v26, %v6200_v42 }
 0xce5   :  { %v15713_v10 = vpop.f32.mrf.mxu1  ;;  %v6070_v50 = vmul.f32 1.442695, %v6053_v17  ;;  %v6611_v48 = vmul.f32 1.442695, %v6580_v20  ;;  %v6605_v58 = vmul.f32 1.442695, %v6577_v34  ;;  %v6575_v20 = vsub.f32 %v15480_v31, %v15642_v37 }
 0xce6   :  { %10612 = vmatpush3.bf16.xpose.msra.mxu0 %v6214_v2  ;;  %v11015_v34 = vld [vmem:[%s16939_s2 + $0x20] sm:$0xff]   ;;  %v6576_v37 = vsub.f32 %v15494_v53, %v15644_v8 }
 0xce7   :  { %v15717_v28 = vpop.f32.mrf.mxu1  ;;  %10613 = vmatprep.subr.bf16.mxu0 %v17103_v38  ;;  %11714 = vpow2.f32 %v6070_v50 }
 0xce8   :  { %v15735_v11 = vpop.eup %11708  ;;  %11716 = vpow2.f32 %v6609_v33 }
 0xce9   :  { %v15720_v57 = vpop.f32.mrf.mxu1  ;;  %11718 = vpow2.f32 %v6611_v48 }
 0xcea   :  { %11720 = vpow2.f32 %v6605_v58 }
 0xceb   :  { %v15724_v45 = vpop.f32.mrf.mxu1 }
 0xced   :  { %v10715_v22 = vpop.f32.mrf.mxu1  ;;  %v15741_v2 = vpop.eup %11710 }
 0xcee   :  { %v15726_v54 = vadd.f32 %v10715_v22, %v7000_v40  ;;  %v15756_v17 = vpop.eup %11712  ;;  %v6996_v22 = vld [vmem:[#allocation4 + $0xd0] sm:$0xff] }
 0xcef   :  { %v7111_v25 = vpop.f32.mrf.mxu1  ;;  %v15769_v33 = vadd.f32 %v15713_v10, %v6996_v22 }
 0xcf0   :  { %7154 = vmax.xlane.f32.xlu1 %v15726_v54  ;;  %v15739_v26 = vadd.f32 %v7111_v25, %v6998_v5  ;;  %v6607_v25 = vmul.f32 1.442695, %v6578_v12  ;;  %v6997_v5 = vld [vmem:[#allocation4 + $0xd8] sm:$0xff] }
 0xcf1   :  { %v10716_v55 = vpop.f32.mrf.mxu1  ;;  %v15783_v10 = vadd.f32 %v15720_v57, %v6997_v5  ;;  %v6603_v57 = vmul.f32 1.442695, %v6576_v37 }
 0xcf2   :  { %v15733_v46 = vadd.f32 %v10716_v55, %v7001_v61  ;;  %11722 = vpow2.f32 %v6607_v25  ;;  %v6573_v25 = vsub.f32 %v15512_v32, %v15646_v0  ;;  %v6574_v32 = vsub.f32 %v15523_v16, %v15648_v29 }
 0xcf3   :  { %v7114_v42 = vpop.f32.mrf.mxu1 }
 0xcf4   :  { %7156 = vmax.xlane.f32.xlu0 %v15733_v46  ;;  %6104 = vadd.xlane.f32.xlu1 %v15735_v11  ;;  %v15749_v4 = vadd.f32 %v7114_v42, %v6999_v59  ;;  %v15764_v55 = vpop.eup %11714  ;;  %v17323_v59 = vld [vmem:[#allocation29_spill] sm:$0xff]  ;;  %v6599_v29 = vmul.f32 1.442695, %v6574_v32 }
 0xcf5   :  { %v10743_v36 = vpop.f32.mrf.mxu1 }
 0xcf6   :  { %v7433_v49 = vadd.f32 %v10743_v36, %v15754_v51  ;;  %v17322_v36 = vld [vmem:[#allocation40_spill] sm:$0xff] }
 0xcf7   :  { %v7424_v35 = vpop.f32.mrf.mxu1 }
 0xcf8   :  { %6106 = vadd.xlane.f32.xlu0 %v15741_v2  ;;  %7150 = vmax.xlane.f32.xlu1 %v15739_v26  ;;  %v7425_v50 = vadd.f32 %v15754_v51, %v7424_v35  ;;  %v305_v35 = vadd.f32 %v17323_v59, %v17322_v36  ;;  %v6992_v59 = vld [vmem:[#allocation4 + $0xb0] sm:$0xff] }
 0xcf9   :  { %v10744_v41 = vpop.f32.mrf.mxu1 }
 0xcfa   :  { %v7436_v23 = vadd.f32 %v10744_v41, %v15754_v51  ;;  %v6601_v41 = vmul.f32 1.442695, %v6575_v20  ;;  %v15792_v53 = vpack.c.bf16 %v305_v35, %v305_v35  ;;  %v6995_v20 = vld [vmem:[#allocation4 + $0xc8] sm:$0xff] }
 0xcfb   :  { %v7427_v40 = vpop.f32.mrf.mxu1  ;;  %v15812_v0 = vadd.f32 %v15724_v45, %v6995_v20 }
 0xcfc   :  { %v7428_v18 = vadd.f32 %v15754_v51, %v7427_v40  ;;  %7152 = vmax.xlane.f32.xlu0 %v15749_v4  ;;  %6100 = vadd.xlane.f32.xlu1 %v15756_v17  ;;  %v7488_v42 = vpack.c.bf16 %v7436_v23, %v7433_v49  ;;  %v15787_v23 = vpop.eup %11716  ;;  %v6994_v40 = vld [vmem:[#allocation4 + $0xc0] sm:$0xff]  ;;  %11724 = vpow2.f32 %v6601_v41 }
 0xcfd   :  { %v10747_v27 = vpop.f32.mrf.mxu1  ;;  %v15796_v49 = vpop.eup %11718  ;;  %11726 = vpow2.f32 %v6603_v57 }
 0xcfe   :  { %v7487_v61 = vpack.c.bf16 %v7428_v18, %v7425_v50  ;;  %v7449_v8 = vadd.f32 %v10747_v27, %v15754_v51  ;;  %v15815_v36 = vpop.eup %11720 }
 0xcff   :  { %v7440_v48 = vpop.f32.mrf.mxu1  ;;  %v15822_v41 = vpop.eup %11722 }
 0xd00   :  { %10759 = vmatprep.mubr.msk.bf16.mxu1 %vm591_vm2, %v7487_v61  ;;  %6102 = vadd.xlane.f32.xlu0 %v15764_v55  ;;  %v7441_v22 = vadd.f32 %v15754_v51, %v7440_v48  ;;  %v15801_v61 = vadd.f32 %v15717_v28, %v6994_v40  ;;  %v6597_v28 = vmul.f32 1.442695, %v6573_v25  ;;  %v6993_v40 = vld [vmem:[#allocation4 + $0xb8] sm:$0xff]  ;;  %v6990_v25 = vld [vmem:[#allocation4 + $0xa0] sm:$0xff] }
 0xd01   :  { %7146 = vmax.xlane.f32.xlu1 %v15769_v33  ;;  %v10748_v31 = vpop.f32.mrf.mxu1  ;;  %10760 = vmatmul.mubr.msk.bf16.vlgmr.msra.gmra.mxu1 %vm591_vm2, %v7488_v42  ;;  %v15851_v32 = vadd.f32 %v15702_v13, %v6990_v25 }
 0xd02   :  { %10796 = vmatpush3.bf16.msra.mxu1 %v15629_v19  ;;  %v7452_v12 = vadd.f32 %v10748_v31, %v15754_v51  ;;  %11728 = vpow2.f32 %v6597_v28  ;;  %v6991_v28 = vld [vmem:[#allocation4 + $0xa8] sm:$0xff] }
 0xd03   :  { %v7443_v58 = vpop.f32.mrf.mxu1  ;;  %10797 = vmatprep.subr.bf16.mxu1 %v11015_v34  ;;  %11730 = vpow2.f32 %v6599_v29  ;;  %v6986_v29 = vld [vmem:[#allocation4 + $0x80] sm:$0xff] }
 0xd04   :  { %v7444_v50 = vadd.f32 %v15754_v51, %v7443_v58  ;;  %7148 = vmax.xlane.f32.xlu0 %v15783_v10  ;;  %v7490_v5 = vpack.c.bf16 %v7452_v12, %v7449_v8  ;;  %v6571_v12 = vsub.f32 %v15538_v43, %v15652_v7  ;;  %v15827_v58 = vadd.f32 %v15698_v60, %v6992_v59  ;;  %v6988_v59 = vld [vmem:[#allocation4 + $0x90] sm:$0xff] }
 0xd05   :  { %6641 = vadd.xlane.f32.xlu1 %v15787_v23  ;;  %v10751_v19 = vpop.f32.mrf.mxu1  ;;  %v15836_v43 = vadd.f32 %v15705_v44, %v6993_v40  ;;  %v15913_v40 = vld [vmem:[%s16937_s0 + $0xd8] sm:$0xff]  }
 0xd06   :  { %v7489_v18 = vpack.c.bf16 %v7444_v50, %v7441_v22  ;;  %10798 = vmatpush3.bf16.msra.mxu1 %v11015_v34  ;;  %v7465_v37 = vadd.f32 %v10751_v19, %v15754_v51  ;;  %v6572_v19 = vsub.f32 %v15547_v15, %v15655_v9  ;;  %v6593_v7 = vmul.f32 1.442695, %v6571_v12  ;;  %v6987_v12 = vld [vmem:[#allocation4 + $0x88] sm:$0xff]  ;;  %17330 = vst [vmem:[#allocation60_spill] sm:$0xff] %v15913_v40 }
 0xd07   :  { %10925 = vmatprep.subr.msk.bf16.mxu1 %vm616_vm1, %v15792_v53  ;;  %v7456_v27 = vpop.f32.mrf.mxu1 }
 0xd08   :  { %10763 = vmatprep.mubr.msk.bf16.mxu1 %vm591_vm2, %v7489_v18  ;;  %6643 = vadd.xlane.f32.xlu0 %v15796_v49  ;;  %v7457_v35 = vadd.f32 %v15754_v51, %v7456_v27  ;;  %v6595_v15 = vmul.f32 1.442695, %v6572_v19  ;;  %11732 = vpow2.f32 %v6593_v7  ;;  %v15944_v19 = vld [vmem:[%s16937_s0 + $0xf0] sm:$0xff]   ;;  %v15951_v7 = vld [vmem:[%s16937_s0 + $0xf8] sm:$0xff]  }
 0xd09   :  { %7142 = vmax.xlane.f32.xlu1 %v15801_v61  ;;  %v10752_v42 = vpop.f32.mrf.mxu1  ;;  %10764 = vmatmul.mubr.msk.bf16.gmra.mxu1 %vm591_vm2, %v7490_v5  ;;  %v15839_v18 = vpop.eup %11724  ;;  %17334 = vst [vmem:[#allocation27_spill] sm:$0xff] %v15944_v19  ;;  %17335 = vst [vmem:[#allocation28_spill] sm:$0xff] %v15951_v7 }
 0xd0a   :  { %v7468_v48 = vadd.f32 %v10752_v42, %v15754_v51  ;;  %v15846_v44 = vpop.eup %11726  ;;  %v6569_v42 = vsub.f32 %v15562_v39, %v15659_v24  ;;  %11734 = vpow2.f32 %v6595_v15  ;;  %v15865_v39 = vld [vmem:[%s16937_s0 + $0xc0] sm:$0xff]  }
 0xd0b   :  { %v7459_v34 = vpop.f32.mrf.mxu1  ;;  %17324 = vst [vmem:[#allocation44_spill] sm:$0xff] %v15865_v39 }
 0xd0c   :  { %v7460_v31 = vadd.f32 %v15754_v51, %v7459_v34  ;;  %7144 = vmax.xlane.f32.xlu0 %v15812_v0  ;;  %v7492_v22 = vpack.c.bf16 %v7468_v48, %v7465_v37  ;;  %v15860_v34 = vadd.f32 %v15711_v3, %v6991_v28  ;;  %v6589_v24 = vmul.f32 1.442695, %v6569_v42  ;;  %v15885_v37 = vld [vmem:[%s16937_s0 + $0xc8] sm:$0xff]  }
 0xd0d   :  { %6637 = vadd.xlane.f32.xlu1 %v15815_v36  ;;  %v10755_v16 = vpop.f32.mrf.mxu1  ;;  %v15876_v3 = vadd.f32 %v15687_v30, %v6988_v59  ;;  %17326 = vst [vmem:[#allocation10_spill] sm:$0xff] %v15885_v37 }
 0xd0e   :  { %v7491_v45 = vpack.c.bf16 %v7460_v31, %v7457_v35  ;;  %v7481_v27 = vadd.f32 %v10755_v16, %v15754_v51  ;;  %11736 = vpow2.f32 %v6589_v24  ;;  %v6989_v35 = vld [vmem:[#allocation4 + $0x98] sm:$0xff]  ;;  %v8053_v31 = vsel %vm616_vm1, %v15792_v53, 0  ;;  %v15895_v16 = vld [vmem:[%s16937_s0 + $0xd0] sm:$0xff]  }
 0xd0f   :  { %v7472_v50 = vpop.f32.mrf.mxu1  ;;  %v15869_v13 = vpop.eup %11728  ;;  %17325 = vst [vmem:[#allocation45_spill] sm:$0xff] %v15876_v3  ;;  %v15890_v30 = vadd.f32 %v15692_v47, %v6989_v35  ;;  %17328 = vst [vmem:[#allocation32_spill] sm:$0xff] %v15895_v16  ;;  %v15906_v47 = vadd.f32 %v15689_v1, %v6986_v29  ;;  %v15923_v1 = vld [vmem:[%s16937_s0 + $0xe0] sm:$0xff]  }
 0xd10   :  { %10767 = vmatprep.mubr.msk.bf16.mxu1 %vm591_vm2, %v7491_v45  ;;  %6639 = vadd.xlane.f32.xlu0 %v15822_v41  ;;  %v7473_v20 = vadd.f32 %v15754_v51, %v7472_v50  ;;  %17332 = vst [vmem:[#allocation46_spill] sm:$0xff] %v15923_v1 }
 0xd11   :  { %7138 = vmax.xlane.f32.xlu1 %v15827_v58  ;;  %v10756_v8 = vpop.f32.mrf.mxu1  ;;  %10768 = vmatmul.mubr.msk.bf16.gmra.mxu1 %vm591_vm2, %v7492_v22  ;;  %17327 = vst [vmem:[#allocation25_spill] sm:$0xff] %v15890_v30  ;;  %17329 = vst [vmem:[#allocation54_spill] sm:$0xff] %v15906_v47  ;;  %v15918_v22 = vadd.f32 %v15696_v21, %v6987_v12  ;;  %v15937_v21 = vld [vmem:[%s16937_s0 + $0xe8] sm:$0xff]  }
 0xd12   :  { %v7484_v60 = vadd.f32 %v10756_v8, %v15754_v51  ;;  %17333 = vst [vmem:[#allocation23_spill] sm:$0xff] %v15937_v21 }
 0xd13   :  { %v7475_v57 = vpop.f32.mrf.mxu1  ;;  %17331 = vst [vmem:[#allocation21_spill] sm:$0xff] %v15918_v22 }
 0xd14   :  { %v7476_v5 = vadd.f32 %v15754_v51, %v7475_v57  ;;  %7140 = vmax.xlane.f32.xlu0 %v15836_v43  ;;  %v7494_v48 = vpack.c.bf16 %v7484_v60, %v7481_v27  ;;  %v6570_v51 = vsub.f32 %v15571_v56, %v15664_v52  ;;  %v15873_v52 = vpop.eup %11730  ;;  %v15958_v60 = vld [vmem:[%s16939_s2 + $0x38] sm:$0xff]  }
 0xd15   :  { %6633 = vadd.xlane.f32.xlu1 %v15839_v18  ;;  %v15899_v53 = vpop.eup %11732 }
 0xd16   :  { %v7493_v9 = vpack.c.bf16 %v7476_v5, %v7473_v20  ;;  %v6591_v56 = vmul.f32 1.442695, %v6570_v51 }
 0xd17   :  { %v15903_v45 = vpop.eup %11734 }
 0xd18   :  { %10771 = vmatprep.mubr.msk.bf16.mxu1 %vm591_vm2, %v7493_v9  ;;  %6635 = vadd.xlane.f32.xlu0 %v15846_v44  ;;  %11738 = vpow2.f32 %v6591_v56 }
 0xd19   :  { %7134 = vmax.xlane.f32.xlu1 %v15851_v32  ;;  %10772 = vmatmul.mubr.msk.bf16.gmra.mxu1 %vm591_vm2, %v7494_v48 }
 0xd1a   :  { %10799 = vmatprep.mubr.msk.bf16.mxu1 %vm172_vm0, %v15865_v39 }
 0xd1b   :  { %v15927_v50 = vpop.eup %11736 }
 0xd1c   :  { %7136 = vmax.xlane.f32.xlu0 %v15860_v34 }
 0xd1d   :  { %6629 = vadd.xlane.f32.xlu1 %v15869_v13 }
 0xd20   :  { %6631 = vadd.xlane.f32.xlu0 %v15873_v52 }
 0xd21   :  { %7130 = vmax.xlane.f32.xlu1 %v15876_v3  ;;  %10800 = vmatmul.mubr.msk.bf16.vlgmr.msra.gmra.mxu1 %vm172_vm0, %v15885_v37 }
 0xd22   :  { %10816 = vmatpush3.bf16.msra.mxu1 %v8053_v31  ;;  %10803 = vmatprep.mubr.msk.bf16.mxu1 %vm172_vm0, %v15895_v16 }
 0xd23   :  { %10853 = vmatprep.subr.bf16.mxu1 %v15958_v60 }
 0xd24   :  { %7132 = vmax.xlane.f32.xlu0 %v15890_v30 }
 0xd25   :  { %6625 = vadd.xlane.f32.xlu1 %v15899_v53  ;;  %v15931_v8 = vpop.eup %11738 }
 0xd28   :  { %6627 = vadd.xlane.f32.xlu0 %v15903_v45 }
 0xd29   :  { %7126 = vmax.xlane.f32.xlu1 %v15906_v47  ;;  %10804 = vmatmul.mubr.msk.bf16.gmra.mxu1 %vm172_vm0, %v15913_v40 }
 0xd2a   :  { %10807 = vmatprep.mubr.msk.bf16.mxu1 %vm172_vm0, %v15923_v1 }
 0xd2c   :  { %7128 = vmax.xlane.f32.xlu0 %v15918_v22 }
 0xd2d   :  { %6621 = vadd.xlane.f32.xlu1 %v15927_v50 }
 0xd30   :  { %6623 = vadd.xlane.f32.xlu0 %v15931_v8 }
 0xd31   :  { %10808 = vmatmul.mubr.msk.bf16.gmra.mxu1 %vm172_vm0, %v15937_v21 }
 0xd32   :  { %10811 = vmatprep.mubr.msk.bf16.mxu1 %vm172_vm0, %v15944_v19 }
 0xd39   :  { %10812 = vmatmul.mubr.msk.bf16.gmra.mxu1 %vm172_vm0, %v15951_v7 }
 0xd79   :  { %v15961_v57 = vpop.xlane.xlu1 %7154 }
 0xd7d   :  { %v15963_v25 = vpop.xlane.xlu0 %7156  ;;  %v6105_v20 = vpop.xlane.xlu1 %6104 }
 0xd7e   :  { %v15965_v5 = vpop.f32.mrf.mxu0  ;;  %11740 = vrcp.f32 %v6105_v20 }
 0xd7f   :  { %17336 = vst [vmem:[#allocation20_spill] sm:$0xff] %v15965_v5 }
 0xd80   :  { %v10561_v27 = vpop.f32.mrf.mxu0 }
 0xd81   :  { %v6107_v15 = vpop.xlane.xlu0 %6106  ;;  %v15967_v9 = vpop.xlane.xlu1 %7150 }
 0xd82   :  { %v5744_v42 = vpop.f32.mrf.mxu0  ;;  %11742 = vrcp.f32 %v6107_v15 }
 0xd84   :  { %v10562_v28 = vpop.f32.mrf.mxu0 }
 0xd85   :  { %v15969_v48 = vpop.xlane.xlu0 %7152  ;;  %v6101_v51 = vpop.xlane.xlu1 %6100 }
 0xd86   :  { %11744 = vrcp.f32 %v6101_v51 }
 0xd89   :  { %v6103_v24 = vpop.xlane.xlu0 %6102 }
 0xd8a   :  { %v15971_v59 = vpop.xlane.xlu1 %7146  ;;  %11746 = vrcp.f32 %v6103_v24 }
 0xd8b   :  { %v11741_v56 = vpop.eup %11740 }
 0xd8c   :  { %v6150_v35 = vmul.f32 %v11741_v56, %v6105_v20 }
 0xd8d   :  { %v15973_v31 = vpop.xlane.xlu0 %7148 }
 0xd8e   :  { %v6642_v29 = vpop.xlane.xlu1 %6641  ;;  %v6166_v12 = vsub.f32 2.0, %v6150_v35 }
 0xd8f   :  { %v11743_v27 = vpop.eup %11742  ;;  %11748 = vrcp.f32 %v6642_v29 }
 0xd90   :  { %v6151_v5 = vmul.f32 %v11743_v27, %v6107_v15  ;;  %v6182_v28 = vmul.f32 %v11741_v56, %v6166_v12 }
 0xd91   :  { %v6644_v42 = vpop.xlane.xlu0 %6643 }
 0xd92   :  { %v15975_v22 = vpop.xlane.xlu1 %7142  ;;  %v6167_v47 = vsub.f32 2.0, %v6151_v5  ;;  %11750 = vrcp.f32 %v6644_v42  ;;  %v6198_v20 = vmul.f32 %v15735_v11, %v6182_v28 }
 0xd93   :  { %v11745_v30 = vpop.eup %11744 }
 0xd94   :  { %v6183_v3 = vmul.f32 %v11743_v27, %v6167_v47  ;;  %v6148_v7 = vmul.f32 %v11745_v30, %v6101_v51 }
 0xd95   :  { %v15977_v19 = vpop.xlane.xlu0 %7144 }
 0xd96   :  { %v6638_v21 = vpop.xlane.xlu1 %6637  ;;  %v6199_v1 = vmul.f32 %v15741_v2, %v6183_v3  ;;  %v6164_v35 = vsub.f32 2.0, %v6148_v7 }
 0xd97   :  { %v11747_v40 = vpop.eup %11746  ;;  %11752 = vrcp.f32 %v6638_v21 }
 0xd98   :  { %v6149_v15 = vmul.f32 %v11747_v40, %v6103_v24  ;;  %v6213_v37 = vpack.c.bf16 %v6199_v1, %v6198_v20  ;;  %v6180_v5 = vmul.f32 %v11745_v30, %v6164_v35 }
 0xd99   :  { %v6640_v16 = vpop.xlane.xlu0 %6639 }
 0xd9a   :  { %v15981_v39 = vpop.xlane.xlu1 %7138  ;;  %v6165_v56 = vsub.f32 2.0, %v6149_v15  ;;  %11754 = vrcp.f32 %v6640_v16  ;;  %10614 = vmatpush3.bf16.xpose.msra.mxu0 %v6213_v37  ;;  %v6196_v3 = vmul.f32 %v15756_v17, %v6180_v5  ;;  %v17338_v15 = vld [vmem:[#allocation36_spill] sm:$0xff] }
 0xd9b   :  { %10615 = vmatprep.subr.bf16.mxu0 %v17103_v38 }
 0xd9c   :  { %v11749_v47 = vpop.eup %11748  ;;  %v6181_v51 = vmul.f32 %v11747_v40, %v6165_v56  ;;  %v17337_v40 = vld [vmem:[#allocation53_spill] sm:$0xff] }
 0xd9d   :  { %v15984_v12 = vpop.xlane.xlu0 %7140  ;;  %v6675_v11 = vmul.f32 %v11749_v47, %v6642_v29  ;;  %v323_v29 = vadd.f32 %v17338_v15, %v17337_v40 }
 0xd9e   :  { %v6634_v2 = vpop.xlane.xlu1 %6633  ;;  %v6197_v7 = vmul.f32 %v15764_v55, %v6181_v51 }
 0xd9f   :  { %v11751_v24 = vpop.eup %11750  ;;  %v6691_v1 = vsub.f32 2.0, %v6675_v11  ;;  %11756 = vrcp.f32 %v6634_v2 }
 0xda0   :  { %v6676_v27 = vmul.f32 %v11751_v24, %v6644_v42  ;;  %v6212_v28 = vpack.c.bf16 %v6197_v7, %v6196_v3  ;;  %v5879_v7 = vpack.c.bf16 %v323_v29, %v323_v29 }
 0xda1   :  { %v6636_v30 = vpop.xlane.xlu0 %6635  ;;  %v6707_v37 = vmul.f32 %v11749_v47, %v6691_v1 }
 0xda2   :  { %v15988_v20 = vpop.xlane.xlu1 %7134  ;;  %v6692_v35 = vsub.f32 2.0, %v6676_v27  ;;  %11758 = vrcp.f32 %v6636_v30  ;;  %10616 = vmatpush3.bf16.xpose.msra.mxu0 %v6212_v28 }
 0xda3   :  { %10659 = vmatprep.subr.bf16.mxu0 %v17103_v38  ;;  %v6723_v42 = vmul.f32 %v15787_v23, %v6707_v37 }
 0xda4   :  { %v11753_v17 = vpop.eup %11752  ;;  %v6708_v5 = vmul.f32 %v11751_v24, %v6692_v35 }
 0xda5   :  { %v15993_v55 = vpop.xlane.xlu0 %7136  ;;  %v6673_v56 = vmul.f32 %v11753_v17, %v6638_v21 }
 0xda6   :  { %v6630_v51 = vpop.xlane.xlu1 %6629  ;;  %v6724_v11 = vmul.f32 %v15796_v49, %v6708_v5 }
 0xda7   :  { %v11755_v3 = vpop.eup %11754  ;;  %v6689_v47 = vsub.f32 2.0, %v6673_v56  ;;  %11760 = vrcp.f32 %v6630_v51 }
 0xda8   :  { %v6674_v1 = vmul.f32 %v11755_v3, %v6640_v16  ;;  %v6732_v28 = vpack.c.bf16 %v6724_v11, %v6723_v42 }
 0xda9   :  { %v6632_v27 = vpop.xlane.xlu0 %6631  ;;  %10618 = vmatmul.mubr.bf16.vlgmr.msra.gmra.mxu0 %v5879_v7  ;;  %v6705_v40 = vmul.f32 %v11753_v17, %v6689_v47 }
 0xdaa   :  { %v15997_v15 = vpop.xlane.xlu1 %7130  ;;  %v6690_v24 = vsub.f32 2.0, %v6674_v1  ;;  %11762 = vrcp.f32 %v6632_v27  ;;  %10660 = vmatpush3.bf16.xpose.msra.mxu0 %v6732_v28  ;;  %10675 = vmatprep.mubr.msk.bf16.mxu0 %vm12126_vm3, %v17103_v38 }
 0xdab   :  { %10661 = vmatprep.subr.bf16.mxu0 %v17103_v38  ;;  %v6721_v35 = vmul.f32 %v15815_v36, %v6705_v40 }
 0xdac   :  { %v11757_v23 = vpop.eup %11756  ;;  %v6706_v49 = vmul.f32 %v11755_v3, %v6690_v24 }
 0xdad   :  { %v16002_v21 = vpop.xlane.xlu0 %7132  ;;  %v6671_v37 = vmul.f32 %v11757_v23, %v6634_v2 }
 0xdae   :  { %v6626_v16 = vpop.xlane.xlu1 %6625  ;;  %v6722_v29 = vmul.f32 %v15822_v41, %v6706_v49 }
 0xdaf   :  { %v11759_v5 = vpop.eup %11758  ;;  %v6687_v17 = vsub.f32 2.0, %v6671_v37  ;;  %11764 = vrcp.f32 %v6626_v16 }
 0xdb0   :  { %v6672_v56 = vmul.f32 %v11759_v5, %v6636_v30  ;;  %v6731_v11 = vpack.c.bf16 %v6722_v29, %v6721_v35 }
 0xdb1   :  { %v6628_v42 = vpop.xlane.xlu0 %6627  ;;  %v6703_v7 = vmul.f32 %v11757_v23, %v6687_v17 }
 0xdb2   :  { %v16006_v47 = vpop.xlane.xlu1 %7126  ;;  %v6688_v1 = vsub.f32 2.0, %v6672_v56  ;;  %11766 = vrcp.f32 %v6628_v42  ;;  %10662 = vmatpush3.bf16.xpose.msra.mxu0 %v6731_v11 }
 0xdb3   :  { %10663 = vmatprep.subr.bf16.mxu0 %v17103_v38  ;;  %v6719_v40 = vmul.f32 %v15839_v18, %v6703_v7 }
 0xdb4   :  { %v11761_v2 = vpop.eup %11760  ;;  %v6704_v3 = vmul.f32 %v11759_v5, %v6688_v1 }
 0xdb5   :  { %v16009_v28 = vpop.xlane.xlu0 %7128  ;;  %v6669_v36 = vmul.f32 %v11761_v2, %v6630_v51 }
 0xdb6   :  { %v6622_v41 = vpop.xlane.xlu1 %6621  ;;  %v6720_v30 = vmul.f32 %v15846_v44, %v6704_v3 }
 0xdb7   :  { %v11763_v24 = vpop.eup %11762  ;;  %v6685_v49 = vsub.f32 2.0, %v6669_v36  ;;  %11768 = vrcp.f32 %v6622_v41 }
 0xdb8   :  { %v6670_v37 = vmul.f32 %v11763_v24, %v6632_v27  ;;  %v6730_v35 = vpack.c.bf16 %v6720_v30, %v6719_v40 }
 0xdb9   :  { %v6624_v23 = vpop.xlane.xlu0 %6623  ;;  %v6701_v29 = vmul.f32 %v11761_v2, %v6685_v49 }
 0xdba   :  { %v6686_v17 = vsub.f32 2.0, %v6670_v37  ;;  %11770 = vrcp.f32 %v6624_v23  ;;  %10664 = vmatpush3.bf16.xpose.msra.mxu0 %v6730_v35 }
 0xdbb   :  { %10665 = vmatprep.subr.bf16.mxu0 %v17103_v38  ;;  %v6717_v11 = vmul.f32 %v15869_v13, %v6701_v29 }
 0xdbc   :  { %v11765_v5 = vpop.eup %11764  ;;  %v6702_v56 = vmul.f32 %v11763_v24, %v6686_v17 }
 0xdbd   :  { %v6667_v51 = vmul.f32 %v11765_v5, %v6626_v16 }
 0xdbe   :  { %v6718_v18 = vmul.f32 %v15873_v52, %v6702_v56  ;;  %v17339_v56 = vld [vmem:[#allocation57_spill] sm:$0xff] }
 0xdbf   :  { %v11767_v44 = vpop.eup %11766  ;;  %v6683_v7 = vsub.f32 2.0, %v6667_v51  ;;  %v6567_v51 = vsub.f32 %v17339_v56, %v15668_v63 }
 0xdc0   :  { %v6668_v1 = vmul.f32 %v11767_v44, %v6628_v42  ;;  %v6729_v27 = vpack.c.bf16 %v6718_v18, %v6717_v11 }
 0xdc1   :  { %v16016_v3 = vpop.f32.mrf.mxu1  ;;  %v6699_v36 = vmul.f32 %v11765_v5, %v6683_v7  ;;  %v17340_v7 = vld [vmem:[#allocation58_spill] sm:$0xff] }
 0xdc2   :  { %v6684_v2 = vsub.f32 2.0, %v6668_v1  ;;  %10666 = vmatpush3.bf16.xpose.msra.mxu0 %v6729_v27 }
 0xdc3   :  { %v16018_v40 = vpop.f32.mrf.mxu1  ;;  %10667 = vmatprep.subr.bf16.mxu0 %v17103_v38  ;;  %v6715_v52 = vmul.f32 %v15899_v53, %v6699_v36 }
 0xdc4   :  { %v11769_v30 = vpop.eup %11768  ;;  %v6700_v24 = vmul.f32 %v11767_v44, %v6684_v2 }
 0xdc5   :  { %v16021_v16 = vpop.f32.mrf.mxu1  ;;  %v6665_v13 = vmul.f32 %v11769_v30, %v6622_v41  ;;  %v6585_v41 = vmul.f32 1.442695, %v6567_v51 }
 0xdc6   :  { %v6716_v49 = vmul.f32 %v15903_v45, %v6700_v24  ;;  %v17341_v24 = vld [vmem:[#allocation22_spill] sm:$0xff] }
 0xdc7   :  { %v16025_v42 = vpop.f32.mrf.mxu1  ;;  %v11771_v37 = vpop.eup %11770  ;;  %v6681_v35 = vsub.f32 2.0, %v6665_v13  ;;  %11772 = vpow2.f32 %v6585_v41  ;;  %v6565_v13 = vsub.f32 %v17341_v24, %v15677_v14  ;;  %v7172_v14 = vsub.f32 %v15726_v54, %v15961_v57 }
 0xdc8   :  { %v6666_v29 = vmul.f32 %v11771_v37, %v6624_v23  ;;  %v6728_v5 = vpack.c.bf16 %v6716_v49, %v6715_v52  ;;  %v6568_v23 = vsub.f32 %v17340_v7, %v15673_v6 }
 0xdc9   :  { %v16027_v17 = vpop.f32.mrf.mxu1  ;;  %v6697_v11 = vmul.f32 %v11769_v30, %v6681_v35  ;;  %v7513_v35 = vld [vmem:[#allocation4 + $0x1f0] sm:$0xff]  ;;  %v7202_v7 = vmul.f32 1.442695, %v7172_v14 }
 0xdca   :  { %v6682_v18 = vsub.f32 2.0, %v6666_v29  ;;  %10668 = vmatpush3.bf16.xpose.msra.mxu0 %v6728_v5  ;;  %v6587_v30 = vmul.f32 1.442695, %v6568_v23  ;;  %v7511_v23 = vld [vmem:[#allocation4 + $0x1e0] sm:$0xff] }
 0xdcb   :  { %v16031_v44 = vpop.f32.mrf.mxu1  ;;  %10669 = vmatprep.subr.bf16.mxu0 %v17103_v38  ;;  %v6713_v1 = vmul.f32 %v15927_v50, %v6697_v11  ;;  %v6581_v50 = vmul.f32 1.442695, %v6565_v13  ;;  %v7514_v11 = vld [vmem:[#allocation4 + $0x1f8] sm:$0xff]  ;;  %v7171_v13 = vsub.f32 %v15749_v4, %v15969_v48 }
 0xdcc   :  { %v6698_v53 = vmul.f32 %v11771_v37, %v6682_v18  ;;  %11774 = vpow2.f32 %v6587_v30 }
 0xdcd   :  { %v16034_v45 = vpop.f32.mrf.mxu1  ;;  %11776 = vpow2.f32 %v6581_v50 }
 0xdce   :  { %v6714_v27 = vmul.f32 %v15931_v8, %v6698_v53  ;;  %v17342_v8 = vld [vmem:[#allocation14_spill] sm:$0xff] }
 0xdcf   :  { %v16040_v36 = vpop.f32.mrf.mxu1  ;;  %v6566_v49 = vsub.f32 %v17342_v8, %v15680_v62  ;;  %v7173_v62 = vsub.f32 %v15733_v46, %v15963_v25  ;;  %v7170_v46 = vsub.f32 %v15739_v26, %v15967_v9  ;;  %v7512_v25 = vld [vmem:[#allocation4 + $0x1e8] sm:$0xff]  ;;  %v16083_v8 = vld [vmem:[%s16940_s3 + $0x2] ss:$0 sm:$0xff] }
 0xdd0   :  { %v6727_v2 = vpack.c.bf16 %v6714_v27, %v6713_v1 }
 0xdd1   :  { %v16042_v63 = vpop.f32.mrf.mxu1  ;;  %v6583_v5 = vmul.f32 1.442695, %v6566_v49  ;;  %v7204_v57 = vmul.f32 1.442695, %v7173_v62  ;;  %v7198_v26 = vmul.f32 1.442695, %v7170_v46  ;;  %v7168_v62 = vsub.f32 %v15769_v33, %v15971_v59 }
 0xdd2   :  { %10670 = vmatpush3.bf16.xpose.msra.mxu0 %v6727_v2  ;;  %v11017_v46 = vld [vmem:[%s16939_s2 + $0x30] sm:$0xff]   ;;  %v7169_v59 = vsub.f32 %v15783_v10, %v15973_v31 }
 0xdd3   :  { %v16046_v52 = vpop.f32.mrf.mxu1  ;;  %10671 = vmatprep.subr.bf16.mxu0 %v17103_v38  ;;  %11778 = vpow2.f32 %v6583_v5 }
 0xdd4   :  { %v16064_v41 = vpop.eup %11772  ;;  %11780 = vpow2.f32 %v7202_v7 }
 0xdd5   :  { %v16049_v6 = vpop.f32.mrf.mxu1  ;;  %11782 = vpow2.f32 %v7204_v57 }
 0xdd6   :  { %11784 = vpow2.f32 %v7198_v26 }
 0xdd7   :  { %v16053_v37 = vpop.f32.mrf.mxu1 }
 0xdd9   :  { %v10773_v29 = vpop.f32.mrf.mxu1  ;;  %v16070_v2 = vpop.eup %11774 }
 0xdda   :  { %v16055_v56 = vadd.f32 %v10773_v29, %v7513_v35  ;;  %v16085_v49 = vpop.eup %11776  ;;  %v7509_v29 = vld [vmem:[#allocation4 + $0x1d0] sm:$0xff] }
 0xddb   :  { %v7624_v51 = vpop.f32.mrf.mxu1  ;;  %v16098_v7 = vadd.f32 %v16042_v63, %v7509_v29 }
 0xddc   :  { %7667 = vmax.xlane.f32.xlu1 %v16055_v56  ;;  %v16068_v27 = vadd.f32 %v7624_v51, %v7511_v23  ;;  %v7200_v51 = vmul.f32 1.442695, %v7171_v13  ;;  %v7510_v23 = vld [vmem:[#allocation4 + $0x1d8] sm:$0xff] }
 0xddd   :  { %v10774_v18 = vpop.f32.mrf.mxu1  ;;  %v16112_v63 = vadd.f32 %v16049_v6, %v7510_v23  ;;  %v7196_v6 = vmul.f32 1.442695, %v7169_v59 }
 0xdde   :  { %v16062_v53 = vadd.f32 %v10774_v18, %v7514_v11  ;;  %11786 = vpow2.f32 %v7200_v51  ;;  %v7166_v51 = vsub.f32 %v15801_v61, %v15975_v22  ;;  %v7167_v61 = vsub.f32 %v15812_v0, %v15977_v19 }
 0xddf   :  { %v7627_v1 = vpop.f32.mrf.mxu1 }
 0xde0   :  { %7669 = vmax.xlane.f32.xlu0 %v16062_v53  ;;  %6617 = vadd.xlane.f32.xlu1 %v16064_v41  ;;  %v16078_v50 = vadd.f32 %v7627_v1, %v7512_v25  ;;  %v16093_v18 = vpop.eup %11778  ;;  %v17344_v25 = vld [vmem:[#allocation31_spill] sm:$0xff]  ;;  %v7192_v19 = vmul.f32 1.442695, %v7167_v61 }
 0xde1   :  { %v10801_v54 = vpop.f32.mrf.mxu1 }
 0xde2   :  { %v7946_v4 = vadd.f32 %v10801_v54, %v16083_v8  ;;  %v17343_v54 = vld [vmem:[#allocation41_spill] sm:$0xff] }
 0xde3   :  { %v7937_v30 = vpop.f32.mrf.mxu1 }
 0xde4   :  { %6619 = vadd.xlane.f32.xlu0 %v16070_v2  ;;  %7663 = vmax.xlane.f32.xlu1 %v16068_v27  ;;  %v7938_v5 = vadd.f32 %v16083_v8, %v7937_v30  ;;  %v309_v30 = vadd.f32 %v17344_v25, %v17343_v54  ;;  %v7505_v25 = vld [vmem:[#allocation4 + $0x1b0] sm:$0xff] }
 0xde5   :  { %v10802_v24 = vpop.f32.mrf.mxu1 }
 0xde6   :  { %v7949_v9 = vadd.f32 %v10802_v24, %v16083_v8  ;;  %v7194_v24 = vmul.f32 1.442695, %v7168_v62  ;;  %v16121_v10 = vpack.c.bf16 %v309_v30, %v309_v30  ;;  %v7508_v62 = vld [vmem:[#allocation4 + $0x1c8] sm:$0xff] }
 0xde7   :  { %v7940_v35 = vpop.f32.mrf.mxu1  ;;  %v16141_v22 = vadd.f32 %v16053_v37, %v7508_v62 }
 0xde8   :  { %v7941_v14 = vadd.f32 %v16083_v8, %v7940_v35  ;;  %7665 = vmax.xlane.f32.xlu0 %v16078_v50  ;;  %6613 = vadd.xlane.f32.xlu1 %v16085_v49  ;;  %v8001_v1 = vpack.c.bf16 %v7949_v9, %v7946_v4  ;;  %v16116_v9 = vpop.eup %11780  ;;  %v7507_v35 = vld [vmem:[#allocation4 + $0x1c0] sm:$0xff]  ;;  %11788 = vpow2.f32 %v7194_v24 }
 0xde9   :  { %v10805_v48 = vpop.f32.mrf.mxu1  ;;  %v16125_v4 = vpop.eup %11782  ;;  %11790 = vpow2.f32 %v7196_v6 }
 0xdea   :  { %v8000_v11 = vpack.c.bf16 %v7941_v14, %v7938_v5  ;;  %v7962_v31 = vadd.f32 %v10805_v48, %v16083_v8  ;;  %v16144_v54 = vpop.eup %11784 }
 0xdeb   :  { %v7953_v57 = vpop.f32.mrf.mxu1  ;;  %v16151_v24 = vpop.eup %11786 }
 0xdec   :  { %10817 = vmatprep.mubr.msk.bf16.mxu1 %vm591_vm2, %v8000_v11  ;;  %6615 = vadd.xlane.f32.xlu0 %v16093_v18  ;;  %v7954_v29 = vadd.f32 %v16083_v8, %v7953_v57  ;;  %v16130_v11 = vadd.f32 %v16046_v52, %v7507_v35  ;;  %v7190_v52 = vmul.f32 1.442695, %v7166_v51  ;;  %v7506_v35 = vld [vmem:[#allocation4 + $0x1b8] sm:$0xff]  ;;  %v7503_v51 = vld [vmem:[#allocation4 + $0x1a0] sm:$0xff] }
 0xded   :  { %7659 = vmax.xlane.f32.xlu1 %v16098_v7  ;;  %v10806_v33 = vpop.f32.mrf.mxu1  ;;  %10818 = vmatmul.mubr.msk.bf16.vlgmr.msra.gmra.mxu1 %vm591_vm2, %v8001_v1  ;;  %v16180_v61 = vadd.f32 %v16031_v44, %v7503_v51  ;;  %v17356_v51 = vld [vmem:[#allocation27_spill] sm:$0xff] }
 0xdee   :  { %10854 = vmatpush3.bf16.msra.mxu1 %v15958_v60  ;;  %v7965_v13 = vadd.f32 %v10806_v33, %v16083_v8  ;;  %11792 = vpow2.f32 %v7190_v52  ;;  %v7504_v52 = vld [vmem:[#allocation4 + $0x1a8] sm:$0xff] }
 0xdef   :  { %v7956_v26 = vpop.f32.mrf.mxu1  ;;  %10855 = vmatprep.subr.bf16.mxu1 %v11017_v46  ;;  %11794 = vpow2.f32 %v7192_v19  ;;  %v17348_v19 = vld [vmem:[#allocation10_spill] sm:$0xff] }
 0xdf0   :  { %v7957_v5 = vadd.f32 %v16083_v8, %v7956_v26  ;;  %7661 = vmax.xlane.f32.xlu0 %v16112_v63  ;;  %v8003_v23 = vpack.c.bf16 %v7965_v13, %v7962_v31  ;;  %v7164_v13 = vsub.f32 %v15827_v58, %v15981_v39  ;;  %v16156_v26 = vadd.f32 %v16027_v17, %v7505_v25  ;;  %v7501_v25 = vld [vmem:[#allocation4 + $0x190] sm:$0xff] }
 0xdf1   :  { %7234 = vadd.xlane.f32.xlu1 %v16116_v9  ;;  %v10809_v60 = vpop.f32.mrf.mxu1  ;;  %v16165_v58 = vadd.f32 %v16034_v45, %v7506_v35 }
 0xdf2   :  { %v8002_v14 = vpack.c.bf16 %v7957_v5, %v7954_v29  ;;  %10856 = vmatpush3.bf16.msra.mxu1 %v11017_v46  ;;  %v7978_v59 = vadd.f32 %v10809_v60, %v16083_v8  ;;  %v7165_v60 = vsub.f32 %v15836_v43, %v15984_v12  ;;  %v7186_v39 = vmul.f32 1.442695, %v7164_v13 }
 0xdf3   :  { %10926 = vmatprep.subr.msk.bf16.mxu1 %vm616_vm1, %v16121_v10  ;;  %v7969_v48 = vpop.f32.mrf.mxu1 }
 0xdf4   :  { %10821 = vmatprep.mubr.msk.bf16.mxu1 %vm591_vm2, %v8002_v14  ;;  %7236 = vadd.xlane.f32.xlu0 %v16125_v4  ;;  %v7970_v30 = vadd.f32 %v16083_v8, %v7969_v48  ;;  %v7188_v43 = vmul.f32 1.442695, %v7165_v60  ;;  %11796 = vpow2.f32 %v7186_v39  ;;  %v17354_v39 = vld [vmem:[#allocation46_spill] sm:$0xff] }
 0xdf5   :  { %7655 = vmax.xlane.f32.xlu1 %v16130_v11  ;;  %v10810_v1 = vpop.f32.mrf.mxu1  ;;  %10822 = vmatmul.mubr.msk.bf16.gmra.mxu1 %vm591_vm2, %v8003_v23  ;;  %v16168_v14 = vpop.eup %11788 }
 0xdf6   :  { %v7981_v57 = vadd.f32 %v10810_v1, %v16083_v8  ;;  %v16175_v45 = vpop.eup %11790  ;;  %v7162_v1 = vsub.f32 %v15851_v32, %v15988_v20  ;;  %11798 = vpow2.f32 %v7188_v43  ;;  %v17345_v32 = vld [vmem:[#allocation44_spill] sm:$0xff] }
 0xdf7   :  { %v7972_v46 = vpop.f32.mrf.mxu1 }
 0xdf8   :  { %v7973_v33 = vadd.f32 %v16083_v8, %v7972_v46  ;;  %7657 = vmax.xlane.f32.xlu0 %v16141_v22  ;;  %v8005_v29 = vpack.c.bf16 %v7981_v57, %v7978_v59  ;;  %v16189_v46 = vadd.f32 %v16040_v36, %v7504_v52  ;;  %v7182_v20 = vmul.f32 1.442695, %v7162_v1  ;;  %v17346_v36 = vld [vmem:[#allocation12_spill] sm:$0xff]  ;;  %v17347_v59 = vld [vmem:[#allocation19_spill] sm:$0xff] }
 0xdf9   :  { %7230 = vadd.xlane.f32.xlu1 %v16144_v54  ;;  %v10813_v0 = vpop.f32.mrf.mxu1 }
 0xdfa   :  { %v8004_v37 = vpack.c.bf16 %v7973_v33, %v7970_v30  ;;  %v7994_v48 = vadd.f32 %v10813_v0, %v16083_v8  ;;  %11800 = vpow2.f32 %v7182_v20  ;;  %v8931_v0 = vpack.c.bf16 %v17347_v59, %v17346_v36 }
 0xdfb   :  { %v7985_v5 = vpop.f32.mrf.mxu1  ;;  %v16193_v44 = vpop.eup %11792 }
 0xdfc   :  { %10825 = vmatprep.mubr.msk.bf16.mxu1 %vm591_vm2, %v8004_v37  ;;  %7232 = vadd.xlane.f32.xlu0 %v16151_v24  ;;  %v7986_v62 = vadd.f32 %v16083_v8, %v7985_v5  ;;  %v16197_v33 = vpop.eup %11794  ;;  %v8566_v37 = vsel %vm616_vm1, %v16121_v10, 0 }
 0xdfd   :  { %7651 = vmax.xlane.f32.xlu1 %v16156_v26  ;;  %v10814_v31 = vpop.f32.mrf.mxu1  ;;  %10826 = vmatmul.mubr.msk.bf16.gmra.mxu1 %vm591_vm2, %v8005_v29  ;;  %v7499_v29 = vld [vmem:[#allocation4 + $0x180] sm:$0xff] }
 0xdfe   :  { %v7997_v17 = vadd.f32 %v10814_v31, %v16083_v8  ;;  %v16222_v10 = vadd.f32 %v16018_v40, %v7499_v29  ;;  %v7500_v31 = vld [vmem:[#allocation4 + $0x188] sm:$0xff] }
 0xdff   :  { %v7988_v6 = vpop.f32.mrf.mxu1  ;;  %v16229_v60 = vadd.f32 %v16025_v42, %v7500_v31  ;;  %v17357_v42 = vld [vmem:[#allocation28_spill] sm:$0xff] }
 0xe00   :  { %v7989_v23 = vadd.f32 %v16083_v8, %v7988_v6  ;;  %7653 = vmax.xlane.f32.xlu0 %v16165_v58  ;;  %v8007_v57 = vpack.c.bf16 %v7997_v17, %v7994_v48  ;;  %v7163_v8 = vsub.f32 %v15860_v34, %v15993_v55  ;;  %v16200_v34 = vadd.f32 %v16016_v3, %v7501_v25  ;;  %v7502_v55 = vld [vmem:[#allocation4 + $0x198] sm:$0xff]  ;;  %v17350_v3 = vld [vmem:[#allocation32_spill] sm:$0xff]  ;;  %v17355_v6 = vld [vmem:[#allocation23_spill] sm:$0xff] }
 0xe01   :  { %7226 = vadd.xlane.f32.xlu1 %v16168_v14  ;;  %v16211_v13 = vadd.f32 %v16021_v16, %v7502_v55  ;;  %v16215_v35 = vpop.eup %11796  ;;  %17351 = vst [vmem:[#allocation30_spill] sm:$0xff] %v16222_v10  ;;  %v17352_v16 = vld [vmem:[#allocation60_spill] sm:$0xff]  ;;  %17353 = vst [vmem:[#allocation55_spill] sm:$0xff] %v16229_v60 }
 0xe02   :  { %v8006_v12 = vpack.c.bf16 %v7989_v23, %v7986_v62  ;;  %v7184_v30 = vmul.f32 1.442695, %v7163_v8 }
 0xe03   :  { %17349 = vst [vmem:[#allocation16_spill] sm:$0xff] %v16211_v13  ;;  %v16219_v5 = vpop.eup %11798 }
 0xe04   :  { %10829 = vmatprep.mubr.msk.bf16.mxu1 %vm591_vm2, %v8006_v12  ;;  %7228 = vadd.xlane.f32.xlu0 %v16175_v45  ;;  %11802 = vpow2.f32 %v7184_v30 }
 0xe05   :  { %7647 = vmax.xlane.f32.xlu1 %v16180_v61  ;;  %10830 = vmatmul.mubr.msk.bf16.gmra.mxu1 %vm591_vm2, %v8007_v57 }
 0xe06   :  { %10857 = vmatprep.mubr.msk.bf16.mxu1 %vm172_vm0, %v17345_v32 }
 0xe07   :  { %v16233_v17 = vpop.eup %11800 }
 0xe08   :  { %7649 = vmax.xlane.f32.xlu0 %v16189_v46 }
 0xe09   :  { %7222 = vadd.xlane.f32.xlu1 %v16193_v44 }
 0xe0c   :  { %7224 = vadd.xlane.f32.xlu0 %v16197_v33 }
 0xe0d   :  { %7643 = vmax.xlane.f32.xlu1 %v16200_v34  ;;  %10858 = vmatmul.mubr.msk.bf16.vlgmr.msra.gmra.mxu1 %vm172_vm0, %v17348_v19 }
 0xe0e   :  { %10874 = vmatpush3.bf16.msra.mxu1 %v8566_v37  ;;  %10861 = vmatprep.mubr.msk.bf16.mxu1 %vm172_vm0, %v17350_v3 }
 0xe0f   :  { %8986 = vmatprep.subr.bf16.mxu1 %v8931_v0 }
 0xe10   :  { %7645 = vmax.xlane.f32.xlu0 %v16211_v13 }
 0xe11   :  { %7218 = vadd.xlane.f32.xlu1 %v16215_v35  ;;  %v16237_v40 = vpop.eup %11802 }
 0xe14   :  { %7220 = vadd.xlane.f32.xlu0 %v16219_v5 }
 0xe15   :  { %7639 = vmax.xlane.f32.xlu1 %v16222_v10  ;;  %10862 = vmatmul.mubr.msk.bf16.gmra.mxu1 %vm172_vm0, %v17352_v16 }
 0xe16   :  { %10865 = vmatprep.mubr.msk.bf16.mxu1 %vm172_vm0, %v17354_v39 }
 0xe18   :  { %7641 = vmax.xlane.f32.xlu0 %v16229_v60 }
 0xe19   :  { %7214 = vadd.xlane.f32.xlu1 %v16233_v17 }
 0xe1c   :  { %7216 = vadd.xlane.f32.xlu0 %v16237_v40 }
 0xe1d   :  { %10866 = vmatmul.mubr.msk.bf16.gmra.mxu1 %vm172_vm0, %v17355_v6 }
 0xe1e   :  { %10869 = vmatprep.mubr.msk.bf16.mxu1 %vm172_vm0, %v17356_v51 }
 0xe25   :  { %10870 = vmatmul.mubr.msk.bf16.gmra.mxu1 %vm172_vm0, %v17357_v42 }
 0xe65   :  { %v16246_v62 = vpop.xlane.xlu1 %7667 }
 0xe69   :  { %v16248_v23 = vpop.xlane.xlu0 %7669  ;;  %v6618_v48 = vpop.xlane.xlu1 %6617 }
 0xe6a   :  { %v16250_v43 = vpop.f32.mrf.mxu0  ;;  %11804 = vrcp.f32 %v6618_v48 }
 0xe6b   :  { %17358 = vst [vmem:[#allocation26_spill] sm:$0xff] %v16250_v43 }
 0xe6c   :  { %v10619_v12 = vpop.f32.mrf.mxu0 }
 0xe6d   :  { %v6620_v1 = vpop.xlane.xlu0 %6619  ;;  %v16252_v52 = vpop.xlane.xlu1 %7663 }
 0xe6e   :  { %v6257_v57 = vpop.f32.mrf.mxu0  ;;  %11806 = vrcp.f32 %v6620_v1 }
 0xe70   :  { %v10620_v8 = vpop.f32.mrf.mxu0 }
 0xe71   :  { %v16254_v32 = vpop.xlane.xlu0 %7665  ;;  %v6614_v20 = vpop.xlane.xlu1 %6613 }
 0xe72   :  { %11808 = vrcp.f32 %v6614_v20 }
 0xe75   :  { %v6616_v25 = vpop.xlane.xlu0 %6615 }
 0xe76   :  { %v16256_v30 = vpop.xlane.xlu1 %7659  ;;  %11810 = vrcp.f32 %v6616_v25 }
 0xe77   :  { %v11805_v55 = vpop.eup %11804 }
 0xe78   :  { %v6663_v36 = vmul.f32 %v11805_v55, %v6618_v48 }
 0xe79   :  { %v16258_v59 = vpop.xlane.xlu0 %7661 }
 0xe7a   :  { %v7235_v0 = vpop.xlane.xlu1 %7234  ;;  %v6679_v19 = vsub.f32 2.0, %v6663_v36 }
 0xe7b   :  { %v11807_v37 = vpop.eup %11806  ;;  %11812 = vrcp.f32 %v7235_v0 }
 0xe7c   :  { %v6664_v3 = vmul.f32 %v11807_v37, %v6620_v1  ;;  %v6695_v16 = vmul.f32 %v11805_v55, %v6679_v19 }
 0xe7d   :  { %v7237_v29 = vpop.xlane.xlu0 %7236 }
 0xe7e   :  { %v16260_v31 = vpop.xlane.xlu1 %7655  ;;  %v6680_v39 = vsub.f32 2.0, %v6664_v3  ;;  %11814 = vrcp.f32 %v7237_v29  ;;  %v6711_v48 = vmul.f32 %v16064_v41, %v6695_v16 }
 0xe7f   :  { %v11809_v6 = vpop.eup %11808 }
 0xe80   :  { %v6696_v51 = vmul.f32 %v11807_v37, %v6680_v39  ;;  %v6661_v42 = vmul.f32 %v11809_v6, %v6614_v20 }
 0xe81   :  { %v16262_v12 = vpop.xlane.xlu0 %7657 }
 0xe82   :  { %v7231_v57 = vpop.xlane.xlu1 %7230  ;;  %v6712_v8 = vmul.f32 %v16070_v2, %v6696_v51  ;;  %v6677_v36 = vsub.f32 2.0, %v6661_v42 }
 0xe83   :  { %v11811_v43 = vpop.eup %11810  ;;  %11816 = vrcp.f32 %v7231_v57 }
 0xe84   :  { %v6662_v1 = vmul.f32 %v11811_v43, %v6616_v25  ;;  %v6726_v10 = vpack.c.bf16 %v6712_v8, %v6711_v48  ;;  %v6693_v55 = vmul.f32 %v11809_v6, %v6677_v36 }
 0xe85   :  { %v7233_v60 = vpop.xlane.xlu0 %7232 }
 0xe86   :  { %v16266_v13 = vpop.xlane.xlu1 %7651  ;;  %v6678_v19 = vsub.f32 2.0, %v6662_v1  ;;  %11818 = vrcp.f32 %v7233_v60  ;;  %10672 = vmatpush3.bf16.xpose.msra.mxu0 %v6726_v10  ;;  %v6709_v16 = vmul.f32 %v16085_v49, %v6693_v55  ;;  %v17360_v1 = vld [vmem:[#allocation38_spill] sm:$0xff] }
 0xe87   :  { %10673 = vmatprep.subr.bf16.mxu0 %v17103_v38 }
 0xe88   :  { %v11813_v20 = vpop.eup %11812  ;;  %v6694_v37 = vmul.f32 %v11811_v43, %v6678_v19  ;;  %v17359_v43 = vld [vmem:[#allocation51_spill] sm:$0xff] }
 0xe89   :  { %v16269_v3 = vpop.xlane.xlu0 %7653  ;;  %v7268_v41 = vmul.f32 %v11813_v20, %v7235_v0  ;;  %v327_v0 = vadd.f32 %v17360_v1, %v17359_v43 }
 0xe8a   :  { %v7227_v2 = vpop.xlane.xlu1 %7226  ;;  %v6710_v25 = vmul.f32 %v16093_v18, %v6694_v37 }
 0xe8b   :  { %v11815_v39 = vpop.eup %11814  ;;  %v7284_v51 = vsub.f32 2.0, %v7268_v41  ;;  %11820 = vrcp.f32 %v7227_v2 }
 0xe8c   :  { %v7269_v42 = vmul.f32 %v11815_v39, %v7237_v29  ;;  %v6725_v48 = vpack.c.bf16 %v6710_v25, %v6709_v16  ;;  %v6392_v25 = vpack.c.bf16 %v327_v0, %v327_v0 }
 0xe8d   :  { %v7229_v6 = vpop.xlane.xlu0 %7228  ;;  %v7300_v10 = vmul.f32 %v11813_v20, %v7284_v51 }
 0xe8e   :  { %v16273_v8 = vpop.xlane.xlu1 %7647  ;;  %v7285_v36 = vsub.f32 2.0, %v7269_v42  ;;  %11822 = vrcp.f32 %v7229_v6  ;;  %10674 = vmatpush3.bf16.xpose.msra.mxu0 %v6725_v48 }
 0xe8f   :  { %10717 = vmatprep.subr.bf16.mxu0 %v17103_v38  ;;  %v7316_v29 = vmul.f32 %v16116_v9, %v7300_v10 }
 0xe90   :  { %v11817_v49 = vpop.eup %11816  ;;  %v7301_v55 = vmul.f32 %v11815_v39, %v7285_v36 }
 0xe91   :  { %v16278_v18 = vpop.xlane.xlu0 %7649  ;;  %v7266_v19 = vmul.f32 %v11817_v49, %v7231_v57 }
 0xe92   :  { %v7223_v37 = vpop.xlane.xlu1 %7222  ;;  %v7317_v41 = vmul.f32 %v16125_v4, %v7301_v55 }
 0xe93   :  { %v11819_v16 = vpop.eup %11818  ;;  %v7282_v20 = vsub.f32 2.0, %v7266_v19  ;;  %11824 = vrcp.f32 %v7223_v37 }
 0xe94   :  { %v7267_v51 = vmul.f32 %v11819_v16, %v7233_v60  ;;  %v7325_v48 = vpack.c.bf16 %v7317_v41, %v7316_v29 }
 0xe95   :  { %v7225_v42 = vpop.xlane.xlu0 %7224  ;;  %10676 = vmatmul.mubr.bf16.vlgmr.msra.gmra.mxu0 %v6392_v25  ;;  %v7298_v43 = vmul.f32 %v11817_v49, %v7282_v20 }
 0xe96   :  { %v16282_v1 = vpop.xlane.xlu1 %7643  ;;  %v7283_v39 = vsub.f32 2.0, %v7267_v51  ;;  %11826 = vrcp.f32 %v7225_v42  ;;  %10718 = vmatpush3.bf16.xpose.msra.mxu0 %v7325_v48  ;;  %10733 = vmatprep.mubr.msk.bf16.mxu0 %vm12126_vm3, %v17103_v38 }
 0xe97   :  { %10719 = vmatprep.subr.bf16.mxu0 %v17103_v38  ;;  %v7314_v36 = vmul.f32 %v16144_v54, %v7298_v43 }
 0xe98   :  { %v11821_v9 = vpop.eup %11820  ;;  %v7299_v4 = vmul.f32 %v11819_v16, %v7283_v39 }
 0xe99   :  { %v16287_v57 = vpop.xlane.xlu0 %7645  ;;  %v7264_v10 = vmul.f32 %v11821_v9, %v7227_v2 }
 0xe9a   :  { %v7219_v60 = vpop.xlane.xlu1 %7218  ;;  %v7315_v0 = vmul.f32 %v16151_v24, %v7299_v4 }
 0xe9b   :  { %v11823_v55 = vpop.eup %11822  ;;  %v7280_v49 = vsub.f32 2.0, %v7264_v10  ;;  %11828 = vrcp.f32 %v7219_v60 }
 0xe9c   :  { %v7265_v19 = vmul.f32 %v11823_v55, %v7229_v6  ;;  %v7324_v41 = vpack.c.bf16 %v7315_v0, %v7314_v36 }
 0xe9d   :  { %v7221_v29 = vpop.xlane.xlu0 %7220  ;;  %v7296_v25 = vmul.f32 %v11821_v9, %v7280_v49 }
 0xe9e   :  { %v16291_v20 = vpop.xlane.xlu1 %7639  ;;  %v7281_v51 = vsub.f32 2.0, %v7265_v19  ;;  %11830 = vrcp.f32 %v7221_v29  ;;  %10720 = vmatpush3.bf16.xpose.msra.mxu0 %v7324_v41 }
 0xe9f   :  { %10721 = vmatprep.subr.bf16.mxu0 %v17103_v38  ;;  %v7312_v43 = vmul.f32 %v16168_v14, %v7296_v25 }
 0xea0   :  { %v11825_v2 = vpop.eup %11824  ;;  %v7297_v16 = vmul.f32 %v11823_v55, %v7281_v51 }
 0xea1   :  { %v16294_v48 = vpop.xlane.xlu0 %7641  ;;  %v7262_v54 = vmul.f32 %v11825_v2, %v7223_v37 }
 0xea2   :  { %v7215_v24 = vpop.xlane.xlu1 %7214  ;;  %v7313_v6 = vmul.f32 %v16175_v45, %v7297_v16 }
 0xea3   :  { %v11827_v39 = vpop.eup %11826  ;;  %v7278_v4 = vsub.f32 2.0, %v7262_v54  ;;  %11832 = vrcp.f32 %v7215_v24 }
 0xea4   :  { %v7263_v10 = vmul.f32 %v11827_v39, %v7225_v42  ;;  %v7323_v36 = vpack.c.bf16 %v7313_v6, %v7312_v43 }
 0xea5   :  { %v7217_v9 = vpop.xlane.xlu0 %7216  ;;  %v7294_v0 = vmul.f32 %v11825_v2, %v7278_v4 }
 0xea6   :  { %v7279_v49 = vsub.f32 2.0, %v7263_v10  ;;  %11834 = vrcp.f32 %v7217_v9  ;;  %10722 = vmatpush3.bf16.xpose.msra.mxu0 %v7323_v36 }
 0xea7   :  { %10723 = vmatprep.subr.bf16.mxu0 %v17103_v38  ;;  %v7310_v41 = vmul.f32 %v16193_v44, %v7294_v0 }
 0xea8   :  { %v11829_v55 = vpop.eup %11828  ;;  %v7295_v19 = vmul.f32 %v11827_v39, %v7279_v49 }
 0xea9   :  { %v7260_v37 = vmul.f32 %v11829_v55, %v7219_v60 }
 0xeaa   :  { %v7311_v14 = vmul.f32 %v16197_v33, %v7295_v19  ;;  %v17361_v19 = vld [vmem:[#allocation45_spill] sm:$0xff] }
 0xeab   :  { %v11831_v45 = vpop.eup %11830  ;;  %v7276_v25 = vsub.f32 2.0, %v7260_v37  ;;  %v7160_v37 = vsub.f32 %v17361_v19, %v15997_v15 }
 0xeac   :  { %v7261_v51 = vmul.f32 %v11831_v45, %v7221_v29  ;;  %v7322_v42 = vpack.c.bf16 %v7311_v14, %v7310_v41 }
 0xead   :  { %v16301_v16 = vpop.f32.mrf.mxu1  ;;  %v7292_v54 = vmul.f32 %v11829_v55, %v7276_v25  ;;  %v17362_v25 = vld [vmem:[#allocation25_spill] sm:$0xff] }
 0xeae   :  { %v7277_v2 = vsub.f32 2.0, %v7261_v51  ;;  %10724 = vmatpush3.bf16.xpose.msra.mxu0 %v7322_v42 }
 0xeaf   :  { %v16303_v43 = vpop.f32.mrf.mxu1  ;;  %10725 = vmatprep.subr.bf16.mxu0 %v17103_v38  ;;  %v7308_v33 = vmul.f32 %v16215_v35, %v7292_v54 }
 0xeb0   :  { %v11833_v6 = vpop.eup %11832  ;;  %v7293_v39 = vmul.f32 %v11831_v45, %v7277_v2 }
 0xeb1   :  { %v16306_v60 = vpop.f32.mrf.mxu1  ;;  %v7258_v44 = vmul.f32 %v11833_v6, %v7215_v24  ;;  %v7178_v24 = vmul.f32 1.442695, %v7160_v37 }
 0xeb2   :  { %v7309_v4 = vmul.f32 %v16219_v5, %v7293_v39  ;;  %v17363_v39 = vld [vmem:[#allocation54_spill] sm:$0xff] }
 0xeb3   :  { %v16310_v29 = vpop.f32.mrf.mxu1  ;;  %v11835_v10 = vpop.eup %11834  ;;  %v7274_v36 = vsub.f32 2.0, %v7258_v44  ;;  %11836 = vpow2.f32 %v7178_v24  ;;  %v7158_v44 = vsub.f32 %v17363_v39, %v16006_v47  ;;  %v7685_v47 = vsub.f32 %v16055_v56, %v16246_v62 }
 0xeb4   :  { %v7259_v0 = vmul.f32 %v11835_v10, %v7217_v9  ;;  %v7321_v55 = vpack.c.bf16 %v7309_v4, %v7308_v33  ;;  %v7161_v9 = vsub.f32 %v17362_v25, %v16002_v21 }
 0xeb5   :  { %v16312_v49 = vpop.f32.mrf.mxu1  ;;  %v7290_v41 = vmul.f32 %v11833_v6, %v7274_v36  ;;  %v8026_v36 = vld [vmem:[#allocation4 + $0x2f0] sm:$0xff]  ;;  %v7715_v25 = vmul.f32 1.442695, %v7685_v47 }
 0xeb6   :  { %v7275_v14 = vsub.f32 2.0, %v7259_v0  ;;  %10726 = vmatpush3.bf16.xpose.msra.mxu0 %v7321_v55  ;;  %v7180_v6 = vmul.f32 1.442695, %v7161_v9  ;;  %v8024_v9 = vld [vmem:[#allocation4 + $0x2e0] sm:$0xff] }
 0xeb7   :  { %v16316_v45 = vpop.f32.mrf.mxu1  ;;  %10727 = vmatprep.subr.bf16.mxu0 %v17103_v38  ;;  %v7306_v51 = vmul.f32 %v16233_v17, %v7290_v41  ;;  %v7174_v17 = vmul.f32 1.442695, %v7158_v44  ;;  %v8027_v41 = vld [vmem:[#allocation4 + $0x2f8] sm:$0xff]  ;;  %v7684_v44 = vsub.f32 %v16078_v50, %v16254_v32 }
 0xeb8   :  { %v7291_v35 = vmul.f32 %v11835_v10, %v7275_v14  ;;  %11838 = vpow2.f32 %v7180_v6 }
 0xeb9   :  { %v16319_v5 = vpop.f32.mrf.mxu1  ;;  %11840 = vpow2.f32 %v7174_v17 }
 0xeba   :  { %v7307_v42 = vmul.f32 %v16237_v40, %v7291_v35  ;;  %v17364_v40 = vld [vmem:[#allocation21_spill] sm:$0xff] }
 0xebb   :  { %v16325_v54 = vpop.f32.mrf.mxu1  ;;  %v7159_v4 = vsub.f32 %v17364_v40, %v16009_v28  ;;  %v7686_v28 = vsub.f32 %v16062_v53, %v16248_v23  ;;  %v7683_v53 = vsub.f32 %v16068_v27, %v16252_v52  ;;  %v8025_v23 = vld [vmem:[#allocation4 + $0x2e8] sm:$0xff]  ;;  %v16368_v40 = vld [vmem:[%s16940_s3 + $0x3] ss:$0 sm:$0xff] }
 0xebc   :  { %v7320_v2 = vpack.c.bf16 %v7307_v42, %v7306_v51 }
 0xebd   :  { %v16327_v15 = vpop.f32.mrf.mxu1  ;;  %v7176_v55 = vmul.f32 1.442695, %v7159_v4  ;;  %v7717_v62 = vmul.f32 1.442695, %v7686_v28  ;;  %v7711_v27 = vmul.f32 1.442695, %v7683_v53  ;;  %v7681_v28 = vsub.f32 %v16098_v7, %v16256_v30 }
 0xebe   :  { %10728 = vmatpush3.bf16.xpose.msra.mxu0 %v7320_v2  ;;  %v17365_v53 = vld [vmem:[#allocation11_spill] sm:$0xff]  ;;  %v7682_v7 = vsub.f32 %v16112_v63, %v16258_v59 }
 0xebf   :  { %v16331_v33 = vpop.f32.mrf.mxu1  ;;  %10729 = vmatprep.subr.bf16.mxu0 %v17103_v38  ;;  %11842 = vpow2.f32 %v7176_v55 }
 0xec0   :  { %v16349_v24 = vpop.eup %11836  ;;  %11844 = vpow2.f32 %v7715_v25 }
 0xec1   :  { %v16334_v21 = vpop.f32.mrf.mxu1  ;;  %11846 = vpow2.f32 %v7717_v62 }
 0xec2   :  { %11848 = vpow2.f32 %v7711_v27 }
 0xec3   :  { %v16338_v10 = vpop.f32.mrf.mxu1 }
 0xec5   :  { %v10831_v0 = vpop.f32.mrf.mxu1  ;;  %v16355_v2 = vpop.eup %11838 }
 0xec6   :  { %v16340_v19 = vadd.f32 %v10831_v0, %v8026_v36  ;;  %v16370_v4 = vpop.eup %11840  ;;  %v8022_v0 = vld [vmem:[#allocation4 + $0x2d0] sm:$0xff] }
 0xec7   :  { %v8137_v37 = vpop.f32.mrf.mxu1  ;;  %v16383_v25 = vadd.f32 %v16327_v15, %v8022_v0  ;;  %v7707_v15 = vmul.f32 1.442695, %v7681_v28 }
 0xec8   :  { %8180 = vmax.xlane.f32.xlu1 %v16340_v19  ;;  %v16353_v42 = vadd.f32 %v8137_v37, %v8024_v9  ;;  %v7713_v37 = vmul.f32 1.442695, %v7684_v44  ;;  %v8023_v9 = vld [vmem:[#allocation4 + $0x2d8] sm:$0xff] }
 0xec9   :  { %v10832_v14 = vpop.f32.mrf.mxu1  ;;  %v16396_v30 = vadd.f32 %v16334_v21, %v8023_v9  ;;  %v7709_v21 = vmul.f32 1.442695, %v7682_v7  ;;  %v8018_v7 = vld [vmem:[#allocation4 + $0x2b0] sm:$0xff] }
 0xeca   :  { %v16347_v35 = vadd.f32 %v10832_v14, %v8027_v41  ;;  %11850 = vpow2.f32 %v7713_v37 }
 0xecb   :  { %v8140_v51 = vpop.f32.mrf.mxu1  ;;  %11852 = vpow2.f32 %v7707_v15 }
 0xecc   :  { %8182 = vmax.xlane.f32.xlu0 %v16347_v35  ;;  %7210 = vadd.xlane.f32.xlu1 %v16349_v24  ;;  %v16363_v17 = vadd.f32 %v8140_v51, %v8025_v23  ;;  %v16378_v14 = vpop.eup %11842  ;;  %v17366_v23 = vld [vmem:[#allocation59_spill] sm:$0xff]  ;;  %11854 = vpow2.f32 %v7709_v21 }
 0xecd   :  { %v10859_v56 = vpop.f32.mrf.mxu1  ;;  %v16399_v0 = vpop.eup %11844 }
 0xece   :  { %v8459_v50 = vadd.f32 %v10859_v56, %v16368_v40  ;;  %v17367_v56 = vld [vmem:[#allocation47_spill] sm:$0xff]  ;;  %v16408_v9 = vpop.eup %11846 }
 0xecf   :  { %v8450_v6 = vpop.f32.mrf.mxu1 }
 0xed0   :  { %7212 = vadd.xlane.f32.xlu0 %v16355_v2  ;;  %8176 = vmax.xlane.f32.xlu1 %v16353_v42  ;;  %v8451_v55 = vadd.f32 %v16368_v40, %v8450_v6  ;;  %v8930_v6 = vpack.c.bf16 %v17366_v23, %v17365_v53  ;;  %v7679_v53 = vsub.f32 %v16130_v11, %v16260_v31  ;;  %v8021_v23 = vld [vmem:[#allocation4 + $0x2c8] sm:$0xff] }
 0xed1   :  { %v10860_v39 = vpop.f32.mrf.mxu1  ;;  %v16422_v11 = vadd.f32 %v16338_v10, %v8021_v23 }
 0xed2   :  { %v8462_v52 = vadd.f32 %v10860_v39, %v16368_v40  ;;  %v17368_v39 = vld [vmem:[#allocation18_spill] sm:$0xff]  ;;  %v7703_v31 = vmul.f32 1.442695, %v7679_v53 }
 0xed3   :  { %v8453_v36 = vpop.f32.mrf.mxu1  ;;  %v8927_v44 = vpack.c.bf16 %v17368_v39, %v17367_v56  ;;  %v7680_v39 = vsub.f32 %v16141_v22, %v16262_v12  ;;  %v8016_v53 = vld [vmem:[#allocation4 + $0x2a0] sm:$0xff] }
 0xed4   :  { %v8454_v47 = vadd.f32 %v16368_v40, %v8453_v36  ;;  %8178 = vmax.xlane.f32.xlu0 %v16363_v17  ;;  %7206 = vadd.xlane.f32.xlu1 %v16370_v4  ;;  %v8514_v51 = vpack.c.bf16 %v8462_v52, %v8459_v50  ;;  %11856 = vpow2.f32 %v7703_v31  ;;  %v8017_v31 = vld [vmem:[#allocation4 + $0x2a8] sm:$0xff] }
 0xed5   :  { %v10863_v32 = vpop.f32.mrf.mxu1  ;;  %v7705_v12 = vmul.f32 1.442695, %v7680_v39  ;;  %v16461_v39 = vadd.f32 %v16316_v45, %v8016_v53 }
 0xed6   :  { %v8513_v41 = vpack.c.bf16 %v8454_v47, %v8451_v55  ;;  %v17369_v55 = vld [vmem:[#allocation52_spill] sm:$0xff]  ;;  %v17370_v47 = vld [vmem:[#allocation17_spill] sm:$0xff]  ;;  %v8475_v63 = vadd.f32 %v10863_v32, %v16368_v40 }
 0xed7   :  { %v8466_v62 = vpop.f32.mrf.mxu1  ;;  %v8926_v50 = vpack.c.bf16 %v17370_v47, %v17369_v55  ;;  %v7677_v47 = vsub.f32 %v16156_v26, %v16266_v13  ;;  %11858 = vpow2.f32 %v7705_v12 }
 0xed8   :  { %10875 = vmatprep.mubr.msk.bf16.mxu1 %vm591_vm2, %v8513_v41  ;;  %7208 = vadd.xlane.f32.xlu0 %v16378_v14  ;;  %v8020_v41 = vld [vmem:[#allocation4 + $0x2c0] sm:$0xff]  ;;  %v8467_v37 = vadd.f32 %v16368_v40, %v8466_v62 }
 0xed9   :  { %8172 = vmax.xlane.f32.xlu1 %v16383_v25  ;;  %v10864_v27 = vpop.f32.mrf.mxu1  ;;  %10876 = vmatmul.mubr.msk.bf16.vlgmr.msra.gmra.mxu1 %vm591_vm2, %v8514_v51  ;;  %v16413_v62 = vadd.f32 %v16331_v33, %v8020_v41  ;;  %v8019_v41 = vld [vmem:[#allocation4 + $0x2b8] sm:$0xff]  ;;  %v7699_v13 = vmul.f32 1.442695, %v7677_v47 }
 0xeda   :  { %8987 = vmatpush1.bf16.msra.mxu1 %v8930_v6  ;;  %v8478_v52 = vadd.f32 %v10864_v27, %v16368_v40  ;;  %v16425_v27 = vpop.eup %11848  ;;  %v16446_v26 = vadd.f32 %v16319_v5, %v8019_v41 }
 0xedb   :  { %8988 = vmatprep.subr.bf16.mxu1 %v8927_v44  ;;  %v8469_v36 = vpop.f32.mrf.mxu1  ;;  %v16432_v55 = vpop.eup %11850  ;;  %11860 = vpow2.f32 %v7699_v13 }
 0xedc   :  { %v8470_v51 = vadd.f32 %v16368_v40, %v8469_v36  ;;  %8174 = vmax.xlane.f32.xlu0 %v16396_v30  ;;  %v8516_v6 = vpack.c.bf16 %v8478_v52, %v8475_v63 }
 0xedd   :  { %7747 = vadd.xlane.f32.xlu1 %v16399_v0  ;;  %v10867_v59 = vpop.f32.mrf.mxu1 }
 0xede   :  { %v8515_v28 = vpack.c.bf16 %v8470_v51, %v8467_v37  ;;  %8989 = vmatpush1.bf16.msra.mxu1 %v8926_v50  ;;  %v8491_v36 = vadd.f32 %v10867_v59, %v16368_v40  ;;  %v16437_v50 = vadd.f32 %v16312_v49, %v8018_v7  ;;  %v7678_v59 = vsub.f32 %v16165_v58, %v16269_v3  ;;  %v8014_v7 = vld [vmem:[#allocation4 + $0x290] sm:$0xff] }
 0xedf   :  { %v8482_v56 = vpop.f32.mrf.mxu1 }
 0xee0   :  { %10879 = vmatprep.mubr.msk.bf16.mxu1 %vm591_vm2, %v8515_v28  ;;  %7749 = vadd.xlane.f32.xlu0 %v16408_v9  ;;  %v8483_v15 = vadd.f32 %v16368_v40, %v8482_v56  ;;  %v16449_v28 = vpop.eup %11852  ;;  %v7701_v58 = vmul.f32 1.442695, %v7678_v59 }
 0xee1   :  { %8168 = vmax.xlane.f32.xlu1 %v16413_v62  ;;  %v10868_v32 = vpop.f32.mrf.mxu1  ;;  %10880 = vmatmul.mubr.msk.bf16.gmra.mxu1 %vm591_vm2, %v8516_v6  ;;  %v16456_v5 = vpop.eup %11854 }
 0xee2   :  { %v8494_v33 = vadd.f32 %v10868_v32, %v16368_v40  ;;  %v7675_v32 = vsub.f32 %v16180_v61, %v16273_v8  ;;  %11862 = vpow2.f32 %v7701_v58  ;;  %v17372_v61 = vmov 0   ;;  %v16473_v45 = vpop.eup %11856 }
 0xee3   :  { %v8485_v44 = vpop.f32.mrf.mxu1 }
 0xee4   :  { %v8486_v52 = vadd.f32 %v16368_v40, %v8485_v44  ;;  %8170 = vmax.xlane.f32.xlu0 %v16422_v11  ;;  %v8518_v37 = vpack.c.bf16 %v8494_v33, %v8491_v36  ;;  %v16470_v44 = vadd.f32 %v16325_v54, %v8017_v31  ;;  %v7695_v8 = vmul.f32 1.442695, %v7675_v32 }
 0xee5   :  { %7743 = vadd.xlane.f32.xlu1 %v16425_v27  ;;  %v10871_v22 = vpop.f32.mrf.mxu1  ;;  %v16480_v36 = vadd.f32 %v16301_v16, %v8014_v7 }
 0xee6   :  { %v8517_v10 = vpack.c.bf16 %v8486_v52, %v8483_v15  ;;  %v8507_v56 = vadd.f32 %v10871_v22, %v16368_v40  ;;  %17371 = vst [vmem:[#allocation24_spill] sm:$0xff] %v16470_v44  ;;  %v16477_v52 = vpop.eup %11858  ;;  %11864 = vpow2.f32 %v7695_v8  ;;  %v8012_v22 = vld [vmem:[#allocation4 + $0x280] sm:$0xff] }
 0xee7   :  { %v8498_v51 = vpop.f32.mrf.mxu1  ;;  %17373 = vst [vmem:[#allocation15_spill] sm:$0xff] %v16480_v36  ;;  %v16494_v16 = vadd.f32 %v16303_v43, %v8012_v22 }
 0xee8   :  { %10883 = vmatprep.mubr.msk.bf16.mxu1 %vm591_vm2, %v8517_v10  ;;  %7745 = vadd.xlane.f32.xlu0 %v16432_v55  ;;  %v8499_v23 = vadd.f32 %v16368_v40, %v8498_v51  ;;  %v16487_v54 = vpop.eup %11860  ;;  %v8013_v10 = vld [vmem:[#allocation4 + $0x288] sm:$0xff] }
 0xee9   :  { %8164 = vmax.xlane.f32.xlu1 %v16437_v50  ;;  %v10872_v63 = vpop.f32.mrf.mxu1  ;;  %10884 = vmatmul.mubr.msk.bf16.gmra.mxu1 %vm591_vm2, %v8518_v37  ;;  %17375 = vst [vmem:[#allocation50_spill] sm:$0xff] %v16494_v16 }
 0xeea   :  { %v8510_v49 = vadd.f32 %v10872_v63, %v16368_v40 }
 0xeeb   :  { %v8501_v21 = vpop.f32.mrf.mxu1 }
 0xeec   :  { %v8502_v6 = vadd.f32 %v16368_v40, %v8501_v21  ;;  %8166 = vmax.xlane.f32.xlu0 %v16446_v26  ;;  %v8520_v33 = vpack.c.bf16 %v8510_v49, %v8507_v56  ;;  %v7676_v40 = vsub.f32 %v16189_v46, %v16278_v18  ;;  %v8015_v46 = vld [vmem:[#allocation4 + $0x298] sm:$0xff] }
 0xeed   :  { %7739 = vadd.xlane.f32.xlu1 %v16449_v28  ;;  %v16485_v18 = vadd.f32 %v16306_v60, %v8015_v46  ;;  %v16499_v60 = vadd.f32 %v16310_v29, %v8013_v10 }
 0xeee   :  { %v8519_v3 = vpack.c.bf16 %v8502_v6, %v8499_v23  ;;  %v7697_v15 = vmul.f32 1.442695, %v7676_v40 }
 0xeef   :  { %17374 = vst [vmem:[#allocation34_spill] sm:$0xff] %v16485_v18  ;;  %v16491_v12 = vpop.eup %11862  ;;  %17376 = vst [vmem:[#allocation13_spill] sm:$0xff] %v16499_v60 }
 0xef0   :  { %10887 = vmatprep.mubr.msk.bf16.mxu1 %vm591_vm2, %v8519_v3  ;;  %7741 = vadd.xlane.f32.xlu0 %v16456_v5  ;;  %11866 = vpow2.f32 %v7697_v15 }
 0xef1   :  { %8160 = vmax.xlane.f32.xlu1 %v16461_v39  ;;  %10888 = vmatmul.mubr.msk.bf16.gmra.mxu1 %vm591_vm2, %v8520_v33 }
 0xef2   :  { %9006 = vmatprep.mubr.bf16.mxu1 %v17372_v61 }
 0xef3   :  { %v16501_v47 = vpop.eup %11864 }
 0xef4   :  { %8162 = vmax.xlane.f32.xlu0 %v16470_v44 }
 0xef5   :  { %7735 = vadd.xlane.f32.xlu1 %v16473_v45 }
 0xef8   :  { %7737 = vadd.xlane.f32.xlu0 %v16477_v52 }
 0xef9   :  { %8156 = vmax.xlane.f32.xlu1 %v16480_v36 }
 0xefc   :  { %8158 = vmax.xlane.f32.xlu0 %v16485_v18 }
 0xefd   :  { %7731 = vadd.xlane.f32.xlu1 %v16487_v54  ;;  %v16505_v41 = vpop.eup %11866 }
 0xf00   :  { %7733 = vadd.xlane.f32.xlu0 %v16491_v12 }
 0xf01   :  { %8152 = vmax.xlane.f32.xlu1 %v16494_v16 }
 0xf04   :  { %8154 = vmax.xlane.f32.xlu0 %v16499_v60 }
 0xf05   :  { %7727 = vadd.xlane.f32.xlu1 %v16501_v47 }
 0xf08   :  { %7729 = vadd.xlane.f32.xlu0 %v16505_v41 }
 0xf51   :  { %v16508_v43 = vpop.xlane.xlu1 %8180 }
 0xf55   :  { %v16510_v37 = vpop.xlane.xlu0 %8182  ;;  %v7211_v51 = vpop.xlane.xlu1 %7210 }
 0xf56   :  { %v16512_v63 = vpop.f32.mrf.mxu0  ;;  %11868 = vrcp.f32 %v7211_v51 }
 0xf57   :  { %17377 = vst [vmem:[#allocation48_spill] sm:$0xff] %v16512_v63 }
 0xf58   :  { %v10677_v29 = vpop.f32.mrf.mxu0 }
 0xf59   :  { %v7213_v59 = vpop.xlane.xlu0 %7212  ;;  %v16514_v13 = vpop.xlane.xlu1 %8176 }
 0xf5a   :  { %v6770_v49 = vpop.f32.mrf.mxu0  ;;  %11870 = vrcp.f32 %v7213_v59 }
 0xf5c   :  { %v10678_v21 = vpop.f32.mrf.mxu0 }
 0xf5d   :  { %v16516_v53 = vpop.xlane.xlu0 %8178  ;;  %v7207_v23 = vpop.xlane.xlu1 %7206 }
 0xf5e   :  { %11872 = vrcp.f32 %v7207_v23 }
 0xf61   :  { %v7209_v6 = vpop.xlane.xlu0 %7208 }
 0xf62   :  { %v16518_v56 = vpop.xlane.xlu1 %8172  ;;  %11874 = vrcp.f32 %v7209_v6 }
 0xf63   :  { %v11869_v58 = vpop.eup %11868 }
 0xf64   :  { %v7256_v3 = vmul.f32 %v11869_v58, %v7211_v51 }
 0xf65   :  { %v16520_v32 = vpop.xlane.xlu0 %8174 }
 0xf66   :  { %v7748_v31 = vpop.xlane.xlu1 %7747  ;;  %v7272_v33 = vsub.f32 2.0, %v7256_v3 }
 0xf67   :  { %v11871_v40 = vpop.eup %11870  ;;  %11876 = vrcp.f32 %v7748_v31 }
 0xf68   :  { %v7257_v8 = vmul.f32 %v11871_v40, %v7213_v59  ;;  %v7288_v46 = vmul.f32 %v11869_v58, %v7272_v33 }
 0xf69   :  { %v7750_v7 = vpop.xlane.xlu0 %7749 }
 0xf6a   :  { %v16522_v15 = vpop.xlane.xlu1 %8168  ;;  %v7273_v22 = vsub.f32 2.0, %v7257_v8  ;;  %11878 = vrcp.f32 %v7750_v7  ;;  %v7304_v51 = vmul.f32 %v16349_v24, %v7288_v46 }
 0xf6b   :  { %v11873_v10 = vpop.eup %11872 }
 0xf6c   :  { %v7289_v29 = vmul.f32 %v11871_v40, %v7273_v22  ;;  %v7254_v49 = vmul.f32 %v11873_v10, %v7207_v23 }
 0xf6d   :  { %v16524_v21 = vpop.xlane.xlu0 %8170 }
 0xf6e   :  { %v7744_v63 = vpop.xlane.xlu1 %7743  ;;  %v7305_v60 = vmul.f32 %v16355_v2, %v7289_v29  ;;  %v7270_v3 = vsub.f32 2.0, %v7254_v49 }
 0xf6f   :  { %v11875_v16 = vpop.eup %11874  ;;  %11880 = vrcp.f32 %v7744_v63 }
 0xf70   :  { %v7255_v59 = vmul.f32 %v11875_v16, %v7209_v6  ;;  %v7319_v36 = vpack.c.bf16 %v7305_v60, %v7304_v51  ;;  %v7286_v58 = vmul.f32 %v11873_v10, %v7270_v3 }
 0xf71   :  { %v7746_v18 = vpop.xlane.xlu0 %7745 }
 0xf72   :  { %v16528_v44 = vpop.xlane.xlu1 %8164  ;;  %v7271_v33 = vsub.f32 2.0, %v7255_v59  ;;  %11882 = vrcp.f32 %v7746_v18  ;;  %10730 = vmatpush3.bf16.xpose.msra.mxu0 %v7319_v36  ;;  %v7302_v46 = vmul.f32 %v16370_v4, %v7286_v58  ;;  %v17379_v59 = vld [vmem:[#allocation33_spill] sm:$0xff] }
 0xf73   :  { %10731 = vmatprep.subr.bf16.mxu0 %v17103_v38 }
 0xf74   :  { %v11877_v23 = vpop.eup %11876  ;;  %v7287_v40 = vmul.f32 %v11875_v16, %v7271_v33  ;;  %v17378_v16 = vld [vmem:[#allocation42_spill] sm:$0xff] }
 0xf75   :  { %v16531_v8 = vpop.xlane.xlu0 %8166  ;;  %v7781_v24 = vmul.f32 %v11877_v23, %v7748_v31  ;;  %v315_v31 = vadd.f32 %v17379_v59, %v17378_v16 }
 0xf76   :  { %v7740_v2 = vpop.xlane.xlu1 %7739  ;;  %v7303_v6 = vmul.f32 %v16378_v14, %v7287_v40 }
 0xf77   :  { %v11879_v22 = vpop.eup %11878  ;;  %v7797_v60 = vsub.f32 2.0, %v7781_v24  ;;  %11884 = vrcp.f32 %v7740_v2 }
 0xf78   :  { %v7782_v29 = vmul.f32 %v11879_v22, %v7750_v7  ;;  %v7318_v49 = vpack.c.bf16 %v7303_v6, %v7302_v46  ;;  %v6985_v6 = vpack.c.bf16 %v315_v31, %v315_v31 }
 0xf79   :  { %v7742_v10 = vpop.xlane.xlu0 %7741  ;;  %v7813_v36 = vmul.f32 %v11877_v23, %v7797_v60 }
 0xf7a   :  { %v16535_v51 = vpop.xlane.xlu1 %8160  ;;  %v7798_v3 = vsub.f32 2.0, %v7782_v29  ;;  %11886 = vrcp.f32 %v7742_v10  ;;  %10732 = vmatpush3.bf16.xpose.msra.mxu0 %v7318_v49 }
 0xf7b   :  { %10775 = vmatprep.subr.bf16.mxu0 %v17103_v38  ;;  %v7829_v7 = vmul.f32 %v16399_v0, %v7813_v36 }
 0xf7c   :  { %v11881_v4 = vpop.eup %11880  ;;  %v7814_v58 = vmul.f32 %v11879_v22, %v7798_v3 }
 0xf7d   :  { %v16540_v14 = vpop.xlane.xlu0 %8162  ;;  %v7779_v33 = vmul.f32 %v11881_v4, %v7744_v63 }
 0xf7e   :  { %v7736_v40 = vpop.xlane.xlu1 %7735  ;;  %v7830_v24 = vmul.f32 %v16408_v9, %v7814_v58 }
 0xf7f   :  { %v11883_v46 = vpop.eup %11882  ;;  %v7795_v23 = vsub.f32 2.0, %v7779_v33  ;;  %11888 = vrcp.f32 %v7736_v40 }
 0xf80   :  { %v7780_v60 = vmul.f32 %v11883_v46, %v7746_v18  ;;  %v7838_v49 = vpack.c.bf16 %v7830_v24, %v7829_v7 }
 0xf81   :  { %v7738_v29 = vpop.xlane.xlu0 %7737  ;;  %10734 = vmatmul.mubr.bf16.vlgmr.msra.gmra.mxu0 %v6985_v6  ;;  %v7811_v59 = vmul.f32 %v11881_v4, %v7795_v23 }
 0xf82   :  { %v16544_v16 = vpop.xlane.xlu1 %8156  ;;  %v7796_v22 = vsub.f32 2.0, %v7780_v60  ;;  %11890 = vrcp.f32 %v7738_v29  ;;  %10776 = vmatpush3.bf16.xpose.msra.mxu0 %v7838_v49  ;;  %10791 = vmatprep.mubr.msk.bf16.mxu0 %vm12126_vm3, %v17103_v38 }
 0xf83   :  { %10777 = vmatprep.subr.bf16.mxu0 %v17103_v38  ;;  %v7827_v3 = vmul.f32 %v16425_v27, %v7811_v59 }
 0xf84   :  { %v11885_v0 = vpop.eup %11884  ;;  %v7812_v9 = vmul.f32 %v11883_v46, %v7796_v22 }
 0xf85   :  { %v16549_v63 = vpop.xlane.xlu0 %8158  ;;  %v7777_v36 = vmul.f32 %v11885_v0, %v7740_v2 }
 0xf86   :  { %v7732_v18 = vpop.xlane.xlu1 %7731  ;;  %v7828_v31 = vmul.f32 %v16432_v55, %v7812_v9 }
 0xf87   :  { %v11887_v58 = vpop.eup %11886  ;;  %v7793_v4 = vsub.f32 2.0, %v7777_v36  ;;  %11892 = vrcp.f32 %v7732_v18 }
 0xf88   :  { %v7778_v33 = vmul.f32 %v11887_v58, %v7742_v10  ;;  %v7837_v24 = vpack.c.bf16 %v7828_v31, %v7827_v3 }
 0xf89   :  { %v7734_v7 = vpop.xlane.xlu0 %7733  ;;  %v7809_v6 = vmul.f32 %v11885_v0, %v7793_v4 }
 0xf8a   :  { %v16553_v23 = vpop.xlane.xlu1 %8152  ;;  %v7794_v60 = vsub.f32 2.0, %v7778_v33  ;;  %11894 = vrcp.f32 %v7734_v7  ;;  %10778 = vmatpush3.bf16.xpose.msra.mxu0 %v7837_v24 }
 0xf8b   :  { %10779 = vmatprep.subr.bf16.mxu0 %v17103_v38  ;;  %v7825_v59 = vmul.f32 %v16449_v28, %v7809_v6 }
 0xf8c   :  { %v11889_v2 = vpop.eup %11888  ;;  %v7810_v46 = vmul.f32 %v11887_v58, %v7794_v60 }
 0xf8d   :  { %v16556_v49 = vpop.xlane.xlu0 %8154  ;;  %v7775_v27 = vmul.f32 %v11889_v2, %v7736_v40 }
 0xf8e   :  { %v7728_v55 = vpop.xlane.xlu1 %7727  ;;  %v7826_v10 = vmul.f32 %v16456_v5, %v7810_v46 }
 0xf8f   :  { %v11891_v22 = vpop.eup %11890  ;;  %v7791_v9 = vsub.f32 2.0, %v7775_v27  ;;  %11896 = vrcp.f32 %v7728_v55 }
 0xf90   :  { %v7776_v36 = vmul.f32 %v11891_v22, %v7738_v29  ;;  %v7836_v3 = vpack.c.bf16 %v7826_v10, %v7825_v59 }
 0xf91   :  { %v7730_v0 = vpop.xlane.xlu0 %7729  ;;  %v7807_v31 = vmul.f32 %v11889_v2, %v7791_v9 }
 0xf92   :  { %v7792_v4 = vsub.f32 2.0, %v7776_v36  ;;  %11898 = vrcp.f32 %v7730_v0  ;;  %10780 = vmatpush3.bf16.xpose.msra.mxu0 %v7836_v3 }
 0xf93   :  { %10781 = vmatprep.subr.bf16.mxu0 %v17103_v38  ;;  %v7823_v24 = vmul.f32 %v16473_v45, %v7807_v31 }
 0xf94   :  { %v11893_v58 = vpop.eup %11892  ;;  %v7808_v33 = vmul.f32 %v11891_v22, %v7792_v4 }
 0xf95   :  { %v7773_v40 = vmul.f32 %v11893_v58, %v7732_v18 }
 0xf96   :  { %v7824_v28 = vmul.f32 %v16477_v52, %v7808_v33  ;;  %v7673_v33 = vsub.f32 %v16200_v34, %v16282_v1 }
 0xf97   :  { %v11895_v5 = vpop.eup %11894  ;;  %v7789_v6 = vsub.f32 2.0, %v7773_v40 }
 0xf98   :  { %v7774_v60 = vmul.f32 %v11895_v5, %v7734_v7  ;;  %v7835_v29 = vpack.c.bf16 %v7824_v28, %v7823_v24 }
 0xf99   :  { %v16563_v46 = vpop.f32.mrf.mxu1  ;;  %v7805_v27 = vmul.f32 %v11893_v58, %v7789_v6 }
 0xf9a   :  { %v7790_v2 = vsub.f32 2.0, %v7774_v60  ;;  %10782 = vmatpush3.bf16.xpose.msra.mxu0 %v7835_v29 }
 0xf9b   :  { %v16565_v59 = vpop.f32.mrf.mxu1  ;;  %10783 = vmatprep.subr.bf16.mxu0 %v17103_v38  ;;  %v7821_v52 = vmul.f32 %v16487_v54, %v7805_v27 }
 0xf9c   :  { %v11897_v10 = vpop.eup %11896  ;;  %v7806_v22 = vmul.f32 %v11895_v5, %v7790_v2  ;;  %v17380_v5 = vld [vmem:[#allocation16_spill] sm:$0xff]  ;;  %v17381_v2 = vld [vmem:[#allocation30_spill] sm:$0xff] }
 0xf9d   :  { %v16568_v18 = vpop.f32.mrf.mxu1  ;;  %v7771_v45 = vmul.f32 %v11897_v10, %v7728_v55  ;;  %v7691_v55 = vmul.f32 1.442695, %v7673_v33  ;;  %v8540_v33 = vld [vmem:[#allocation4 + $0x3f8] sm:$0xff] }
 0xf9e   :  { %v7822_v9 = vmul.f32 %v16491_v12, %v7806_v22 }
 0xf9f   :  { %v16572_v7 = vpop.f32.mrf.mxu1  ;;  %v11899_v36 = vpop.eup %11898  ;;  %v7787_v3 = vsub.f32 2.0, %v7771_v45  ;;  %11900 = vpow2.f32 %v7691_v55 }
 0xfa0   :  { %v7772_v31 = vmul.f32 %v11899_v36, %v7730_v0  ;;  %v7834_v58 = vpack.c.bf16 %v7822_v9, %v7821_v52  ;;  %v7674_v0 = vsub.f32 %v17380_v5, %v16287_v57  ;;  %v8539_v9 = vld [vmem:[#allocation4 + $0x3f0] sm:$0xff]  ;;  %v8537_v5 = vld [vmem:[#allocation4 + $0x3e0] sm:$0xff] }
 0xfa1   :  { %v16574_v4 = vpop.f32.mrf.mxu1  ;;  %v7803_v40 = vmul.f32 %v11897_v10, %v7787_v3  ;;  %v7671_v10 = vsub.f32 %v17381_v2, %v16291_v20 }
 0xfa2   :  { %v7788_v24 = vsub.f32 2.0, %v7772_v31  ;;  %10784 = vmatpush3.bf16.xpose.msra.mxu0 %v7834_v58  ;;  %v7693_v27 = vmul.f32 1.442695, %v7674_v0  ;;  %v8198_v31 = vsub.f32 %v16340_v19, %v16508_v43  ;;  %v8196_v43 = vsub.f32 %v16353_v42, %v16514_v13  ;;  %v8535_v42 = vld [vmem:[#allocation4 + $0x3d0] sm:$0xff] }
 0xfa3   :  { %v16578_v28 = vpop.f32.mrf.mxu1  ;;  %10785 = vmatprep.subr.bf16.mxu0 %v17103_v38  ;;  %v7819_v6 = vmul.f32 %v16501_v47, %v7803_v40  ;;  %v7687_v57 = vmul.f32 1.442695, %v7671_v10  ;;  %v17382_v47 = vld [vmem:[#allocation55_spill] sm:$0xff]  ;;  %v8194_v10 = vsub.f32 %v16383_v25, %v16518_v56  ;;  %v8192_v56 = vsub.f32 %v16413_v62, %v16522_v15  ;;  %v8531_v62 = vld [vmem:[#allocation4 + $0x3b0] sm:$0xff]  ;;  %v11018_v15 = vld [vmem:[%s16944_s7] sm:$0xff]  }
 0xfa4   :  { %v7804_v54 = vmul.f32 %v11899_v36, %v7788_v24  ;;  %11902 = vpow2.f32 %v7693_v27  ;;  %v7672_v52 = vsub.f32 %v17382_v47, %v16294_v48  ;;  %v8228_v24 = vmul.f32 1.442695, %v8198_v31  ;;  %9531 = vmatmul.mubr.msk.bf16.vlgmr.msra.gmra.mxu1 %vm172_vm0, %v11018_v15 }
 0xfa5   :  { %v16581_v12 = vpop.f32.mrf.mxu1  ;;  %11904 = vpow2.f32 %v7687_v57  ;;  %v8199_v48 = vsub.f32 %v16347_v35, %v16510_v37  ;;  %v8538_v35 = vld [vmem:[#allocation4 + $0x3e8] sm:$0xff]  ;;  %v8224_v37 = vmul.f32 1.442695, %v8196_v43  ;;  %9016 = vmatprep.mubr.bf16.mxu1 %v17372_v61  ;;  %v8188_v43 = vsub.f32 %v16461_v39, %v16535_v51 }
 0xfa6   :  { %v7820_v60 = vmul.f32 %v16505_v41, %v7804_v54  ;;  %v7689_v3 = vmul.f32 1.442695, %v7672_v52  ;;  %v8536_v52 = vld [vmem:[#allocation4 + $0x3d8] sm:$0xff]  ;;  %v17384_v39 = vld [vmem:[#allocation15_spill] sm:$0xff] }
 0xfa7   :  { %v16587_v29 = vpop.f32.mrf.mxu1  ;;  %v8230_v19 = vmul.f32 1.442695, %v8199_v48  ;;  %v8191_v48 = vsub.f32 %v16446_v26, %v16531_v8  ;;  %v8186_v51 = vsub.f32 %v17384_v39, %v16544_v16 }
 0xfa8   :  { %v7833_v1 = vpack.c.bf16 %v7820_v60, %v7819_v6  ;;  %11906 = vpow2.f32 %v7689_v3  ;;  %v8533_v3 = vld [vmem:[#allocation4 + $0x3c0] sm:$0xff] }
 0xfa9   :  { %v10885_v34 = vpop.f32.mrf.mxu1  ;;  %11908 = vpow2.f32 %v8228_v24 }
 0xfaa   :  { %10786 = vmatpush3.bf16.xpose.msra.mxu0 %v7833_v1  ;;  %11910 = vpow2.f32 %v8230_v19  ;;  %v8197_v1 = vsub.f32 %v16363_v17, %v16516_v53  ;;  %v16627_v57 = vadd.f32 %v10885_v34, %v8535_v42  ;;  %v8220_v17 = vmul.f32 1.442695, %v8194_v10  ;;  %v8527_v42 = vld [vmem:[#allocation4 + $0x390] sm:$0xff]  ;;  %v17385_v10 = vld [vmem:[#allocation34_spill] sm:$0xff] }
 0xfab   :  { %v8634_v22 = vpop.f32.mrf.mxu1  ;;  %10787 = vmatprep.subr.bf16.mxu0 %v17103_v38  ;;  %11912 = vpow2.f32 %v8224_v37  ;;  %v8195_v53 = vsub.f32 %v16396_v30, %v16520_v32  ;;  %v8216_v30 = vmul.f32 1.442695, %v8192_v56  ;;  %v8193_v32 = vsub.f32 %v16422_v11, %v16524_v21 }
 0xfac   :  { %v16605_v55 = vpop.eup %11900  ;;  %v8226_v13 = vmul.f32 1.442695, %v8197_v1  ;;  %v16643_v34 = vadd.f32 %v8634_v22, %v8533_v3  ;;  %v16664_v11 = vadd.f32 %v16574_v4, %v8531_v62  ;;  %v8529_v4 = vld [vmem:[#allocation4 + $0x3a0] sm:$0xff]  ;;  %v8214_v19 = vmul.f32 1.442695, %v8191_v48  ;;  %v8528_v3 = vld [vmem:[#allocation4 + $0x398] sm:$0xff] }
 0xfad   :  { %v10886_v45 = vpop.f32.mrf.mxu1  ;;  %v8222_v25 = vmul.f32 1.442695, %v8195_v53  ;;  %v8218_v22 = vmul.f32 1.442695, %v8193_v32  ;;  %v16687_v26 = vadd.f32 %v16578_v28, %v8529_v4  ;;  %v8208_v37 = vmul.f32 1.442695, %v8188_v43 }
 0xfae   :  { %11914 = vpow2.f32 %v8226_v13  ;;  %v16711_v16 = vadd.f32 %v16563_v46, %v8527_v42  ;;  %v8525_v46 = vld [vmem:[#allocation4 + $0x380] sm:$0xff] }
 0xfaf   :  { %v16594_v41 = vpop.f32.mrf.mxu1  ;;  %11916 = vpow2.f32 %v8220_v17  ;;  %v17386_v17 = vld [vmem:[#allocation50_spill] sm:$0xff]  ;;  %v16727_v62 = vadd.f32 %v16565_v59, %v8525_v46 }
 0xfb0   :  { %11918 = vpow2.f32 %v8222_v25  ;;  %v8184_v53 = vsub.f32 %v17386_v17, %v16553_v23 }
 0xfb1   :  { %v10889_v36 = vpop.f32.mrf.mxu1  ;;  %v16613_v6 = vpop.eup %11902  ;;  %11920 = vpow2.f32 %v8216_v30  ;;  %v16720_v30 = vadd.f32 %v16568_v18, %v8528_v3 }
 0xfb2   :  { %v16598_v20 = vadd.f32 %v10889_v36, %v8539_v9  ;;  %v16621_v2 = vpop.eup %11904  ;;  %v16635_v9 = vadd.f32 %v10886_v45, %v8536_v52  ;;  %11922 = vpow2.f32 %v8218_v22  ;;  %v8187_v52 = vsub.f32 %v17385_v10, %v16549_v63  ;;  %v17387_v63 = vld [vmem:[#allocation13_spill] sm:$0xff]  ;;  %v8526_v22 = vld [vmem:[#allocation4 + $0x388] sm:$0xff] }
 0xfb3   :  { %v8650_v58 = vpop.f32.mrf.mxu1  ;;  %v8200_v56 = vmul.f32 1.442695, %v8184_v53 }
 0xfb4   :  { %8693 = vmax.xlane.f32.xlu1 %v16598_v20  ;;  %v16611_v0 = vadd.f32 %v8650_v58, %v8537_v5  ;;  %v8534_v58 = vld [vmem:[#allocation4 + $0x3c8] sm:$0xff]  ;;  %v8206_v25 = vmul.f32 1.442695, %v8187_v52 }
 0xfb5   :  { %v10890_v40 = vpop.f32.mrf.mxu1  ;;  %v16629_v47 = vpop.eup %11906  ;;  %v16652_v45 = vadd.f32 %v16594_v41, %v8534_v58  ;;  %v8532_v41 = vld [vmem:[#allocation4 + $0x3b8] sm:$0xff]  ;;  %v11019_v5 = vld [vmem:[%s16944_s7 + $0x8] sm:$0xff]   ;;  %v8185_v58 = vsub.f32 %v17387_v63, %v16556_v49  ;;  %v16734_v49 = vadd.f32 %v16572_v7, %v8526_v22 }
 0xfb6   :  { %v16603_v54 = vadd.f32 %v10890_v40, %v8540_v33  ;;  %v16637_v36 = vpop.eup %11908  ;;  %v8190_v40 = vsub.f32 %v16437_v50, %v16528_v44  ;;  %v16675_v50 = vadd.f32 %v16581_v12, %v8532_v41  ;;  %9532 = vmatmul.mubr.msk.bf16.gmra.mxu1 %vm172_vm0, %v11019_v5  ;;  %v8530_v12 = vld [vmem:[#allocation4 + $0x3a8] sm:$0xff] }
 0xfb7   :  { %v8653_v60 = vpop.f32.mrf.mxu1  ;;  %v16645_v31 = vpop.eup %11910  ;;  %9059 = vmatprep.mubr.bf16.mxu1 %v17372_v61  ;;  %v16700_v28 = vadd.f32 %v16587_v29, %v8530_v12  ;;  %v8202_v32 = vmul.f32 1.442695, %v8185_v58 }
 0xfb8   :  { %8695 = vmax.xlane.f32.xlu0 %v16603_v54  ;;  %7723 = vadd.xlane.f32.xlu1 %v16605_v55  ;;  %v16619_v27 = vadd.f32 %v8653_v60, %v8538_v35  ;;  %v16654_v33 = vpop.eup %11912  ;;  %v8212_v24 = vmul.f32 1.442695, %v8190_v40  ;;  %v17383_v60 = vld [vmem:[#allocation24_spill] sm:$0xff] }
 0xfb9   :  { %v8189_v35 = vsub.f32 %v17383_v60, %v16540_v14  ;;  %v8204_v14 = vmul.f32 1.442695, %v8186_v51 }
 0xfba   :  { %11924 = vpow2.f32 %v8212_v24 }
 0xfbb   :  { %v16667_v21 = vpop.eup %11914  ;;  %11926 = vpow2.f32 %v8214_v19  ;;  %v8210_v13 = vmul.f32 1.442695, %v8189_v35 }
 0xfbc   :  { %7725 = vadd.xlane.f32.xlu0 %v16613_v6  ;;  %8689 = vmax.xlane.f32.xlu1 %v16611_v0  ;;  %v16677_v44 = vpop.eup %11916  ;;  %11928 = vpow2.f32 %v8208_v37 }
 0xfbd   :  { %v16690_v8 = vpop.eup %11918  ;;  %11930 = vpow2.f32 %v8210_v13 }
 0xfbe   :  { %v16702_v1 = vpop.eup %11920  ;;  %11932 = vpow2.f32 %v8204_v14 }
 0xfbf   :  { %v16713_v29 = vpop.eup %11922  ;;  %11934 = vpow2.f32 %v8206_v25 }
 0xfc0   :  { %8691 = vmax.xlane.f32.xlu0 %v16619_v27  ;;  %7719 = vadd.xlane.f32.xlu1 %v16621_v2  ;;  %11936 = vpow2.f32 %v8200_v56 }
 0xfc1   :  { %11938 = vpow2.f32 %v8202_v32 }
 0xfc4   :  { %7721 = vadd.xlane.f32.xlu0 %v16629_v47  ;;  %8685 = vmax.xlane.f32.xlu1 %v16627_v57 }
 0xfc7   :  { %v16722_v23 = vpop.eup %11924 }
 0xfc8   :  { %8687 = vmax.xlane.f32.xlu0 %v16635_v9  ;;  %8260 = vadd.xlane.f32.xlu1 %v16637_v36  ;;  %v16729_v15 = vpop.eup %11926 }
 0xfc9   :  { %v16736_v18 = vpop.eup %11928 }
 0xfca   :  { %v16740_v40 = vpop.eup %11930 }
 0xfcb   :  { %v16742_v59 = vpop.eup %11932 }
 0xfcc   :  { %8262 = vadd.xlane.f32.xlu0 %v16645_v31  ;;  %8681 = vmax.xlane.f32.xlu1 %v16643_v34  ;;  %v16746_v41 = vpop.eup %11934 }
 0xfcd   :  { %v16748_v24 = vpop.eup %11936 }
 0xfce   :  { %v16752_v7 = vpop.eup %11938 }
 0xfd0   :  { %8683 = vmax.xlane.f32.xlu0 %v16652_v45  ;;  %8256 = vadd.xlane.f32.xlu1 %v16654_v33 }
 0xfd4   :  { %8258 = vadd.xlane.f32.xlu0 %v16667_v21  ;;  %8677 = vmax.xlane.f32.xlu1 %v16664_v11 }
 0xfd8   :  { %8679 = vmax.xlane.f32.xlu0 %v16675_v50  ;;  %8252 = vadd.xlane.f32.xlu1 %v16677_v44 }
 0xfdc   :  { %8254 = vadd.xlane.f32.xlu0 %v16690_v8  ;;  %8673 = vmax.xlane.f32.xlu1 %v16687_v26 }
 0xfe0   :  { %8675 = vmax.xlane.f32.xlu0 %v16700_v28  ;;  %8248 = vadd.xlane.f32.xlu1 %v16702_v1 }
 0xfe4   :  { %8250 = vadd.xlane.f32.xlu0 %v16713_v29  ;;  %8669 = vmax.xlane.f32.xlu1 %v16711_v16 }
 0xfe8   :  { %8671 = vmax.xlane.f32.xlu0 %v16720_v30  ;;  %8244 = vadd.xlane.f32.xlu1 %v16722_v23 }
 0xfec   :  { %8246 = vadd.xlane.f32.xlu0 %v16729_v15  ;;  %8665 = vmax.xlane.f32.xlu1 %v16727_v62 }
 0xff0   :  { %8667 = vmax.xlane.f32.xlu0 %v16734_v49  ;;  %8240 = vadd.xlane.f32.xlu1 %v16736_v18 }
 0xff4   :  { %8242 = vadd.xlane.f32.xlu0 %v16740_v40  ;;  %8236 = vadd.xlane.f32.xlu1 %v16742_v59 }
 0xff8   :  { %8238 = vadd.xlane.f32.xlu0 %v16746_v41  ;;  %8232 = vadd.xlane.f32.xlu1 %v16748_v24 }
 0xffc   :  { %8234 = vadd.xlane.f32.xlu0 %v16752_v7 }
0x103d   :  { %v8694_v48 = vpop.xlane.xlu1 %8693 }
0x103e   :  { %v8711_v4 = vsub.f32 %v16598_v20, %v8694_v48 }
0x1040   :  { %v8741_v5 = vmul.f32 1.442695, %v8711_v4 }
0x1041   :  { %v8696_v19 = vpop.xlane.xlu0 %8695  ;;  %v7724_v43 = vpop.xlane.xlu1 %7723 }
0x1042   :  { %11940 = vpow2.f32 %v8741_v5  ;;  %v8712_v12 = vsub.f32 %v16603_v54, %v8696_v19  ;;  %v16757_v60 = vpop.f32.mrf.mxu0 }
0x1043   :  { %11942 = vrcp.f32 %v7724_v43 }
0x1044   :  { %v8743_v35 = vmul.f32 1.442695, %v8712_v12  ;;  %v10735_v37 = vpop.f32.mrf.mxu0 }
0x1045   :  { %v7726_v39 = vpop.xlane.xlu0 %7725  ;;  %v8690_v51 = vpop.xlane.xlu1 %8689 }
0x1046   :  { %11944 = vpow2.f32 %v8743_v35  ;;  %v7363_v42 = vpop.f32.mrf.mxu0  ;;  %v8709_v13 = vsub.f32 %v16611_v0, %v8690_v51 }
0x1047   :  { %11946 = vrcp.f32 %v7726_v39 }
0x1048   :  { %v8737_v10 = vmul.f32 1.442695, %v8709_v13  ;;  %v10736_v20 = vpop.f32.mrf.mxu0 }
0x1049   :  { %v8692_v52 = vpop.xlane.xlu0 %8691  ;;  %v7720_v14 = vpop.xlane.xlu1 %7719 }
0x104a   :  { %11948 = vpow2.f32 %v8737_v10  ;;  %v8710_v17 = vsub.f32 %v16619_v27, %v8692_v52 }
0x104b   :  { %11950 = vrcp.f32 %v7720_v14 }
0x104c   :  { %v8739_v54 = vmul.f32 1.442695, %v8710_v17 }
0x104d   :  { %v7722_v53 = vpop.xlane.xlu0 %7721  ;;  %v8686_v3 = vpop.xlane.xlu1 %8685 }
0x104e   :  { %11952 = vpow2.f32 %v8739_v54  ;;  %v8707_v25 = vsub.f32 %v16627_v57, %v8686_v3 }
0x104f   :  { %v16762_v56 = vpop.eup %11940  ;;  %11954 = vrcp.f32 %v7722_v53 }
0x1050   :  { %v11943_v63 = vpop.eup %11942  ;;  %v8733_v0 = vmul.f32 1.442695, %v8707_v25  ;;  %8773 = vadd.xlane.f32.xlu1 %v16762_v56 }
0x1051   :  { %v7769_v58 = vmul.f32 %v11943_v63, %v7724_v43  ;;  %v8688_v46 = vpop.xlane.xlu0 %8687  ;;  %v8261_v32 = vpop.xlane.xlu1 %8260 }
0x1052   :  { %11956 = vpow2.f32 %v8733_v0  ;;  %v8708_v27 = vsub.f32 %v16635_v9, %v8688_v46 }
0x1053   :  { %v16766_v22 = vpop.eup %11944  ;;  %v7785_v48 = vsub.f32 2.0, %v7769_v58  ;;  %11958 = vrcp.f32 %v8261_v32 }
0x1054   :  { %v11947_v4 = vpop.eup %11946  ;;  %v8735_v5 = vmul.f32 1.442695, %v8708_v27  ;;  %8775 = vadd.xlane.f32.xlu0 %v16766_v22 }
0x1055   :  { %v7770_v57 = vmul.f32 %v11947_v4, %v7726_v39  ;;  %v8263_v19 = vpop.xlane.xlu0 %8262  ;;  %v8682_v12 = vpop.xlane.xlu1 %8681  ;;  %v7801_v37 = vmul.f32 %v11943_v63, %v7785_v48 }
0x1056   :  { %11960 = vpow2.f32 %v8735_v5  ;;  %v8705_v35 = vsub.f32 %v16643_v34, %v8682_v12 }
0x1057   :  { %v16770_v43 = vpop.eup %11948  ;;  %v7786_v51 = vsub.f32 2.0, %v7770_v57  ;;  %11962 = vrcp.f32 %v8263_v19  ;;  %v7817_v34 = vmul.f32 %v16605_v55, %v7801_v37 }
0x1058   :  { %v11951_v9 = vpop.eup %11950  ;;  %v8729_v42 = vmul.f32 1.442695, %v8705_v35  ;;  %8769 = vadd.xlane.f32.xlu1 %v16770_v43 }
0x1059   :  { %v7802_v13 = vmul.f32 %v11947_v4, %v7786_v51  ;;  %v7767_v10 = vmul.f32 %v11951_v9, %v7720_v14  ;;  %v8684_v20 = vpop.xlane.xlu0 %8683  ;;  %v8257_v52 = vpop.xlane.xlu1 %8256 }
0x105a   :  { %11964 = vpow2.f32 %v8729_v42  ;;  %v8706_v39 = vsub.f32 %v16652_v45, %v8684_v20 }
0x105b   :  { %v16774_v17 = vpop.eup %11952  ;;  %v7818_v54 = vmul.f32 %v16613_v6, %v7802_v13  ;;  %v7783_v3 = vsub.f32 2.0, %v7767_v10  ;;  %11966 = vrcp.f32 %v8257_v52 }
0x105c   :  { %v11955_v25 = vpop.eup %11954  ;;  %v8731_v63 = vmul.f32 1.442695, %v8706_v39  ;;  %8771 = vadd.xlane.f32.xlu0 %v16774_v17 }
0x105d   :  { %v7768_v0 = vmul.f32 %v11955_v25, %v7722_v53  ;;  %v8259_v58 = vpop.xlane.xlu0 %8258  ;;  %v8678_v14 = vpop.xlane.xlu1 %8677  ;;  %v7832_v46 = vpack.c.bf16 %v7818_v54, %v7817_v34  ;;  %v7799_v48 = vmul.f32 %v11951_v9, %v7783_v3 }
0x105e   :  { %11968 = vpow2.f32 %v8731_v63  ;;  %v8703_v27 = vsub.f32 %v16664_v11, %v8678_v14  ;;  %v17389_v63 = vld [vmem:[#allocation35_spill] sm:$0xff] }
0x105f   :  { %v16780_v45 = vpop.eup %11956  ;;  %v7784_v4 = vsub.f32 2.0, %v7768_v0  ;;  %11970 = vrcp.f32 %v8259_v58  ;;  %10788 = vmatpush3.bf16.xpose.msra.mxu0 %v7832_v46  ;;  %v7815_v37 = vmul.f32 %v16621_v2, %v7799_v48 }
0x1060   :  { %v11959_v55 = vpop.eup %11958  ;;  %v8725_v6 = vmul.f32 1.442695, %v8703_v27  ;;  %8765 = vadd.xlane.f32.xlu1 %v16780_v45  ;;  %10789 = vmatprep.subr.bf16.mxu0 %v17103_v38 }
0x1061   :  { %v7800_v5 = vmul.f32 %v11955_v25, %v7784_v4  ;;  %v8294_v53 = vmul.f32 %v11959_v55, %v8261_v32  ;;  %v8680_v57 = vpop.xlane.xlu0 %8679  ;;  %v8253_v12 = vpop.xlane.xlu1 %8252  ;;  %v17388_v25 = vld [vmem:[#allocation43_spill] sm:$0xff] }
0x1062   :  { %11972 = vpow2.f32 %v8725_v6  ;;  %v8704_v35 = vsub.f32 %v16675_v50, %v8680_v57  ;;  %v319_v0 = vadd.f32 %v17389_v63, %v17388_v25 }
0x1063   :  { %v16785_v11 = vpop.eup %11960  ;;  %v7816_v51 = vmul.f32 %v16629_v47, %v7800_v5  ;;  %v8310_v9 = vsub.f32 2.0, %v8294_v53  ;;  %11974 = vrcp.f32 %v8253_v12 }
0x1064   :  { %v11963_v42 = vpop.eup %11962  ;;  %v8727_v13 = vmul.f32 1.442695, %v8704_v35  ;;  %8767 = vadd.xlane.f32.xlu0 %v16785_v11  ;;  %v7498_v57 = vpack.c.bf16 %v319_v0, %v319_v0 }
0x1065   :  { %v8295_v10 = vmul.f32 %v11963_v42, %v8263_v19  ;;  %v8255_v20 = vpop.xlane.xlu0 %8254  ;;  %v8674_v32 = vpop.xlane.xlu1 %8673  ;;  %v7831_v39 = vpack.c.bf16 %v7816_v51, %v7815_v37  ;;  %v8326_v54 = vmul.f32 %v11959_v55, %v8310_v9 }
0x1066   :  { %11976 = vpow2.f32 %v8727_v13  ;;  %v8701_v34 = vsub.f32 %v16687_v26, %v8674_v32 }
0x1067   :  { %v16791_v50 = vpop.eup %11964  ;;  %v8311_v3 = vsub.f32 2.0, %v8295_v10  ;;  %11978 = vrcp.f32 %v8255_v20  ;;  %10790 = vmatpush3.bf16.xpose.msra.mxu0 %v7831_v39  ;;  %v8342_v4 = vmul.f32 %v16637_v36, %v8326_v54 }
0x1068   :  { %v11967_v2 = vpop.eup %11966  ;;  %v8721_v47 = vmul.f32 1.442695, %v8701_v34  ;;  %8761 = vadd.xlane.f32.xlu1 %v16791_v50  ;;  %10833 = vmatprep.subr.bf16.mxu0 %v17103_v38 }
0x1069   :  { %v8327_v19 = vmul.f32 %v11963_v42, %v8311_v3  ;;  %v8292_v14 = vmul.f32 %v11967_v2, %v8257_v52  ;;  %v8676_v46 = vpop.xlane.xlu0 %8675  ;;  %v8249_v27 = vpop.xlane.xlu1 %8248 }
0x106a   :  { %11980 = vpow2.f32 %v8721_v47  ;;  %v8702_v26 = vsub.f32 %v16700_v28, %v8676_v46 }
0x106b   :  { %v16798_v48 = vpop.eup %11968  ;;  %v8343_v55 = vmul.f32 %v16645_v31, %v8327_v19  ;;  %v8308_v6 = vsub.f32 2.0, %v8292_v14  ;;  %11982 = vrcp.f32 %v8249_v27 }
0x106c   :  { %v11971_v5 = vpop.eup %11970  ;;  %v8723_v53 = vmul.f32 1.442695, %v8702_v26  ;;  %8763 = vadd.xlane.f32.xlu0 %v16798_v48 }
0x106d   :  { %v8293_v35 = vmul.f32 %v11971_v5, %v8259_v58  ;;  %v8251_v52 = vpop.xlane.xlu0 %8250  ;;  %v8670_v37 = vpop.xlane.xlu1 %8669  ;;  %v8351_v51 = vpack.c.bf16 %v8343_v55, %v8342_v4  ;;  %v8324_v36 = vmul.f32 %v11967_v2, %v8308_v6 }
0x106e   :  { %11984 = vpow2.f32 %v8723_v53  ;;  %10792 = vmatmul.mubr.bf16.vlgmr.msra.gmra.mxu0 %v7498_v57  ;;  %v8699_v28 = vsub.f32 %v16711_v16, %v8670_v37 }
0x106f   :  { %v16804_v9 = vpop.eup %11972  ;;  %v8309_v42 = vsub.f32 2.0, %v8293_v35  ;;  %11986 = vrcp.f32 %v8251_v52  ;;  %10834 = vmatpush3.bf16.xpose.msra.mxu0 %v8351_v51  ;;  %10849 = vmatprep.mubr.msk.bf16.mxu0 %vm12126_vm3, %v17103_v38  ;;  %v8340_v54 = vmul.f32 %v16654_v33, %v8324_v36 }
0x1070   :  { %v11975_v31 = vpop.eup %11974  ;;  %v8717_v13 = vmul.f32 1.442695, %v8699_v28  ;;  %8757 = vadd.xlane.f32.xlu1 %v16804_v9  ;;  %10835 = vmatprep.subr.bf16.mxu0 %v17103_v38 }
0x1071   :  { %v8325_v58 = vmul.f32 %v11971_v5, %v8309_v42  ;;  %v8290_v10 = vmul.f32 %v11975_v31, %v8253_v12  ;;  %v8672_v32 = vpop.xlane.xlu0 %8671  ;;  %v8245_v39 = vpop.xlane.xlu1 %8244 }
0x1072   :  { %11988 = vpow2.f32 %v8717_v13  ;;  %v8700_v16 = vsub.f32 %v16720_v30, %v8672_v32 }
0x1073   :  { %v16811_v34 = vpop.eup %11976  ;;  %v8341_v3 = vmul.f32 %v16667_v21, %v8325_v58  ;;  %v8306_v2 = vsub.f32 2.0, %v8290_v10  ;;  %11990 = vrcp.f32 %v8245_v39 }
0x1074   :  { %v11979_v47 = vpop.eup %11978  ;;  %v8719_v25 = vmul.f32 1.442695, %v8700_v16  ;;  %8759 = vadd.xlane.f32.xlu0 %v16811_v34 }
0x1075   :  { %v8291_v63 = vmul.f32 %v11979_v47, %v8255_v20  ;;  %v8247_v0 = vpop.xlane.xlu0 %8246  ;;  %v8666_v12 = vpop.xlane.xlu1 %8665  ;;  %v8350_v19 = vpack.c.bf16 %v8341_v3, %v8340_v54  ;;  %v8322_v46 = vmul.f32 %v11975_v31, %v8306_v2 }
0x1076   :  { %11992 = vpow2.f32 %v8719_v25  ;;  %v8697_v14 = vsub.f32 %v16727_v62, %v8666_v12 }
0x1077   :  { %v16817_v30 = vpop.eup %11980  ;;  %v8307_v26 = vsub.f32 2.0, %v8291_v63  ;;  %11994 = vrcp.f32 %v8247_v0  ;;  %10836 = vmatpush3.bf16.xpose.msra.mxu0 %v8350_v19  ;;  %v8338_v53 = vmul.f32 %v16677_v44, %v8322_v46 }
0x1078   :  { %v11983_v33 = vpop.eup %11982  ;;  %v8713_v21 = vmul.f32 1.442695, %v8697_v14  ;;  %8753 = vadd.xlane.f32.xlu1 %v16817_v30  ;;  %10837 = vmatprep.subr.bf16.mxu0 %v17103_v38 }
0x1079   :  { %v8323_v4 = vmul.f32 %v11979_v47, %v8307_v26  ;;  %v8288_v20 = vmul.f32 %v11983_v33, %v8249_v27  ;;  %v8668_v55 = vpop.xlane.xlu0 %8667  ;;  %v8241_v6 = vpop.xlane.xlu1 %8240 }
0x107a   :  { %11996 = vpow2.f32 %v8713_v21  ;;  %v8698_v5 = vsub.f32 %v16734_v49, %v8668_v55 }
0x107b   :  { %v16822_v62 = vpop.eup %11984  ;;  %v8339_v57 = vmul.f32 %v16690_v8, %v8323_v4  ;;  %v8304_v35 = vsub.f32 2.0, %v8288_v20  ;;  %11998 = vrcp.f32 %v8241_v6 }
0x107c   :  { %v11987_v37 = vpop.eup %11986  ;;  %v8715_v51 = vmul.f32 1.442695, %v8698_v5  ;;  %8755 = vadd.xlane.f32.xlu0 %v16822_v62 }
0x107d   :  { %v8289_v28 = vmul.f32 %v11987_v37, %v8251_v52  ;;  %v8243_v36 = vpop.xlane.xlu0 %8242  ;;  %v8237_v27 = vpop.xlane.xlu1 %8236  ;;  %v8349_v42 = vpack.c.bf16 %v8339_v57, %v8338_v53  ;;  %v8320_v49 = vmul.f32 %v11983_v33, %v8304_v35 }
0x107e   :  { %12000 = vpow2.f32 %v8715_v51 }
0x107f   :  { %v16827_v31 = vpop.eup %11988  ;;  %v8305_v13 = vsub.f32 2.0, %v8289_v28  ;;  %12002 = vrcp.f32 %v8243_v36  ;;  %10838 = vmatpush3.bf16.xpose.msra.mxu0 %v8349_v42  ;;  %v8336_v32 = vmul.f32 %v16702_v1, %v8320_v49 }
0x1080   :  { %v11991_v44 = vpop.eup %11990  ;;  %12004 = vrcp.f32 %v8237_v27  ;;  %8749 = vadd.xlane.f32.xlu1 %v16827_v31  ;;  %10839 = vmatprep.subr.bf16.mxu0 %v17103_v38 }
0x1081   :  { %v8321_v8 = vmul.f32 %v11987_v37, %v8305_v13  ;;  %v8286_v58 = vmul.f32 %v11991_v44, %v8245_v39  ;;  %v8239_v10 = vpop.xlane.xlu0 %8238  ;;  %v8233_v2 = vpop.xlane.xlu1 %8232 }
0x1082   :  { %12006 = vrcp.f32 %v8239_v10 }
0x1083   :  { %v16831_v52 = vpop.eup %11992  ;;  %v8337_v16 = vmul.f32 %v16713_v29, %v8321_v8  ;;  %v8302_v54 = vsub.f32 2.0, %v8286_v58 }
0x1084   :  { %v11995_v3 = vpop.eup %11994  ;;  %8751 = vadd.xlane.f32.xlu0 %v16831_v52 }
0x1085   :  { %v8287_v47 = vmul.f32 %v11995_v3, %v8247_v0  ;;  %v8235_v25 = vpop.xlane.xlu0 %8234  ;;  %v8348_v63 = vpack.c.bf16 %v8337_v16, %v8336_v32  ;;  %v8318_v39 = vmul.f32 %v11991_v44, %v8302_v54 }
0x1086   :  { %12008 = vrcp.f32 %v8235_v25 }
0x1087   :  { %v16836_v12 = vpop.eup %11996  ;;  %v8303_v19 = vsub.f32 2.0, %v8287_v47  ;;  %12010 = vrcp.f32 %v8233_v2  ;;  %10840 = vmatpush3.bf16.xpose.msra.mxu0 %v8348_v63  ;;  %v8334_v0 = vmul.f32 %v16722_v23, %v8318_v39  ;;  %v17390_v39 = vld [vmem:[#allocation53_spill] sm:$0xff] }
0x1088   :  { %v11999_v14 = vpop.eup %11998  ;;  %8745 = vadd.xlane.f32.xlu1 %v16836_v12  ;;  %10841 = vmatprep.subr.bf16.mxu0 %v17103_v38 }
0x1089   :  { %v8319_v1 = vmul.f32 %v11995_v3, %v8303_v19  ;;  %v8284_v29 = vmul.f32 %v11999_v14, %v8241_v6  ;;  %v17391_v19 = vld [vmem:[#allocation37_spill] sm:$0xff] }
0x108b   :  { %v16840_v46 = vpop.eup %12000  ;;  %v8335_v26 = vmul.f32 %v16729_v15, %v8319_v1  ;;  %v8300_v33 = vsub.f32 2.0, %v8284_v29 }
0x108c   :  { %v12003_v21 = vpop.eup %12002  ;;  %8747 = vadd.xlane.f32.xlu0 %v16840_v46 }
0x108d   :  { %v12005_v4 = vpop.eup %12004  ;;  %v8285_v20 = vmul.f32 %v12003_v21, %v8243_v36  ;;  %v8347_v55 = vpack.c.bf16 %v8335_v26, %v8334_v0  ;;  %v8316_v53 = vmul.f32 %v11999_v14, %v8300_v33  ;;  %v325_v14 = vadd.f32 %v17391_v19, %v17390_v39 }
0x108e   :  { %v8282_v35 = vmul.f32 %v12005_v4, %v8237_v27  ;;  %v8934_v27 = vld [vmem:[%s16945_s8] sm:$0xff] }
0x108f   :  { %v12007_v5 = vpop.eup %12006  ;;  %v8301_v57 = vsub.f32 2.0, %v8285_v20  ;;  %10842 = vmatpush3.bf16.xpose.msra.mxu0 %v8347_v55  ;;  %v8332_v15 = vmul.f32 %v16736_v18, %v8316_v53  ;;  %v8936_v18 = vld [vmem:[%s16945_s8 + $0x10] sm:$0xff]  ;;  %v8011_v1 = vpack.c.bf16 %v325_v14, %v325_v14 }
0x1090   :  { %v8283_v37 = vmul.f32 %v12007_v5, %v8239_v10  ;;  %10843 = vmatprep.subr.bf16.mxu0 %v17103_v38  ;;  %v8298_v42 = vsub.f32 2.0, %v8282_v35 }
0x1091   :  { %v8317_v6 = vmul.f32 %v12003_v21, %v8301_v57 }
0x1092   :  { %v8299_v51 = vsub.f32 2.0, %v8283_v37  ;;  %v8314_v8 = vmul.f32 %v12005_v4, %v8298_v42 }
0x1093   :  { %v12009_v23 = vpop.eup %12008  ;;  %v8333_v28 = vmul.f32 %v16740_v40, %v8317_v6 }
0x1094   :  { %v12011_v49 = vpop.eup %12010  ;;  %v8315_v13 = vmul.f32 %v12007_v5, %v8299_v51  ;;  %v8281_v36 = vmul.f32 %v12009_v23, %v8235_v25  ;;  %v8330_v40 = vmul.f32 %v16742_v59, %v8314_v8 }
0x1095   :  { %v8346_v44 = vpack.c.bf16 %v8333_v28, %v8332_v15  ;;  %v8280_v58 = vmul.f32 %v12011_v49, %v8233_v2  ;;  %v8937_v2 = vld [vmem:[%s16945_s8 + $0x18] sm:$0xff] }
0x1096   :  { %v8331_v10 = vmul.f32 %v16746_v41, %v8315_v13  ;;  %v8297_v32 = vsub.f32 2.0, %v8281_v36  ;;  %v8935_v41 = vld [vmem:[%s16945_s8 + $0x8] sm:$0xff] }
0x1097   :  { %10844 = vmatpush3.bf16.xpose.msra.mxu0 %v8346_v44  ;;  %v8296_v16 = vsub.f32 2.0, %v8280_v58 }
0x1098   :  { %10845 = vmatprep.subr.bf16.mxu0 %v17103_v38  ;;  %v8313_v54 = vmul.f32 %v12009_v23, %v8297_v32  ;;  %v8345_v3 = vpack.c.bf16 %v8331_v10, %v8330_v40 }
0x1099   :  { %8940 = vperm.xlu1 %10937, %v8934_v27   ;;  %v8312_v47 = vmul.f32 %v12011_v49, %v8296_v16 }
0x109a   :  { %v8329_v25 = vmul.f32 %v16752_v7, %v8313_v54 }
0x109b   :  { %v8328_v59 = vmul.f32 %v16748_v24, %v8312_v47 }
0x109d   :  { %8950 = vperm.xlu1 %10937, %v8936_v18   ;;  %v8344_v63 = vpack.c.bf16 %v8329_v25, %v8328_v59 }
0x109f   :  { %10846 = vmatpush3.bf16.xpose.msra.mxu0 %v8345_v3 }
0x10a0   :  { %10847 = vmatprep.subr.bf16.mxu0 %v17103_v38 }
0x10a1   :  { %8955 = vperm.xlu1 %10937, %v8937_v2  }
0x10a2   :  { %8945 = vperm.xlu0 %10936, %v8935_v41  }
0x10a7   :  { %10848 = vmatpush3.bf16.xpose.msra.mxu0 %v8344_v63  ;;  %v9008_v63 = vpop.f32.mrf.mxu1 }
0x10a8   :  { %10891 = vmatprep.subr.bf16.mxu0 %v17103_v38 }
0x10ae   :  { %10850 = vmatmul.mubr.bf16.vlgmr.msra.gmra.mxu0 %v8011_v1 }
0x10af   :  { %10907 = vmatprep.mubr.msk.bf16.mxu0 %vm12126_vm3, %v17103_v38 }
0x10d9   :  { %v8774_v29 = vpop.xlane.xlu1 %8773 }
0x10da   :  { %12012 = vrcp.f32 %v8774_v29 }
0x10dd   :  { %v8776_v0 = vpop.xlane.xlu0 %8775 }
0x10de   :  { %12014 = vrcp.f32 %v8776_v0 }
0x10e1   :  { %v8770_v7 = vpop.xlane.xlu1 %8769 }
0x10e2   :  { %12016 = vrcp.f32 %v8770_v7 }
0x10e5   :  { %v8772_v26 = vpop.xlane.xlu0 %8771 }
0x10e6   :  { %12018 = vrcp.f32 %v8772_v26 }
0x10e7   :  { %v12013_v24 = vpop.eup %12012 }
0x10e8   :  { %v8807_v33 = vmul.f32 %v12013_v24, %v8774_v29 }
0x10e9   :  { %v8766_v21 = vpop.xlane.xlu1 %8765 }
0x10ea   :  { %v8823_v4 = vsub.f32 2.0, %v8807_v33  ;;  %12020 = vrcp.f32 %v8766_v21 }
0x10eb   :  { %v12015_v20 = vpop.eup %12014 }
0x10ec   :  { %v8808_v55 = vmul.f32 %v12015_v20, %v8776_v0  ;;  %v8839_v53 = vmul.f32 %v12013_v24, %v8823_v4  ;;  %v9010_v0 = vpop.f32.mrf.mxu1 }
0x10ed   :  { %v8768_v5 = vpop.xlane.xlu0 %8767 }
0x10ee   :  { %v8824_v57 = vsub.f32 2.0, %v8808_v55  ;;  %12022 = vrcp.f32 %v8768_v5  ;;  %v8855_v23 = vmul.f32 %v16762_v56, %v8839_v53 }
0x10ef   :  { %v12017_v35 = vpop.eup %12016 }
0x10f0   :  { %v8840_v37 = vmul.f32 %v12015_v20, %v8824_v57  ;;  %v8805_v6 = vmul.f32 %v12017_v35, %v8770_v7  ;;  %v9012_v20 = vpop.f32.mrf.mxu1 }
0x10f1   :  { %v8762_v51 = vpop.xlane.xlu1 %8761 }
0x10f2   :  { %v8856_v15 = vmul.f32 %v16766_v22, %v8840_v37  ;;  %v8821_v28 = vsub.f32 2.0, %v8805_v6  ;;  %12024 = vrcp.f32 %v8762_v51  ;;  %v9014_v37 = vpop.f32.mrf.mxu1 }
0x10f3   :  { %v12019_v42 = vpop.eup %12018 }
0x10f4   :  { %v8806_v49 = vmul.f32 %v12019_v42, %v8772_v26  ;;  %v8864_v13 = vpack.c.bf16 %v8856_v15, %v8855_v23  ;;  %v8837_v44 = vmul.f32 %v12017_v35, %v8821_v28 }
0x10f5   :  { %v8764_v36 = vpop.xlane.xlu0 %8763 }
0x10f6   :  { %v8822_v27 = vsub.f32 2.0, %v8806_v49  ;;  %12026 = vrcp.f32 %v8764_v36  ;;  %10892 = vmatpush3.bf16.xpose.msra.mxu0 %v8864_v13  ;;  %v8853_v56 = vmul.f32 %v16770_v43, %v8837_v44  ;;  %v9018_v49 = vpop.f32.mrf.mxu1 }
0x10f7   :  { %v12021_v8 = vpop.eup %12020  ;;  %10893 = vmatprep.subr.bf16.mxu0 %v17103_v38 }
0x10f8   :  { %v8838_v58 = vmul.f32 %v12019_v42, %v8822_v27  ;;  %v8803_v10 = vmul.f32 %v12021_v8, %v8766_v21 }
0x10f9   :  { %v8758_v32 = vpop.xlane.xlu1 %8757 }
0x10fa   :  { %v8854_v22 = vmul.f32 %v16774_v17, %v8838_v58  ;;  %v8819_v18 = vsub.f32 2.0, %v8803_v10  ;;  %12028 = vrcp.f32 %v8758_v32  ;;  %v9020_v58 = vpop.f32.mrf.mxu1 }
0x10fb   :  { %v12023_v40 = vpop.eup %12022 }
0x10fc   :  { %v8804_v16 = vmul.f32 %v12023_v40, %v8768_v5  ;;  %v8863_v54 = vpack.c.bf16 %v8854_v22, %v8853_v56  ;;  %v8835_v2 = vmul.f32 %v12021_v8, %v8819_v18 }
0x10fd   :  { %v8760_v3 = vpop.xlane.xlu0 %8759 }
0x10fe   :  { %v8820_v47 = vsub.f32 2.0, %v8804_v16  ;;  %12030 = vrcp.f32 %v8760_v3  ;;  %10894 = vmatpush3.bf16.xpose.msra.mxu0 %v8863_v54  ;;  %v8851_v43 = vmul.f32 %v16780_v45, %v8835_v2  ;;  %v9022_v54 = vpop.f32.mrf.mxu1 }
0x10ff   :  { %v12025_v41 = vpop.eup %12024  ;;  %10895 = vmatprep.subr.bf16.mxu0 %v17103_v38 }
0x1100   :  { %v8836_v25 = vmul.f32 %v12023_v40, %v8820_v47  ;;  %v8801_v59 = vmul.f32 %v12025_v41, %v8762_v51 }
0x1101   :  { %v8754_v39 = vpop.xlane.xlu1 %8753 }
0x1102   :  { %v8852_v17 = vmul.f32 %v16785_v11, %v8836_v25  ;;  %v8817_v19 = vsub.f32 2.0, %v8801_v59  ;;  %12032 = vrcp.f32 %v8754_v39 }
0x1103   :  { %v12027_v14 = vpop.eup %12026 }
0x1104   :  { %v8802_v1 = vmul.f32 %v12027_v14, %v8764_v36  ;;  %v8862_v29 = vpack.c.bf16 %v8852_v17, %v8851_v43  ;;  %v8833_v26 = vmul.f32 %v12025_v41, %v8817_v19  ;;  %v9024_v43 = vpop.f32.mrf.mxu1 }
0x1105   :  { %v8756_v7 = vpop.xlane.xlu0 %8755 }
0x1106   :  { %v8818_v24 = vsub.f32 2.0, %v8802_v1  ;;  %12034 = vrcp.f32 %v8756_v7  ;;  %10896 = vmatpush3.bf16.xpose.msra.mxu0 %v8862_v29  ;;  %v8849_v11 = vmul.f32 %v16791_v50, %v8833_v26 }
0x1107   :  { %v12029_v33 = vpop.eup %12028  ;;  %10897 = vmatprep.subr.bf16.mxu0 %v17103_v38 }
0x1108   :  { %v8834_v21 = vmul.f32 %v12027_v14, %v8818_v24  ;;  %v8799_v4 = vmul.f32 %v12029_v33, %v8758_v32 }
0x1109   :  { %v8750_v45 = vpop.xlane.xlu1 %8749 }
0x110a   :  { %v8850_v55 = vmul.f32 %v16798_v48, %v8834_v21  ;;  %v8815_v5 = vsub.f32 2.0, %v8799_v4  ;;  %12036 = vrcp.f32 %v8750_v45 }
0x110b   :  { %v12031_v53 = vpop.eup %12030 }
0x110c   :  { %v8800_v57 = vmul.f32 %v12031_v53, %v8760_v3  ;;  %v8861_v35 = vpack.c.bf16 %v8850_v55, %v8849_v11  ;;  %v8831_v51 = vmul.f32 %v12029_v33, %v8815_v5 }
0x110d   :  { %v8752_v6 = vpop.xlane.xlu0 %8751 }
0x110e   :  { %v8816_v23 = vsub.f32 2.0, %v8800_v57  ;;  %12038 = vrcp.f32 %v8752_v6  ;;  %10898 = vmatpush3.bf16.xpose.msra.mxu0 %v8861_v35  ;;  %v8847_v48 = vmul.f32 %v16804_v9, %v8831_v51 }
0x110f   :  { %v12033_v15 = vpop.eup %12032  ;;  %10899 = vmatprep.subr.bf16.mxu0 %v17103_v38 }
0x1110   :  { %v8832_v28 = vmul.f32 %v12031_v53, %v8816_v23  ;;  %v8797_v42 = vmul.f32 %v12033_v15, %v8754_v39  ;;  %v17393_v23 = vld [vmem:[#allocation39_spill] sm:$0xff] }
0x1111   :  { %v8746_v50 = vpop.xlane.xlu1 %8745 }
0x1112   :  { %v8848_v13 = vmul.f32 %v16811_v34, %v8832_v28  ;;  %v8813_v36 = vsub.f32 2.0, %v8797_v42  ;;  %12040 = vrcp.f32 %v8746_v50 }
0x1113   :  { %v12035_v44 = vpop.eup %12034 }
0x1114   :  { %v8798_v27 = vmul.f32 %v12035_v44, %v8756_v7  ;;  %v8860_v8 = vpack.c.bf16 %v8848_v13, %v8847_v48  ;;  %v8829_v10 = vmul.f32 %v12033_v15, %v8813_v36 }
0x1115   :  { %v8748_v32 = vpop.xlane.xlu0 %8747  ;;  %v16885_v56 = vpop.permute.xlu1 %8940 }
0x1116   :  { %v8814_v22 = vsub.f32 2.0, %v8798_v27  ;;  %12042 = vrcp.f32 %v8748_v32  ;;  %v9009_v18 = vadd.f32 %v9008_v63, %v16885_v56  ;;  %10900 = vmatpush3.bf16.xpose.msra.mxu0 %v8860_v8  ;;  %v9011_v9 = vadd.f32 %v9010_v0, %v16885_v56  ;;  %v17395_v27 = vld [vmem:[#allocation48_spill] sm:$0xff] }
0x1117   :  { %v12037_v40 = vpop.eup %12036  ;;  %10901 = vmatprep.subr.bf16.mxu0 %v17103_v38  ;;  %v8845_v3 = vmul.f32 %v16817_v30, %v8829_v10 }
0x1118   :  { %v8830_v34 = vmul.f32 %v12035_v44, %v8814_v22  ;;  %v8795_v16 = vmul.f32 %v12037_v40, %v8750_v45  ;;  %9080 = vst [vmem:[#allocation7] sm:$0xff] %v9009_v18  ;;  %9081 = vst [vmem:[#allocation7 + $0x8] sm:$0xff] %v9011_v9  ;;  %v17397_v22 = vld [vmem:[#allocation20_spill] sm:$0xff]  ;;  %v12075_v9 = vld [vmem:[%s16944_s7] sm:$0xff]  }
0x1119   :  { %v16891_v2 = vpop.permute.xlu1 %8950 }
0x111a   :  { %v8846_v47 = vmul.f32 %v16822_v62, %v8830_v34  ;;  %v8811_v41 = vsub.f32 2.0, %v8795_v16  ;;  %v9019_v25 = vadd.f32 %v9018_v49, %v16891_v2  ;;  %v9021_v59 = vadd.f32 %v9020_v58, %v16891_v2 }
0x111b   :  { %v12039_v63 = vpop.eup %12038 }
0x111c   :  { %v8796_v39 = vmul.f32 %v12039_v63, %v8752_v6  ;;  %9088 = vst [vmem:[#allocation7 + $0x40] sm:$0xff] %v9019_v25  ;;  %9089 = vst [vmem:[#allocation7 + $0x48] sm:$0xff] %v9021_v59  ;;  %v8859_v17 = vpack.c.bf16 %v8846_v47, %v8845_v3  ;;  %v8827_v30 = vmul.f32 %v12037_v40, %v8811_v41 }
0x111d   :  { %v16896_v19 = vpop.permute.xlu0 %8945  ;;  %v16898_v14 = vpop.permute.xlu1 %8955 }
0x111e   :  { %v8812_v1 = vsub.f32 2.0, %v8796_v39  ;;  %v9013_v29 = vadd.f32 %v9012_v20, %v16896_v19  ;;  %v9015_v62 = vadd.f32 %v9014_v37, %v16896_v19  ;;  %10902 = vmatpush3.bf16.xpose.msra.mxu0 %v8859_v17  ;;  %v9023_v7 = vadd.f32 %v9022_v54, %v16898_v14 }
0x111f   :  { %v12041_v0 = vpop.eup %12040  ;;  %v9025_v26 = vadd.f32 %v9024_v43, %v16898_v14  ;;  %10903 = vmatprep.subr.bf16.mxu0 %v17103_v38  ;;  %v8843_v21 = vmul.f32 %v16827_v31, %v8827_v30  ;;  %v17392_v31 = vld [vmem:[#allocation51_spill] sm:$0xff] }
0x1120   :  { %v8828_v24 = vmul.f32 %v12039_v63, %v8812_v1  ;;  %v8793_v33 = vmul.f32 %v12041_v0, %v8746_v50  ;;  %9084 = vst [vmem:[#allocation7 + $0x20] sm:$0xff] %v9013_v29  ;;  %9085 = vst [vmem:[#allocation7 + $0x28] sm:$0xff] %v9015_v62 }
0x1121   :  { %9092 = vst [vmem:[#allocation7 + $0x60] sm:$0xff] %v9023_v7  ;;  %9093 = vst [vmem:[#allocation7 + $0x68] sm:$0xff] %v9025_v26 }
0x1122   :  { %v8844_v4 = vmul.f32 %v16831_v52, %v8828_v24  ;;  %v8809_v20 = vsub.f32 2.0, %v8793_v33  ;;  %v329_v52 = vadd.f32 %v17393_v23, %v17392_v31 }
0x1123   :  { %v12043_v45 = vpop.eup %12042 }
0x1124   :  { %v8794_v11 = vmul.f32 %v12043_v45, %v8748_v32  ;;  %v8858_v55 = vpack.c.bf16 %v8844_v4, %v8843_v21  ;;  %v8825_v5 = vmul.f32 %v12041_v0, %v8809_v20  ;;  %v8524_v42 = vpack.c.bf16 %v329_v52, %v329_v52  ;;  %v17396_v32 = vld [vmem:[#allocation56_spill] sm:$0xff] }
0x1125   :  { %v8928_v18 = vpack.c.bf16 %v17397_v22, %v17396_v32 }
0x1126   :  { %v8810_v53 = vsub.f32 2.0, %v8794_v11  ;;  %10904 = vmatpush3.bf16.xpose.msra.mxu0 %v8858_v55  ;;  %v8841_v35 = vmul.f32 %v16836_v12, %v8825_v5  ;;  %v17394_v12 = vld [vmem:[#allocation26_spill] sm:$0xff] }
0x1127   :  { %10905 = vmatprep.subr.bf16.mxu0 %v17103_v38 }
0x1128   :  { %v8826_v57 = vmul.f32 %v12043_v45, %v8810_v53 }
0x112a   :  { %v8842_v37 = vmul.f32 %v16840_v46, %v8826_v57  ;;  %v8932_v46 = vpack.c.bf16 %v17395_v27, %v17394_v12 }
0x112c   :  { %v8857_v6 = vpack.c.bf16 %v8842_v37, %v8841_v35 }
0x112e   :  { %v7873_v51 = vpop.f32.mrf.mxu0  ;;  %10906 = vmatpush3.bf16.xpose.msra.mxu0 %v8857_v6 }
0x112f   :  { %v8929_v58 = vpack.c.bf16 %v7873_v51, %v16757_v60  ;;  %v12076_v60 = vld [vmem:[%s16944_s7 + $0x8] sm:$0xff]   ;;  %s12127_s7 = smov [#allocation7]  }
0x1130   :  { %v10793_v15 = vpop.f32.mrf.mxu0  ;;  %s9101_s20 = sshll.u32 %s12127_s7, 4  ;;  %s9102_s20 = int_to_ptr.vmem [resolvable:$true] %s9101_s20 }
0x1131   :  { %s12097_s21 = scalar_lea.vmem %s9102_s20, 2048  ;;  %p12102_p6 = scmp.lt.s32.totalorder %s9102_s20, %s9102_s20 }
0x1132   :  { %v7876_v28 = vpop.f32.mrf.mxu0  ;;  %p12098_p5 = scmp.ne.s32.totalorder %s9102_s20, %s12097_s21  ;;  %p12103_p7 = scmp.lt.s32.totalorder %s12097_s21, %s12097_s21 }
0x1134   :  { %v10794_v49 = vpop.f32.mrf.mxu0  ;;  %p12104_p8 = por %p12103_p7, %p12102_p6 }
0x1135   :  { %10908 = vmatmul.mubr.bf16.vlgmr.msra.gmra.mxu0 %v8524_v42 }
0x1136   :  { %p12105_p9 = pnand %p12104_p8, %p12098_p5 }
0x116e   :  { %v8386_v50 = vpop.f32.mrf.mxu0 }
0x1170   :  { %v10851_v48 = vpop.f32.mrf.mxu0 }
0x1172   :  { %v8389_v13 = vpop.f32.mrf.mxu0 }
0x1174   :  { %v10852_v38 = vpop.f32.mrf.mxu0 }
0x11f5   :  { %v8899_v36 = vpop.f32.mrf.mxu0 }
0x11f6   :  { %v8933_v44 = vpack.c.bf16 %v8899_v36, %v8386_v50 }
0x11f7   :  { %v10909_v8 = vpop.f32.mrf.mxu0 }
0x11f8   :  { %9039 = vmatprep.subr.bf16.mxu1 %v8933_v44 }
0x11f9   :  { %v8902_v10 = vpop.f32.mrf.mxu0  ;;  %9040 = vmatpush1.bf16.msra.mxu1 %v8932_v46 }
0x11fa   :  { %9041 = vmatprep.subr.bf16.mxu1 %v8929_v58 }
0x11fb   :  { %v10910_v40 = vpop.f32.mrf.mxu0 }
0x11fd   :  { %9042 = vmatpush1.bf16.msra.mxu1 %v8928_v18 }
0x1200   :  { %9533 = vmatmul.mubr.msk.bf16.vlgmr.msra.gmra.mxu1 %vm172_vm0, %v12075_v9 }
0x1201   :  { %9069 = vmatprep.mubr.bf16.mxu1 %v17372_v61 }
0x1208   :  { %9534 = vmatmul.mubr.msk.bf16.gmra.mxu1 %vm172_vm0, %v12076_v60 }
0x12c0   :  { %v9061_v34 = vpop.f32.mrf.mxu1 }
0x12c1   :  { %v9062_v16 = vadd.f32 %v9061_v34, %v16885_v56 }
0x12c2   :  { %v9063_v54 = vpop.f32.mrf.mxu1 }
0x12c3   :  { %9082 = vst [vmem:[#allocation7 + $0x10] sm:$0xff] %v9062_v16  ;;  %v9064_v3 = vadd.f32 %v9063_v54, %v16885_v56 }
0x12c4   :  { %v9065_v47 = vpop.f32.mrf.mxu1 }
0x12c5   :  { %9083 = vst [vmem:[#allocation7 + $0x18] sm:$0xff] %v9064_v3  ;;  %v9066_v41 = vadd.f32 %v9065_v47, %v16896_v19 }
0x12c6   :  { %v9067_v25 = vpop.f32.mrf.mxu1 }
0x12c7   :  { %9086 = vst [vmem:[#allocation7 + $0x30] sm:$0xff] %v9066_v41  ;;  %v9068_v61 = vadd.f32 %v9067_v25, %v16896_v19 }
0x12c8   :  { %v9071_v59 = vpop.f32.mrf.mxu1 }
0x12c9   :  { %9087 = vst [vmem:[#allocation7 + $0x38] sm:$0xff] %v9068_v61  ;;  %v9072_v63 = vadd.f32 %v9071_v59, %v16891_v2 }
0x12ca   :  { %v9073_v39 = vpop.f32.mrf.mxu1 }
0x12cb   :  { %9090 = vst [vmem:[#allocation7 + $0x50] sm:$0xff] %v9072_v63  ;;  %v9074_v43 = vadd.f32 %v9073_v39, %v16891_v2 }
0x12cc   :  { %v9075_v17 = vpop.f32.mrf.mxu1 }
0x12cd   :  { %9091 = vst [vmem:[#allocation7 + $0x58] sm:$0xff] %v9074_v43  ;;  %v9076_v56 = vadd.f32 %v9075_v17, %v16898_v14 }
0x12ce   :  { %v9077_v30 = vpop.f32.mrf.mxu1 }
0x12cf   :  { %9094 = vst [vmem:[#allocation7 + $0x70] sm:$0xff] %v9076_v56  ;;  %v9078_v1 = vadd.f32 %v9077_v30, %v16898_v14 }
0x12d1   :  { %9095 = vst [vmem:[#allocation7 + $0x78] sm:$0xff] %v9078_v1 }
0x12d2   :  { %12108 = shalt.err (!%p12105_p9)
}
0x12d3   :  { %s12128_s22 = smov 512   ;;  %s12129_s23 = smov 32  }
0x12d4   :  { %9107 = dma.vmem_to_hbm [thread:$0]  %s9102_s20, 2048, %s16946_s9, [#allocation6], %s12128_s22, %s12128_s22, %s12129_s23  }
0x12d5   :  { %12119 = dma.done.wait [#allocation6], 2048  }
0x12d6   :  { %12120 = vsyncadd [#allocation6], 4294965248 }
0x12d7   :  { %9111 = vsyncpa [#allocation5], 1 }
0x12d8   :  { %9112 = vsyncpa [#allocation6], 1 }

</bundles_post_ra>
